<compile_context>
chip_gen: v7x
topology: tpu7x:2x2x1
jax: 0.10.0
libtpu: 0.0.40
codegen_flags: <defaults>
</compile_context>

<pallas_src>
import functools

import numpy as np
import jax
import jax.numpy as jnp
from jax.experimental import pallas as pl
from jax.experimental.pallas import tpu as pltpu

_LEAK = 0.2
_GAIN = float(1.0 / np.sqrt(2.0))     # torch.rsqrt(2.0)
_VMEM_LIMIT = 32 * 1024 * 1024


def _lrelu(x):
    return jnp.where(x >= 0.0, x, _LEAK * x)


# ---------------------------------------------------------------------------
# Fused ResBlock kernel (one grid step per batch element, all VMEM-resident).
# ---------------------------------------------------------------------------
def _resblock_kernel(*refs, cin, cout, howo, has_in_proj, has_sc):
    it = iter(refs)
    x_ref = next(it)                       # (1, HW, Cx) f32
    if has_in_proj:
        win_ref = next(it)                 # (8, Cin)  bf16 (stem 1x1, K padded to 8)
        bin_ref = next(it)                 # (1, Cin)  f32
    pa_ref = next(it)                      # (9, HoWo, HW)   bf16  pool @ conv1-tap select
    pool_ref = next(it)                    # (HoWo, HW)      bf16  2x2 avg-pool matrix
    tap2_ref = next(it)                    # (9, HoWo, HoWo) bf16  conv2 tap select
    w1_ref = next(it)                      # (9, Cin, Cin)   bf16
    b1_ref = next(it)                      # (1, Cin)        f32
    eca_ref = next(it)                     # (Cin, Cin)      f32  tridiag conv1d(k=3)
    w2_ref = next(it)                      # (9, Cin, Cout)  bf16
    b2_ref = next(it)                      # (1, Cout)       f32
    sc_ref = next(it) if has_sc else None  # (Cin, Cout)     bf16 (bias=False)
    out_ref = next(it)                     # (1, HoWo, Cout) f32

    xin = x_ref[0]
    if has_in_proj:
        # stem conv1x1(3 -> dim_in) folded into the first block
        x = jnp.dot(xin.astype(jnp.bfloat16), win_ref[...],
                    preferred_element_type=jnp.float32) + bin_ref[...]
    else:
        x = xin                                              # (HW, Cin) f32

    xa = _lrelu(x).astype(jnp.bfloat16)                      # residual pre-activation
    xr = x.astype(jnp.bfloat16)                              # raw x for the shortcut

    # conv3x3(Cin->Cin) fused with AvgPool2d(2): per tap, (pool @ tap-select) is a
    # precomputed (HoWo, HW) matrix; bias passes through the average unchanged.
    acc1 = jnp.zeros((howo, cin), jnp.float32)
    for t in range(9):
        sel = jnp.dot(pa_ref[t], xa, preferred_element_type=jnp.float32)
        acc1 = acc1 + jnp.dot(sel.astype(jnp.bfloat16), w1_ref[t],
                              preferred_element_type=jnp.float32)
    p = acc1 + b1_ref[...]                                   # (HoWo, Cin)

    # ECA: global avg pool -> conv1d(k=3, pad=1, no bias) over channels -> sigmoid
    m = jnp.mean(p, axis=0, keepdims=True)                   # (1, Cin)
    m8 = jnp.broadcast_to(m, (8, cin))                       # sublane-friendly M
    g = jnp.dot(m8, eca_ref[...], preferred_element_type=jnp.float32)[0:1, :]
    gate = jax.nn.sigmoid(g)
    z = _lrelu(p * gate).astype(jnp.bfloat16)                # channel gate + LReLU

    # conv3x3(Cin->Cout) on the pooled grid
    acc2 = jnp.zeros((howo, cout), jnp.float32)
    for t in range(9):
        sel = jnp.dot(tap2_ref[t], z, preferred_element_type=jnp.float32)
        acc2 = acc2 + jnp.dot(sel.astype(jnp.bfloat16), w2_ref[t],
                              preferred_element_type=jnp.float32)
    acc2 = acc2 + b2_ref[...]

    # shortcut: AvgPool2d(2) then conv1x1(bias=False) (commutes with the 1x1 conv)
    s = jnp.dot(pool_ref[...], xr, preferred_element_type=jnp.float32)
    if has_sc:
        s = jnp.dot(s.astype(jnp.bfloat16), sc_ref[...],
                    preferred_element_type=jnp.float32)

    out_ref[0] = (_GAIN * (s + acc2)).astype(out_ref.dtype)


# ---------------------------------------------------------------------------
# Fused heads kernel: shared-LReLU -> 4x4-valid conv GEMM (cls | proj) -> LReLU
# -> the two 1x1 convs -> F.normalize on the projector output.
# ---------------------------------------------------------------------------
def _head_kernel(h_ref, wh_ref, bh_ref, wc_ref, bc_ref, wp_ref, bp_ref,
                 logit_ref, proj_ref, *, d_out):
    h = _lrelu(h_ref[...]).astype(jnp.bfloat16)          # final `shared` activation
    t = jnp.dot(h, wh_ref[...], preferred_element_type=jnp.float32) + bh_ref[...]
    t = _lrelu(t)                                        # head activation (both heads)
    c = t[:, :d_out].astype(jnp.bfloat16)
    p = t[:, d_out:].astype(jnp.bfloat16)
    logit_ref[...] = (jnp.dot(c, wc_ref[...], preferred_element_type=jnp.float32)
                      + bc_ref[...]).astype(logit_ref.dtype)
    pr = jnp.dot(p, wp_ref[...], preferred_element_type=jnp.float32) + bp_ref[...]
    ss = jnp.sum(pr * pr, axis=1, keepdims=True)         # F.normalize(p=2, dim=1, eps=1e-12)
    proj_ref[...] = (pr * jax.lax.rsqrt(jnp.maximum(ss, 1e-24))).astype(proj_ref.dtype)


# ---------------------------------------------------------------------------
# Wrappers
# ---------------------------------------------------------------------------
def _const_index_map(ndim):
    zeros = (0,) * ndim
    return lambda n: zeros


def _full_spec(arr):
    return pl.BlockSpec(arr.shape, _const_index_map(arr.ndim))


def resblock_apply(x, blk):
    N, HW, Cx = x.shape
    cin, cout, howo = blk['cin'], blk['cout'], blk['howo']
    has_in_proj = 'win' in blk
    has_sc = 'sc_w' in blk

    args = [x]
    in_specs = [pl.BlockSpec((1, HW, Cx), lambda n: (n, 0, 0))]

    def add(arr):
        args.append(arr)
        in_specs.append(_full_spec(arr))

    if has_in_proj:
        add(blk['win']); add(blk['bin'])
    add(blk['pa']); add(blk['pool']); add(blk['tap2'])
    add(blk['w1']); add(blk['b1'])
    add(blk['eca'])
    add(blk['w2']); add(blk['b2'])
    if has_sc:
        add(blk['sc_w'])

    kernel = functools.partial(_resblock_kernel, cin=cin, cout=cout, howo=howo,
                               has_in_proj=has_in_proj, has_sc=has_sc)
    return pl.pallas_call(
        kernel,
        out_shape=jax.ShapeDtypeStruct((N, howo, cout), jnp.float32),
        grid=(N,),
        in_specs=in_specs,
        out_specs=pl.BlockSpec((1, howo, cout), lambda n: (n, 0, 0)),
        compiler_params=pltpu.CompilerParams(
            dimension_semantics=("parallel",),
            vmem_limit_bytes=_VMEM_LIMIT),
    )(*args)


def head_apply(hf, params):
    N, _ = hf.shape
    d_out = params['d_out']
    fdim = params['feature_dim']
    args = [hf, params['head_w'], params['head_b'], params['cls_w'],
            params['cls_b'], params['proj_w'], params['proj_b']]
    kernel = functools.partial(_head_kernel, d_out=d_out)
    logits, proj = pl.pallas_call(
        kernel,
        out_shape=(jax.ShapeDtypeStruct((N, 1), jnp.float32),
                   jax.ShapeDtypeStruct((N, fdim), jnp.float32)),
        grid=(1,),
        in_specs=[_full_spec(a) for a in args],
        out_specs=(pl.BlockSpec((N, 1), lambda n: (0, 0)),
                   pl.BlockSpec((N, fdim), lambda n: (0, 0))),
        compiler_params=pltpu.CompilerParams(
            dimension_semantics=("arbitrary",),
            vmem_limit_bytes=_VMEM_LIMIT),
    )(*args)
    return logits, proj


# ---------------------------------------------------------------------------
# Parameters & precomputed selection/pool matrices (built once, at init time)
# ---------------------------------------------------------------------------
def _dense_init(key, fan_in, shape):
    return jax.random.normal(key, shape, jnp.float32) * (1.0 / np.sqrt(fan_in))


def _eca_matrix(w3, c):
    # y = m @ T  ==  conv1d(m, [w0,w1,w2], padding=1, bias=False) over channels.
    return (w3[0] * jnp.eye(c, k=1, dtype=jnp.float32)
            + w3[1] * jnp.eye(c, dtype=jnp.float32)
            + w3[2] * jnp.eye(c, k=-1, dtype=jnp.float32))


def _pool_matrix(h, w):
    ho, wo = h // 2, w // 2
    P = np.zeros((ho * wo, h * w), np.float32)
    for i in range(ho):
        for j in range(wo):
            r = i * wo + j
            for a in range(2):
                for b in range(2):
                    P[r, (2 * i + a) * w + (2 * j + b)] = 0.25
    return P


def _tap_matrices(h, w):
    # A[t, out_pixel, in_pixel] = 1 if in_pixel is tap t of out_pixel for a
    # 3x3 conv with stride 1 / padding 1 (zeros outside the image).
    A = np.zeros((9, h * w, h * w), np.float32)
    for t in range(9):
        dy, dx = t // 3 - 1, t % 3 - 1
        for i in range(h):
            for j in range(w):
                ii, jj = i + dy, j + dx
                if 0 <= ii < h and 0 <= jj < w:
                    A[t, i * w + j, ii * w + jj] = 1.0
    return A


def init_params(key, image_size, feature_dim=64, dim_in=32, max_conv_dim=512):
    repeat_num = int(np.log2(image_size)) - 2
    keys = iter(jax.random.split(key, 16 + 5 * repeat_num))
    params = {'feature_dim': feature_dim}

    blocks = []
    d_in = dim_in
    h = image_size
    d_out = dim_in
    for b in range(repeat_num):
        d_out = min(d_in * 2, max_conv_dim)
        ho = h // 2
        blk = {'cin': d_in, 'cout': d_out, 'howo': ho * ho}
        if b == 0:
            # stem conv1x1(3 -> dim_in) folded into the first block; K padded to 8.
            win = jnp.zeros((8, d_in), jnp.float32).at[:3].set(
                _dense_init(next(keys), 3, (3, d_in)))
            blk['win'] = win.astype(jnp.bfloat16)
            blk['bin'] = jnp.zeros((1, d_in), jnp.float32)
        P = _pool_matrix(h, h)
        A = _tap_matrices(h, h)
        blk['pa'] = jnp.asarray(np.einsum('ij,tjk->tik', P, A), jnp.bfloat16)
        blk['pool'] = jnp.asarray(P, jnp.bfloat16)
        blk['tap2'] = jnp.asarray(_tap_matrices(ho, ho), jnp.bfloat16)
        blk['w1'] = _dense_init(next(keys), 9 * d_in,
                                (9, d_in, d_in)).astype(jnp.bfloat16)
        blk['b1'] = jnp.zeros((1, d_in), jnp.float32)
        blk['eca'] = _eca_matrix(_dense_init(next(keys), 3, (3,)), d_in)
        blk['w2'] = _dense_init(next(keys), 9 * d_in,
                                (9, d_in, d_out)).astype(jnp.bfloat16)
        blk['b2'] = jnp.zeros((1, d_out), jnp.float32)
        if d_in != d_out:
            blk['sc_w'] = _dense_init(next(keys), d_in,
                                      (d_in, d_out)).astype(jnp.bfloat16)
        blocks.append(blk)
        d_in = d_out
        h = ho
    params['blocks'] = blocks
    params['d_out'] = d_out
    params['final_hw'] = h * h

    # heads: the two 4x4-valid convs (classifier / projector) share one GEMM.
    k = params['final_hw'] * d_out
    wc1 = _dense_init(next(keys), k, (k, d_out))
    wp1 = _dense_init(next(keys), k, (k, d_out))
    params['head_w'] = jnp.concatenate([wc1, wp1], axis=1).astype(jnp.bfloat16)
    params['head_b'] = jnp.zeros((1, 2 * d_out), jnp.float32)
    params['cls_w'] = _dense_init(next(keys), d_out, (d_out, 1)).astype(jnp.bfloat16)
    params['cls_b'] = jnp.zeros((1, 1), jnp.float32)
    params['proj_w'] = _dense_init(next(keys), d_out,
                                   (d_out, feature_dim)).astype(jnp.bfloat16)
    params['proj_b'] = jnp.zeros((1, feature_dim), jnp.float32)
    return params


# ---------------------------------------------------------------------------
# Forward
# ---------------------------------------------------------------------------
def discriminator_forward(params, x, logit=True, project=True):
    """x: (N, H, W, 3) NHWC float32. Returns (logits (N,1) | None, proj (N,F) | None)."""
    N, H, W, C = x.shape
    h = x.reshape(N, H * W, C)
    if C < 8:                        # stem GEMM K padded to 8 sublanes (weights match)
        h = jnp.pad(h, ((0, 0), (0, 0), (0, 8 - C)))
    for blk in params['blocks']:
        h = resblock_apply(h, blk)
    if not (logit or project):
        return None, None
    hf = h.reshape(N, -1)            # 4x4-valid head conv == flatten + GEMM
    logits, projections = head_apply(hf, params)
    return (logits if logit else None), (projections if project else None)


if __name__ == "__main__":
    key = jax.random.PRNGKey(0)
    kp, kx = jax.random.split(key)

    batch = 2
    image_size = 16        # repeat_num = log2(16) - 2 = 2 -> spatial 16 -> 8 -> 4
    feature_dim = 64
    dim_in = 32

    params = init_params(kp, image_size, feature_dim=feature_dim, dim_in=dim_in)

    # PyTorch-style NCHW input, transposed once to the kernels' NHWC layout.
    x_nchw = jax.random.normal(kx, (batch, 3, image_size, image_size), jnp.float32)
    x = jnp.transpose(x_nchw, (0, 2, 3, 1))

    fwd = jax.jit(lambda xx: discriminator_forward(params, xx, logit=True, project=True))
    logits, projections = fwd(x)
    jax.block_until_ready((logits, projections))

    assert logits.shape == (batch, 1)
    assert projections.shape == (batch, feature_dim)
    assert bool(jnp.all(jnp.isfinite(logits)))
    assert bool(jnp.all(jnp.isfinite(projections)))
    print("KERNEL_OK")
</pallas_src>

<mosaic_0001>
module attributes {stable_mosaic.version = 11 : i64} {
  func.func @_resblock_kernel(%arg0: i32, %arg1: memref<1x256x8xf32, #tpu.memory_space<vmem>>, %arg2: memref<8x32xbf16, #tpu.memory_space<vmem>>, %arg3: memref<1x32xf32, #tpu.memory_space<vmem>>, %arg4: memref<9x64x256xbf16, #tpu.memory_space<vmem>>, %arg5: memref<64x256xbf16, #tpu.memory_space<vmem>>, %arg6: memref<9x64x64xbf16, #tpu.memory_space<vmem>>, %arg7: memref<9x32x32xbf16, #tpu.memory_space<vmem>>, %arg8: memref<1x32xf32, #tpu.memory_space<vmem>>, %arg9: memref<32x32xf32, #tpu.memory_space<vmem>>, %arg10: memref<9x32x64xbf16, #tpu.memory_space<vmem>>, %arg11: memref<1x64xf32, #tpu.memory_space<vmem>>, %arg12: memref<32x64xbf16, #tpu.memory_space<vmem>>, %arg13: memref<1x64x64xf32, #tpu.memory_space<vmem>>) attributes {dimension_semantics = [#tpu.dimension_semantics<parallel>], iteration_bounds = array<i64: 2>, scalar_prefetch = 0 : i64, scratch_operands = 0 : i64, tpu.core_type = #tpu.core_type<tc>, window_params = [{transform_indices = @transform_0, window_bounds = array<i64: 1, 256, 8>}, {pipeline_mode = #tpu.pipeline_mode<synchronous>, transform_indices = @transform_1, window_bounds = array<i64: 8, 32>}, {pipeline_mode = #tpu.pipeline_mode<synchronous>, transform_indices = @transform_2, window_bounds = array<i64: 1, 32>}, {pipeline_mode = #tpu.pipeline_mode<synchronous>, transform_indices = @transform_3, window_bounds = array<i64: 9, 64, 256>}, {pipeline_mode = #tpu.pipeline_mode<synchronous>, transform_indices = @transform_4, window_bounds = array<i64: 64, 256>}, {pipeline_mode = #tpu.pipeline_mode<synchronous>, transform_indices = @transform_5, window_bounds = array<i64: 9, 64, 64>}, {pipeline_mode = #tpu.pipeline_mode<synchronous>, transform_indices = @transform_6, window_bounds = array<i64: 9, 32, 32>}, {pipeline_mode = #tpu.pipeline_mode<synchronous>, transform_indices = @transform_7, window_bounds = array<i64: 1, 32>}, {pipeline_mode = #tpu.pipeline_mode<synchronous>, transform_indices = @transform_8, window_bounds = array<i64: 32, 32>}, {pipeline_mode = #tpu.pipeline_mode<synchronous>, transform_indices = @transform_9, window_bounds = array<i64: 9, 32, 64>}, {pipeline_mode = #tpu.pipeline_mode<synchronous>, transform_indices = @transform_10, window_bounds = array<i64: 1, 64>}, {pipeline_mode = #tpu.pipeline_mode<synchronous>, transform_indices = @transform_11, window_bounds = array<i64: 32, 64>}, {transform_indices = @transform_12, window_bounds = array<i64: 1, 64, 64>}]} {
    %c0 = arith.constant 0 : index
    %c0_0 = arith.constant 0 : index
    %c0_1 = arith.constant 0 : index
    %0 = vector.load %arg1[%c0, %c0_0, %c0_1] : memref<1x256x8xf32, #tpu.memory_space<vmem>>, vector<1x256x8xf32>
    %1 = vector.shape_cast %0 : vector<1x256x8xf32> to vector<256x8xf32>
    %2 = arith.truncf %1 : vector<256x8xf32> to vector<256x8xbf16>
    %c0_2 = arith.constant 0 : index
    %c0_3 = arith.constant 0 : index
    %3 = vector.load %arg2[%c0_2, %c0_3] : memref<8x32xbf16, #tpu.memory_space<vmem>>, vector<8x32xbf16>
    %cst = arith.constant dense<0.000000e+00> : vector<256x32xf32>
    %4 = tpu.matmul %2, %3, %cst {dimension_numbers = #tpu.dot_dimension_numbers<[1], [0], [0], [1], [0, 0, 1, 1], [], []>} : vector<256x8xbf16>, vector<8x32xbf16>, vector<256x32xf32> -> vector<256x32xf32>
    %c0_4 = arith.constant 0 : index
    %c0_5 = arith.constant 0 : index
    %5 = vector.load %arg3[%c0_4, %c0_5] : memref<1x32xf32, #tpu.memory_space<vmem>>, vector<1x32xf32>
    %6 = vector.broadcast %5 : vector<1x32xf32> to vector<256x32xf32>
    %7 = arith.addf %4, %6 : vector<256x32xf32>
    %cst_6 = arith.constant 0.000000e+00 : f32
    %8 = vector.broadcast %cst_6 : f32 to vector<256x32xf32>
    %9 = arith.cmpf oge, %7, %8 : vector<256x32xf32>
    %cst_7 = arith.constant 2.000000e-01 : f32
    %10 = vector.broadcast %cst_7 : f32 to vector<256x32xf32>
    %11 = arith.mulf %10, %7 : vector<256x32xf32>
    %12 = arith.select %9, %7, %11 : vector<256x32xi1>, vector<256x32xf32>
    %13 = arith.truncf %12 : vector<256x32xf32> to vector<256x32xbf16>
    %14 = arith.truncf %7 : vector<256x32xf32> to vector<256x32xbf16>
    %cst_8 = arith.constant 0.000000e+00 : f32
    %15 = vector.broadcast %cst_8 : f32 to vector<64x32xf32>
    %c0_9 = arith.constant 0 : index
    %c0_10 = arith.constant 0 : index
    %c0_11 = arith.constant 0 : index
    %16 = vector.load %arg4[%c0_9, %c0_10, %c0_11] : memref<9x64x256xbf16, #tpu.memory_space<vmem>>, vector<1x64x256xbf16>
    %17 = vector.shape_cast %16 : vector<1x64x256xbf16> to vector<64x256xbf16>
    %cst_12 = arith.constant dense<0.000000e+00> : vector<64x32xf32>
    %18 = tpu.matmul %17, %13, %cst_12 {dimension_numbers = #tpu.dot_dimension_numbers<[1], [0], [0], [1], [0, 0, 1, 1], [], []>} : vector<64x256xbf16>, vector<256x32xbf16>, vector<64x32xf32> -> vector<64x32xf32>
    %19 = arith.truncf %18 : vector<64x32xf32> to vector<64x32xbf16>
    %c0_13 = arith.constant 0 : index
    %c0_14 = arith.constant 0 : index
    %c0_15 = arith.constant 0 : index
    %20 = vector.load %arg7[%c0_13, %c0_14, %c0_15] : memref<9x32x32xbf16, #tpu.memory_space<vmem>>, vector<1x32x32xbf16>
    %21 = vector.shape_cast %20 : vector<1x32x32xbf16> to vector<32x32xbf16>
    %cst_16 = arith.constant dense<0.000000e+00> : vector<64x32xf32>
    %22 = tpu.matmul %19, %21, %cst_16 {dimension_numbers = #tpu.dot_dimension_numbers<[1], [0], [0], [1], [0, 0, 1, 1], [], []>} : vector<64x32xbf16>, vector<32x32xbf16>, vector<64x32xf32> -> vector<64x32xf32>
    %23 = arith.addf %15, %22 : vector<64x32xf32>
    %c1 = arith.constant 1 : index
    %c0_17 = arith.constant 0 : index
    %c0_18 = arith.constant 0 : index
    %24 = vector.load %arg4[%c1, %c0_17, %c0_18] : memref<9x64x256xbf16, #tpu.memory_space<vmem>>, vector<1x64x256xbf16>
    %25 = vector.shape_cast %24 : vector<1x64x256xbf16> to vector<64x256xbf16>
    %cst_19 = arith.constant dense<0.000000e+00> : vector<64x32xf32>
    %26 = tpu.matmul %25, %13, %cst_19 {dimension_numbers = #tpu.dot_dimension_numbers<[1], [0], [0], [1], [0, 0, 1, 1], [], []>} : vector<64x256xbf16>, vector<256x32xbf16>, vector<64x32xf32> -> vector<64x32xf32>
    %27 = arith.truncf %26 : vector<64x32xf32> to vector<64x32xbf16>
    %c1_20 = arith.constant 1 : index
    %c0_21 = arith.constant 0 : index
    %c0_22 = arith.constant 0 : index
    %28 = vector.load %arg7[%c1_20, %c0_21, %c0_22] : memref<9x32x32xbf16, #tpu.memory_space<vmem>>, vector<1x32x32xbf16>
    %29 = vector.shape_cast %28 : vector<1x32x32xbf16> to vector<32x32xbf16>
    %cst_23 = arith.constant dense<0.000000e+00> : vector<64x32xf32>
    %30 = tpu.matmul %27, %29, %cst_23 {dimension_numbers = #tpu.dot_dimension_numbers<[1], [0], [0], [1], [0, 0, 1, 1], [], []>} : vector<64x32xbf16>, vector<32x32xbf16>, vector<64x32xf32> -> vector<64x32xf32>
    %31 = arith.addf %23, %30 : vector<64x32xf32>
    %c2 = arith.constant 2 : index
    %c0_24 = arith.constant 0 : index
    %c0_25 = arith.constant 0 : index
    %32 = vector.load %arg4[%c2, %c0_24, %c0_25] : memref<9x64x256xbf16, #tpu.memory_space<vmem>>, vector<1x64x256xbf16>
    %33 = vector.shape_cast %32 : vector<1x64x256xbf16> to vector<64x256xbf16>
    %cst_26 = arith.constant dense<0.000000e+00> : vector<64x32xf32>
    %34 = tpu.matmul %33, %13, %cst_26 {dimension_numbers = #tpu.dot_dimension_numbers<[1], [0], [0], [1], [0, 0, 1, 1], [], []>} : vector<64x256xbf16>, vector<256x32xbf16>, vector<64x32xf32> -> vector<64x32xf32>
    %35 = arith.truncf %34 : vector<64x32xf32> to vector<64x32xbf16>
    %c2_27 = arith.constant 2 : index
    %c0_28 = arith.constant 0 : index
    %c0_29 = arith.constant 0 : index
    %36 = vector.load %arg7[%c2_27, %c0_28, %c0_29] : memref<9x32x32xbf16, #tpu.memory_space<vmem>>, vector<1x32x32xbf16>
    %37 = vector.shape_cast %36 : vector<1x32x32xbf16> to vector<32x32xbf16>
    %cst_30 = arith.constant dense<0.000000e+00> : vector<64x32xf32>
    %38 = tpu.matmul %35, %37, %cst_30 {dimension_numbers = #tpu.dot_dimension_numbers<[1], [0], [0], [1], [0, 0, 1, 1], [], []>} : vector<64x32xbf16>, vector<32x32xbf16>, vector<64x32xf32> -> vector<64x32xf32>
    %39 = arith.addf %31, %38 : vector<64x32xf32>
    %c3 = arith.constant 3 : index
    %c0_31 = arith.constant 0 : index
    %c0_32 = arith.constant 0 : index
    %40 = vector.load %arg4[%c3, %c0_31, %c0_32] : memref<9x64x256xbf16, #tpu.memory_space<vmem>>, vector<1x64x256xbf16>
    %41 = vector.shape_cast %40 : vector<1x64x256xbf16> to vector<64x256xbf16>
    %cst_33 = arith.constant dense<0.000000e+00> : vector<64x32xf32>
    %42 = tpu.matmul %41, %13, %cst_33 {dimension_numbers = #tpu.dot_dimension_numbers<[1], [0], [0], [1], [0, 0, 1, 1], [], []>} : vector<64x256xbf16>, vector<256x32xbf16>, vector<64x32xf32> -> vector<64x32xf32>
    %43 = arith.truncf %42 : vector<64x32xf32> to vector<64x32xbf16>
    %c3_34 = arith.constant 3 : index
    %c0_35 = arith.constant 0 : index
    %c0_36 = arith.constant 0 : index
    %44 = vector.load %arg7[%c3_34, %c0_35, %c0_36] : memref<9x32x32xbf16, #tpu.memory_space<vmem>>, vector<1x32x32xbf16>
    %45 = vector.shape_cast %44 : vector<1x32x32xbf16> to vector<32x32xbf16>
    %cst_37 = arith.constant dense<0.000000e+00> : vector<64x32xf32>
    %46 = tpu.matmul %43, %45, %cst_37 {dimension_numbers = #tpu.dot_dimension_numbers<[1], [0], [0], [1], [0, 0, 1, 1], [], []>} : vector<64x32xbf16>, vector<32x32xbf16>, vector<64x32xf32> -> vector<64x32xf32>
    %47 = arith.addf %39, %46 : vector<64x32xf32>
    %c4 = arith.constant 4 : index
    %c0_38 = arith.constant 0 : index
    %c0_39 = arith.constant 0 : index
    %48 = vector.load %arg4[%c4, %c0_38, %c0_39] : memref<9x64x256xbf16, #tpu.memory_space<vmem>>, vector<1x64x256xbf16>
    %49 = vector.shape_cast %48 : vector<1x64x256xbf16> to vector<64x256xbf16>
    %cst_40 = arith.constant dense<0.000000e+00> : vector<64x32xf32>
    %50 = tpu.matmul %49, %13, %cst_40 {dimension_numbers = #tpu.dot_dimension_numbers<[1], [0], [0], [1], [0, 0, 1, 1], [], []>} : vector<64x256xbf16>, vector<256x32xbf16>, vector<64x32xf32> -> vector<64x32xf32>
    %51 = arith.truncf %50 : vector<64x32xf32> to vector<64x32xbf16>
    %c4_41 = arith.constant 4 : index
    %c0_42 = arith.constant 0 : index
    %c0_43 = arith.constant 0 : index
    %52 = vector.load %arg7[%c4_41, %c0_42, %c0_43] : memref<9x32x32xbf16, #tpu.memory_space<vmem>>, vector<1x32x32xbf16>
    %53 = vector.shape_cast %52 : vector<1x32x32xbf16> to vector<32x32xbf16>
    %cst_44 = arith.constant dense<0.000000e+00> : vector<64x32xf32>
    %54 = tpu.matmul %51, %53, %cst_44 {dimension_numbers = #tpu.dot_dimension_numbers<[1], [0], [0], [1], [0, 0, 1, 1], [], []>} : vector<64x32xbf16>, vector<32x32xbf16>, vector<64x32xf32> -> vector<64x32xf32>
    %55 = arith.addf %47, %54 : vector<64x32xf32>
    %c5 = arith.constant 5 : index
    %c0_45 = arith.constant 0 : index
    %c0_46 = arith.constant 0 : index
    %56 = vector.load %arg4[%c5, %c0_45, %c0_46] : memref<9x64x256xbf16, #tpu.memory_space<vmem>>, vector<1x64x256xbf16>
    %57 = vector.shape_cast %56 : vector<1x64x256xbf16> to vector<64x256xbf16>
    %cst_47 = arith.constant dense<0.000000e+00> : vector<64x32xf32>
    %58 = tpu.matmul %57, %13, %cst_47 {dimension_numbers = #tpu.dot_dimension_numbers<[1], [0], [0], [1], [0, 0, 1, 1], [], []>} : vector<64x256xbf16>, vector<256x32xbf16>, vector<64x32xf32> -> vector<64x32xf32>
    %59 = arith.truncf %58 : vector<64x32xf32> to vector<64x32xbf16>
    %c5_48 = arith.constant 5 : index
    %c0_49 = arith.constant 0 : index
    %c0_50 = arith.constant 0 : index
    %60 = vector.load %arg7[%c5_48, %c0_49, %c0_50] : memref<9x32x32xbf16, #tpu.memory_space<vmem>>, vector<1x32x32xbf16>
    %61 = vector.shape_cast %60 : vector<1x32x32xbf16> to vector<32x32xbf16>
    %cst_51 = arith.constant dense<0.000000e+00> : vector<64x32xf32>
    %62 = tpu.matmul %59, %61, %cst_51 {dimension_numbers = #tpu.dot_dimension_numbers<[1], [0], [0], [1], [0, 0, 1, 1], [], []>} : vector<64x32xbf16>, vector<32x32xbf16>, vector<64x32xf32> -> vector<64x32xf32>
    %63 = arith.addf %55, %62 : vector<64x32xf32>
    %c6 = arith.constant 6 : index
    %c0_52 = arith.constant 0 : index
    %c0_53 = arith.constant 0 : index
    %64 = vector.load %arg4[%c6, %c0_52, %c0_53] : memref<9x64x256xbf16, #tpu.memory_space<vmem>>, vector<1x64x256xbf16>
    %65 = vector.shape_cast %64 : vector<1x64x256xbf16> to vector<64x256xbf16>
    %cst_54 = arith.constant dense<0.000000e+00> : vector<64x32xf32>
    %66 = tpu.matmul %65, %13, %cst_54 {dimension_numbers = #tpu.dot_dimension_numbers<[1], [0], [0], [1], [0, 0, 1, 1], [], []>} : vector<64x256xbf16>, vector<256x32xbf16>, vector<64x32xf32> -> vector<64x32xf32>
    %67 = arith.truncf %66 : vector<64x32xf32> to vector<64x32xbf16>
    %c6_55 = arith.constant 6 : index
    %c0_56 = arith.constant 0 : index
    %c0_57 = arith.constant 0 : index
    %68 = vector.load %arg7[%c6_55, %c0_56, %c0_57] : memref<9x32x32xbf16, #tpu.memory_space<vmem>>, vector<1x32x32xbf16>
    %69 = vector.shape_cast %68 : vector<1x32x32xbf16> to vector<32x32xbf16>
    %cst_58 = arith.constant dense<0.000000e+00> : vector<64x32xf32>
    %70 = tpu.matmul %67, %69, %cst_58 {dimension_numbers = #tpu.dot_dimension_numbers<[1], [0], [0], [1], [0, 0, 1, 1], [], []>} : vector<64x32xbf16>, vector<32x32xbf16>, vector<64x32xf32> -> vector<64x32xf32>
    %71 = arith.addf %63, %70 : vector<64x32xf32>
    %c7 = arith.constant 7 : index
    %c0_59 = arith.constant 0 : index
    %c0_60 = arith.constant 0 : index
    %72 = vector.load %arg4[%c7, %c0_59, %c0_60] : memref<9x64x256xbf16, #tpu.memory_space<vmem>>, vector<1x64x256xbf16>
    %73 = vector.shape_cast %72 : vector<1x64x256xbf16> to vector<64x256xbf16>
    %cst_61 = arith.constant dense<0.000000e+00> : vector<64x32xf32>
    %74 = tpu.matmul %73, %13, %cst_61 {dimension_numbers = #tpu.dot_dimension_numbers<[1], [0], [0], [1], [0, 0, 1, 1], [], []>} : vector<64x256xbf16>, vector<256x32xbf16>, vector<64x32xf32> -> vector<64x32xf32>
    %75 = arith.truncf %74 : vector<64x32xf32> to vector<64x32xbf16>
    %c7_62 = arith.constant 7 : index
    %c0_63 = arith.constant 0 : index
    %c0_64 = arith.constant 0 : index
    %76 = vector.load %arg7[%c7_62, %c0_63, %c0_64] : memref<9x32x32xbf16, #tpu.memory_space<vmem>>, vector<1x32x32xbf16>
    %77 = vector.shape_cast %76 : vector<1x32x32xbf16> to vector<32x32xbf16>
    %cst_65 = arith.constant dense<0.000000e+00> : vector<64x32xf32>
    %78 = tpu.matmul %75, %77, %cst_65 {dimension_numbers = #tpu.dot_dimension_numbers<[1], [0], [0], [1], [0, 0, 1, 1], [], []>} : vector<64x32xbf16>, vector<32x32xbf16>, vector<64x32xf32> -> vector<64x32xf32>
    %79 = arith.addf %71, %78 : vector<64x32xf32>
    %c8 = arith.constant 8 : index
    %c0_66 = arith.constant 0 : index
    %c0_67 = arith.constant 0 : index
    %80 = vector.load %arg4[%c8, %c0_66, %c0_67] : memref<9x64x256xbf16, #tpu.memory_space<vmem>>, vector<1x64x256xbf16>
    %81 = vector.shape_cast %80 : vector<1x64x256xbf16> to vector<64x256xbf16>
    %cst_68 = arith.constant dense<0.000000e+00> : vector<64x32xf32>
    %82 = tpu.matmul %81, %13, %cst_68 {dimension_numbers = #tpu.dot_dimension_numbers<[1], [0], [0], [1], [0, 0, 1, 1], [], []>} : vector<64x256xbf16>, vector<256x32xbf16>, vector<64x32xf32> -> vector<64x32xf32>
    %83 = arith.truncf %82 : vector<64x32xf32> to vector<64x32xbf16>
    %c8_69 = arith.constant 8 : index
    %c0_70 = arith.constant 0 : index
    %c0_71 = arith.constant 0 : index
    %84 = vector.load %arg7[%c8_69, %c0_70, %c0_71] : memref<9x32x32xbf16, #tpu.memory_space<vmem>>, vector<1x32x32xbf16>
    %85 = vector.shape_cast %84 : vector<1x32x32xbf16> to vector<32x32xbf16>
    %cst_72 = arith.constant dense<0.000000e+00> : vector<64x32xf32>
    %86 = tpu.matmul %83, %85, %cst_72 {dimension_numbers = #tpu.dot_dimension_numbers<[1], [0], [0], [1], [0, 0, 1, 1], [], []>} : vector<64x32xbf16>, vector<32x32xbf16>, vector<64x32xf32> -> vector<64x32xf32>
    %87 = arith.addf %79, %86 : vector<64x32xf32>
    %c0_73 = arith.constant 0 : index
    %c0_74 = arith.constant 0 : index
    %88 = vector.load %arg8[%c0_73, %c0_74] : memref<1x32xf32, #tpu.memory_space<vmem>>, vector<1x32xf32>
    %89 = vector.broadcast %88 : vector<1x32xf32> to vector<64x32xf32>
    %90 = arith.addf %87, %89 : vector<64x32xf32>
    %cst_75 = arith.constant dense<0.000000e+00> : vector<32xf32>
    %91 = vector.multi_reduction <add>, %90, %cst_75 [0] : vector<64x32xf32> to vector<32xf32>
    %92 = vector.shape_cast %91 : vector<32xf32> to vector<1x32xf32>
    %cst_76 = arith.constant 6.400000e+01 : f32
    %93 = vector.broadcast %cst_76 : f32 to vector<1x32xf32>
    %94 = arith.divf %92, %93 : vector<1x32xf32>
    %95 = vector.shape_cast %94 : vector<1x32xf32> to vector<1x32xf32>
    %96 = vector.broadcast %95 : vector<1x32xf32> to vector<8x32xf32>
    %c0_77 = arith.constant 0 : index
    %c0_78 = arith.constant 0 : index
    %97 = vector.load %arg9[%c0_77, %c0_78] : memref<32x32xf32, #tpu.memory_space<vmem>>, vector<32x32xf32>
    %cst_79 = arith.constant dense<0.000000e+00> : vector<8x32xf32>
    %98 = tpu.matmul %96, %97, %cst_79 {dimension_numbers = #tpu.dot_dimension_numbers<[1], [0], [0], [1], [0, 0, 1, 1], [], []>} : vector<8x32xf32>, vector<32x32xf32>, vector<8x32xf32> -> vector<8x32xf32>
    %99 = vector.extract_strided_slice %98 {offsets = [0, 0], sizes = [1, 32], strides = [1, 1]} : vector<8x32xf32> to vector<1x32xf32>
    %100 = arith.negf %99 : vector<1x32xf32>
    %101 = math.exp %100 : vector<1x32xf32>
    %cst_80 = arith.constant 1.000000e+00 : f32
    %102 = vector.broadcast %cst_80 : f32 to vector<1x32xf32>
    %103 = arith.addf %102, %101 : vector<1x32xf32>
    %104 = arith.divf %102, %103 : vector<1x32xf32>
    %105 = vector.broadcast %104 : vector<1x32xf32> to vector<64x32xf32>
    %106 = arith.mulf %90, %105 : vector<64x32xf32>
    %cst_81 = arith.constant 0.000000e+00 : f32
    %107 = vector.broadcast %cst_81 : f32 to vector<64x32xf32>
    %108 = arith.cmpf oge, %106, %107 : vector<64x32xf32>
    %cst_82 = arith.constant 2.000000e-01 : f32
    %109 = vector.broadcast %cst_82 : f32 to vector<64x32xf32>
    %110 = arith.mulf %109, %106 : vector<64x32xf32>
    %111 = arith.select %108, %106, %110 : vector<64x32xi1>, vector<64x32xf32>
    %112 = arith.truncf %111 : vector<64x32xf32> to vector<64x32xbf16>
    %cst_83 = arith.constant 0.000000e+00 : f32
    %113 = vector.broadcast %cst_83 : f32 to vector<64x64xf32>
    %c0_84 = arith.constant 0 : index
    %c0_85 = arith.constant 0 : index
    %c0_86 = arith.constant 0 : index
    %114 = vector.load %arg6[%c0_84, %c0_85, %c0_86] : memref<9x64x64xbf16, #tpu.memory_space<vmem>>, vector<1x64x64xbf16>
    %115 = vector.shape_cast %114 : vector<1x64x64xbf16> to vector<64x64xbf16>
    %cst_87 = arith.constant dense<0.000000e+00> : vector<64x32xf32>
    %116 = tpu.matmul %115, %112, %cst_87 {dimension_numbers = #tpu.dot_dimension_numbers<[1], [0], [0], [1], [0, 0, 1, 1], [], []>} : vector<64x64xbf16>, vector<64x32xbf16>, vector<64x32xf32> -> vector<64x32xf32>
    %117 = arith.truncf %116 : vector<64x32xf32> to vector<64x32xbf16>
    %c0_88 = arith.constant 0 : index
    %c0_89 = arith.constant 0 : index
    %c0_90 = arith.constant 0 : index
    %118 = vector.load %arg10[%c0_88, %c0_89, %c0_90] : memref<9x32x64xbf16, #tpu.memory_space<vmem>>, vector<1x32x64xbf16>
    %119 = vector.shape_cast %118 : vector<1x32x64xbf16> to vector<32x64xbf16>
    %cst_91 = arith.constant dense<0.000000e+00> : vector<64x64xf32>
    %120 = tpu.matmul %117, %119, %cst_91 {dimension_numbers = #tpu.dot_dimension_numbers<[1], [0], [0], [1], [0, 0, 1, 1], [], []>} : vector<64x32xbf16>, vector<32x64xbf16>, vector<64x64xf32> -> vector<64x64xf32>
    %121 = arith.addf %113, %120 : vector<64x64xf32>
    %c1_92 = arith.constant 1 : index
    %c0_93 = arith.constant 0 : index
    %c0_94 = arith.constant 0 : index
    %122 = vector.load %arg6[%c1_92, %c0_93, %c0_94] : memref<9x64x64xbf16, #tpu.memory_space<vmem>>, vector<1x64x64xbf16>
    %123 = vector.shape_cast %122 : vector<1x64x64xbf16> to vector<64x64xbf16>
    %cst_95 = arith.constant dense<0.000000e+00> : vector<64x32xf32>
    %124 = tpu.matmul %123, %112, %cst_95 {dimension_numbers = #tpu.dot_dimension_numbers<[1], [0], [0], [1], [0, 0, 1, 1], [], []>} : vector<64x64xbf16>, vector<64x32xbf16>, vector<64x32xf32> -> vector<64x32xf32>
    %125 = arith.truncf %124 : vector<64x32xf32> to vector<64x32xbf16>
    %c1_96 = arith.constant 1 : index
    %c0_97 = arith.constant 0 : index
    %c0_98 = arith.constant 0 : index
    %126 = vector.load %arg10[%c1_96, %c0_97, %c0_98] : memref<9x32x64xbf16, #tpu.memory_space<vmem>>, vector<1x32x64xbf16>
    %127 = vector.shape_cast %126 : vector<1x32x64xbf16> to vector<32x64xbf16>
    %cst_99 = arith.constant dense<0.000000e+00> : vector<64x64xf32>
    %128 = tpu.matmul %125, %127, %cst_99 {dimension_numbers = #tpu.dot_dimension_numbers<[1], [0], [0], [1], [0, 0, 1, 1], [], []>} : vector<64x32xbf16>, vector<32x64xbf16>, vector<64x64xf32> -> vector<64x64xf32>
    %129 = arith.addf %121, %128 : vector<64x64xf32>
    %c2_100 = arith.constant 2 : index
    %c0_101 = arith.constant 0 : index
    %c0_102 = arith.constant 0 : index
    %130 = vector.load %arg6[%c2_100, %c0_101, %c0_102] : memref<9x64x64xbf16, #tpu.memory_space<vmem>>, vector<1x64x64xbf16>
    %131 = vector.shape_cast %130 : vector<1x64x64xbf16> to vector<64x64xbf16>
    %cst_103 = arith.constant dense<0.000000e+00> : vector<64x32xf32>
    %132 = tpu.matmul %131, %112, %cst_103 {dimension_numbers = #tpu.dot_dimension_numbers<[1], [0], [0], [1], [0, 0, 1, 1], [], []>} : vector<64x64xbf16>, vector<64x32xbf16>, vector<64x32xf32> -> vector<64x32xf32>
    %133 = arith.truncf %132 : vector<64x32xf32> to vector<64x32xbf16>
    %c2_104 = arith.constant 2 : index
    %c0_105 = arith.constant 0 : index
    %c0_106 = arith.constant 0 : index
    %134 = vector.load %arg10[%c2_104, %c0_105, %c0_106] : memref<9x32x64xbf16, #tpu.memory_space<vmem>>, vector<1x32x64xbf16>
    %135 = vector.shape_cast %134 : vector<1x32x64xbf16> to vector<32x64xbf16>
    %cst_107 = arith.constant dense<0.000000e+00> : vector<64x64xf32>
    %136 = tpu.matmul %133, %135, %cst_107 {dimension_numbers = #tpu.dot_dimension_numbers<[1], [0], [0], [1], [0, 0, 1, 1], [], []>} : vector<64x32xbf16>, vector<32x64xbf16>, vector<64x64xf32> -> vector<64x64xf32>
    %137 = arith.addf %129, %136 : vector<64x64xf32>
    %c3_108 = arith.constant 3 : index
    %c0_109 = arith.constant 0 : index
    %c0_110 = arith.constant 0 : index
    %138 = vector.load %arg6[%c3_108, %c0_109, %c0_110] : memref<9x64x64xbf16, #tpu.memory_space<vmem>>, vector<1x64x64xbf16>
    %139 = vector.shape_cast %138 : vector<1x64x64xbf16> to vector<64x64xbf16>
    %cst_111 = arith.constant dense<0.000000e+00> : vector<64x32xf32>
    %140 = tpu.matmul %139, %112, %cst_111 {dimension_numbers = #tpu.dot_dimension_numbers<[1], [0], [0], [1], [0, 0, 1, 1], [], []>} : vector<64x64xbf16>, vector<64x32xbf16>, vector<64x32xf32> -> vector<64x32xf32>
    %141 = arith.truncf %140 : vector<64x32xf32> to vector<64x32xbf16>
    %c3_112 = arith.constant 3 : index
    %c0_113 = arith.constant 0 : index
    %c0_114 = arith.constant 0 : index
    %142 = vector.load %arg10[%c3_112, %c0_113, %c0_114] : memref<9x32x64xbf16, #tpu.memory_space<vmem>>, vector<1x32x64xbf16>
    %143 = vector.shape_cast %142 : vector<1x32x64xbf16> to vector<32x64xbf16>
    %cst_115 = arith.constant dense<0.000000e+00> : vector<64x64xf32>
    %144 = tpu.matmul %141, %143, %cst_115 {dimension_numbers = #tpu.dot_dimension_numbers<[1], [0], [0], [1], [0, 0, 1, 1], [], []>} : vector<64x32xbf16>, vector<32x64xbf16>, vector<64x64xf32> -> vector<64x64xf32>
    %145 = arith.addf %137, %144 : vector<64x64xf32>
    %c4_116 = arith.constant 4 : index
    %c0_117 = arith.constant 0 : index
    %c0_118 = arith.constant 0 : index
    %146 = vector.load %arg6[%c4_116, %c0_117, %c0_118] : memref<9x64x64xbf16, #tpu.memory_space<vmem>>, vector<1x64x64xbf16>
    %147 = vector.shape_cast %146 : vector<1x64x64xbf16> to vector<64x64xbf16>
    %cst_119 = arith.constant dense<0.000000e+00> : vector<64x32xf32>
    %148 = tpu.matmul %147, %112, %cst_119 {dimension_numbers = #tpu.dot_dimension_numbers<[1], [0], [0], [1], [0, 0, 1, 1], [], []>} : vector<64x64xbf16>, vector<64x32xbf16>, vector<64x32xf32> -> vector<64x32xf32>
    %149 = arith.truncf %148 : vector<64x32xf32> to vector<64x32xbf16>
    %c4_120 = arith.constant 4 : index
    %c0_121 = arith.constant 0 : index
    %c0_122 = arith.constant 0 : index
    %150 = vector.load %arg10[%c4_120, %c0_121, %c0_122] : memref<9x32x64xbf16, #tpu.memory_space<vmem>>, vector<1x32x64xbf16>
    %151 = vector.shape_cast %150 : vector<1x32x64xbf16> to vector<32x64xbf16>
    %cst_123 = arith.constant dense<0.000000e+00> : vector<64x64xf32>
    %152 = tpu.matmul %149, %151, %cst_123 {dimension_numbers = #tpu.dot_dimension_numbers<[1], [0], [0], [1], [0, 0, 1, 1], [], []>} : vector<64x32xbf16>, vector<32x64xbf16>, vector<64x64xf32> -> vector<64x64xf32>
    %153 = arith.addf %145, %152 : vector<64x64xf32>
    %c5_124 = arith.constant 5 : index
    %c0_125 = arith.constant 0 : index
    %c0_126 = arith.constant 0 : index
    %154 = vector.load %arg6[%c5_124, %c0_125, %c0_126] : memref<9x64x64xbf16, #tpu.memory_space<vmem>>, vector<1x64x64xbf16>
    %155 = vector.shape_cast %154 : vector<1x64x64xbf16> to vector<64x64xbf16>
    %cst_127 = arith.constant dense<0.000000e+00> : vector<64x32xf32>
    %156 = tpu.matmul %155, %112, %cst_127 {dimension_numbers = #tpu.dot_dimension_numbers<[1], [0], [0], [1], [0, 0, 1, 1], [], []>} : vector<64x64xbf16>, vector<64x32xbf16>, vector<64x32xf32> -> vector<64x32xf32>
    %157 = arith.truncf %156 : vector<64x32xf32> to vector<64x32xbf16>
    %c5_128 = arith.constant 5 : index
    %c0_129 = arith.constant 0 : index
    %c0_130 = arith.constant 0 : index
    %158 = vector.load %arg10[%c5_128, %c0_129, %c0_130] : memref<9x32x64xbf16, #tpu.memory_space<vmem>>, vector<1x32x64xbf16>
    %159 = vector.shape_cast %158 : vector<1x32x64xbf16> to vector<32x64xbf16>
    %cst_131 = arith.constant dense<0.000000e+00> : vector<64x64xf32>
    %160 = tpu.matmul %157, %159, %cst_131 {dimension_numbers = #tpu.dot_dimension_numbers<[1], [0], [0], [1], [0, 0, 1, 1], [], []>} : vector<64x32xbf16>, vector<32x64xbf16>, vector<64x64xf32> -> vector<64x64xf32>
    %161 = arith.addf %153, %160 : vector<64x64xf32>
    %c6_132 = arith.constant 6 : index
    %c0_133 = arith.constant 0 : index
    %c0_134 = arith.constant 0 : index
    %162 = vector.load %arg6[%c6_132, %c0_133, %c0_134] : memref<9x64x64xbf16, #tpu.memory_space<vmem>>, vector<1x64x64xbf16>
    %163 = vector.shape_cast %162 : vector<1x64x64xbf16> to vector<64x64xbf16>
    %cst_135 = arith.constant dense<0.000000e+00> : vector<64x32xf32>
    %164 = tpu.matmul %163, %112, %cst_135 {dimension_numbers = #tpu.dot_dimension_numbers<[1], [0], [0], [1], [0, 0, 1, 1], [], []>} : vector<64x64xbf16>, vector<64x32xbf16>, vector<64x32xf32> -> vector<64x32xf32>
    %165 = arith.truncf %164 : vector<64x32xf32> to vector<64x32xbf16>
    %c6_136 = arith.constant 6 : index
    %c0_137 = arith.constant 0 : index
    %c0_138 = arith.constant 0 : index
    %166 = vector.load %arg10[%c6_136, %c0_137, %c0_138] : memref<9x32x64xbf16, #tpu.memory_space<vmem>>, vector<1x32x64xbf16>
    %167 = vector.shape_cast %166 : vector<1x32x64xbf16> to vector<32x64xbf16>
    %cst_139 = arith.constant dense<0.000000e+00> : vector<64x64xf32>
    %168 = tpu.matmul %165, %167, %cst_139 {dimension_numbers = #tpu.dot_dimension_numbers<[1], [0], [0], [1], [0, 0, 1, 1], [], []>} : vector<64x32xbf16>, vector<32x64xbf16>, vector<64x64xf32> -> vector<64x64xf32>
    %169 = arith.addf %161, %168 : vector<64x64xf32>
    %c7_140 = arith.constant 7 : index
    %c0_141 = arith.constant 0 : index
    %c0_142 = arith.constant 0 : index
    %170 = vector.load %arg6[%c7_140, %c0_141, %c0_142] : memref<9x64x64xbf16, #tpu.memory_space<vmem>>, vector<1x64x64xbf16>
    %171 = vector.shape_cast %170 : vector<1x64x64xbf16> to vector<64x64xbf16>
    %cst_143 = arith.constant dense<0.000000e+00> : vector<64x32xf32>
    %172 = tpu.matmul %171, %112, %cst_143 {dimension_numbers = #tpu.dot_dimension_numbers<[1], [0], [0], [1], [0, 0, 1, 1], [], []>} : vector<64x64xbf16>, vector<64x32xbf16>, vector<64x32xf32> -> vector<64x32xf32>
    %173 = arith.truncf %172 : vector<64x32xf32> to vector<64x32xbf16>
    %c7_144 = arith.constant 7 : index
    %c0_145 = arith.constant 0 : index
    %c0_146 = arith.constant 0 : index
    %174 = vector.load %arg10[%c7_144, %c0_145, %c0_146] : memref<9x32x64xbf16, #tpu.memory_space<vmem>>, vector<1x32x64xbf16>
    %175 = vector.shape_cast %174 : vector<1x32x64xbf16> to vector<32x64xbf16>
    %cst_147 = arith.constant dense<0.000000e+00> : vector<64x64xf32>
    %176 = tpu.matmul %173, %175, %cst_147 {dimension_numbers = #tpu.dot_dimension_numbers<[1], [0], [0], [1], [0, 0, 1, 1], [], []>} : vector<64x32xbf16>, vector<32x64xbf16>, vector<64x64xf32> -> vector<64x64xf32>
    %177 = arith.addf %169, %176 : vector<64x64xf32>
    %c8_148 = arith.constant 8 : index
    %c0_149 = arith.constant 0 : index
    %c0_150 = arith.constant 0 : index
    %178 = vector.load %arg6[%c8_148, %c0_149, %c0_150] : memref<9x64x64xbf16, #tpu.memory_space<vmem>>, vector<1x64x64xbf16>
    %179 = vector.shape_cast %178 : vector<1x64x64xbf16> to vector<64x64xbf16>
    %cst_151 = arith.constant dense<0.000000e+00> : vector<64x32xf32>
    %180 = tpu.matmul %179, %112, %cst_151 {dimension_numbers = #tpu.dot_dimension_numbers<[1], [0], [0], [1], [0, 0, 1, 1], [], []>} : vector<64x64xbf16>, vector<64x32xbf16>, vector<64x32xf32> -> vector<64x32xf32>
    %181 = arith.truncf %180 : vector<64x32xf32> to vector<64x32xbf16>
    %c8_152 = arith.constant 8 : index
    %c0_153 = arith.constant 0 : index
    %c0_154 = arith.constant 0 : index
    %182 = vector.load %arg10[%c8_152, %c0_153, %c0_154] : memref<9x32x64xbf16, #tpu.memory_space<vmem>>, vector<1x32x64xbf16>
    %183 = vector.shape_cast %182 : vector<1x32x64xbf16> to vector<32x64xbf16>
    %cst_155 = arith.constant dense<0.000000e+00> : vector<64x64xf32>
    %184 = tpu.matmul %181, %183, %cst_155 {dimension_numbers = #tpu.dot_dimension_numbers<[1], [0], [0], [1], [0, 0, 1, 1], [], []>} : vector<64x32xbf16>, vector<32x64xbf16>, vector<64x64xf32> -> vector<64x64xf32>
    %185 = arith.addf %177, %184 : vector<64x64xf32>
    %c0_156 = arith.constant 0 : index
    %c0_157 = arith.constant 0 : index
    %186 = vector.load %arg11[%c0_156, %c0_157] : memref<1x64xf32, #tpu.memory_space<vmem>>, vector<1x64xf32>
    %187 = vector.broadcast %186 : vector<1x64xf32> to vector<64x64xf32>
    %188 = arith.addf %185, %187 : vector<64x64xf32>
    %c0_158 = arith.constant 0 : index
    %c0_159 = arith.constant 0 : index
    %189 = vector.load %arg5[%c0_158, %c0_159] : memref<64x256xbf16, #tpu.memory_space<vmem>>, vector<64x256xbf16>
    %cst_160 = arith.constant dense<0.000000e+00> : vector<64x32xf32>
    %190 = tpu.matmul %189, %14, %cst_160 {dimension_numbers = #tpu.dot_dimension_numbers<[1], [0], [0], [1], [0, 0, 1, 1], [], []>} : vector<64x256xbf16>, vector<256x32xbf16>, vector<64x32xf32> -> vector<64x32xf32>
    %191 = arith.truncf %190 : vector<64x32xf32> to vector<64x32xbf16>
    %c0_161 = arith.constant 0 : index
    %c0_162 = arith.constant 0 : index
    %192 = vector.load %arg12[%c0_161, %c0_162] : memref<32x64xbf16, #tpu.memory_space<vmem>>, vector<32x64xbf16>
    %cst_163 = arith.constant dense<0.000000e+00> : vector<64x64xf32>
    %193 = tpu.matmul %191, %192, %cst_163 {dimension_numbers = #tpu.dot_dimension_numbers<[1], [0], [0], [1], [0, 0, 1, 1], [], []>} : vector<64x32xbf16>, vector<32x64xbf16>, vector<64x64xf32> -> vector<64x64xf32>
    %194 = arith.addf %193, %188 : vector<64x64xf32>
    %cst_164 = arith.constant 0.707106769 : f32
    %195 = vector.broadcast %cst_164 : f32 to vector<64x64xf32>
    %196 = arith.mulf %195, %194 : vector<64x64xf32>
    %c0_165 = arith.constant 0 : index
    %c0_166 = arith.constant 0 : index
    %c0_167 = arith.constant 0 : index
    %197 = vector.load %arg13[%c0_165, %c0_166, %c0_167] : memref<1x64x64xf32, #tpu.memory_space<vmem>>, vector<1x64x64xf32>
    %198 = vector.shape_cast %197 : vector<1x64x64xf32> to vector<64x64xf32>
    %199 = vector.shape_cast %196 : vector<64x64xf32> to vector<1x64x64xf32>
    tpu.vector_store %arg13[%c0_165, %c0_166, %c0_167], %199 {strides = array<i32>} : memref<1x64x64xf32, #tpu.memory_space<vmem>>, vector<1x64x64xf32>,
    return
  }
  func.func @transform_0(%arg0: i32) -> (i32, i32, i32) {
    %c0_i32 = arith.constant 0 : i32
    %c0_i32_0 = arith.constant 0 : i32
    %c0_i32_1 = arith.constant 0 : i32
    return %arg0, %c0_i32, %c0_i32_0 : i32, i32, i32
  }
  func.func @transform_1(%arg0: i32) -> (i32, i32) {
    %c0_i32 = arith.constant 0 : i32
    %c0_i32_0 = arith.constant 0 : i32
    %c0_i32_1 = arith.constant 0 : i32
    return %c0_i32, %c0_i32_0 : i32, i32
  }
  func.func @transform_2(%arg0: i32) -> (i32, i32) {
    %c0_i32 = arith.constant 0 : i32
    %c0_i32_0 = arith.constant 0 : i32
    %c0_i32_1 = arith.constant 0 : i32
    return %c0_i32, %c0_i32_0 : i32, i32
  }
  func.func @transform_3(%arg0: i32) -> (i32, i32, i32) {
    %c0_i32 = arith.constant 0 : i32
    %c0_i32_0 = arith.constant 0 : i32
    %c0_i32_1 = arith.constant 0 : i32
    %c0_i32_2 = arith.constant 0 : i32
    return %c0_i32, %c0_i32_0, %c0_i32_1 : i32, i32, i32
  }
  func.func @transform_4(%arg0: i32) -> (i32, i32) {
    %c0_i32 = arith.constant 0 : i32
    %c0_i32_0 = arith.constant 0 : i32
    %c0_i32_1 = arith.constant 0 : i32
    return %c0_i32, %c0_i32_0 : i32, i32
  }
  func.func @transform_5(%arg0: i32) -> (i32, i32, i32) {
    %c0_i32 = arith.constant 0 : i32
    %c0_i32_0 = arith.constant 0 : i32
    %c0_i32_1 = arith.constant 0 : i32
    %c0_i32_2 = arith.constant 0 : i32
    return %c0_i32, %c0_i32_0, %c0_i32_1 : i32, i32, i32
  }
  func.func @transform_6(%arg0: i32) -> (i32, i32, i32) {
    %c0_i32 = arith.constant 0 : i32
    %c0_i32_0 = arith.constant 0 : i32
    %c0_i32_1 = arith.constant 0 : i32
    %c0_i32_2 = arith.constant 0 : i32
    return %c0_i32, %c0_i32_0, %c0_i32_1 : i32, i32, i32
  }
  func.func @transform_7(%arg0: i32) -> (i32, i32) {
    %c0_i32 = arith.constant 0 : i32
    %c0_i32_0 = arith.constant 0 : i32
    %c0_i32_1 = arith.constant 0 : i32
    return %c0_i32, %c0_i32_0 : i32, i32
  }
  func.func @transform_8(%arg0: i32) -> (i32, i32) {
    %c0_i32 = arith.constant 0 : i32
    %c0_i32_0 = arith.constant 0 : i32
    %c0_i32_1 = arith.constant 0 : i32
    return %c0_i32, %c0_i32_0 : i32, i32
  }
  func.func @transform_9(%arg0: i32) -> (i32, i32, i32) {
    %c0_i32 = arith.constant 0 : i32
    %c0_i32_0 = arith.constant 0 : i32
    %c0_i32_1 = arith.constant 0 : i32
    %c0_i32_2 = arith.constant 0 : i32
    return %c0_i32, %c0_i32_0, %c0_i32_1 : i32, i32, i32
  }
  func.func @transform_10(%arg0: i32) -> (i32, i32) {
    %c0_i32 = arith.constant 0 : i32
    %c0_i32_0 = arith.constant 0 : i32
    %c0_i32_1 = arith.constant 0 : i32
    return %c0_i32, %c0_i32_0 : i32, i32
  }
  func.func @transform_11(%arg0: i32) -> (i32, i32) {
    %c0_i32 = arith.constant 0 : i32
    %c0_i32_0 = arith.constant 0 : i32
    %c0_i32_1 = arith.constant 0 : i32
    return %c0_i32, %c0_i32_0 : i32, i32
  }
  func.func @transform_12(%arg0: i32) -> (i32, i32, i32) {
    %c0_i32 = arith.constant 0 : i32
    %c0_i32_0 = arith.constant 0 : i32
    %c0_i32_1 = arith.constant 0 : i32
    return %arg0, %c0_i32, %c0_i32_0 : i32, i32, i32
  }
}

module attributes {stable_mosaic.version = 11 : i64} {
  func.func @_head_kernel(%arg0: i32, %arg1: memref<2x2048xf32, #tpu.memory_space<vmem>>, %arg2: memref<2048x256xbf16, #tpu.memory_space<vmem>>, %arg3: memref<1x256xf32, #tpu.memory_space<vmem>>, %arg4: memref<128x1xbf16, #tpu.memory_space<vmem>>, %arg5: memref<1x1xf32, #tpu.memory_space<vmem>>, %arg6: memref<128x64xbf16, #tpu.memory_space<vmem>>, %arg7: memref<1x64xf32, #tpu.memory_space<vmem>>, %arg8: memref<2x1xf32, #tpu.memory_space<vmem>>, %arg9: memref<2x64xf32, #tpu.memory_space<vmem>>) attributes {dimension_semantics = [#tpu.dimension_semantics<arbitrary>], iteration_bounds = array<i64: 1>, scalar_prefetch = 0 : i64, scratch_operands = 0 : i64, tpu.core_type = #tpu.core_type<tc>, window_params = [{pipeline_mode = #tpu.pipeline_mode<synchronous>, transform_indices = @transform_0, window_bounds = array<i64: 2, 2048>}, {pipeline_mode = #tpu.pipeline_mode<synchronous>, transform_indices = @transform_1, window_bounds = array<i64: 2048, 256>}, {pipeline_mode = #tpu.pipeline_mode<synchronous>, transform_indices = @transform_2, window_bounds = array<i64: 1, 256>}, {pipeline_mode = #tpu.pipeline_mode<synchronous>, transform_indices = @transform_3, window_bounds = array<i64: 128, 1>}, {pipeline_mode = #tpu.pipeline_mode<synchronous>, transform_indices = @transform_4, window_bounds = array<i64: 1, 1>}, {pipeline_mode = #tpu.pipeline_mode<synchronous>, transform_indices = @transform_5, window_bounds = array<i64: 128, 64>}, {pipeline_mode = #tpu.pipeline_mode<synchronous>, transform_indices = @transform_6, window_bounds = array<i64: 1, 64>}, {pipeline_mode = #tpu.pipeline_mode<synchronous>, transform_indices = @transform_7, window_bounds = array<i64: 2, 1>}, {pipeline_mode = #tpu.pipeline_mode<synchronous>, transform_indices = @transform_8, window_bounds = array<i64: 2, 64>}]} {
    %c0 = arith.constant 0 : index
    %c0_0 = arith.constant 0 : index
    %0 = vector.load %arg1[%c0, %c0_0] : memref<2x2048xf32, #tpu.memory_space<vmem>>, vector<2x2048xf32>
    %cst = arith.constant 0.000000e+00 : f32
    %1 = vector.broadcast %cst : f32 to vector<2x2048xf32>
    %2 = arith.cmpf oge, %0, %1 : vector<2x2048xf32>
    %cst_1 = arith.constant 2.000000e-01 : f32
    %3 = vector.broadcast %cst_1 : f32 to vector<2x2048xf32>
    %4 = arith.mulf %3, %0 : vector<2x2048xf32>
    %5 = arith.select %2, %0, %4 : vector<2x2048xi1>, vector<2x2048xf32>
    %6 = arith.truncf %5 : vector<2x2048xf32> to vector<2x2048xbf16>
    %c0_2 = arith.constant 0 : index
    %c0_3 = arith.constant 0 : index
    %7 = vector.load %arg2[%c0_2, %c0_3] : memref<2048x256xbf16, #tpu.memory_space<vmem>>, vector<2048x256xbf16>
    %cst_4 = arith.constant dense<0.000000e+00> : vector<2x256xf32>
    %8 = tpu.matmul %6, %7, %cst_4 {dimension_numbers = #tpu.dot_dimension_numbers<[1], [0], [0], [1], [0, 0, 1, 1], [], []>} : vector<2x2048xbf16>, vector<2048x256xbf16>, vector<2x256xf32> -> vector<2x256xf32>
    %c0_5 = arith.constant 0 : index
    %c0_6 = arith.constant 0 : index
    %9 = vector.load %arg3[%c0_5, %c0_6] : memref<1x256xf32, #tpu.memory_space<vmem>>, vector<1x256xf32>
    %10 = vector.broadcast %9 : vector<1x256xf32> to vector<2x256xf32>
    %11 = arith.addf %8, %10 : vector<2x256xf32>
    %cst_7 = arith.constant 0.000000e+00 : f32
    %12 = vector.broadcast %cst_7 : f32 to vector<2x256xf32>
    %13 = arith.cmpf oge, %11, %12 : vector<2x256xf32>
    %cst_8 = arith.constant 2.000000e-01 : f32
    %14 = vector.broadcast %cst_8 : f32 to vector<2x256xf32>
    %15 = arith.mulf %14, %11 : vector<2x256xf32>
    %16 = arith.select %13, %11, %15 : vector<2x256xi1>, vector<2x256xf32>
    %17 = vector.extract_strided_slice %16 {offsets = [0, 0], sizes = [2, 128], strides = [1, 1]} : vector<2x256xf32> to vector<2x128xf32>
    %18 = arith.truncf %17 : vector<2x128xf32> to vector<2x128xbf16>
    %19 = vector.extract_strided_slice %16 {offsets = [0, 128], sizes = [2, 128], strides = [1, 1]} : vector<2x256xf32> to vector<2x128xf32>
    %20 = arith.truncf %19 : vector<2x128xf32> to vector<2x128xbf16>
    %c0_9 = arith.constant 0 : index
    %c0_10 = arith.constant 0 : index
    %21 = vector.load %arg4[%c0_9, %c0_10] : memref<128x1xbf16, #tpu.memory_space<vmem>>, vector<128x1xbf16>
    %cst_11 = arith.constant dense<0.000000e+00> : vector<2x1xf32>
    %22 = tpu.matmul %18, %21, %cst_11 {dimension_numbers = #tpu.dot_dimension_numbers<[1], [0], [0], [1], [0, 0, 1, 1], [], []>} : vector<2x128xbf16>, vector<128x1xbf16>, vector<2x1xf32> -> vector<2x1xf32>
    %c0_12 = arith.constant 0 : index
    %c0_13 = arith.constant 0 : index
    %23 = vector.load %arg5[%c0_12, %c0_13] : memref<1x1xf32, #tpu.memory_space<vmem>>, vector<1x1xf32>
    %24 = vector.broadcast %23 : vector<1x1xf32> to vector<2x1xf32>
    %25 = arith.addf %22, %24 : vector<2x1xf32>
    %c0_14 = arith.constant 0 : index
    %c0_15 = arith.constant 0 : index
    %26 = vector.load %arg8[%c0_14, %c0_15] : memref<2x1xf32, #tpu.memory_space<vmem>>, vector<2x1xf32>
    tpu.vector_store %arg8[%c0_14, %c0_15], %25 {strides = array<i32>} : memref<2x1xf32, #tpu.memory_space<vmem>>, vector<2x1xf32>,
    %c0_16 = arith.constant 0 : index
    %c0_17 = arith.constant 0 : index
    %27 = vector.load %arg6[%c0_16, %c0_17] : memref<128x64xbf16, #tpu.memory_space<vmem>>, vector<128x64xbf16>
    %cst_18 = arith.constant dense<0.000000e+00> : vector<2x64xf32>
    %28 = tpu.matmul %20, %27, %cst_18 {dimension_numbers = #tpu.dot_dimension_numbers<[1], [0], [0], [1], [0, 0, 1, 1], [], []>} : vector<2x128xbf16>, vector<128x64xbf16>, vector<2x64xf32> -> vector<2x64xf32>
    %c0_19 = arith.constant 0 : index
    %c0_20 = arith.constant 0 : index
    %29 = vector.load %arg7[%c0_19, %c0_20] : memref<1x64xf32, #tpu.memory_space<vmem>>, vector<1x64xf32>
    %30 = vector.broadcast %29 : vector<1x64xf32> to vector<2x64xf32>
    %31 = arith.addf %28, %30 : vector<2x64xf32>
    %32 = arith.mulf %31, %31 : vector<2x64xf32>
    %cst_21 = arith.constant dense<0.000000e+00> : vector<2xf32>
    %33 = vector.multi_reduction <add>, %32, %cst_21 [1] : vector<2x64xf32> to vector<2xf32>
    %34 = vector.shape_cast %33 : vector<2xf32> to vector<2x1xf32>
    %cst_22 = arith.constant 1.000000e-24 : f32
    %35 = vector.broadcast %cst_22 : f32 to vector<2x1xf32>
    %36 = arith.maximumf %34, %35 : vector<2x1xf32>
    %37 = math.rsqrt %36 : vector<2x1xf32>
    %38 = vector.broadcast %37 : vector<2x1xf32> to vector<2x64xf32>
    %39 = arith.mulf %31, %38 : vector<2x64xf32>
    %c0_23 = arith.constant 0 : index
    %c0_24 = arith.constant 0 : index
    %40 = vector.load %arg9[%c0_23, %c0_24] : memref<2x64xf32, #tpu.memory_space<vmem>>, vector<2x64xf32>
    tpu.vector_store %arg9[%c0_23, %c0_24], %39 {strides = array<i32>} : memref<2x64xf32, #tpu.memory_space<vmem>>, vector<2x64xf32>,
    return
  }
  func.func @transform_0(%arg0: i32) -> (i32, i32) {
    %c0_i32 = arith.constant 0 : i32
    %c0_i32_0 = arith.constant 0 : i32
    %c0_i32_1 = arith.constant 0 : i32
    return %c0_i32, %c0_i32_0 : i32, i32
  }
  func.func @transform_1(%arg0: i32) -> (i32, i32) {
    %c0_i32 = arith.constant 0 : i32
    %c0_i32_0 = arith.constant 0 : i32
    %c0_i32_1 = arith.constant 0 : i32
    return %c0_i32, %c0_i32_0 : i32, i32
  }
  func.func @transform_2(%arg0: i32) -> (i32, i32) {
    %c0_i32 = arith.constant 0 : i32
    %c0_i32_0 = arith.constant 0 : i32
    %c0_i32_1 = arith.constant 0 : i32
    return %c0_i32, %c0_i32_0 : i32, i32
  }
  func.func @transform_3(%arg0: i32) -> (i32, i32) {
    %c0_i32 = arith.constant 0 : i32
    %c0_i32_0 = arith.constant 0 : i32
    %c0_i32_1 = arith.constant 0 : i32
    return %c0_i32, %c0_i32_0 : i32, i32
  }
  func.func @transform_4(%arg0: i32) -> (i32, i32) {
    %c0_i32 = arith.constant 0 : i32
    %c0_i32_0 = arith.constant 0 : i32
    %c0_i32_1 = arith.constant 0 : i32
    return %c0_i32, %c0_i32_0 : i32, i32
  }
  func.func @transform_5(%arg0: i32) -> (i32, i32) {
    %c0_i32 = arith.constant 0 : i32
    %c0_i32_0 = arith.constant 0 : i32
    %c0_i32_1 = arith.constant 0 : i32
    return %c0_i32, %c0_i32_0 : i32, i32
  }
  func.func @transform_6(%arg0: i32) -> (i32, i32) {
    %c0_i32 = arith.constant 0 : i32
    %c0_i32_0 = arith.constant 0 : i32
    %c0_i32_1 = arith.constant 0 : i32
    return %c0_i32, %c0_i32_0 : i32, i32
  }
  func.func @transform_7(%arg0: i32) -> (i32, i32) {
    %c0_i32 = arith.constant 0 : i32
    %c0_i32_0 = arith.constant 0 : i32
    %c0_i32_1 = arith.constant 0 : i32
    return %c0_i32, %c0_i32_0 : i32, i32
  }
  func.func @transform_8(%arg0: i32) -> (i32, i32) {
    %c0_i32 = arith.constant 0 : i32
    %c0_i32_0 = arith.constant 0 : i32
    %c0_i32_1 = arith.constant 0 : i32
    return %c0_i32, %c0_i32_0 : i32, i32
  }
}

module attributes {stable_mosaic.version = 11 : i64} {
  func.func @_resblock_kernel(%arg0: i32, %arg1: memref<1x64x64xf32, #tpu.memory_space<vmem>>, %arg2: memref<9x16x64xbf16, #tpu.memory_space<vmem>>, %arg3: memref<16x64xbf16, #tpu.memory_space<vmem>>, %arg4: memref<9x16x16xbf16, #tpu.memory_space<vmem>>, %arg5: memref<9x64x64xbf16, #tpu.memory_space<vmem>>, %arg6: memref<1x64xf32, #tpu.memory_space<vmem>>, %arg7: memref<64x64xf32, #tpu.memory_space<vmem>>, %arg8: memref<9x64x128xbf16, #tpu.memory_space<vmem>>, %arg9: memref<1x128xf32, #tpu.memory_space<vmem>>, %arg10: memref<64x128xbf16, #tpu.memory_space<vmem>>, %arg11: memref<1x16x128xf32, #tpu.memory_space<vmem>>) attributes {dimension_semantics = [#tpu.dimension_semantics<parallel>], iteration_bounds = array<i64: 2>, scalar_prefetch = 0 : i64, scratch_operands = 0 : i64, tpu.core_type = #tpu.core_type<tc>, window_params = [{transform_indices = @transform_0, window_bounds = array<i64: 1, 64, 64>}, {pipeline_mode = #tpu.pipeline_mode<synchronous>, transform_indices = @transform_1, window_bounds = array<i64: 9, 16, 64>}, {pipeline_mode = #tpu.pipeline_mode<synchronous>, transform_indices = @transform_2, window_bounds = array<i64: 16, 64>}, {pipeline_mode = #tpu.pipeline_mode<synchronous>, transform_indices = @transform_3, window_bounds = array<i64: 9, 16, 16>}, {pipeline_mode = #tpu.pipeline_mode<synchronous>, transform_indices = @transform_4, window_bounds = array<i64: 9, 64, 64>}, {pipeline_mode = #tpu.pipeline_mode<synchronous>, transform_indices = @transform_5, window_bounds = array<i64: 1, 64>}, {pipeline_mode = #tpu.pipeline_mode<synchronous>, transform_indices = @transform_6, window_bounds = array<i64: 64, 64>}, {pipeline_mode = #tpu.pipeline_mode<synchronous>, transform_indices = @transform_7, window_bounds = array<i64: 9, 64, 128>}, {pipeline_mode = #tpu.pipeline_mode<synchronous>, transform_indices = @transform_8, window_bounds = array<i64: 1, 128>}, {pipeline_mode = #tpu.pipeline_mode<synchronous>, transform_indices = @transform_9, window_bounds = array<i64: 64, 128>}, {transform_indices = @transform_10, window_bounds = array<i64: 1, 16, 128>}]} {
    %c0 = arith.constant 0 : index
    %c0_0 = arith.constant 0 : index
    %c0_1 = arith.constant 0 : index
    %0 = vector.load %arg1[%c0, %c0_0, %c0_1] : memref<1x64x64xf32, #tpu.memory_space<vmem>>, vector<1x64x64xf32>
    %1 = vector.shape_cast %0 : vector<1x64x64xf32> to vector<64x64xf32>
    %cst = arith.constant 0.000000e+00 : f32
    %2 = vector.broadcast %cst : f32 to vector<64x64xf32>
    %3 = arith.cmpf oge, %1, %2 : vector<64x64xf32>
    %cst_2 = arith.constant 2.000000e-01 : f32
    %4 = vector.broadcast %cst_2 : f32 to vector<64x64xf32>
    %5 = arith.mulf %4, %1 : vector<64x64xf32>
    %6 = arith.select %3, %1, %5 : vector<64x64xi1>, vector<64x64xf32>
    %7 = arith.truncf %6 : vector<64x64xf32> to vector<64x64xbf16>
    %8 = arith.truncf %1 : vector<64x64xf32> to vector<64x64xbf16>
    %cst_3 = arith.constant 0.000000e+00 : f32
    %9 = vector.broadcast %cst_3 : f32 to vector<16x64xf32>
    %c0_4 = arith.constant 0 : index
    %c0_5 = arith.constant 0 : index
    %c0_6 = arith.constant 0 : index
    %10 = vector.load %arg2[%c0_4, %c0_5, %c0_6] : memref<9x16x64xbf16, #tpu.memory_space<vmem>>, vector<1x16x64xbf16>
    %11 = vector.shape_cast %10 : vector<1x16x64xbf16> to vector<16x64xbf16>
    %cst_7 = arith.constant dense<0.000000e+00> : vector<16x64xf32>
    %12 = tpu.matmul %11, %7, %cst_7 {dimension_numbers = #tpu.dot_dimension_numbers<[1], [0], [0], [1], [0, 0, 1, 1], [], []>} : vector<16x64xbf16>, vector<64x64xbf16>, vector<16x64xf32> -> vector<16x64xf32>
    %13 = arith.truncf %12 : vector<16x64xf32> to vector<16x64xbf16>
    %c0_8 = arith.constant 0 : index
    %c0_9 = arith.constant 0 : index
    %c0_10 = arith.constant 0 : index
    %14 = vector.load %arg5[%c0_8, %c0_9, %c0_10] : memref<9x64x64xbf16, #tpu.memory_space<vmem>>, vector<1x64x64xbf16>
    %15 = vector.shape_cast %14 : vector<1x64x64xbf16> to vector<64x64xbf16>
    %cst_11 = arith.constant dense<0.000000e+00> : vector<16x64xf32>
    %16 = tpu.matmul %13, %15, %cst_11 {dimension_numbers = #tpu.dot_dimension_numbers<[1], [0], [0], [1], [0, 0, 1, 1], [], []>} : vector<16x64xbf16>, vector<64x64xbf16>, vector<16x64xf32> -> vector<16x64xf32>
    %17 = arith.addf %9, %16 : vector<16x64xf32>
    %c1 = arith.constant 1 : index
    %c0_12 = arith.constant 0 : index
    %c0_13 = arith.constant 0 : index
    %18 = vector.load %arg2[%c1, %c0_12, %c0_13] : memref<9x16x64xbf16, #tpu.memory_space<vmem>>, vector<1x16x64xbf16>
    %19 = vector.shape_cast %18 : vector<1x16x64xbf16> to vector<16x64xbf16>
    %cst_14 = arith.constant dense<0.000000e+00> : vector<16x64xf32>
    %20 = tpu.matmul %19, %7, %cst_14 {dimension_numbers = #tpu.dot_dimension_numbers<[1], [0], [0], [1], [0, 0, 1, 1], [], []>} : vector<16x64xbf16>, vector<64x64xbf16>, vector<16x64xf32> -> vector<16x64xf32>
    %21 = arith.truncf %20 : vector<16x64xf32> to vector<16x64xbf16>
    %c1_15 = arith.constant 1 : index
    %c0_16 = arith.constant 0 : index
    %c0_17 = arith.constant 0 : index
    %22 = vector.load %arg5[%c1_15, %c0_16, %c0_17] : memref<9x64x64xbf16, #tpu.memory_space<vmem>>, vector<1x64x64xbf16>
    %23 = vector.shape_cast %22 : vector<1x64x64xbf16> to vector<64x64xbf16>
    %cst_18 = arith.constant dense<0.000000e+00> : vector<16x64xf32>
    %24 = tpu.matmul %21, %23, %cst_18 {dimension_numbers = #tpu.dot_dimension_numbers<[1], [0], [0], [1], [0, 0, 1, 1], [], []>} : vector<16x64xbf16>, vector<64x64xbf16>, vector<16x64xf32> -> vector<16x64xf32>
    %25 = arith.addf %17, %24 : vector<16x64xf32>
    %c2 = arith.constant 2 : index
    %c0_19 = arith.constant 0 : index
    %c0_20 = arith.constant 0 : index
    %26 = vector.load %arg2[%c2, %c0_19, %c0_20] : memref<9x16x64xbf16, #tpu.memory_space<vmem>>, vector<1x16x64xbf16>
    %27 = vector.shape_cast %26 : vector<1x16x64xbf16> to vector<16x64xbf16>
    %cst_21 = arith.constant dense<0.000000e+00> : vector<16x64xf32>
    %28 = tpu.matmul %27, %7, %cst_21 {dimension_numbers = #tpu.dot_dimension_numbers<[1], [0], [0], [1], [0, 0, 1, 1], [], []>} : vector<16x64xbf16>, vector<64x64xbf16>, vector<16x64xf32> -> vector<16x64xf32>
    %29 = arith.truncf %28 : vector<16x64xf32> to vector<16x64xbf16>
    %c2_22 = arith.constant 2 : index
    %c0_23 = arith.constant 0 : index
    %c0_24 = arith.constant 0 : index
    %30 = vector.load %arg5[%c2_22, %c0_23, %c0_24] : memref<9x64x64xbf16, #tpu.memory_space<vmem>>, vector<1x64x64xbf16>
    %31 = vector.shape_cast %30 : vector<1x64x64xbf16> to vector<64x64xbf16>
    %cst_25 = arith.constant dense<0.000000e+00> : vector<16x64xf32>
    %32 = tpu.matmul %29, %31, %cst_25 {dimension_numbers = #tpu.dot_dimension_numbers<[1], [0], [0], [1], [0, 0, 1, 1], [], []>} : vector<16x64xbf16>, vector<64x64xbf16>, vector<16x64xf32> -> vector<16x64xf32>
    %33 = arith.addf %25, %32 : vector<16x64xf32>
    %c3 = arith.constant 3 : index
    %c0_26 = arith.constant 0 : index
    %c0_27 = arith.constant 0 : index
    %34 = vector.load %arg2[%c3, %c0_26, %c0_27] : memref<9x16x64xbf16, #tpu.memory_space<vmem>>, vector<1x16x64xbf16>
    %35 = vector.shape_cast %34 : vector<1x16x64xbf16> to vector<16x64xbf16>
    %cst_28 = arith.constant dense<0.000000e+00> : vector<16x64xf32>
    %36 = tpu.matmul %35, %7, %cst_28 {dimension_numbers = #tpu.dot_dimension_numbers<[1], [0], [0], [1], [0, 0, 1, 1], [], []>} : vector<16x64xbf16>, vector<64x64xbf16>, vector<16x64xf32> -> vector<16x64xf32>
    %37 = arith.truncf %36 : vector<16x64xf32> to vector<16x64xbf16>
    %c3_29 = arith.constant 3 : index
    %c0_30 = arith.constant 0 : index
    %c0_31 = arith.constant 0 : index
    %38 = vector.load %arg5[%c3_29, %c0_30, %c0_31] : memref<9x64x64xbf16, #tpu.memory_space<vmem>>, vector<1x64x64xbf16>
    %39 = vector.shape_cast %38 : vector<1x64x64xbf16> to vector<64x64xbf16>
    %cst_32 = arith.constant dense<0.000000e+00> : vector<16x64xf32>
    %40 = tpu.matmul %37, %39, %cst_32 {dimension_numbers = #tpu.dot_dimension_numbers<[1], [0], [0], [1], [0, 0, 1, 1], [], []>} : vector<16x64xbf16>, vector<64x64xbf16>, vector<16x64xf32> -> vector<16x64xf32>
    %41 = arith.addf %33, %40 : vector<16x64xf32>
    %c4 = arith.constant 4 : index
    %c0_33 = arith.constant 0 : index
    %c0_34 = arith.constant 0 : index
    %42 = vector.load %arg2[%c4, %c0_33, %c0_34] : memref<9x16x64xbf16, #tpu.memory_space<vmem>>, vector<1x16x64xbf16>
    %43 = vector.shape_cast %42 : vector<1x16x64xbf16> to vector<16x64xbf16>
    %cst_35 = arith.constant dense<0.000000e+00> : vector<16x64xf32>
    %44 = tpu.matmul %43, %7, %cst_35 {dimension_numbers = #tpu.dot_dimension_numbers<[1], [0], [0], [1], [0, 0, 1, 1], [], []>} : vector<16x64xbf16>, vector<64x64xbf16>, vector<16x64xf32> -> vector<16x64xf32>
    %45 = arith.truncf %44 : vector<16x64xf32> to vector<16x64xbf16>
    %c4_36 = arith.constant 4 : index
    %c0_37 = arith.constant 0 : index
    %c0_38 = arith.constant 0 : index
    %46 = vector.load %arg5[%c4_36, %c0_37, %c0_38] : memref<9x64x64xbf16, #tpu.memory_space<vmem>>, vector<1x64x64xbf16>
    %47 = vector.shape_cast %46 : vector<1x64x64xbf16> to vector<64x64xbf16>
    %cst_39 = arith.constant dense<0.000000e+00> : vector<16x64xf32>
    %48 = tpu.matmul %45, %47, %cst_39 {dimension_numbers = #tpu.dot_dimension_numbers<[1], [0], [0], [1], [0, 0, 1, 1], [], []>} : vector<16x64xbf16>, vector<64x64xbf16>, vector<16x64xf32> -> vector<16x64xf32>
    %49 = arith.addf %41, %48 : vector<16x64xf32>
    %c5 = arith.constant 5 : index
    %c0_40 = arith.constant 0 : index
    %c0_41 = arith.constant 0 : index
    %50 = vector.load %arg2[%c5, %c0_40, %c0_41] : memref<9x16x64xbf16, #tpu.memory_space<vmem>>, vector<1x16x64xbf16>
    %51 = vector.shape_cast %50 : vector<1x16x64xbf16> to vector<16x64xbf16>
    %cst_42 = arith.constant dense<0.000000e+00> : vector<16x64xf32>
    %52 = tpu.matmul %51, %7, %cst_42 {dimension_numbers = #tpu.dot_dimension_numbers<[1], [0], [0], [1], [0, 0, 1, 1], [], []>} : vector<16x64xbf16>, vector<64x64xbf16>, vector<16x64xf32> -> vector<16x64xf32>
    %53 = arith.truncf %52 : vector<16x64xf32> to vector<16x64xbf16>
    %c5_43 = arith.constant 5 : index
    %c0_44 = arith.constant 0 : index
    %c0_45 = arith.constant 0 : index
    %54 = vector.load %arg5[%c5_43, %c0_44, %c0_45] : memref<9x64x64xbf16, #tpu.memory_space<vmem>>, vector<1x64x64xbf16>
    %55 = vector.shape_cast %54 : vector<1x64x64xbf16> to vector<64x64xbf16>
    %cst_46 = arith.constant dense<0.000000e+00> : vector<16x64xf32>
    %56 = tpu.matmul %53, %55, %cst_46 {dimension_numbers = #tpu.dot_dimension_numbers<[1], [0], [0], [1], [0, 0, 1, 1], [], []>} : vector<16x64xbf16>, vector<64x64xbf16>, vector<16x64xf32> -> vector<16x64xf32>
    %57 = arith.addf %49, %56 : vector<16x64xf32>
    %c6 = arith.constant 6 : index
    %c0_47 = arith.constant 0 : index
    %c0_48 = arith.constant 0 : index
    %58 = vector.load %arg2[%c6, %c0_47, %c0_48] : memref<9x16x64xbf16, #tpu.memory_space<vmem>>, vector<1x16x64xbf16>
    %59 = vector.shape_cast %58 : vector<1x16x64xbf16> to vector<16x64xbf16>
    %cst_49 = arith.constant dense<0.000000e+00> : vector<16x64xf32>
    %60 = tpu.matmul %59, %7, %cst_49 {dimension_numbers = #tpu.dot_dimension_numbers<[1], [0], [0], [1], [0, 0, 1, 1], [], []>} : vector<16x64xbf16>, vector<64x64xbf16>, vector<16x64xf32> -> vector<16x64xf32>
    %61 = arith.truncf %60 : vector<16x64xf32> to vector<16x64xbf16>
    %c6_50 = arith.constant 6 : index
    %c0_51 = arith.constant 0 : index
    %c0_52 = arith.constant 0 : index
    %62 = vector.load %arg5[%c6_50, %c0_51, %c0_52] : memref<9x64x64xbf16, #tpu.memory_space<vmem>>, vector<1x64x64xbf16>
    %63 = vector.shape_cast %62 : vector<1x64x64xbf16> to vector<64x64xbf16>
    %cst_53 = arith.constant dense<0.000000e+00> : vector<16x64xf32>
    %64 = tpu.matmul %61, %63, %cst_53 {dimension_numbers = #tpu.dot_dimension_numbers<[1], [0], [0], [1], [0, 0, 1, 1], [], []>} : vector<16x64xbf16>, vector<64x64xbf16>, vector<16x64xf32> -> vector<16x64xf32>
    %65 = arith.addf %57, %64 : vector<16x64xf32>
    %c7 = arith.constant 7 : index
    %c0_54 = arith.constant 0 : index
    %c0_55 = arith.constant 0 : index
    %66 = vector.load %arg2[%c7, %c0_54, %c0_55] : memref<9x16x64xbf16, #tpu.memory_space<vmem>>, vector<1x16x64xbf16>
    %67 = vector.shape_cast %66 : vector<1x16x64xbf16> to vector<16x64xbf16>
    %cst_56 = arith.constant dense<0.000000e+00> : vector<16x64xf32>
    %68 = tpu.matmul %67, %7, %cst_56 {dimension_numbers = #tpu.dot_dimension_numbers<[1], [0], [0], [1], [0, 0, 1, 1], [], []>} : vector<16x64xbf16>, vector<64x64xbf16>, vector<16x64xf32> -> vector<16x64xf32>
    %69 = arith.truncf %68 : vector<16x64xf32> to vector<16x64xbf16>
    %c7_57 = arith.constant 7 : index
    %c0_58 = arith.constant 0 : index
    %c0_59 = arith.constant 0 : index
    %70 = vector.load %arg5[%c7_57, %c0_58, %c0_59] : memref<9x64x64xbf16, #tpu.memory_space<vmem>>, vector<1x64x64xbf16>
    %71 = vector.shape_cast %70 : vector<1x64x64xbf16> to vector<64x64xbf16>
    %cst_60 = arith.constant dense<0.000000e+00> : vector<16x64xf32>
    %72 = tpu.matmul %69, %71, %cst_60 {dimension_numbers = #tpu.dot_dimension_numbers<[1], [0], [0], [1], [0, 0, 1, 1], [], []>} : vector<16x64xbf16>, vector<64x64xbf16>, vector<16x64xf32> -> vector<16x64xf32>
    %73 = arith.addf %65, %72 : vector<16x64xf32>
    %c8 = arith.constant 8 : index
    %c0_61 = arith.constant 0 : index
    %c0_62 = arith.constant 0 : index
    %74 = vector.load %arg2[%c8, %c0_61, %c0_62] : memref<9x16x64xbf16, #tpu.memory_space<vmem>>, vector<1x16x64xbf16>
    %75 = vector.shape_cast %74 : vector<1x16x64xbf16> to vector<16x64xbf16>
    %cst_63 = arith.constant dense<0.000000e+00> : vector<16x64xf32>
    %76 = tpu.matmul %75, %7, %cst_63 {dimension_numbers = #tpu.dot_dimension_numbers<[1], [0], [0], [1], [0, 0, 1, 1], [], []>} : vector<16x64xbf16>, vector<64x64xbf16>, vector<16x64xf32> -> vector<16x64xf32>
    %77 = arith.truncf %76 : vector<16x64xf32> to vector<16x64xbf16>
    %c8_64 = arith.constant 8 : index
    %c0_65 = arith.constant 0 : index
    %c0_66 = arith.constant 0 : index
    %78 = vector.load %arg5[%c8_64, %c0_65, %c0_66] : memref<9x64x64xbf16, #tpu.memory_space<vmem>>, vector<1x64x64xbf16>
    %79 = vector.shape_cast %78 : vector<1x64x64xbf16> to vector<64x64xbf16>
    %cst_67 = arith.constant dense<0.000000e+00> : vector<16x64xf32>
    %80 = tpu.matmul %77, %79, %cst_67 {dimension_numbers = #tpu.dot_dimension_numbers<[1], [0], [0], [1], [0, 0, 1, 1], [], []>} : vector<16x64xbf16>, vector<64x64xbf16>, vector<16x64xf32> -> vector<16x64xf32>
    %81 = arith.addf %73, %80 : vector<16x64xf32>
    %c0_68 = arith.constant 0 : index
    %c0_69 = arith.constant 0 : index
    %82 = vector.load %arg6[%c0_68, %c0_69] : memref<1x64xf32, #tpu.memory_space<vmem>>, vector<1x64xf32>
    %83 = vector.broadcast %82 : vector<1x64xf32> to vector<16x64xf32>
    %84 = arith.addf %81, %83 : vector<16x64xf32>
    %cst_70 = arith.constant dense<0.000000e+00> : vector<64xf32>
    %85 = vector.multi_reduction <add>, %84, %cst_70 [0] : vector<16x64xf32> to vector<64xf32>
    %86 = vector.shape_cast %85 : vector<64xf32> to vector<1x64xf32>
    %cst_71 = arith.constant 1.600000e+01 : f32
    %87 = vector.broadcast %cst_71 : f32 to vector<1x64xf32>
    %88 = arith.divf %86, %87 : vector<1x64xf32>
    %89 = vector.shape_cast %88 : vector<1x64xf32> to vector<1x64xf32>
    %90 = vector.broadcast %89 : vector<1x64xf32> to vector<8x64xf32>
    %c0_72 = arith.constant 0 : index
    %c0_73 = arith.constant 0 : index
    %91 = vector.load %arg7[%c0_72, %c0_73] : memref<64x64xf32, #tpu.memory_space<vmem>>, vector<64x64xf32>
    %cst_74 = arith.constant dense<0.000000e+00> : vector<8x64xf32>
    %92 = tpu.matmul %90, %91, %cst_74 {dimension_numbers = #tpu.dot_dimension_numbers<[1], [0], [0], [1], [0, 0, 1, 1], [], []>} : vector<8x64xf32>, vector<64x64xf32>, vector<8x64xf32> -> vector<8x64xf32>
    %93 = vector.extract_strided_slice %92 {offsets = [0, 0], sizes = [1, 64], strides = [1, 1]} : vector<8x64xf32> to vector<1x64xf32>
    %94 = arith.negf %93 : vector<1x64xf32>
    %95 = math.exp %94 : vector<1x64xf32>
    %cst_75 = arith.constant 1.000000e+00 : f32
    %96 = vector.broadcast %cst_75 : f32 to vector<1x64xf32>
    %97 = arith.addf %96, %95 : vector<1x64xf32>
    %98 = arith.divf %96, %97 : vector<1x64xf32>
    %99 = vector.broadcast %98 : vector<1x64xf32> to vector<16x64xf32>
    %100 = arith.mulf %84, %99 : vector<16x64xf32>
    %cst_76 = arith.constant 0.000000e+00 : f32
    %101 = vector.broadcast %cst_76 : f32 to vector<16x64xf32>
    %102 = arith.cmpf oge, %100, %101 : vector<16x64xf32>
    %cst_77 = arith.constant 2.000000e-01 : f32
    %103 = vector.broadcast %cst_77 : f32 to vector<16x64xf32>
    %104 = arith.mulf %103, %100 : vector<16x64xf32>
    %105 = arith.select %102, %100, %104 : vector<16x64xi1>, vector<16x64xf32>
    %106 = arith.truncf %105 : vector<16x64xf32> to vector<16x64xbf16>
    %cst_78 = arith.constant 0.000000e+00 : f32
    %107 = vector.broadcast %cst_78 : f32 to vector<16x128xf32>
    %c0_79 = arith.constant 0 : index
    %c0_80 = arith.constant 0 : index
    %c0_81 = arith.constant 0 : index
    %108 = vector.load %arg4[%c0_79, %c0_80, %c0_81] : memref<9x16x16xbf16, #tpu.memory_space<vmem>>, vector<1x16x16xbf16>
    %109 = vector.shape_cast %108 : vector<1x16x16xbf16> to vector<16x16xbf16>
    %cst_82 = arith.constant dense<0.000000e+00> : vector<16x64xf32>
    %110 = tpu.matmul %109, %106, %cst_82 {dimension_numbers = #tpu.dot_dimension_numbers<[1], [0], [0], [1], [0, 0, 1, 1], [], []>} : vector<16x16xbf16>, vector<16x64xbf16>, vector<16x64xf32> -> vector<16x64xf32>
    %111 = arith.truncf %110 : vector<16x64xf32> to vector<16x64xbf16>
    %c0_83 = arith.constant 0 : index
    %c0_84 = arith.constant 0 : index
    %c0_85 = arith.constant 0 : index
    %112 = vector.load %arg8[%c0_83, %c0_84, %c0_85] : memref<9x64x128xbf16, #tpu.memory_space<vmem>>, vector<1x64x128xbf16>
    %113 = vector.shape_cast %112 : vector<1x64x128xbf16> to vector<64x128xbf16>
    %cst_86 = arith.constant dense<0.000000e+00> : vector<16x128xf32>
    %114 = tpu.matmul %111, %113, %cst_86 {dimension_numbers = #tpu.dot_dimension_numbers<[1], [0], [0], [1], [0, 0, 1, 1], [], []>} : vector<16x64xbf16>, vector<64x128xbf16>, vector<16x128xf32> -> vector<16x128xf32>
    %115 = arith.addf %107, %114 : vector<16x128xf32>
    %c1_87 = arith.constant 1 : index
    %c0_88 = arith.constant 0 : index
    %c0_89 = arith.constant 0 : index
    %116 = vector.load %arg4[%c1_87, %c0_88, %c0_89] : memref<9x16x16xbf16, #tpu.memory_space<vmem>>, vector<1x16x16xbf16>
    %117 = vector.shape_cast %116 : vector<1x16x16xbf16> to vector<16x16xbf16>
    %cst_90 = arith.constant dense<0.000000e+00> : vector<16x64xf32>
    %118 = tpu.matmul %117, %106, %cst_90 {dimension_numbers = #tpu.dot_dimension_numbers<[1], [0], [0], [1], [0, 0, 1, 1], [], []>} : vector<16x16xbf16>, vector<16x64xbf16>, vector<16x64xf32> -> vector<16x64xf32>
    %119 = arith.truncf %118 : vector<16x64xf32> to vector<16x64xbf16>
    %c1_91 = arith.constant 1 : index
    %c0_92 = arith.constant 0 : index
    %c0_93 = arith.constant 0 : index
    %120 = vector.load %arg8[%c1_91, %c0_92, %c0_93] : memref<9x64x128xbf16, #tpu.memory_space<vmem>>, vector<1x64x128xbf16>
    %121 = vector.shape_cast %120 : vector<1x64x128xbf16> to vector<64x128xbf16>
    %cst_94 = arith.constant dense<0.000000e+00> : vector<16x128xf32>
    %122 = tpu.matmul %119, %121, %cst_94 {dimension_numbers = #tpu.dot_dimension_numbers<[1], [0], [0], [1], [0, 0, 1, 1], [], []>} : vector<16x64xbf16>, vector<64x128xbf16>, vector<16x128xf32> -> vector<16x128xf32>
    %123 = arith.addf %115, %122 : vector<16x128xf32>
    %c2_95 = arith.constant 2 : index
    %c0_96 = arith.constant 0 : index
    %c0_97 = arith.constant 0 : index
    %124 = vector.load %arg4[%c2_95, %c0_96, %c0_97] : memref<9x16x16xbf16, #tpu.memory_space<vmem>>, vector<1x16x16xbf16>
    %125 = vector.shape_cast %124 : vector<1x16x16xbf16> to vector<16x16xbf16>
    %cst_98 = arith.constant dense<0.000000e+00> : vector<16x64xf32>
    %126 = tpu.matmul %125, %106, %cst_98 {dimension_numbers = #tpu.dot_dimension_numbers<[1], [0], [0], [1], [0, 0, 1, 1], [], []>} : vector<16x16xbf16>, vector<16x64xbf16>, vector<16x64xf32> -> vector<16x64xf32>
    %127 = arith.truncf %126 : vector<16x64xf32> to vector<16x64xbf16>
    %c2_99 = arith.constant 2 : index
    %c0_100 = arith.constant 0 : index
    %c0_101 = arith.constant 0 : index
    %128 = vector.load %arg8[%c2_99, %c0_100, %c0_101] : memref<9x64x128xbf16, #tpu.memory_space<vmem>>, vector<1x64x128xbf16>
    %129 = vector.shape_cast %128 : vector<1x64x128xbf16> to vector<64x128xbf16>
    %cst_102 = arith.constant dense<0.000000e+00> : vector<16x128xf32>
    %130 = tpu.matmul %127, %129, %cst_102 {dimension_numbers = #tpu.dot_dimension_numbers<[1], [0], [0], [1], [0, 0, 1, 1], [], []>} : vector<16x64xbf16>, vector<64x128xbf16>, vector<16x128xf32> -> vector<16x128xf32>
    %131 = arith.addf %123, %130 : vector<16x128xf32>
    %c3_103 = arith.constant 3 : index
    %c0_104 = arith.constant 0 : index
    %c0_105 = arith.constant 0 : index
    %132 = vector.load %arg4[%c3_103, %c0_104, %c0_105] : memref<9x16x16xbf16, #tpu.memory_space<vmem>>, vector<1x16x16xbf16>
    %133 = vector.shape_cast %132 : vector<1x16x16xbf16> to vector<16x16xbf16>
    %cst_106 = arith.constant dense<0.000000e+00> : vector<16x64xf32>
    %134 = tpu.matmul %133, %106, %cst_106 {dimension_numbers = #tpu.dot_dimension_numbers<[1], [0], [0], [1], [0, 0, 1, 1], [], []>} : vector<16x16xbf16>, vector<16x64xbf16>, vector<16x64xf32> -> vector<16x64xf32>
    %135 = arith.truncf %134 : vector<16x64xf32> to vector<16x64xbf16>
    %c3_107 = arith.constant 3 : index
    %c0_108 = arith.constant 0 : index
    %c0_109 = arith.constant 0 : index
    %136 = vector.load %arg8[%c3_107, %c0_108, %c0_109] : memref<9x64x128xbf16, #tpu.memory_space<vmem>>, vector<1x64x128xbf16>
    %137 = vector.shape_cast %136 : vector<1x64x128xbf16> to vector<64x128xbf16>
    %cst_110 = arith.constant dense<0.000000e+00> : vector<16x128xf32>
    %138 = tpu.matmul %135, %137, %cst_110 {dimension_numbers = #tpu.dot_dimension_numbers<[1], [0], [0], [1], [0, 0, 1, 1], [], []>} : vector<16x64xbf16>, vector<64x128xbf16>, vector<16x128xf32> -> vector<16x128xf32>
    %139 = arith.addf %131, %138 : vector<16x128xf32>
    %c4_111 = arith.constant 4 : index
    %c0_112 = arith.constant 0 : index
    %c0_113 = arith.constant 0 : index
    %140 = vector.load %arg4[%c4_111, %c0_112, %c0_113] : memref<9x16x16xbf16, #tpu.memory_space<vmem>>, vector<1x16x16xbf16>
    %141 = vector.shape_cast %140 : vector<1x16x16xbf16> to vector<16x16xbf16>
    %cst_114 = arith.constant dense<0.000000e+00> : vector<16x64xf32>
    %142 = tpu.matmul %141, %106, %cst_114 {dimension_numbers = #tpu.dot_dimension_numbers<[1], [0], [0], [1], [0, 0, 1, 1], [], []>} : vector<16x16xbf16>, vector<16x64xbf16>, vector<16x64xf32> -> vector<16x64xf32>
    %143 = arith.truncf %142 : vector<16x64xf32> to vector<16x64xbf16>
    %c4_115 = arith.constant 4 : index
    %c0_116 = arith.constant 0 : index
    %c0_117 = arith.constant 0 : index
    %144 = vector.load %arg8[%c4_115, %c0_116, %c0_117] : memref<9x64x128xbf16, #tpu.memory_space<vmem>>, vector<1x64x128xbf16>
    %145 = vector.shape_cast %144 : vector<1x64x128xbf16> to vector<64x128xbf16>
    %cst_118 = arith.constant dense<0.000000e+00> : vector<16x128xf32>
    %146 = tpu.matmul %143, %145, %cst_118 {dimension_numbers = #tpu.dot_dimension_numbers<[1], [0], [0], [1], [0, 0, 1, 1], [], []>} : vector<16x64xbf16>, vector<64x128xbf16>, vector<16x128xf32> -> vector<16x128xf32>
    %147 = arith.addf %139, %146 : vector<16x128xf32>
    %c5_119 = arith.constant 5 : index
    %c0_120 = arith.constant 0 : index
    %c0_121 = arith.constant 0 : index
    %148 = vector.load %arg4[%c5_119, %c0_120, %c0_121] : memref<9x16x16xbf16, #tpu.memory_space<vmem>>, vector<1x16x16xbf16>
    %149 = vector.shape_cast %148 : vector<1x16x16xbf16> to vector<16x16xbf16>
    %cst_122 = arith.constant dense<0.000000e+00> : vector<16x64xf32>
    %150 = tpu.matmul %149, %106, %cst_122 {dimension_numbers = #tpu.dot_dimension_numbers<[1], [0], [0], [1], [0, 0, 1, 1], [], []>} : vector<16x16xbf16>, vector<16x64xbf16>, vector<16x64xf32> -> vector<16x64xf32>
    %151 = arith.truncf %150 : vector<16x64xf32> to vector<16x64xbf16>
    %c5_123 = arith.constant 5 : index
    %c0_124 = arith.constant 0 : index
    %c0_125 = arith.constant 0 : index
    %152 = vector.load %arg8[%c5_123, %c0_124, %c0_125] : memref<9x64x128xbf16, #tpu.memory_space<vmem>>, vector<1x64x128xbf16>
    %153 = vector.shape_cast %152 : vector<1x64x128xbf16> to vector<64x128xbf16>
    %cst_126 = arith.constant dense<0.000000e+00> : vector<16x128xf32>
    %154 = tpu.matmul %151, %153, %cst_126 {dimension_numbers = #tpu.dot_dimension_numbers<[1], [0], [0], [1], [0, 0, 1, 1], [], []>} : vector<16x64xbf16>, vector<64x128xbf16>, vector<16x128xf32> -> vector<16x128xf32>
    %155 = arith.addf %147, %154 : vector<16x128xf32>
    %c6_127 = arith.constant 6 : index
    %c0_128 = arith.constant 0 : index
    %c0_129 = arith.constant 0 : index
    %156 = vector.load %arg4[%c6_127, %c0_128, %c0_129] : memref<9x16x16xbf16, #tpu.memory_space<vmem>>, vector<1x16x16xbf16>
    %157 = vector.shape_cast %156 : vector<1x16x16xbf16> to vector<16x16xbf16>
    %cst_130 = arith.constant dense<0.000000e+00> : vector<16x64xf32>
    %158 = tpu.matmul %157, %106, %cst_130 {dimension_numbers = #tpu.dot_dimension_numbers<[1], [0], [0], [1], [0, 0, 1, 1], [], []>} : vector<16x16xbf16>, vector<16x64xbf16>, vector<16x64xf32> -> vector<16x64xf32>
    %159 = arith.truncf %158 : vector<16x64xf32> to vector<16x64xbf16>
    %c6_131 = arith.constant 6 : index
    %c0_132 = arith.constant 0 : index
    %c0_133 = arith.constant 0 : index
    %160 = vector.load %arg8[%c6_131, %c0_132, %c0_133] : memref<9x64x128xbf16, #tpu.memory_space<vmem>>, vector<1x64x128xbf16>
    %161 = vector.shape_cast %160 : vector<1x64x128xbf16> to vector<64x128xbf16>
    %cst_134 = arith.constant dense<0.000000e+00> : vector<16x128xf32>
    %162 = tpu.matmul %159, %161, %cst_134 {dimension_numbers = #tpu.dot_dimension_numbers<[1], [0], [0], [1], [0, 0, 1, 1], [], []>} : vector<16x64xbf16>, vector<64x128xbf16>, vector<16x128xf32> -> vector<16x128xf32>
    %163 = arith.addf %155, %162 : vector<16x128xf32>
    %c7_135 = arith.constant 7 : index
    %c0_136 = arith.constant 0 : index
    %c0_137 = arith.constant 0 : index
    %164 = vector.load %arg4[%c7_135, %c0_136, %c0_137] : memref<9x16x16xbf16, #tpu.memory_space<vmem>>, vector<1x16x16xbf16>
    %165 = vector.shape_cast %164 : vector<1x16x16xbf16> to vector<16x16xbf16>
    %cst_138 = arith.constant dense<0.000000e+00> : vector<16x64xf32>
    %166 = tpu.matmul %165, %106, %cst_138 {dimension_numbers = #tpu.dot_dimension_numbers<[1], [0], [0], [1], [0, 0, 1, 1], [], []>} : vector<16x16xbf16>, vector<16x64xbf16>, vector<16x64xf32> -> vector<16x64xf32>
    %167 = arith.truncf %166 : vector<16x64xf32> to vector<16x64xbf16>
    %c7_139 = arith.constant 7 : index
    %c0_140 = arith.constant 0 : index
    %c0_141 = arith.constant 0 : index
    %168 = vector.load %arg8[%c7_139, %c0_140, %c0_141] : memref<9x64x128xbf16, #tpu.memory_space<vmem>>, vector<1x64x128xbf16>
    %169 = vector.shape_cast %168 : vector<1x64x128xbf16> to vector<64x128xbf16>
    %cst_142 = arith.constant dense<0.000000e+00> : vector<16x128xf32>
    %170 = tpu.matmul %167, %169, %cst_142 {dimension_numbers = #tpu.dot_dimension_numbers<[1], [0], [0], [1], [0, 0, 1, 1], [], []>} : vector<16x64xbf16>, vector<64x128xbf16>, vector<16x128xf32> -> vector<16x128xf32>
    %171 = arith.addf %163, %170 : vector<16x128xf32>
    %c8_143 = arith.constant 8 : index
    %c0_144 = arith.constant 0 : index
    %c0_145 = arith.constant 0 : index
    %172 = vector.load %arg4[%c8_143, %c0_144, %c0_145] : memref<9x16x16xbf16, #tpu.memory_space<vmem>>, vector<1x16x16xbf16>
    %173 = vector.shape_cast %172 : vector<1x16x16xbf16> to vector<16x16xbf16>
    %cst_146 = arith.constant dense<0.000000e+00> : vector<16x64xf32>
    %174 = tpu.matmul %173, %106, %cst_146 {dimension_numbers = #tpu.dot_dimension_numbers<[1], [0], [0], [1], [0, 0, 1, 1], [], []>} : vector<16x16xbf16>, vector<16x64xbf16>, vector<16x64xf32> -> vector<16x64xf32>
    %175 = arith.truncf %174 : vector<16x64xf32> to vector<16x64xbf16>
    %c8_147 = arith.constant 8 : index
    %c0_148 = arith.constant 0 : index
    %c0_149 = arith.constant 0 : index
    %176 = vector.load %arg8[%c8_147, %c0_148, %c0_149] : memref<9x64x128xbf16, #tpu.memory_space<vmem>>, vector<1x64x128xbf16>
    %177 = vector.shape_cast %176 : vector<1x64x128xbf16> to vector<64x128xbf16>
    %cst_150 = arith.constant dense<0.000000e+00> : vector<16x128xf32>
    %178 = tpu.matmul %175, %177, %cst_150 {dimension_numbers = #tpu.dot_dimension_numbers<[1], [0], [0], [1], [0, 0, 1, 1], [], []>} : vector<16x64xbf16>, vector<64x128xbf16>, vector<16x128xf32> -> vector<16x128xf32>
    %179 = arith.addf %171, %178 : vector<16x128xf32>
    %c0_151 = arith.constant 0 : index
    %c0_152 = arith.constant 0 : index
    %180 = vector.load %arg9[%c0_151, %c0_152] : memref<1x128xf32, #tpu.memory_space<vmem>>, vector<1x128xf32>
    %181 = vector.broadcast %180 : vector<1x128xf32> to vector<16x128xf32>
    %182 = arith.addf %179, %181 : vector<16x128xf32>
    %c0_153 = arith.constant 0 : index
    %c0_154 = arith.constant 0 : index
    %183 = vector.load %arg3[%c0_153, %c0_154] : memref<16x64xbf16, #tpu.memory_space<vmem>>, vector<16x64xbf16>
    %cst_155 = arith.constant dense<0.000000e+00> : vector<16x64xf32>
    %184 = tpu.matmul %183, %8, %cst_155 {dimension_numbers = #tpu.dot_dimension_numbers<[1], [0], [0], [1], [0, 0, 1, 1], [], []>} : vector<16x64xbf16>, vector<64x64xbf16>, vector<16x64xf32> -> vector<16x64xf32>
    %185 = arith.truncf %184 : vector<16x64xf32> to vector<16x64xbf16>
    %c0_156 = arith.constant 0 : index
    %c0_157 = arith.constant 0 : index
    %186 = vector.load %arg10[%c0_156, %c0_157] : memref<64x128xbf16, #tpu.memory_space<vmem>>, vector<64x128xbf16>
    %cst_158 = arith.constant dense<0.000000e+00> : vector<16x128xf32>
    %187 = tpu.matmul %185, %186, %cst_158 {dimension_numbers = #tpu.dot_dimension_numbers<[1], [0], [0], [1], [0, 0, 1, 1], [], []>} : vector<16x64xbf16>, vector<64x128xbf16>, vector<16x128xf32> -> vector<16x128xf32>
    %188 = arith.addf %187, %182 : vector<16x128xf32>
    %cst_159 = arith.constant 0.707106769 : f32
    %189 = vector.broadcast %cst_159 : f32 to vector<16x128xf32>
    %190 = arith.mulf %189, %188 : vector<16x128xf32>
    %c0_160 = arith.constant 0 : index
    %c0_161 = arith.constant 0 : index
    %c0_162 = arith.constant 0 : index
    %191 = vector.load %arg11[%c0_160, %c0_161, %c0_162] : memref<1x16x128xf32, #tpu.memory_space<vmem>>, vector<1x16x128xf32>
    %192 = vector.shape_cast %191 : vector<1x16x128xf32> to vector<16x128xf32>
    %193 = vector.shape_cast %190 : vector<16x128xf32> to vector<1x16x128xf32>
    tpu.vector_store %arg11[%c0_160, %c0_161, %c0_162], %193 {strides = array<i32>} : memref<1x16x128xf32, #tpu.memory_space<vmem>>, vector<1x16x128xf32>,
    return
  }
  func.func @transform_0(%arg0: i32) -> (i32, i32, i32) {
    %c0_i32 = arith.constant 0 : i32
    %c0_i32_0 = arith.constant 0 : i32
    %c0_i32_1 = arith.constant 0 : i32
    return %arg0, %c0_i32, %c0_i32_0 : i32, i32, i32
  }
  func.func @transform_1(%arg0: i32) -> (i32, i32, i32) {
    %c0_i32 = arith.constant 0 : i32
    %c0_i32_0 = arith.constant 0 : i32
    %c0_i32_1 = arith.constant 0 : i32
    %c0_i32_2 = arith.constant 0 : i32
    return %c0_i32, %c0_i32_0, %c0_i32_1 : i32, i32, i32
  }
  func.func @transform_2(%arg0: i32) -> (i32, i32) {
    %c0_i32 = arith.constant 0 : i32
    %c0_i32_0 = arith.constant 0 : i32
    %c0_i32_1 = arith.constant 0 : i32
    return %c0_i32, %c0_i32_0 : i32, i32
  }
  func.func @transform_3(%arg0: i32) -> (i32, i32, i32) {
    %c0_i32 = arith.constant 0 : i32
    %c0_i32_0 = arith.constant 0 : i32
    %c0_i32_1 = arith.constant 0 : i32
    %c0_i32_2 = arith.constant 0 : i32
    return %c0_i32, %c0_i32_0, %c0_i32_1 : i32, i32, i32
  }
  func.func @transform_4(%arg0: i32) -> (i32, i32, i32) {
    %c0_i32 = arith.constant 0 : i32
    %c0_i32_0 = arith.constant 0 : i32
    %c0_i32_1 = arith.constant 0 : i32
    %c0_i32_2 = arith.constant 0 : i32
    return %c0_i32, %c0_i32_0, %c0_i32_1 : i32, i32, i32
  }
  func.func @transform_5(%arg0: i32) -> (i32, i32) {
    %c0_i32 = arith.constant 0 : i32
    %c0_i32_0 = arith.constant 0 : i32
    %c0_i32_1 = arith.constant 0 : i32
    return %c0_i32, %c0_i32_0 : i32, i32
  }
  func.func @transform_6(%arg0: i32) -> (i32, i32) {
    %c0_i32 = arith.constant 0 : i32
    %c0_i32_0 = arith.constant 0 : i32
    %c0_i32_1 = arith.constant 0 : i32
    return %c0_i32, %c0_i32_0 : i32, i32
  }
  func.func @transform_7(%arg0: i32) -> (i32, i32, i32) {
    %c0_i32 = arith.constant 0 : i32
    %c0_i32_0 = arith.constant 0 : i32
    %c0_i32_1 = arith.constant 0 : i32
    %c0_i32_2 = arith.constant 0 : i32
    return %c0_i32, %c0_i32_0, %c0_i32_1 : i32, i32, i32
  }
  func.func @transform_8(%arg0: i32) -> (i32, i32) {
    %c0_i32 = arith.constant 0 : i32
    %c0_i32_0 = arith.constant 0 : i32
    %c0_i32_1 = arith.constant 0 : i32
    return %c0_i32, %c0_i32_0 : i32, i32
  }
  func.func @transform_9(%arg0: i32) -> (i32, i32) {
    %c0_i32 = arith.constant 0 : i32
    %c0_i32_0 = arith.constant 0 : i32
    %c0_i32_1 = arith.constant 0 : i32
    return %c0_i32, %c0_i32_0 : i32, i32
  }
  func.func @transform_10(%arg0: i32) -> (i32, i32, i32) {
    %c0_i32 = arith.constant 0 : i32
    %c0_i32_0 = arith.constant 0 : i32
    %c0_i32_1 = arith.constant 0 : i32
    return %arg0, %c0_i32, %c0_i32_0 : i32, i32, i32
  }
}

</mosaic_0001>

<bundles_post_ra>
// kernel: _lambda_.5
= control target key start
LH: loop header
LB: loop body
LE: loop exit
PB: predicated region body
PF: predicated region fallthrough
CT: control target
= control target key end

     0   :  { %s4064_s0 = inlined_call_operand.vmem [shape: f32[2,2048], index: 0, kind: input, shape index: {}]   ;;  %s4065_s1 = inlined_call_operand.vmem [shape: bf16[2048,256], index: 1, kind: input, shape index: {}]   ;;  %s4066_s2 = inlined_call_operand.vmem [shape: f32[1,256], index: 2, kind: input, shape index: {}]   ;;  %s4067_s3 = inlined_call_operand.vmem [shape: bf16[128,1], index: 3, kind: input, shape index: {}]   ;;  %s4068_s4 = inlined_call_operand.<no memory space> [shape: f32[1,1], index: 4, kind: input, shape index: {}]   ;;  %s4069_s5 = inlined_call_operand.vmem [shape: bf16[128,64], index: 5, kind: input, shape index: {}]   ;;  %s4070_s6 = inlined_call_operand.vmem [shape: f32[1,64], index: 6, kind: input, shape index: {}]   ;;  %s4071_s7 = inlined_call_operand.vmem [shape: f32[2,1], index: 7, kind: output, shape index: {0}]   ;;  %s4072_s8 = inlined_call_operand.hbm [shape: f32[2,64], index: 8, kind: output, shape index: {1}]  }
   0x1   :  { %v14_v0 = vstv %s4068_s4 }
   0x2   :  { %15 = vst [vmem:[#allocation2] sm:$0x1] %v14_v0 }
   0x3   :  { %v2651_v1 = vld [vmem:[%s4065_s1 + $0x4] ss:$8 sps:$4 sm:$0xff]   ;;  %v2655_v3 = vld [vmem:[%s4065_s1] ss:$8 sps:$4 sm:$0xff]   ;;  %v2657_v5 = vld [vmem:[%s4065_s1 + $0x14] ss:$8 sps:$4 sm:$0xff]   ;;  %v56_v41 = vlaneseq }
   0x4   :  { %v2653_v2 = vld [vmem:[%s4065_s1 + $0x304] ss:$8 sps:$4 sm:$0xff]   ;;  %1700 = vmatprep.subr.bf16.mxu1 %v2651_v1  ;;  %v2656_v4 = vld [vmem:[%s4065_s1 + $0x300] ss:$8 sps:$4 sm:$0xff]   ;;  %v2659_v6 = vld [vmem:[%s4065_s1 + $0x314] ss:$8 sps:$4 sm:$0xff]  }
   0x5   :  { %1823 = vmatprep.subr.bf16.mxu0 %v2653_v2  ;;  %1701 = vmatpush1.bf16.msra.mxu1 %v2655_v3  ;;  %v2661_v7 = vld [vmem:[%s4065_s1 + $0x10] ss:$8 sps:$4 sm:$0xff]   ;;  %v2663_v9 = vld [vmem:[%s4065_s1 + $0x24] ss:$8 sps:$4 sm:$0xff]   ;;  %v2667_v11 = vld [vmem:[%s4065_s1 + $0x20] ss:$8 sps:$4 sm:$0xff]  }
   0x6   :  { %1824 = vmatpush1.bf16.msra.mxu0 %v2656_v4  ;;  %1702 = vmatprep.subr.bf16.mxu1 %v2657_v5  ;;  %v2662_v8 = vld [vmem:[%s4065_s1 + $0x310] ss:$8 sps:$4 sm:$0xff]   ;;  %v2665_v10 = vld [vmem:[%s4065_s1 + $0x324] ss:$8 sps:$4 sm:$0xff]   ;;  %v2668_v12 = vld [vmem:[%s4065_s1 + $0x320] ss:$8 sps:$4 sm:$0xff]  }
   0x7   :  { %1825 = vmatprep.subr.bf16.mxu0 %v2659_v6  ;;  %v2669_v13 = vld [vmem:[%s4065_s1 + $0x34] ss:$8 sps:$4 sm:$0xff]   ;;  %v2673_v15 = vld [vmem:[%s4065_s1 + $0x30] ss:$8 sps:$4 sm:$0xff]   ;;  %v2675_v17 = vld [vmem:[%s4065_s1 + $0x44] ss:$8 sps:$4 sm:$0xff]  }
   0x8   :  { %v2671_v14 = vld [vmem:[%s4065_s1 + $0x334] ss:$8 sps:$4 sm:$0xff]   ;;  %v2674_v16 = vld [vmem:[%s4065_s1 + $0x330] ss:$8 sps:$4 sm:$0xff]   ;;  %v2677_v18 = vld [vmem:[%s4065_s1 + $0x344] ss:$8 sps:$4 sm:$0xff]  }
   0x9   :  { %1703 = vmatpush1.bf16.msra.mxu1 %v2661_v7  ;;  %v2679_v19 = vld [vmem:[%s4065_s1 + $0x40] ss:$8 sps:$4 sm:$0xff]   ;;  %v2681_v21 = vld [vmem:[%s4065_s1 + $0x54] ss:$8 sps:$4 sm:$0xff]   ;;  %v2685_v23 = vld [vmem:[%s4065_s1 + $0x50] ss:$8 sps:$4 sm:$0xff]  }
   0xa   :  { %1826 = vmatpush1.bf16.msra.mxu0 %v2662_v8  ;;  %1704 = vmatprep.subr.bf16.mxu1 %v2663_v9  ;;  %v2680_v20 = vld [vmem:[%s4065_s1 + $0x340] ss:$8 sps:$4 sm:$0xff]   ;;  %v2683_v22 = vld [vmem:[%s4065_s1 + $0x354] ss:$8 sps:$4 sm:$0xff]   ;;  %v2686_v24 = vld [vmem:[%s4065_s1 + $0x350] ss:$8 sps:$4 sm:$0xff]  }
   0xb   :  { %1827 = vmatprep.subr.bf16.mxu0 %v2665_v10  ;;  %v2687_v25 = vld [vmem:[%s4065_s1 + $0x64] ss:$8 sps:$4 sm:$0xff]   ;;  %v2691_v27 = vld [vmem:[%s4065_s1 + $0x60] ss:$8 sps:$4 sm:$0xff]   ;;  %v2693_v29 = vld [vmem:[%s4065_s1 + $0x74] ss:$8 sps:$4 sm:$0xff]  }
   0xc   :  { %v2689_v26 = vld [vmem:[%s4065_s1 + $0x364] ss:$8 sps:$4 sm:$0xff]   ;;  %v2692_v28 = vld [vmem:[%s4065_s1 + $0x360] ss:$8 sps:$4 sm:$0xff]   ;;  %v2695_v30 = vld [vmem:[%s4065_s1 + $0x374] ss:$8 sps:$4 sm:$0xff]  }
   0xd   :  { %1705 = vmatpush1.bf16.msra.mxu1 %v2667_v11  ;;  %v2697_v31 = vld [vmem:[%s4065_s1 + $0x70] ss:$8 sps:$4 sm:$0xff]   ;;  %v2699_v33 = vld [vmem:[%s4065_s1 + $0x84] ss:$8 sps:$4 sm:$0xff]   ;;  %v2703_v35 = vld [vmem:[%s4065_s1 + $0x80] ss:$8 sps:$4 sm:$0xff]  }
   0xe   :  { %1828 = vmatpush1.bf16.msra.mxu0 %v2668_v12  ;;  %1706 = vmatprep.subr.bf16.mxu1 %v2669_v13  ;;  %v2698_v32 = vld [vmem:[%s4065_s1 + $0x370] ss:$8 sps:$4 sm:$0xff]   ;;  %v2701_v34 = vld [vmem:[%s4065_s1 + $0x384] ss:$8 sps:$4 sm:$0xff]   ;;  %v2704_v36 = vld [vmem:[%s4065_s1 + $0x380] ss:$8 sps:$4 sm:$0xff]  }
   0xf   :  { %1829 = vmatprep.subr.bf16.mxu0 %v2671_v14  ;;  %v2705_v37 = vld [vmem:[%s4065_s1 + $0x94] ss:$8 sps:$4 sm:$0xff]   ;;  %v3077_v39 = vmov 1983009808   ;;  %v2709_v42 = vld [vmem:[%s4065_s1 + $0x90] ss:$8 sps:$4 sm:$0xff]  }
  0x10   :  { %v2707_v38 = vld [vmem:[%s4065_s1 + $0x394] ss:$8 sps:$4 sm:$0xff]   ;;  %v54_v40 = vunpack.c.l.s4 %v3077_v39  ;;  %v2710_v43 = vld [vmem:[%s4065_s1 + $0x390] ss:$8 sps:$4 sm:$0xff]   ;;  %v2711_v44 = vld [vmem:[%s4065_s1 + $0xa4] ss:$8 sps:$4 sm:$0xff]  }
  0x11   :  { %1707 = vmatpush1.bf16.msra.mxu1 %v2673_v15  ;;  %v2713_v45 = vld [vmem:[%s4065_s1 + $0x3a4] ss:$8 sps:$4 sm:$0xff]   ;;  %v3255_v47 = vshrl.u32 %v56_v41, 7  ;;  %v2715_v48 = vld [vmem:[%s4065_s1 + $0xa0] ss:$8 sps:$4 sm:$0xff]  }
  0x12   :  { %1830 = vmatpush1.bf16.msra.mxu0 %v2674_v16  ;;  %1708 = vmatprep.subr.bf16.mxu1 %v2675_v17  ;;  %v55_v46 = vunpack.c.0.s8 %v54_v40  ;;  %v2716_v49 = vld [vmem:[%s4065_s1 + $0x3a0] ss:$8 sps:$4 sm:$0xff]   ;;  %v2717_v50 = vld [vmem:[%s4065_s1 + $0xb4] ss:$8 sps:$4 sm:$0xff]   ;;  %v2721_v52 = vld [vmem:[%s4065_s1 + $0xb0] ss:$8 sps:$4 sm:$0xff]  }
  0x13   :  { %1831 = vmatprep.subr.bf16.mxu0 %v2677_v18  ;;  %v2719_v51 = vld [vmem:[%s4065_s1 + $0x3b4] ss:$8 sps:$4 sm:$0xff]   ;;  %v32_v53 = vld [vmem:[%s4064_s0] sm:$0xff]  ;;  %v33_v56 = vld [vmem:[%s4064_s0 + $0x8] sm:$0xff] }
  0x14   :  { %v3276_v54 = vsub.s32 %v55_v46, %v3255_v47  ;;  %vm36_vm0 = vcmp.ge.f32.partialorder %v32_v53, 0.0  ;;  %v40_v55 = vmul.f32 0.2, %v32_v53  ;;  %v2722_v57 = vld [vmem:[%s4065_s1 + $0x3b0] ss:$8 sps:$4 sm:$0xff]   ;;  %vm37_vm1 = vcmp.ge.f32.partialorder %v33_v56, 0.0 }
  0x15   :  { %1709 = vmatpush1.bf16.msra.mxu1 %v2679_v19  ;;  %v2723_v58 = vld [vmem:[%s4065_s1 + $0xc4] ss:$8 sps:$4 sm:$0xff]   ;;  %v41_v61 = vmul.f32 0.2, %v33_v56  ;;  %v2727_v0 = vld [vmem:[%s4065_s1 + $0xc0] ss:$8 sps:$4 sm:$0xff]  }
  0x16   :  { %1832 = vmatpush1.bf16.msra.mxu0 %v2680_v20  ;;  %1710 = vmatprep.subr.bf16.mxu1 %v2681_v21  ;;  %v2725_v59 = vld [vmem:[%s4065_s1 + $0x3c4] ss:$8 sps:$4 sm:$0xff]   ;;  %v44_v60 = vsel %vm36_vm0, %v32_v53, %v40_v55  ;;  %v2728_v1 = vld [vmem:[%s4065_s1 + $0x3c0] ss:$8 sps:$4 sm:$0xff]   ;;  %v2729_v4 = vld [vmem:[%s4065_s1 + $0xd4] ss:$8 sps:$4 sm:$0xff]  }
  0x17   :  { %1833 = vmatprep.subr.bf16.mxu0 %v2683_v22  ;;  %v59_v62 = vrot.slane %v44_v60, %v3276_v54  ;;  %v3291_v63 = vsel %vm37_vm1, %v33_v56, %v41_v61  ;;  %v2731_v5 = vld [vmem:[%s4065_s1 + $0x3d4] ss:$8 sps:$4 sm:$0xff]   ;;  %v2733_v8 = vld [vmem:[%s4065_s1 + $0xd0] ss:$8 sps:$4 sm:$0xff]   ;;  %v2735_v11 = vld [vmem:[%s4065_s1 + $0xe4] ss:$8 sps:$4 sm:$0xff]   ;;  %v52_v13 = vcombine.high %v44_v60, %v44_v60 }
  0x18   :  { %v69_v3 = vcombine.high %v3291_v63, %v3291_v63  ;;  %v2734_v9 = vld [vmem:[%s4065_s1 + $0x3d0] ss:$8 sps:$4 sm:$0xff]   ;;  %v2737_v12 = vld [vmem:[%s4065_s1 + $0x3e4] ss:$8 sps:$4 sm:$0xff]   ;;  %v2739_v15 = vld [vmem:[%s4065_s1 + $0xe0] ss:$8 sps:$4 sm:$0xff]  }
  0x19   :  { %1711 = vmatpush1.bf16.msra.mxu1 %v2685_v23  ;;  %v67_v2 = vcombine.high %v59_v62, %v59_v62  ;;  %v2740_v16 = vld [vmem:[%s4065_s1 + $0x3e0] ss:$8 sps:$4 sm:$0xff]   ;;  %v2741_v17 = vld [vmem:[%s4065_s1 + $0xf4] ss:$8 sps:$4 sm:$0xff]   ;;  %v3333_v19 = vrot.slane %v52_v13, %v3276_v54  ;;  %v2745_v20 = vld [vmem:[%s4065_s1 + $0xf0] ss:$8 sps:$4 sm:$0xff]  }
  0x1a   :  { %1834 = vmatpush1.bf16.msra.mxu0 %v2686_v24  ;;  %1712 = vmatprep.subr.bf16.mxu1 %v2687_v25  ;;  %v83_v7 = vrot.slane %v69_v3, %v3276_v54  ;;  %v2743_v18 = vld [vmem:[%s4065_s1 + $0x3f4] ss:$8 sps:$4 sm:$0xff]   ;;  %v2746_v21 = vld [vmem:[%s4065_s1 + $0x3f0] ss:$8 sps:$4 sm:$0xff]   ;;  %v2749_v22 = vld [vmem:[%s4065_s1 + $0x104] ss:$8 sps:$4 sm:$0xff]   ;;  %v136_v25 = vpack.c.bf16 %v59_v62, %v59_v62 }
  0x1b   :  { %1835 = vmatprep.subr.bf16.mxu0 %v2689_v26  ;;  %v137_v6 = vpack.c.bf16 %v67_v2, %v67_v2  ;;  %v2752_v23 = vld [vmem:[%s4065_s1 + $0x404] ss:$8 sps:$4 sm:$0xff]   ;;  %v68_v24 = vcombine.high %v3333_v19, %v3333_v19  ;;  %v2770_v39 = vld [vmem:[%s4065_s1 + $0x434] ss:$8 sps:$4 sm:$0xff]   ;;  %v2765_v40 = vld [vmem:[%s4065_s1 + $0x130] ss:$8 sps:$4 sm:$0xff]  }
  0x1c   :  { %v85_v10 = vcombine.high %v83_v7, %v83_v7  ;;  %v142_v26 = vpack.c.bf16 %v83_v7, %v83_v7  ;;  %v2768_v41 = vld [vmem:[%s4065_s1 + $0x430] ss:$8 sps:$4 sm:$0xff]   ;;  %v2779_v46 = vld [vmem:[%s4065_s1 + $0x154] ss:$8 sps:$4 sm:$0xff]   ;;  %v2783_v53 = vld [vmem:[%s4065_s1 + $0x160] ss:$8 sps:$4 sm:$0xff]  }
  0x1d   :  { %1713 = vmatpush1.bf16.msra.mxu1 %v2691_v27  ;;  %1732 = vmatprep.mubr.bf16.mxu1 %v137_v6  ;;  %v2747_v27 = vld [vmem:[%s4065_s1 + $0x100] ss:$8 sps:$4 sm:$0xff]   ;;  %v34_v56 = vld [vmem:[%s4064_s0 + $0x10] sm:$0xff]  ;;  %v2800_v2 = vld [vmem:[%s4065_s1 + $0x484] ss:$8 sps:$4 sm:$0xff]  }
  0x1e   :  { %1836 = vmatpush1.bf16.msra.mxu0 %v2692_v28  ;;  %1714 = vmatprep.subr.bf16.mxu1 %v2693_v29  ;;  %v143_v14 = vpack.c.bf16 %v85_v10, %v85_v10  ;;  %v2750_v28 = vld [vmem:[%s4065_s1 + $0x400] ss:$8 sps:$4 sm:$0xff]   ;;  %v2755_v29 = vld [vmem:[%s4065_s1 + $0x114] ss:$8 sps:$4 sm:$0xff]   ;;  %vm38_vm2 = vcmp.ge.f32.partialorder %v34_v56, 0.0 }
  0x1f   :  { %1837 = vmatprep.subr.bf16.mxu0 %v2695_v30  ;;  %v2758_v30 = vld [vmem:[%s4065_s1 + $0x414] ss:$8 sps:$4 sm:$0xff]   ;;  %v2786_v55 = vld [vmem:[%s4065_s1 + $0x460] ss:$8 sps:$4 sm:$0xff]   ;;  %v2789_v61 = vld [vmem:[%s4065_s1 + $0x170] ss:$8 sps:$4 sm:$0xff]  }
  0x20   :  { %1855 = vmatprep.mubr.bf16.mxu0 %v143_v14  ;;  %v2792_v62 = vld [vmem:[%s4065_s1 + $0x470] ss:$8 sps:$4 sm:$0xff]   ;;  %v2803_v7 = vld [vmem:[%s4065_s1 + $0x194] ss:$8 sps:$4 sm:$0xff]   ;;  %v2807_v13 = vld [vmem:[%s4065_s1 + $0x1a0] ss:$8 sps:$4 sm:$0xff]  }
  0x21   :  { %1715 = vmatpush1.bf16.msra.mxu1 %v2697_v31  ;;  %v139_v31 = vpack.c.bf16 %v68_v24, %v68_v24  ;;  %v2804_v10 = vld [vmem:[%s4065_s1 + $0x490] ss:$8 sps:$4 sm:$0xff]   ;;  %v2810_v14 = vld [vmem:[%s4065_s1 + $0x4a0] ss:$8 sps:$4 sm:$0xff]   ;;  %v2827_v24 = vld [vmem:[%s4065_s1 + $0x1d4] ss:$8 sps:$4 sm:$0xff]  }
  0x22   :  { %1838 = vmatpush1.bf16.msra.mxu0 %v2698_v32  ;;  %1716 = vmatprep.subr.bf16.mxu1 %v2699_v33  ;;  %v2753_v32 = vld [vmem:[%s4065_s1 + $0x110] ss:$8 sps:$4 sm:$0xff]  }
  0x23   :  { %1839 = vmatprep.subr.bf16.mxu0 %v2701_v34  ;;  %v2756_v33 = vld [vmem:[%s4065_s1 + $0x410] ss:$8 sps:$4 sm:$0xff]   ;;  %v2761_v34 = vld [vmem:[%s4065_s1 + $0x124] ss:$8 sps:$4 sm:$0xff]  }
  0x25   :  { %1717 = vmatpush1.bf16.msra.mxu1 %v2703_v35  ;;  %v2764_v35 = vld [vmem:[%s4065_s1 + $0x424] ss:$8 sps:$4 sm:$0xff]  }
  0x26   :  { %1840 = vmatpush1.bf16.msra.mxu0 %v2704_v36  ;;  %1718 = vmatprep.subr.bf16.mxu1 %v2705_v37  ;;  %v2759_v36 = vld [vmem:[%s4065_s1 + $0x120] ss:$8 sps:$4 sm:$0xff]  }
  0x27   :  { %1841 = vmatprep.subr.bf16.mxu0 %v2707_v38  ;;  %v2762_v37 = vld [vmem:[%s4065_s1 + $0x420] ss:$8 sps:$4 sm:$0xff]   ;;  %v2767_v38 = vld [vmem:[%s4065_s1 + $0x134] ss:$8 sps:$4 sm:$0xff]  }
  0x29   :  { %1719 = vmatpush1.bf16.msra.mxu1 %v2709_v42  ;;  %v2773_v42 = vld [vmem:[%s4065_s1 + $0x144] ss:$8 sps:$4 sm:$0xff]  }
  0x2a   :  { %1842 = vmatpush1.bf16.msra.mxu0 %v2710_v43  ;;  %1720 = vmatprep.subr.bf16.mxu1 %v2711_v44  ;;  %v2776_v43 = vld [vmem:[%s4065_s1 + $0x444] ss:$8 sps:$4 sm:$0xff]   ;;  %v2771_v44 = vld [vmem:[%s4065_s1 + $0x140] ss:$8 sps:$4 sm:$0xff]  }
  0x2b   :  { %1843 = vmatprep.subr.bf16.mxu0 %v2713_v45  ;;  %v2774_v45 = vld [vmem:[%s4065_s1 + $0x440] ss:$8 sps:$4 sm:$0xff]  }
  0x2d   :  { %1721 = vmatpush1.bf16.msra.mxu1 %v2715_v48  ;;  %v2782_v48 = vld [vmem:[%s4065_s1 + $0x454] ss:$8 sps:$4 sm:$0xff]  }
  0x2e   :  { %1844 = vmatpush1.bf16.msra.mxu0 %v2716_v49  ;;  %1722 = vmatprep.subr.bf16.mxu1 %v2717_v50  ;;  %v2777_v49 = vld [vmem:[%s4065_s1 + $0x150] ss:$8 sps:$4 sm:$0xff]  }
  0x2f   :  { %1845 = vmatprep.subr.bf16.mxu0 %v2719_v51  ;;  %v2780_v50 = vld [vmem:[%s4065_s1 + $0x450] ss:$8 sps:$4 sm:$0xff]   ;;  %v2785_v51 = vld [vmem:[%s4065_s1 + $0x164] ss:$8 sps:$4 sm:$0xff]  }
  0x31   :  { %1723 = vmatpush1.bf16.msra.mxu1 %v2721_v52  ;;  %v2788_v52 = vld [vmem:[%s4065_s1 + $0x464] ss:$8 sps:$4 sm:$0xff]  }
  0x32   :  { %1846 = vmatpush1.bf16.msra.mxu0 %v2722_v57  ;;  %1724 = vmatprep.subr.bf16.mxu1 %v2723_v58  ;;  %v2791_v57 = vld [vmem:[%s4065_s1 + $0x174] ss:$8 sps:$4 sm:$0xff]   ;;  %v42_v58 = vmul.f32 0.2, %v34_v56 }
  0x33   :  { %1847 = vmatprep.subr.bf16.mxu0 %v2725_v59  ;;  %v2794_v59 = vld [vmem:[%s4065_s1 + $0x474] ss:$8 sps:$4 sm:$0xff]  }
  0x34   :  { %v3436_v60 = vsel %vm38_vm2, %v34_v56, %v42_v58  ;;  %v2858_v56 = vld [vmem:[%s4065_s1 + $0x520] ss:$8 sps:$4 sm:$0xff]   ;;  %v2866_v58 = vld [vmem:[%s4065_s1 + $0x534] ss:$8 sps:$4 sm:$0xff]  }
  0x35   :  { %1725 = vmatpush1.bf16.msra.mxu1 %v2727_v0  ;;  %v3446_v0 = vrot.slane %v3436_v60, %v3276_v54 }
  0x36   :  { %1848 = vmatpush1.bf16.msra.mxu0 %v2728_v1  ;;  %1726 = vmatprep.subr.bf16.mxu1 %v2729_v4  ;;  %v2797_v1 = vld [vmem:[%s4065_s1 + $0x184] ss:$8 sps:$4 sm:$0xff]   ;;  %v2795_v4 = vld [vmem:[%s4065_s1 + $0x180] ss:$8 sps:$4 sm:$0xff]  }
  0x37   :  { %1849 = vmatprep.subr.bf16.mxu0 %v2731_v5  ;;  %v101_v3 = vcombine.high %v3446_v0, %v3446_v0  ;;  %v2798_v5 = vld [vmem:[%s4065_s1 + $0x480] ss:$8 sps:$4 sm:$0xff]  }
  0x39   :  { %1727 = vmatpush1.bf16.msra.mxu1 %v2733_v8  ;;  %v145_v6 = vpack.c.bf16 %v101_v3, %v101_v3  ;;  %v2806_v8 = vld [vmem:[%s4065_s1 + $0x494] ss:$8 sps:$4 sm:$0xff]  }
  0x3a   :  { %1850 = vmatpush1.bf16.msra.mxu0 %v2734_v9  ;;  %1728 = vmatprep.subr.bf16.mxu1 %v2735_v11  ;;  %v2801_v9 = vld [vmem:[%s4065_s1 + $0x190] ss:$8 sps:$4 sm:$0xff]   ;;  %v2809_v11 = vld [vmem:[%s4065_s1 + $0x1a4] ss:$8 sps:$4 sm:$0xff]   ;;  %v2878_v3 = vld [vmem:[%s4065_s1 + $0x554] ss:$8 sps:$4 sm:$0xff]  }
  0x3b   :  { %1851 = vmatprep.subr.bf16.mxu0 %v2737_v12  ;;  %v2812_v12 = vld [vmem:[%s4065_s1 + $0x4a4] ss:$8 sps:$4 sm:$0xff]  }
  0x3d   :  { %1729 = vmatpush1.bf16.msra.mxu1 %v2739_v15  ;;  %v2815_v15 = vld [vmem:[%s4065_s1 + $0x1b4] ss:$8 sps:$4 sm:$0xff]  }
  0x3e   :  { %1852 = vmatpush1.bf16.msra.mxu0 %v2740_v16  ;;  %1730 = vmatprep.subr.bf16.mxu1 %v2741_v17  ;;  %v2818_v16 = vld [vmem:[%s4065_s1 + $0x4b4] ss:$8 sps:$4 sm:$0xff]   ;;  %v2813_v17 = vld [vmem:[%s4065_s1 + $0x1b0] ss:$8 sps:$4 sm:$0xff]  }
  0x3f   :  { %1853 = vmatprep.subr.bf16.mxu0 %v2743_v18  ;;  %v2816_v18 = vld [vmem:[%s4065_s1 + $0x4b0] ss:$8 sps:$4 sm:$0xff]  }
  0x41   :  { %1731 = vmatpush1.bf16.msra.mxu1 %v2745_v20  ;;  %v2821_v20 = vld [vmem:[%s4065_s1 + $0x1c4] ss:$8 sps:$4 sm:$0xff]  }
  0x42   :  { %1854 = vmatpush1.bf16.msra.mxu0 %v2746_v21  ;;  %1741 = vmatprep.subr.bf16.mxu1 %v2749_v22  ;;  %v2824_v21 = vld [vmem:[%s4065_s1 + $0x4c4] ss:$8 sps:$4 sm:$0xff]   ;;  %v2819_v22 = vld [vmem:[%s4065_s1 + $0x1c0] ss:$8 sps:$4 sm:$0xff]  }
  0x43   :  { %1864 = vmatprep.subr.bf16.mxu0 %v2752_v23  ;;  %v2822_v23 = vld [vmem:[%s4065_s1 + $0x4c0] ss:$8 sps:$4 sm:$0xff]  }
  0x44   :  { %1733 = vmatmul.mubr.bf16.vlgmr.msra.gmra.mrb[0].mxu1 %v136_v25  ;;  %v2830_v25 = vld [vmem:[%s4065_s1 + $0x4d4] ss:$8 sps:$4 sm:$0xff]  }
  0x45   :  { %1856 = vmatmul.mubr.bf16.vlgmr.msra.gmra.mrb[0].mxu0 %v142_v26  ;;  %1742 = vmatpush1.bf16.msra.mxu1 %v2747_v27  ;;  %v2825_v26 = vld [vmem:[%s4065_s1 + $0x1d0] ss:$8 sps:$4 sm:$0xff]  }
  0x46   :  { %1865 = vmatpush1.bf16.msra.mxu0 %v2750_v28  ;;  %1743 = vmatprep.subr.bf16.mxu1 %v2755_v29  ;;  %v2828_v27 = vld [vmem:[%s4065_s1 + $0x4d0] ss:$8 sps:$4 sm:$0xff]   ;;  %v2833_v28 = vld [vmem:[%s4065_s1 + $0x1e4] ss:$8 sps:$4 sm:$0xff]  }
  0x47   :  { %1866 = vmatprep.subr.bf16.mxu0 %v2758_v30  ;;  %1773 = vmatprep.mubr.bf16.mxu1 %v139_v31  ;;  %v2836_v29 = vld [vmem:[%s4065_s1 + $0x4e4] ss:$8 sps:$4 sm:$0xff]   ;;  %v86_v30 = vcombine.high %v3436_v60, %v3436_v60  ;;  %v2831_v31 = vld [vmem:[%s4065_s1 + $0x1e0] ss:$8 sps:$4 sm:$0xff]   ;;  %v2864_v60 = vld [vmem:[%s4065_s1 + $0x530] ss:$8 sps:$4 sm:$0xff]  }
  0x48   :  { %1896 = vmatprep.mubr.bf16.mxu0 %v145_v6  ;;  %v2881_v6 = vld [vmem:[%s4065_s1 + $0x264] ss:$8 sps:$4 sm:$0xff]  }
  0x49   :  { %1744 = vmatpush1.bf16.msra.mxu1 %v2753_v32  ;;  %v2834_v32 = vld [vmem:[%s4065_s1 + $0x4e0] ss:$8 sps:$4 sm:$0xff]  }
  0x4a   :  { %1867 = vmatpush1.bf16.msra.mxu0 %v2756_v33  ;;  %1745 = vmatprep.subr.bf16.mxu1 %v2761_v34  ;;  %v2839_v33 = vld [vmem:[%s4065_s1 + $0x1f4] ss:$8 sps:$4 sm:$0xff]  }
  0x4b   :  { %1868 = vmatprep.subr.bf16.mxu0 %v2764_v35  ;;  %v2842_v34 = vld [vmem:[%s4065_s1 + $0x4f4] ss:$8 sps:$4 sm:$0xff]   ;;  %v3544_v35 = vrot.slane %v3291_v63, %v3276_v54  ;;  %v2848_v63 = vld [vmem:[%s4065_s1 + $0x504] ss:$8 sps:$4 sm:$0xff]  }
  0x4d   :  { %1746 = vmatpush1.bf16.msra.mxu1 %v2759_v36  ;;  %v3547_v36 = vrot.slane %v86_v30, %v3276_v54  ;;  %v2912_v30 = vld [vmem:[%s4065_s1 + $0x5b0] ss:$8 sps:$4 sm:$0xff]  }
  0x4e   :  { %1869 = vmatpush1.bf16.msra.mxu0 %v2762_v37  ;;  %1747 = vmatprep.subr.bf16.mxu1 %v2767_v38  ;;  %v2837_v37 = vld [vmem:[%s4065_s1 + $0x1f0] ss:$8 sps:$4 sm:$0xff]  }
  0x4f   :  { %1870 = vmatprep.subr.bf16.mxu0 %v2770_v39  ;;  %v2840_v38 = vld [vmem:[%s4065_s1 + $0x4f0] ss:$8 sps:$4 sm:$0xff]   ;;  %v2845_v39 = vld [vmem:[%s4065_s1 + $0x204] ss:$8 sps:$4 sm:$0xff]  }
  0x51   :  { %1748 = vmatpush1.bf16.msra.mxu1 %v2765_v40  ;;  %v84_v40 = vcombine.high %v3544_v35, %v3544_v35 }
  0x52   :  { %1871 = vmatpush1.bf16.msra.mxu0 %v2768_v41  ;;  %1749 = vmatprep.subr.bf16.mxu1 %v2773_v42  ;;  %v102_v41 = vcombine.high %v3547_v36, %v3547_v36  ;;  %v2843_v42 = vld [vmem:[%s4065_s1 + $0x200] ss:$8 sps:$4 sm:$0xff]  }
  0x53   :  { %1872 = vmatprep.subr.bf16.mxu0 %v2776_v43  ;;  %v2846_v43 = vld [vmem:[%s4065_s1 + $0x500] ss:$8 sps:$4 sm:$0xff]  }
  0x55   :  { %1750 = vmatpush1.bf16.msra.mxu1 %v2771_v44  ;;  %v138_v44 = vpack.c.bf16 %v3333_v19, %v3333_v19  ;;  %v2849_v19 = vld [vmem:[%s4065_s1 + $0x210] ss:$8 sps:$4 sm:$0xff]  }
  0x56   :  { %1873 = vmatpush1.bf16.msra.mxu0 %v2774_v45  ;;  %1751 = vmatprep.subr.bf16.mxu1 %v2779_v46  ;;  %v144_v45 = vpack.c.bf16 %v3446_v0, %v3446_v0  ;;  %v2851_v46 = vld [vmem:[%s4065_s1 + $0x214] ss:$8 sps:$4 sm:$0xff]   ;;  %v2867_v0 = vld [vmem:[%s4065_s1 + $0x240] ss:$8 sps:$4 sm:$0xff]  }
  0x57   :  { %1874 = vmatprep.subr.bf16.mxu0 %v2782_v48  ;;  %v2854_v48 = vld [vmem:[%s4065_s1 + $0x514] ss:$8 sps:$4 sm:$0xff]  }
  0x59   :  { %1752 = vmatpush1.bf16.msra.mxu1 %v2777_v49  ;;  %v141_v49 = vpack.c.bf16 %v84_v40, %v84_v40  ;;  %v2921_v40 = vld [vmem:[%s4065_s1 + $0x2d0] ss:$8 sps:$4 sm:$0xff]  }
  0x5a   :  { %1875 = vmatpush1.bf16.msra.mxu0 %v2780_v50  ;;  %1753 = vmatprep.subr.bf16.mxu1 %v2785_v51  ;;  %v147_v50 = vpack.c.bf16 %v102_v41, %v102_v41  ;;  %v2852_v51 = vld [vmem:[%s4065_s1 + $0x510] ss:$8 sps:$4 sm:$0xff]  }
  0x5b   :  { %1876 = vmatprep.subr.bf16.mxu0 %v2788_v52  ;;  %v2857_v52 = vld [vmem:[%s4065_s1 + $0x224] ss:$8 sps:$4 sm:$0xff]   ;;  %v2924_v41 = vld [vmem:[%s4065_s1 + $0x5d0] ss:$8 sps:$4 sm:$0xff]  }
  0x5d   :  { %1754 = vmatpush1.bf16.msra.mxu1 %v2783_v53  ;;  %v2860_v53 = vld [vmem:[%s4065_s1 + $0x524] ss:$8 sps:$4 sm:$0xff]  }
  0x5e   :  { %1877 = vmatpush1.bf16.msra.mxu0 %v2786_v55  ;;  %1755 = vmatprep.subr.bf16.mxu1 %v2791_v57  ;;  %v2855_v55 = vld [vmem:[%s4065_s1 + $0x220] ss:$8 sps:$4 sm:$0xff]   ;;  %v2863_v57 = vld [vmem:[%s4065_s1 + $0x234] ss:$8 sps:$4 sm:$0xff]  }
  0x5f   :  { %1878 = vmatprep.subr.bf16.mxu0 %v2794_v59  ;;  %v2861_v59 = vld [vmem:[%s4065_s1 + $0x230] ss:$8 sps:$4 sm:$0xff]  }
  0x61   :  { %1756 = vmatpush1.bf16.msra.mxu1 %v2789_v61  ;;  %v2869_v61 = vld [vmem:[%s4065_s1 + $0x244] ss:$8 sps:$4 sm:$0xff]  }
  0x62   :  { %1879 = vmatpush1.bf16.msra.mxu0 %v2792_v62  ;;  %1757 = vmatprep.subr.bf16.mxu1 %v2797_v1  ;;  %v2872_v62 = vld [vmem:[%s4065_s1 + $0x544] ss:$8 sps:$4 sm:$0xff]   ;;  %v2870_v1 = vld [vmem:[%s4065_s1 + $0x540] ss:$8 sps:$4 sm:$0xff]  }
  0x63   :  { %1880 = vmatprep.subr.bf16.mxu0 %v2800_v2  ;;  %v2875_v2 = vld [vmem:[%s4065_s1 + $0x254] ss:$8 sps:$4 sm:$0xff]  }
  0x65   :  { %1758 = vmatpush1.bf16.msra.mxu1 %v2795_v4  ;;  %v2873_v4 = vld [vmem:[%s4065_s1 + $0x250] ss:$8 sps:$4 sm:$0xff]  }
  0x66   :  { %1881 = vmatpush1.bf16.msra.mxu0 %v2798_v5  ;;  %1759 = vmatprep.subr.bf16.mxu1 %v2803_v7  ;;  %v2876_v5 = vld [vmem:[%s4065_s1 + $0x550] ss:$8 sps:$4 sm:$0xff]   ;;  %v2884_v7 = vld [vmem:[%s4065_s1 + $0x564] ss:$8 sps:$4 sm:$0xff]  }
  0x67   :  { %1882 = vmatprep.subr.bf16.mxu0 %v2806_v8  ;;  %v2879_v8 = vld [vmem:[%s4065_s1 + $0x260] ss:$8 sps:$4 sm:$0xff]  }
  0x69   :  { %1760 = vmatpush1.bf16.msra.mxu1 %v2801_v9  ;;  %v2882_v9 = vld [vmem:[%s4065_s1 + $0x560] ss:$8 sps:$4 sm:$0xff]  }
  0x6a   :  { %1883 = vmatpush1.bf16.msra.mxu0 %v2804_v10  ;;  %1761 = vmatprep.subr.bf16.mxu1 %v2809_v11  ;;  %v2887_v10 = vld [vmem:[%s4065_s1 + $0x274] ss:$8 sps:$4 sm:$0xff]  }
  0x6b   :  { %1884 = vmatprep.subr.bf16.mxu0 %v2812_v12  ;;  %v2890_v11 = vld [vmem:[%s4065_s1 + $0x574] ss:$8 sps:$4 sm:$0xff]   ;;  %v2885_v12 = vld [vmem:[%s4065_s1 + $0x270] ss:$8 sps:$4 sm:$0xff]  }
  0x6d   :  { %1762 = vmatpush1.bf16.msra.mxu1 %v2807_v13  ;;  %v2888_v13 = vld [vmem:[%s4065_s1 + $0x570] ss:$8 sps:$4 sm:$0xff]  }
  0x6e   :  { %1885 = vmatpush1.bf16.msra.mxu0 %v2810_v14  ;;  %1763 = vmatprep.subr.bf16.mxu1 %v2815_v15  ;;  %v2893_v14 = vld [vmem:[%s4065_s1 + $0x284] ss:$8 sps:$4 sm:$0xff]  }
  0x6f   :  { %1886 = vmatprep.subr.bf16.mxu0 %v2818_v16  ;;  %v2896_v15 = vld [vmem:[%s4065_s1 + $0x584] ss:$8 sps:$4 sm:$0xff]   ;;  %v2891_v16 = vld [vmem:[%s4065_s1 + $0x280] ss:$8 sps:$4 sm:$0xff]  }
  0x71   :  { %1764 = vmatpush1.bf16.msra.mxu1 %v2813_v17  ;;  %v2894_v17 = vld [vmem:[%s4065_s1 + $0x580] ss:$8 sps:$4 sm:$0xff]  }
  0x72   :  { %1887 = vmatpush1.bf16.msra.mxu0 %v2816_v18  ;;  %1765 = vmatprep.subr.bf16.mxu1 %v2821_v20  ;;  %v2899_v18 = vld [vmem:[%s4065_s1 + $0x294] ss:$8 sps:$4 sm:$0xff]  }
  0x73   :  { %1888 = vmatprep.subr.bf16.mxu0 %v2824_v21  ;;  %v2902_v20 = vld [vmem:[%s4065_s1 + $0x594] ss:$8 sps:$4 sm:$0xff]   ;;  %v2897_v21 = vld [vmem:[%s4065_s1 + $0x290] ss:$8 sps:$4 sm:$0xff]  }
  0x75   :  { %1766 = vmatpush1.bf16.msra.mxu1 %v2819_v22  ;;  %v2900_v22 = vld [vmem:[%s4065_s1 + $0x590] ss:$8 sps:$4 sm:$0xff]  }
  0x76   :  { %1889 = vmatpush1.bf16.msra.mxu0 %v2822_v23  ;;  %1767 = vmatprep.subr.bf16.mxu1 %v2827_v24  ;;  %v2905_v23 = vld [vmem:[%s4065_s1 + $0x2a4] ss:$8 sps:$4 sm:$0xff]  }
  0x77   :  { %1890 = vmatprep.subr.bf16.mxu0 %v2830_v25  ;;  %v2908_v24 = vld [vmem:[%s4065_s1 + $0x5a4] ss:$8 sps:$4 sm:$0xff]   ;;  %v2903_v25 = vld [vmem:[%s4065_s1 + $0x2a0] ss:$8 sps:$4 sm:$0xff]  }
  0x79   :  { %1768 = vmatpush1.bf16.msra.mxu1 %v2825_v26  ;;  %v2906_v26 = vld [vmem:[%s4065_s1 + $0x5a0] ss:$8 sps:$4 sm:$0xff]  }
  0x7a   :  { %1891 = vmatpush1.bf16.msra.mxu0 %v2828_v27  ;;  %1769 = vmatprep.subr.bf16.mxu1 %v2833_v28  ;;  %v2911_v27 = vld [vmem:[%s4065_s1 + $0x2b4] ss:$8 sps:$4 sm:$0xff]  }
  0x7b   :  { %1892 = vmatprep.subr.bf16.mxu0 %v2836_v29  ;;  %v2914_v28 = vld [vmem:[%s4065_s1 + $0x5b4] ss:$8 sps:$4 sm:$0xff]   ;;  %v2909_v29 = vld [vmem:[%s4065_s1 + $0x2b0] ss:$8 sps:$4 sm:$0xff]  }
  0x7d   :  { %1770 = vmatpush1.bf16.msra.mxu1 %v2831_v31  ;;  %v2917_v31 = vld [vmem:[%s4065_s1 + $0x2c4] ss:$8 sps:$4 sm:$0xff]  }
  0x7e   :  { %1893 = vmatpush1.bf16.msra.mxu0 %v2834_v32  ;;  %1771 = vmatprep.subr.bf16.mxu1 %v2839_v33  ;;  %v2920_v32 = vld [vmem:[%s4065_s1 + $0x5c4] ss:$8 sps:$4 sm:$0xff]   ;;  %v35_v33 = vld [vmem:[%s4064_s0 + $0x18] sm:$0xff] }
  0x7f   :  { %1894 = vmatprep.subr.bf16.mxu0 %v2842_v34  ;;  %v2915_v34 = vld [vmem:[%s4065_s1 + $0x2c0] ss:$8 sps:$4 sm:$0xff]   ;;  %vm39_vm3 = vcmp.ge.f32.partialorder %v35_v33, 0.0 }
  0x81   :  { %1772 = vmatpush1.bf16.msra.mxu1 %v2837_v37  ;;  %v2918_v37 = vld [vmem:[%s4065_s1 + $0x5c0] ss:$8 sps:$4 sm:$0xff]  }
  0x82   :  { %1895 = vmatpush1.bf16.msra.mxu0 %v2840_v38  ;;  %1782 = vmatprep.subr.bf16.mxu1 %v2845_v39  ;;  %v2923_v38 = vld [vmem:[%s4065_s1 + $0x2d4] ss:$8 sps:$4 sm:$0xff]  }
  0x83   :  { %1905 = vmatprep.subr.bf16.mxu0 %v2848_v63  ;;  %v2926_v39 = vld [vmem:[%s4065_s1 + $0x5d4] ss:$8 sps:$4 sm:$0xff]   ;;  %v43_v63 = vmul.f32 0.2, %v35_v33 }
  0x84   :  { %1774 = vmatmul.mubr.bf16.vlgmr.msra.gmra.mrb[0].mxu1 %v138_v44 }
  0x85   :  { %1897 = vmatmul.mubr.bf16.vlgmr.msra.gmra.mrb[0].mxu0 %v144_v45  ;;  %1783 = vmatpush1.bf16.msra.mxu1 %v2843_v42  ;;  %v2929_v42 = vld [vmem:[%s4065_s1 + $0x2e4] ss:$8 sps:$4 sm:$0xff]   ;;  %v3740_v44 = vsel %vm39_vm3, %v35_v33, %v43_v63 }
  0x86   :  { %1906 = vmatpush1.bf16.msra.mxu0 %v2846_v43  ;;  %1784 = vmatprep.subr.bf16.mxu1 %v2851_v46  ;;  %v2932_v43 = vld [vmem:[%s4065_s1 + $0x5e4] ss:$8 sps:$4 sm:$0xff]  }
  0x87   :  { %1907 = vmatprep.subr.bf16.mxu0 %v2854_v48  ;;  %1814 = vmatprep.mubr.bf16.mxu1 %v141_v49 }
  0x88   :  { %1937 = vmatprep.mubr.bf16.mxu0 %v147_v50 }
  0x89   :  { %1785 = vmatpush1.bf16.msra.mxu1 %v2849_v19 }
  0x8a   :  { %1908 = vmatpush1.bf16.msra.mxu0 %v2852_v51  ;;  %1786 = vmatprep.subr.bf16.mxu1 %v2857_v52 }
  0x8b   :  { %1909 = vmatprep.subr.bf16.mxu0 %v2860_v53 }
  0x8d   :  { %1787 = vmatpush1.bf16.msra.mxu1 %v2855_v55 }
  0x8e   :  { %1910 = vmatpush1.bf16.msra.mxu0 %v2858_v56  ;;  %1788 = vmatprep.subr.bf16.mxu1 %v2863_v57 }
  0x8f   :  { %1911 = vmatprep.subr.bf16.mxu0 %v2866_v58 }
  0x91   :  { %1789 = vmatpush1.bf16.msra.mxu1 %v2861_v59 }
  0x92   :  { %1912 = vmatpush1.bf16.msra.mxu0 %v2864_v60  ;;  %1790 = vmatprep.subr.bf16.mxu1 %v2869_v61 }
  0x93   :  { %1913 = vmatprep.subr.bf16.mxu0 %v2872_v62 }
  0x95   :  { %1791 = vmatpush1.bf16.msra.mxu1 %v2867_v0 }
  0x96   :  { %1914 = vmatpush1.bf16.msra.mxu0 %v2870_v1  ;;  %1792 = vmatprep.subr.bf16.mxu1 %v2875_v2 }
  0x97   :  { %1915 = vmatprep.subr.bf16.mxu0 %v2878_v3 }
  0x99   :  { %1793 = vmatpush1.bf16.msra.mxu1 %v2873_v4 }
  0x9a   :  { %1916 = vmatpush1.bf16.msra.mxu0 %v2876_v5  ;;  %1794 = vmatprep.subr.bf16.mxu1 %v2881_v6 }
  0x9b   :  { %1917 = vmatprep.subr.bf16.mxu0 %v2884_v7 }
  0x9d   :  { %1795 = vmatpush1.bf16.msra.mxu1 %v2879_v8 }
  0x9e   :  { %1918 = vmatpush1.bf16.msra.mxu0 %v2882_v9  ;;  %1796 = vmatprep.subr.bf16.mxu1 %v2887_v10 }
  0x9f   :  { %1919 = vmatprep.subr.bf16.mxu0 %v2890_v11 }
  0xa1   :  { %1797 = vmatpush1.bf16.msra.mxu1 %v2885_v12 }
  0xa2   :  { %1920 = vmatpush1.bf16.msra.mxu0 %v2888_v13  ;;  %1798 = vmatprep.subr.bf16.mxu1 %v2893_v14 }
  0xa3   :  { %1921 = vmatprep.subr.bf16.mxu0 %v2896_v15 }
  0xa5   :  { %1799 = vmatpush1.bf16.msra.mxu1 %v2891_v16 }
  0xa6   :  { %1922 = vmatpush1.bf16.msra.mxu0 %v2894_v17  ;;  %1800 = vmatprep.subr.bf16.mxu1 %v2899_v18 }
  0xa7   :  { %1923 = vmatprep.subr.bf16.mxu0 %v2902_v20 }
  0xa9   :  { %1801 = vmatpush1.bf16.msra.mxu1 %v2897_v21 }
  0xaa   :  { %1924 = vmatpush1.bf16.msra.mxu0 %v2900_v22  ;;  %1802 = vmatprep.subr.bf16.mxu1 %v2905_v23 }
  0xab   :  { %1925 = vmatprep.subr.bf16.mxu0 %v2908_v24 }
  0xad   :  { %1803 = vmatpush1.bf16.msra.mxu1 %v2903_v25 }
  0xae   :  { %1926 = vmatpush1.bf16.msra.mxu0 %v2906_v26  ;;  %1804 = vmatprep.subr.bf16.mxu1 %v2911_v27 }
  0xaf   :  { %1927 = vmatprep.subr.bf16.mxu0 %v2914_v28 }
  0xb1   :  { %1805 = vmatpush1.bf16.msra.mxu1 %v2909_v29 }
  0xb2   :  { %1928 = vmatpush1.bf16.msra.mxu0 %v2912_v30  ;;  %1806 = vmatprep.subr.bf16.mxu1 %v2917_v31 }
  0xb3   :  { %1929 = vmatprep.subr.bf16.mxu0 %v2920_v32 }
  0xb5   :  { %1807 = vmatpush1.bf16.msra.mxu1 %v2915_v34 }
  0xb6   :  { %1930 = vmatpush1.bf16.msra.mxu0 %v2918_v37  ;;  %1808 = vmatprep.subr.bf16.mxu1 %v2923_v38 }
  0xb7   :  { %1931 = vmatprep.subr.bf16.mxu0 %v2926_v39 }
  0xb8   :  { %16 = vsyncpa [#allocation4], 0  ;;  %v2927_v45 = vld [vmem:[%s4065_s1 + $0x2e0] ss:$8 sps:$4 sm:$0xff]   ;;  %v3750_v48 = vrot.slane %v3740_v44, %v3276_v54  ;;  %v2935_v49 = vld [vmem:[%s4065_s1 + $0x2f4] ss:$8 sps:$4 sm:$0xff]   ;;  %v140_v55 = vpack.c.bf16 %v3544_v35, %v3544_v35  ;;  %v146_v56 = vpack.c.bf16 %v3547_v36, %v3547_v36  ;;  %v103_v21 = vcombine.high %v3740_v44, %v3740_v44 }
  0xb9   :  { %1809 = vmatpush1.bf16.msra.mxu1 %v2921_v40  ;;  %v2930_v46 = vld [vmem:[%s4065_s1 + $0x5e0] ss:$8 sps:$4 sm:$0xff]   ;;  %v2938_v50 = vld [vmem:[%s4065_s1 + $0x5f4] ss:$8 sps:$4 sm:$0xff]   ;;  %v2933_v19 = vld [vmem:[%s4065_s1 + $0x2f0] ss:$8 sps:$4 sm:$0xff]  }
  0xba   :  { %1932 = vmatpush1.bf16.msra.mxu0 %v2924_v41  ;;  %1810 = vmatprep.subr.bf16.mxu1 %v2929_v42  ;;  %v2936_v51 = vld [vmem:[%s4065_s1 + $0x5f0] ss:$8 sps:$4 sm:$0xff]   ;;  %v118_v52 = vcombine.high %v3750_v48, %v3750_v48  ;;  %v2941_v53 = vld [vmem:[%s4065_s1 + $0x604] ss:$8 sps:$4 sm:$0xff]   ;;  %v2939_v57 = vld [vmem:[%s4065_s1 + $0x600] ss:$8 sps:$4 sm:$0xff]   ;;  %v3863_v24 = vrot.slane %v103_v21, %v3276_v54  ;;  %v148_v54 = vpack.c.bf16 %v3750_v48, %v3750_v48 }
  0xbb   :  { %1933 = vmatprep.subr.bf16.mxu0 %v2932_v43  ;;  %v2944_v59 = vld [vmem:[%s4065_s1 + $0x614] ss:$8 sps:$4 sm:$0xff]   ;;  %v2942_v35 = vld [vmem:[%s4065_s1 + $0x610] ss:$8 sps:$4 sm:$0xff]   ;;  %v2947_v36 = vld [vmem:[%s4065_s1 + $0x624] ss:$8 sps:$4 sm:$0xff]  }
  0xbc   :  { %v149_v58 = vpack.c.bf16 %v118_v52, %v118_v52  ;;  %v2945_v60 = vld [vmem:[%s4065_s1 + $0x620] ss:$8 sps:$4 sm:$0xff]   ;;  %v2950_v61 = vld [vmem:[%s4065_s1 + $0x634] ss:$8 sps:$4 sm:$0xff]   ;;  %v2948_v62 = vld [vmem:[%s4065_s1 + $0x630] ss:$8 sps:$4 sm:$0xff]   ;;  %v119_v27 = vcombine.high %v3863_v24, %v3863_v24 }
  0xbd   :  { %1811 = vmatpush1.bf16.msra.mxu1 %v2927_v45  ;;  %v2953_v0 = vld [vmem:[%s4065_s1 + $0x644] ss:$8 sps:$4 sm:$0xff]   ;;  %v2951_v1 = vld [vmem:[%s4065_s1 + $0x640] ss:$8 sps:$4 sm:$0xff]   ;;  %v2956_v2 = vld [vmem:[%s4065_s1 + $0x654] ss:$8 sps:$4 sm:$0xff]  }
  0xbe   :  { %1934 = vmatpush1.bf16.msra.mxu0 %v2930_v46  ;;  %1812 = vmatprep.subr.bf16.mxu1 %v2935_v49  ;;  %v2954_v3 = vld [vmem:[%s4065_s1 + $0x650] ss:$8 sps:$4 sm:$0xff]   ;;  %v2959_v4 = vld [vmem:[%s4065_s1 + $0x664] ss:$8 sps:$4 sm:$0xff]   ;;  %v2957_v5 = vld [vmem:[%s4065_s1 + $0x660] ss:$8 sps:$4 sm:$0xff]   ;;  %v151_v30 = vpack.c.bf16 %v119_v27, %v119_v27 }
  0xbf   :  { %1935 = vmatprep.subr.bf16.mxu0 %v2938_v50  ;;  %v2962_v6 = vld [vmem:[%s4065_s1 + $0x674] ss:$8 sps:$4 sm:$0xff]   ;;  %v2960_v7 = vld [vmem:[%s4065_s1 + $0x670] ss:$8 sps:$4 sm:$0xff]   ;;  %v2965_v8 = vld [vmem:[%s4065_s1 + $0x684] ss:$8 sps:$4 sm:$0xff]  }
  0xc0   :  { %v2963_v9 = vld [vmem:[%s4065_s1 + $0x680] ss:$8 sps:$4 sm:$0xff]   ;;  %v2968_v10 = vld [vmem:[%s4065_s1 + $0x694] ss:$8 sps:$4 sm:$0xff]   ;;  %v2966_v11 = vld [vmem:[%s4065_s1 + $0x690] ss:$8 sps:$4 sm:$0xff]  }
  0xc1   :  { %1813 = vmatpush1.bf16.msra.mxu1 %v2933_v19  ;;  %v2971_v12 = vld [vmem:[%s4065_s1 + $0x6a4] ss:$8 sps:$4 sm:$0xff]   ;;  %v2969_v13 = vld [vmem:[%s4065_s1 + $0x6a0] ss:$8 sps:$4 sm:$0xff]   ;;  %v2974_v14 = vld [vmem:[%s4065_s1 + $0x6b4] ss:$8 sps:$4 sm:$0xff]  }
  0xc2   :  { %1936 = vmatpush1.bf16.msra.mxu0 %v2936_v51  ;;  %v2972_v15 = vld [vmem:[%s4065_s1 + $0x6b0] ss:$8 sps:$4 sm:$0xff]   ;;  %v2977_v16 = vld [vmem:[%s4065_s1 + $0x6c4] ss:$8 sps:$4 sm:$0xff]   ;;  %v2975_v17 = vld [vmem:[%s4065_s1 + $0x6c0] ss:$8 sps:$4 sm:$0xff]  }
  0xc3   :  { %1946 = vmatprep.subr.bf16.mxu0 %v2941_v53  ;;  %v2980_v18 = vld [vmem:[%s4065_s1 + $0x6d4] ss:$8 sps:$4 sm:$0xff]   ;;  %v2978_v20 = vld [vmem:[%s4065_s1 + $0x6d0] ss:$8 sps:$4 sm:$0xff]   ;;  %v2983_v22 = vld [vmem:[%s4065_s1 + $0x6e4] ss:$8 sps:$4 sm:$0xff]  }
  0xc4   :  { %1815 = vmatmul.mubr.bf16.vlgmr.msra.gmra.mrb[0].mxu1 %v140_v55  ;;  %v2981_v23 = vld [vmem:[%s4065_s1 + $0x6e0] ss:$8 sps:$4 sm:$0xff]   ;;  %v2986_v25 = vld [vmem:[%s4065_s1 + $0x6f4] ss:$8 sps:$4 sm:$0xff]   ;;  %v2984_v26 = vld [vmem:[%s4065_s1 + $0x6f0] ss:$8 sps:$4 sm:$0xff]  }
  0xc5   :  { %1938 = vmatmul.mubr.bf16.vlgmr.msra.gmra.mrb[0].mxu0 %v146_v56  ;;  %v2989_v28 = vld [vmem:[%s4065_s1 + $0x704] ss:$8 sps:$4 sm:$0xff]   ;;  %v2987_v29 = vld [vmem:[%s4065_s1 + $0x700] ss:$8 sps:$4 sm:$0xff]   ;;  %v2992_v31 = vld [vmem:[%s4065_s1 + $0x714] ss:$8 sps:$4 sm:$0xff]  }
  0xc6   :  { %1947 = vmatpush1.bf16.msra.mxu0 %v2939_v57  ;;  %1978 = vmatprep.mubr.bf16.mxu0 %v149_v58  ;;  %v2990_v32 = vld [vmem:[%s4065_s1 + $0x710] ss:$8 sps:$4 sm:$0xff]   ;;  %v2995_v33 = vld [vmem:[%s4065_s1 + $0x724] ss:$8 sps:$4 sm:$0xff]   ;;  %v2993_v34 = vld [vmem:[%s4065_s1 + $0x720] ss:$8 sps:$4 sm:$0xff]  }
  0xc7   :  { %1948 = vmatprep.subr.bf16.mxu0 %v2944_v59  ;;  %v2998_v37 = vld [vmem:[%s4065_s1 + $0x734] ss:$8 sps:$4 sm:$0xff]   ;;  %v2996_v38 = vld [vmem:[%s4065_s1 + $0x730] ss:$8 sps:$4 sm:$0xff]   ;;  %v3001_v39 = vld [vmem:[%s4065_s1 + $0x744] ss:$8 sps:$4 sm:$0xff]  }
  0xc8   :  { %v2999_v63 = vld [vmem:[%s4065_s1 + $0x740] ss:$8 sps:$4 sm:$0xff]   ;;  %v3004_v40 = vld [vmem:[%s4065_s1 + $0x754] ss:$8 sps:$4 sm:$0xff]   ;;  %v3002_v41 = vld [vmem:[%s4065_s1 + $0x750] ss:$8 sps:$4 sm:$0xff]  }
  0xc9   :  { %v3007_v42 = vld [vmem:[%s4065_s1 + $0x764] ss:$8 sps:$4 sm:$0xff]   ;;  %v3005_v43 = vld [vmem:[%s4065_s1 + $0x760] ss:$8 sps:$4 sm:$0xff]   ;;  %v3010_v44 = vld [vmem:[%s4065_s1 + $0x774] ss:$8 sps:$4 sm:$0xff]  }
  0xca   :  { %1949 = vmatpush1.bf16.msra.mxu0 %v2942_v35  ;;  %v3035_v45 = vld [vmem:[%s4067_s3] sm:$0xff]   ;;  %v3078_v46 = vmov 0.0   ;;  %v3036_v48 = vld [vmem:[%s4067_s3 + $0x8] sm:$0xff]   ;;  %v3008_v49 = vld [vmem:[%s4065_s1 + $0x770] ss:$8 sps:$4 sm:$0xff]   ;;  %vm3079_vm4 = vmmov 0  }
  0xcb   :  { %1950 = vmatprep.subr.bf16.mxu0 %v2947_v36  ;;  %2579 = vmatprep.subr.bf16.mxu1 %v3078_v46  ;;  %v3013_v50 = vld [vmem:[%s4065_s1 + $0x784] ss:$8 sps:$4 sm:$0xff]   ;;  %v3037_v19 = vld [vmem:[%s4067_s3 + $0x10] sm:$0xff]   ;;  %v3011_v51 = vld [vmem:[%s4065_s1 + $0x780] ss:$8 sps:$4 sm:$0xff]   ;;  %vm2147_vm7 = vcmask 1024  }
  0xcc   :  { %2580 = vmatpush3.bf16.msra.mxu1 %v3035_v45  ;;  %v3016_v52 = vld [vmem:[%s4065_s1 + $0x794] ss:$8 sps:$4 sm:$0xff]   ;;  %v3014_v55 = vld [vmem:[%s4065_s1 + $0x790] ss:$8 sps:$4 sm:$0xff]   ;;  %v3019_v56 = vld [vmem:[%s4065_s1 + $0x7a4] ss:$8 sps:$4 sm:$0xff]   ;;  %2595 = vmatprep.mubr.msk.bf16.mxu1 %vm3079_vm4, %v3078_v46 }
  0xcd   :  { %2581 = vmatprep.subr.bf16.mxu1 %v3078_v46  ;;  %v3038_v53 = vld [vmem:[%s4067_s3 + $0x18] sm:$0xff]   ;;  %v3039_v57 = vld [vmem:[%s4067_s3 + $0x20] sm:$0xff]   ;;  %v3040_v35 = vld [vmem:[%s4067_s3 + $0x28] sm:$0xff]   ;;  %vm2261_vm8 = vcmask 517120  }
  0xce   :  { %1951 = vmatpush1.bf16.msra.mxu0 %v2945_v60  ;;  %v3017_v58 = vld [vmem:[%s4065_s1 + $0x7a0] ss:$8 sps:$4 sm:$0xff]   ;;  %v3022_v59 = vld [vmem:[%s4065_s1 + $0x7b4] ss:$8 sps:$4 sm:$0xff]   ;;  %v3020_v36 = vld [vmem:[%s4065_s1 + $0x7b0] ss:$8 sps:$4 sm:$0xff]  }
  0xcf   :  { %1952 = vmatprep.subr.bf16.mxu0 %v2950_v61  ;;  %v3025_v60 = vld [vmem:[%s4065_s1 + $0x7c4] ss:$8 sps:$4 sm:$0xff]   ;;  %v3023_v61 = vld [vmem:[%s4065_s1 + $0x7c0] ss:$8 sps:$4 sm:$0xff]  }
  0xd0   :  { %2582 = vmatpush3.bf16.msra.mxu1 %v3036_v48  ;;  %v2552_v45 = vld [vmem:[%s4070_s6] ss:$0 sm:$0xff] }
  0xd1   :  { %2583 = vmatprep.subr.bf16.mxu1 %v3078_v46 }
  0xd2   :  { %1953 = vmatpush1.bf16.msra.mxu0 %v2948_v62  ;;  %v3028_v62 = vld [vmem:[%s4065_s1 + $0x7d4] ss:$8 sps:$4 sm:$0xff]  }
  0xd3   :  { %1954 = vmatprep.subr.bf16.mxu0 %v2953_v0  ;;  %v3026_v0 = vld [vmem:[%s4065_s1 + $0x7d0] ss:$8 sps:$4 sm:$0xff]  }
  0xd4   :  { %2584 = vmatpush3.bf16.msra.mxu1 %v3037_v19 }
  0xd5   :  { %2585 = vmatprep.subr.bf16.mxu1 %v3078_v46 }
  0xd6   :  { %1955 = vmatpush1.bf16.msra.mxu0 %v2951_v1  ;;  %v3031_v1 = vld [vmem:[%s4065_s1 + $0x7e4] ss:$8 sps:$4 sm:$0xff]  }
  0xd7   :  { %1956 = vmatprep.subr.bf16.mxu0 %v2956_v2  ;;  %v3029_v2 = vld [vmem:[%s4065_s1 + $0x7e0] ss:$8 sps:$4 sm:$0xff]  }
  0xd8   :  { %2586 = vmatpush3.bf16.msra.mxu1 %v3038_v53 }
  0xd9   :  { %2587 = vmatprep.subr.bf16.mxu1 %v3078_v46 }
  0xda   :  { %1957 = vmatpush1.bf16.msra.mxu0 %v2954_v3  ;;  %v3034_v3 = vld [vmem:[%s4065_s1 + $0x7f4] ss:$8 sps:$4 sm:$0xff]  }
  0xdb   :  { %1958 = vmatprep.subr.bf16.mxu0 %v2959_v4  ;;  %v3032_v4 = vld [vmem:[%s4065_s1 + $0x7f0] ss:$8 sps:$4 sm:$0xff]  }
  0xdc   :  { %2588 = vmatpush3.bf16.msra.mxu1 %v3039_v57 }
  0xdd   :  { %2589 = vmatprep.subr.bf16.mxu1 %v3078_v46 }
  0xde   :  { %1959 = vmatpush1.bf16.msra.mxu0 %v2957_v5  ;;  %v150_v5 = vpack.c.bf16 %v3863_v24, %v3863_v24 }
  0xdf   :  { %1960 = vmatprep.subr.bf16.mxu0 %v2962_v6  ;;  %v3041_v6 = vld [vmem:[%s4067_s3 + $0x30] sm:$0xff]  }
  0xe0   :  { %2590 = vmatpush3.bf16.msra.mxu1 %v3040_v35 }
  0xe1   :  { %2591 = vmatprep.subr.bf16.mxu1 %v3078_v46 }
  0xe2   :  { %1961 = vmatpush1.bf16.msra.mxu0 %v2960_v7 }
  0xe3   :  { %1962 = vmatprep.subr.bf16.mxu0 %v2965_v8 }
  0xe4   :  { %2592 = vmatpush3.bf16.msra.mxu1 %v3041_v6 }
  0xe5   :  { %2593 = vmatprep.subr.bf16.mxu1 %v3078_v46 }
  0xe6   :  { %1963 = vmatpush1.bf16.msra.mxu0 %v2963_v9 }
  0xe7   :  { %1964 = vmatprep.subr.bf16.mxu0 %v2968_v10  ;;  %v3042_v10 = vld [vmem:[%s4067_s3 + $0x38] sm:$0xff]  }
  0xe8   :  { %2594 = vmatpush3.bf16.msra.mxu1 %v3042_v10 }
  0xe9   :  { %2599 = vmatprep.subr.bf16.mxu1 %v3078_v46 }
  0xea   :  { %1965 = vmatpush1.bf16.msra.mxu0 %v2966_v11 }
  0xeb   :  { %1966 = vmatprep.subr.bf16.mxu0 %v2971_v12  ;;  %v412_v12 = vsub.s32 0, %v3255_v47 }
  0xee   :  { %1967 = vmatpush1.bf16.msra.mxu0 %v2969_v13  ;;  %v408_v13 = vld [vmem:[%s4066_s2] sm:$0x3] }
  0xef   :  { %1968 = vmatprep.subr.bf16.mxu0 %v2974_v14  ;;  %v416_v14 = vsub.s32 1, %v3255_v47  ;;  %v3044_v47 = vld [vmem:[%s4069_s5 + $0x8] sm:$0xff]  }
  0xf2   :  { %1969 = vmatpush1.bf16.msra.mxu0 %v2972_v15  ;;  %v413_v15 = vrot.slane %v408_v13, %v412_v12 }
  0xf3   :  { %1970 = vmatprep.subr.bf16.mxu0 %v2977_v16  ;;  %v417_v16 = vrot.slane %v408_v13, %v416_v14 }
  0xf6   :  { %1971 = vmatpush1.bf16.msra.mxu0 %v2975_v17 }
  0xf7   :  { %1972 = vmatprep.subr.bf16.mxu0 %v2980_v18 }
  0xfa   :  { %1973 = vmatpush1.bf16.msra.mxu0 %v2978_v20 }
  0xfb   :  { %1974 = vmatprep.subr.bf16.mxu0 %v2983_v22 }
  0xfe   :  { %1975 = vmatpush1.bf16.msra.mxu0 %v2981_v23 }
  0xff   :  { %1976 = vmatprep.subr.bf16.mxu0 %v2986_v25 }
 0x102   :  { %1977 = vmatpush1.bf16.msra.mxu0 %v2984_v26 }
 0x103   :  { %1987 = vmatprep.subr.bf16.mxu0 %v2989_v28  ;;  %v3043_v28 = vld [vmem:[%s4069_s5] sm:$0xff]  }
 0x105   :  { %1979 = vmatmul.mubr.bf16.vlgmr.msra.gmra.mrb[0].mxu0 %v148_v54 }
 0x106   :  { %1988 = vmatpush1.bf16.msra.mxu0 %v2987_v29  ;;  %2019 = vmatprep.mubr.bf16.mxu0 %v151_v30  ;;  %v3045_v29 = vld [vmem:[%s4069_s5 + $0x10] sm:$0xff]   ;;  %v3046_v30 = vld [vmem:[%s4069_s5 + $0x18] sm:$0xff]  }
 0x107   :  { %1989 = vmatprep.subr.bf16.mxu0 %v2992_v31  ;;  %v3047_v31 = vld [vmem:[%s4069_s5 + $0x20] sm:$0xff]  }
 0x10a   :  { %1990 = vmatpush1.bf16.msra.mxu0 %v2990_v32  ;;  %v3048_v32 = vld [vmem:[%s4069_s5 + $0x28] sm:$0xff]  }
 0x10b   :  { %1991 = vmatprep.subr.bf16.mxu0 %v2995_v33  ;;  %v3049_v33 = vld [vmem:[%s4069_s5 + $0x30] sm:$0xff]  }
 0x10e   :  { %1992 = vmatpush1.bf16.msra.mxu0 %v2993_v34 }
 0x10f   :  { %1993 = vmatprep.subr.bf16.mxu0 %v2998_v37  ;;  %v3050_v37 = vld [vmem:[%s4069_s5 + $0x38] sm:$0xff]   ;;  %s3080_s5 = smov [#allocation3]  }
 0x110   :  { %s2277_s24 = sshll.u32 %s3080_s5, 4  ;;  %s2278_s24 = int_to_ptr.vmem [resolvable:$true] %s2277_s24 }
 0x111   :  { %p3058_p1 = scmp.lt.s32.totalorder %s2278_s24, %s2278_s24 }
 0x112   :  { %1994 = vmatpush1.bf16.msra.mxu0 %v2996_v38 }
 0x113   :  { %1995 = vmatprep.subr.bf16.mxu0 %v3001_v39 }
 0x116   :  { %1996 = vmatpush1.bf16.msra.mxu0 %v2999_v63  ;;  %v2543_v63 = vld [vmem:[#allocation2] ss:$0 sm:$0xff] }
 0x117   :  { %1997 = vmatprep.subr.bf16.mxu0 %v3004_v40 }
 0x11a   :  { %1998 = vmatpush1.bf16.msra.mxu0 %v3002_v41 }
 0x11b   :  { %1999 = vmatprep.subr.bf16.mxu0 %v3007_v42 }
 0x11e   :  { %2000 = vmatpush1.bf16.msra.mxu0 %v3005_v43 }
 0x11f   :  { %2001 = vmatprep.subr.bf16.mxu0 %v3010_v44 }
 0x122   :  { %2002 = vmatpush1.bf16.msra.mxu0 %v3008_v49 }
 0x123   :  { %2003 = vmatprep.subr.bf16.mxu0 %v3013_v50 }
 0x126   :  { %2004 = vmatpush1.bf16.msra.mxu0 %v3011_v51 }
 0x127   :  { %2005 = vmatprep.subr.bf16.mxu0 %v3016_v52 }
 0x12a   :  { %2006 = vmatpush1.bf16.msra.mxu0 %v3014_v55 }
 0x12b   :  { %2007 = vmatprep.subr.bf16.mxu0 %v3019_v56 }
 0x12e   :  { %2008 = vmatpush1.bf16.msra.mxu0 %v3017_v58 }
 0x12f   :  { %2009 = vmatprep.subr.bf16.mxu0 %v3022_v59 }
 0x132   :  { %2010 = vmatpush1.bf16.msra.mxu0 %v3020_v36 }
 0x133   :  { %2011 = vmatprep.subr.bf16.mxu0 %v3025_v60 }
 0x136   :  { %2012 = vmatpush1.bf16.msra.mxu0 %v3023_v61 }
 0x137   :  { %2013 = vmatprep.subr.bf16.mxu0 %v3028_v62 }
 0x13a   :  { %2014 = vmatpush1.bf16.msra.mxu0 %v3026_v0 }
 0x13b   :  { %2015 = vmatprep.subr.bf16.mxu0 %v3031_v1 }
 0x13e   :  { %2016 = vmatpush1.bf16.msra.mxu0 %v3029_v2 }
 0x13f   :  { %2017 = vmatprep.subr.bf16.mxu0 %v3034_v3 }
 0x142   :  { %2018 = vmatpush1.bf16.msra.mxu0 %v3032_v4 }
 0x145   :  { %2020 = vmatmul.mubr.bf16.vlgmr.msra.gmra.mrb[0].mxu0 %v150_v5 }
 0x197   :  { %v1816_v7 = vpop.f32.mrb[0].mxu1 }
 0x198   :  { %v1818_v8 = vpop.f32.mrb[1].mxu1  ;;  %v2619_v17 = vadd.f32 %v1816_v7, %v413_v15 }
 0x199   :  { %v1820_v9 = vpop.f32.mrb[2].mxu1  ;;  %v2621_v18 = vadd.f32 %v1818_v8, %v417_v16 }
 0x19a   :  { %v1821_v11 = vpop.f32.mrb[3].mxu1 }
 0x218   :  { %v2021_v20 = vpop.f32.mrb[0].mxu0 }
 0x219   :  { %v2620_v21 = vadd.f32 %v2619_v17, %v2021_v20  ;;  %v2023_v22 = vpop.f32.mrb[1].mxu0 }
 0x21a   :  { %v2622_v23 = vadd.f32 %v2621_v18, %v2023_v22  ;;  %v2025_v24 = vpop.f32.mrb[2].mxu0 }
 0x21b   :  { %vm2028_vm5 = vcmp.ge.f32.partialorder %v2620_v21, 0.0  ;;  %v2030_v25 = vmul.f32 0.2, %v2620_v21  ;;  %v2026_v26 = vpop.f32.mrb[3].mxu0 }
 0x21c   :  { %v2031_v34 = vmul.f32 0.2, %v2622_v23  ;;  %vm2029_vm6 = vcmp.ge.f32.partialorder %v2622_v23, 0.0 }
 0x21d   :  { %v2032_v27 = vsel %vm2028_vm5, %v2620_v21, %v2030_v25 }
 0x21e   :  { %v2034_v54 = vpack.c.bf16 %v2032_v27, %v2032_v27  ;;  %v2033_v38 = vsel %vm2029_vm6, %v2622_v23, %v2031_v34 }
 0x21f   :  { %v2035_v39 = vpack.c.bf16 %v2033_v38, %v2033_v38 }
 0x220   :  { %2596 = vmatmul.mubr.bf16.vlgmr.msra.gmra.mrb[4].mxu1 %v2034_v54 }
 0x221   :  { %2600 = vmatpush3.bf16.msra.mxu1 %v3043_v28  ;;  %2615 = vmatprep.mubr.msk.bf16.mxu1 %vm3079_vm4, %v3078_v46 }
 0x222   :  { %2601 = vmatprep.subr.bf16.mxu1 %v3078_v46 }
 0x225   :  { %2602 = vmatpush3.bf16.msra.mxu1 %v3044_v47 }
 0x226   :  { %2603 = vmatprep.subr.bf16.mxu1 %v3078_v46 }
 0x229   :  { %2604 = vmatpush3.bf16.msra.mxu1 %v3045_v29 }
 0x22a   :  { %2605 = vmatprep.subr.bf16.mxu1 %v3078_v46 }
 0x22d   :  { %2606 = vmatpush3.bf16.msra.mxu1 %v3046_v30 }
 0x22e   :  { %2607 = vmatprep.subr.bf16.mxu1 %v3078_v46 }
 0x231   :  { %2608 = vmatpush3.bf16.msra.mxu1 %v3047_v31 }
 0x232   :  { %2609 = vmatprep.subr.bf16.mxu1 %v3078_v46 }
 0x235   :  { %2610 = vmatpush3.bf16.msra.mxu1 %v3048_v32 }
 0x236   :  { %2611 = vmatprep.subr.bf16.mxu1 %v3078_v46 }
 0x239   :  { %2612 = vmatpush3.bf16.msra.mxu1 %v3049_v33 }
 0x23a   :  { %2613 = vmatprep.subr.bf16.mxu1 %v3078_v46 }
 0x23d   :  { %2614 = vmatpush3.bf16.msra.mxu1 %v3050_v37 }
 0x240   :  { %2616 = vmatmul.mubr.bf16.vlgmr.msra.gmra.mrb[8].mxu1 %v2035_v39 }
 0x2f3   :  { %v2141_v40 = vpop.f32.mrb[4].mxu1 }
 0x2f4   :  { %v2142_v41 = vadd.f32 %v2543_v63, %v2141_v40  ;;  %v2597_v42 = vpop.f32.mrb[5].mxu1 }
 0x2f5   :  { %v2144_v43 = vpop.f32.mrb[6].mxu1 }
 0x2f6   :  { %2148 = vst.msk [vmem:[%s4071_s7] sm:$0x3] %vm2147_vm7, %v2142_v41  ;;  %v2598_v44 = vpop.f32.mrb[7].mxu1  ;;  %s3053_s7 = scalar_lea.vmem %s2278_s24, 32 }
 0x2f7   :  { %p3054_p0 = scmp.ne.s32.totalorder %s2278_s24, %s3053_s7  ;;  %p3059_p2 = scmp.lt.s32.totalorder %s3053_s7, %s3053_s7 }
 0x2f9   :  { %p3060_p3 = por %p3059_p2, %p3058_p1 }
 0x2fb   :  { %p3061_p4 = pnand %p3060_p3, %p3054_p0 }
 0x313   :  { %v2254_v46 = vpop.f32.mrb[8].mxu1 }
 0x314   :  { %v2255_v48 = vadd.f32 %v2552_v45, %v2254_v46  ;;  %v2617_v49 = vpop.f32.mrb[9].mxu1 }
 0x315   :  { %v2257_v50 = vpop.f32.mrb[10].mxu1 }
 0x316   :  { %v2618_v19 = vpop.f32.mrb[11].mxu1  ;;  %v2260_v51 = vmul.f32 %v2255_v48, %v2255_v48 }
 0x318   :  { %v2262_v52 = vsel %vm2261_vm8, %v2260_v51, 0.0 }
 0x319   :  { %2263 = vadd.xlane.f32.xlu0 %v2262_v52 }
 0x3a6   :  { %v2264_v53 = vpop.xlane.xlu0 %2263 }
 0x3a7   :  { %v2265_v55 = vmax.f32 %v2264_v53, 1e-24 }
 0x3a9   :  { %3051 = vrsqrt.f32 %v2265_v55 }
 0x3b3   :  { %v3052_v56 = vpop.eup %3051 }
 0x3b4   :  { %v2267_v57 = vmul.f32 %v3052_v56, %v2255_v48 }
 0x3b6   :  { %2268 = vst.msk [vmem:[#allocation3] sm:$0x3] %vm2261_vm8, %v2267_v57 }
 0x3b7   :  { %3064 = shalt.err (!%p3061_p4)
}
 0x3b8   :  { %s3065_s26 = scalar_lea.hbm %s4072_s8, 32 }
 0x3b9   :  { %p3066_p5 = scmp.ne.s32.totalorder %s4072_s8, %s3065_s26  ;;  %p3069_p6 = scmp.lt.u32.totalorder %s3065_s26, %s4072_s8 }
 0x3bb   :  { %p3071_p7 = pnand %p3069_p6, %p3066_p5 }
 0x3bd   :  { %3074 = shalt.err (!%p3071_p7)
}
 0x3be   :  { %2280 = dma.vmem_to_hbm [thread:$0]  %s2278_s24, 32, %s4072_s8, [#allocation4]  }
 0x3bf   :  { %3075 = dma.done.wait [#allocation4], 32  }
 0x3c0   :  { %3076 = vsyncadd [#allocation4], 4294967264 }
 0x3c1   :  { %2286 = vsyncpa [#allocation4], 1 }

// kernel: _lambda_.4
= control target key start
LH: loop header
LB: loop body
LE: loop exit
PB: predicated region body
PF: predicated region fallthrough
CT: control target
= control target key end

     0   :  { %s4220_s13 = smov 0   ;;  %s4916_s0 = inlined_call_operand.vmem [shape: f32[2,64,64], index: 0, kind: input, shape index: {}]   ;;  %s4917_s1 = inlined_call_operand.vmem [shape: bf16[9,16,64], index: 1, kind: input, shape index: {}]   ;;  %s4918_s2 = inlined_call_operand.vmem [shape: bf16[16,64], index: 2, kind: input, shape index: {}]   ;;  %s4919_s3 = inlined_call_operand.vmem [shape: bf16[9,16,16], index: 3, kind: input, shape index: {}]   ;;  %s4920_s4 = inlined_call_operand.vmem [shape: bf16[9,64,64], index: 4, kind: input, shape index: {}]   ;;  %s4921_s5 = inlined_call_operand.vmem [shape: f32[1,64], index: 5, kind: input, shape index: {}]   ;;  %s4922_s6 = inlined_call_operand.vmem [shape: f32[64,64], index: 6, kind: input, shape index: {}]   ;;  %s4923_s7 = inlined_call_operand.vmem [shape: bf16[9,64,128], index: 7, kind: input, shape index: {}]   ;;  %s4924_s8 = inlined_call_operand.vmem [shape: f32[1,128], index: 8, kind: input, shape index: {}]   ;;  %s4925_s9 = inlined_call_operand.vmem [shape: bf16[64,128], index: 9, kind: input, shape index: {}]   ;;  %s4926_s10 = inlined_call_operand.vmem [shape: f32[2,16,128], index: 10, kind: output, shape index: {}]  }
   0x1 LB: > { %s3083_s14 = sadd.s32 4294967295, %s4160_s13   ;;  %p3087_p0 = scmp.ge.s32.totalorder %s4160_s13, 1  ;;  %s4160_s13 = sphi %s4220_s13, %s20_s13  }
   0x2   : > { %p312_p1 = scmp.lt.s32.totalorder %s4160_s13, 3 }
   0x4   : > { %p313_p2 = pnand %p3087_p0, %p312_p1 }
   0x5   : > { %p350_p3 = scmp.lt.s32.totalorder (!%p313_p2), %s3083_s14, 1  ;;  %v4162_v0 = vmov (!%p313_p2), 0.0   ;;  %vm4163_vm0 = vmmov (!%p313_p2), 0   ;;  %vm408_vm9 = vcmask (!%p313_p2), 523264   ;;  %v4047_v29 = vld [vmem:[%s4917_s1] sm:$0xff] (!%p313_p2)   ;;  %v4049_v30 = vld [vmem:[%s4917_s1 + $0x10] sm:$0xff] (!%p313_p2)  }
   0x6   : > { %316 = sbr.rel (%p313_p2) target bundleno = 1469 (0x5bd), region = 60  ;;  %3565 = vmatprep.subr.bf16.mxu1 (!%p313_p2), %v4162_v0  ;;  %3573 = vmatprep.mubr.msk.bf16.mxu1 (!%p313_p2), %vm4163_vm0, %v4162_v0  ;;  %v4048_v31 = vld [vmem:[%s4917_s1 + $0x8] sm:$0xff] (!%p313_p2)   ;;  %v4050_v32 = vld [vmem:[%s4917_s1 + $0x18] sm:$0xff] (!%p313_p2)   ;;  %v4051_v33 = vld [vmem:[%s4917_s1 + $0x20] sm:$0xff] (!%p313_p2)   ;;  %vm1711_vm12 = vcmask (!%p313_p2), 130048  }
   0x7   : > { %3613 = vmatprep.subr.bf16.mxu0 (!%p313_p2), %v4162_v0  ;;  %3621 = vmatprep.mubr.msk.bf16.mxu0 (!%p313_p2), %vm4163_vm0, %v4162_v0  ;;  %v4052_v34 = vld [vmem:[%s4917_s1 + $0x28] sm:$0xff] (!%p313_p2)   ;;  %v4053_v35 = vld [vmem:[%s4917_s1 + $0x30] sm:$0xff] (!%p313_p2)   ;;  %v4054_v36 = vld [vmem:[%s4917_s1 + $0x38] sm:$0xff] (!%p313_p2)  }
   0x8   : > { %v4056_v37 = vld [vmem:[%s4920_s4 + $0x20] sm:$0xff] (!%p313_p2)   ;;  %v4057_v38 = vld [vmem:[%s4920_s4 + $0x28] sm:$0xff] (!%p313_p2)   ;;  %v4058_v39 = vld [vmem:[%s4920_s4 + $0x30] sm:$0xff] (!%p313_p2)  }
   0x9   : > { %v4055_v40 = vld [vmem:[%s4917_s1 + $0x40] sm:$0xff] (!%p313_p2)   ;;  %v4059_v41 = vld [vmem:[%s4920_s4 + $0x38] sm:$0xff] (!%p313_p2)   ;;  %v4061_v63 = vld [vmem:[%s4920_s4 + $0x8] sm:$0xff] (!%p313_p2)  }
   0xa   : > { %v4060_v56 = vld [vmem:[%s4920_s4] sm:$0xff] (!%p313_p2)  }
   0xd   : > { %s4928_s14 = smov (!%p350_p3, %s3083_s14), 1 }
   0xe   : > { %s3391_s15 = sshll.u32 %s4928_s14, 6  ;;  %s3392_s20 = sshll.u32 %s4928_s14, 4 }
   0xf   : > { %s4240_s18 = scalar_lea.vmem %s4916_s0, %s3391_s15  ;;  %s359_s23 = scalar_lea.vmem %s4926_s10, %s3392_s20 }
  0x10   : > { %v361_v1 = vld [vmem:[%s4240_s18] sm:$0xff]  ;;  %v362_v2 = vld [vmem:[%s4240_s18 + $0x8] sm:$0xff]  ;;  %v363_v3 = vld [vmem:[%s4240_s18 + $0x10] sm:$0xff] }
  0x11   : > { %vm369_vm1 = vcmp.ge.f32.partialorder %v361_v1, 0.0  ;;  %vm370_vm2 = vcmp.ge.f32.partialorder %v362_v2, 0.0  ;;  %v377_v4 = vmul.f32 0.2, %v361_v1  ;;  %v378_v5 = vmul.f32 0.2, %v362_v2 }
  0x12   : > { %v364_v6 = vld [vmem:[%s4240_s18 + $0x18] sm:$0xff]  ;;  %vm371_vm3 = vcmp.ge.f32.partialorder %v363_v3, 0.0  ;;  %v379_v7 = vmul.f32 0.2, %v363_v3  ;;  %v365_v8 = vld [vmem:[%s4240_s18 + $0x20] sm:$0xff]  ;;  %v366_v9 = vld [vmem:[%s4240_s18 + $0x28] sm:$0xff] }
  0x13   : > { %v385_v10 = vsel %vm369_vm1, %v361_v1, %v377_v4  ;;  %v386_v11 = vsel %vm370_vm2, %v362_v2, %v378_v5  ;;  %vm372_vm4 = vcmp.ge.f32.partialorder %v364_v6, 0.0  ;;  %v380_v12 = vmul.f32 0.2, %v364_v6  ;;  %v367_v13 = vld [vmem:[%s4240_s18 + $0x30] sm:$0xff]  ;;  %v368_v14 = vld [vmem:[%s4240_s18 + $0x38] sm:$0xff]  ;;  %v4064_v4 = vld [vmem:[%s4920_s4 + $0x40] sm:$0xff]  }
  0x14   : > { %v4250_v15 = vpack.c.bf16 %v386_v11, %v385_v10  ;;  %v387_v16 = vsel %vm371_vm3, %v363_v3, %v379_v7  ;;  %vm373_vm5 = vcmp.ge.f32.partialorder %v365_v8, 0.0  ;;  %vm374_vm6 = vcmp.ge.f32.partialorder %v366_v9, 0.0  ;;  %v4062_v1 = vld [vmem:[%s4920_s4 + $0x10] sm:$0xff]   ;;  %v4063_v2 = vld [vmem:[%s4920_s4 + $0x18] sm:$0xff]  }
  0x15   : > { %v388_v17 = vsel %vm372_vm4, %v364_v6, %v380_v12  ;;  %v381_v18 = vmul.f32 0.2, %v365_v8  ;;  %v382_v19 = vmul.f32 0.2, %v366_v9  ;;  %v383_v21 = vmul.f32 0.2, %v367_v13 }
  0x16   : > { %3566 = vmatpush3.bf16.msra.mxu1 %v4250_v15  ;;  %v4253_v20 = vpack.c.bf16 %v388_v17, %v387_v16  ;;  %v384_v22 = vmul.f32 0.2, %v368_v14  ;;  %3614 = vmatpush3.bf16.msra.mxu0 %v4250_v15  ;;  %vm375_vm7 = vcmp.ge.f32.partialorder %v367_v13, 0.0  ;;  %vm376_vm8 = vcmp.ge.f32.partialorder %v368_v14, 0.0  ;;  %v4066_v10 = vld [vmem:[%s4920_s4 + $0x50] sm:$0xff]   ;;  %v4067_v11 = vld [vmem:[%s4920_s4 + $0x58] sm:$0xff]  }
  0x17   : > { %3567 = vmatprep.subr.bf16.mxu1 %v4162_v0  ;;  %v389_v23 = vsel %vm373_vm5, %v365_v8, %v381_v18  ;;  %v390_v24 = vsel %vm374_vm6, %v366_v9, %v382_v19  ;;  %3615 = vmatprep.subr.bf16.mxu0 %v4162_v0  ;;  %v391_v26 = vsel %vm375_vm7, %v367_v13, %v383_v21  ;;  %v4065_v9 = vld [vmem:[%s4920_s4 + $0x48] sm:$0xff]   ;;  %v4068_v13 = vld [vmem:[%s4920_s4 + $0x60] sm:$0xff]   ;;  %v4070_v19 = vld [vmem:[%s4920_s4 + $0x70] sm:$0xff]  }
  0x18   : > { %v4259_v25 = vpack.c.bf16 %v390_v24, %v389_v23  ;;  %v392_v27 = vsel %vm376_vm8, %v368_v14, %v384_v22  ;;  %v4069_v18 = vld [vmem:[%s4920_s4 + $0x68] sm:$0xff]   ;;  %v4072_v22 = vld [vmem:[%s4920_s4 + $0x80] sm:$0xff]  }
  0x19   : > { %v4265_v28 = vpack.c.bf16 %v392_v27, %v391_v26  ;;  %v4073_v27 = vld [vmem:[%s4920_s4 + $0x88] sm:$0xff]  }
  0x1a   : > { %3568 = vmatpush3.bf16.msra.mxu1 %v4253_v20  ;;  %3616 = vmatpush3.bf16.msra.mxu0 %v4253_v20 }
  0x1b   : > { %3569 = vmatprep.subr.bf16.mxu1 %v4162_v0  ;;  %3617 = vmatprep.subr.bf16.mxu0 %v4162_v0 }
  0x1e   : > { %3570 = vmatpush3.bf16.msra.mxu1 %v4259_v25  ;;  %3618 = vmatpush3.bf16.msra.mxu0 %v4259_v25 }
  0x1f   : > { %3571 = vmatprep.subr.bf16.mxu1 %v4162_v0  ;;  %3619 = vmatprep.subr.bf16.mxu0 %v4162_v0 }
  0x22   : > { %3572 = vmatpush3.bf16.msra.mxu1 %v4265_v28  ;;  %3620 = vmatpush3.bf16.msra.mxu0 %v4265_v28 }
  0x23   : > { %3577 = vmatprep.subr.bf16.mxu1 %v4162_v0  ;;  %3637 = vmatprep.subr.bf16.mxu0 %v4162_v0 }
  0x25   : > { %3574 = vmatmul.mubr.msk.bf16.vlgmr.msra.gmra.mrb[0].mxu1 %vm408_vm9, %v4047_v29  ;;  %3622 = vmatmul.mubr.msk.bf16.vlgmr.msra.gmra.mrb[0].mxu0 %vm408_vm9, %v4049_v30  ;;  %v4075_v29 = vld [vmem:[%s4920_s4 + $0x98] sm:$0xff]  }
  0x26   : > { %3578 = vmatpush3.bf16.msra.mxu1 %v4250_v15  ;;  %3585 = vmatprep.mubr.msk.bf16.mxu1 %vm4163_vm0, %v4162_v0 }
  0x27   : > { %3579 = vmatprep.subr.bf16.mxu1 %v4162_v0  ;;  %3638 = vmatpush3.bf16.msra.mxu0 %v4250_v15 }
  0x28   : > { %3639 = vmatprep.subr.bf16.mxu0 %v4162_v0  ;;  %3645 = vmatprep.mubr.msk.bf16.mxu0 %vm4163_vm0, %v4162_v0 }
  0x2a   : > { %3580 = vmatpush3.bf16.msra.mxu1 %v4253_v20 }
  0x2b   : > { %3581 = vmatprep.subr.bf16.mxu1 %v4162_v0  ;;  %3640 = vmatpush3.bf16.msra.mxu0 %v4253_v20 }
  0x2c   : > { %3641 = vmatprep.subr.bf16.mxu0 %v4162_v0 }
  0x2e   : > { %3582 = vmatpush3.bf16.msra.mxu1 %v4259_v25 }
  0x2f   : > { %3583 = vmatprep.subr.bf16.mxu1 %v4162_v0  ;;  %3642 = vmatpush3.bf16.msra.mxu0 %v4259_v25 }
  0x30   : > { %3643 = vmatprep.subr.bf16.mxu0 %v4162_v0 }
  0x32   : > { %3584 = vmatpush3.bf16.msra.mxu1 %v4265_v28 }
  0x33   : > { %3644 = vmatpush3.bf16.msra.mxu0 %v4265_v28  ;;  %3589 = vmatprep.subr.bf16.mxu1 %v4162_v0 }
  0x34   : > { %3661 = vmatprep.subr.bf16.mxu0 %v4162_v0 }
  0x35   : > { %3586 = vmatmul.mubr.msk.bf16.vlgmr.msra.gmra.mrb[4].mxu1 %vm408_vm9, %v4048_v31  ;;  %v4076_v31 = vld [vmem:[%s4920_s4 + $0xa0] sm:$0xff]  }
  0x36   : > { %3646 = vmatmul.mubr.msk.bf16.vlgmr.msra.gmra.mrb[4].mxu0 %vm408_vm9, %v4050_v32  ;;  %3597 = vmatprep.mubr.msk.bf16.mxu1 %vm4163_vm0, %v4162_v0 }
  0x37   : > { %3662 = vmatpush3.bf16.msra.mxu0 %v4250_v15  ;;  %3669 = vmatprep.mubr.msk.bf16.mxu0 %vm4163_vm0, %v4162_v0 }
  0x38   : > { %3663 = vmatprep.subr.bf16.mxu0 %v4162_v0  ;;  %3590 = vmatpush3.bf16.msra.mxu1 %v4056_v37  ;;  %v4078_v37 = vld [vmem:[%s4920_s4 + $0xb0] sm:$0xff]  }
  0x39   : > { %3591 = vmatprep.subr.bf16.mxu1 %v4162_v0 }
  0x3b   : > { %3664 = vmatpush3.bf16.msra.mxu0 %v4253_v20 }
  0x3c   : > { %3665 = vmatprep.subr.bf16.mxu0 %v4162_v0  ;;  %3592 = vmatpush3.bf16.msra.mxu1 %v4057_v38  ;;  %v4079_v38 = vld [vmem:[%s4920_s4 + $0xb8] sm:$0xff]  }
  0x3d   : > { %3593 = vmatprep.subr.bf16.mxu1 %v4162_v0 }
  0x3f   : > { %3666 = vmatpush3.bf16.msra.mxu0 %v4259_v25 }
  0x40   : > { %3667 = vmatprep.subr.bf16.mxu0 %v4162_v0  ;;  %3594 = vmatpush3.bf16.msra.mxu1 %v4058_v39 }
  0x41   : > { %3595 = vmatprep.subr.bf16.mxu1 %v4162_v0 }
  0x43   : > { %3668 = vmatpush3.bf16.msra.mxu0 %v4265_v28 }
  0x44   : > { %3685 = vmatprep.subr.bf16.mxu0 %v4162_v0  ;;  %3596 = vmatpush3.bf16.msra.mxu1 %v4059_v41 }
  0x45   : > { %3601 = vmatprep.subr.bf16.mxu1 %v4162_v0 }
  0x46   : > { %3670 = vmatmul.mubr.msk.bf16.vlgmr.msra.gmra.mrb[8].mxu0 %vm408_vm9, %v4051_v33 }
  0x47   : > { %3686 = vmatpush3.bf16.msra.mxu0 %v4250_v15  ;;  %3693 = vmatprep.mubr.msk.bf16.mxu0 %vm4163_vm0, %v4162_v0 }
  0x48   : > { %3687 = vmatprep.subr.bf16.mxu0 %v4162_v0 }
  0x4b   : > { %3688 = vmatpush3.bf16.msra.mxu0 %v4253_v20 }
  0x4c   : > { %3689 = vmatprep.subr.bf16.mxu0 %v4162_v0 }
  0x4f   : > { %3690 = vmatpush3.bf16.msra.mxu0 %v4259_v25 }
  0x50   : > { %3691 = vmatprep.subr.bf16.mxu0 %v4162_v0 }
  0x53   : > { %3692 = vmatpush3.bf16.msra.mxu0 %v4265_v28 }
  0x54   : > { %3709 = vmatprep.subr.bf16.mxu0 %v4162_v0 }
  0x56   : > { %3694 = vmatmul.mubr.msk.bf16.vlgmr.msra.gmra.mrb[12].mxu0 %vm408_vm9, %v4052_v34 }
  0x57   : > { %3710 = vmatpush3.bf16.msra.mxu0 %v4250_v15  ;;  %3717 = vmatprep.mubr.msk.bf16.mxu0 %vm4163_vm0, %v4162_v0 }
  0x58   : > { %3711 = vmatprep.subr.bf16.mxu0 %v4162_v0 }
  0x5b   : > { %3712 = vmatpush3.bf16.msra.mxu0 %v4253_v20 }
  0x5c   : > { %3713 = vmatprep.subr.bf16.mxu0 %v4162_v0 }
  0x5f   : > { %3714 = vmatpush3.bf16.msra.mxu0 %v4259_v25 }
  0x60   : > { %3715 = vmatprep.subr.bf16.mxu0 %v4162_v0 }
  0x63   : > { %3716 = vmatpush3.bf16.msra.mxu0 %v4265_v28 }
  0x64   : > { %3733 = vmatprep.subr.bf16.mxu0 %v4162_v0 }
  0x66   : > { %3718 = vmatmul.mubr.msk.bf16.vlgmr.msra.gmra.mrb[16].mxu0 %vm408_vm9, %v4053_v35 }
  0x67   : > { %3734 = vmatpush3.bf16.msra.mxu0 %v4250_v15  ;;  %3741 = vmatprep.mubr.msk.bf16.mxu0 %vm4163_vm0, %v4162_v0 }
  0x68   : > { %3735 = vmatprep.subr.bf16.mxu0 %v4162_v0 }
  0x6b   : > { %3736 = vmatpush3.bf16.msra.mxu0 %v4253_v20 }
  0x6c   : > { %3737 = vmatprep.subr.bf16.mxu0 %v4162_v0 }
  0x6f   : > { %3738 = vmatpush3.bf16.msra.mxu0 %v4259_v25 }
  0x70   : > { %3739 = vmatprep.subr.bf16.mxu0 %v4162_v0 }
  0x73   : > { %3740 = vmatpush3.bf16.msra.mxu0 %v4265_v28 }
  0x74   : > { %3757 = vmatprep.subr.bf16.mxu0 %v4162_v0 }
  0x76   : > { %3742 = vmatmul.mubr.msk.bf16.vlgmr.msra.gmra.mrb[20].mxu0 %vm408_vm9, %v4054_v36  ;;  %v4077_v36 = vld [vmem:[%s4920_s4 + $0xa8] sm:$0xff]  }
  0x77   : > { %3758 = vmatpush3.bf16.msra.mxu0 %v4250_v15  ;;  %3765 = vmatprep.mubr.msk.bf16.mxu0 %vm4163_vm0, %v4162_v0 }
  0x78   : > { %3759 = vmatprep.subr.bf16.mxu0 %v4162_v0 }
  0x7b   : > { %3760 = vmatpush3.bf16.msra.mxu0 %v4253_v20  ;;  %v4071_v20 = vld [vmem:[%s4920_s4 + $0x78] sm:$0xff]  }
  0x7c   : > { %3761 = vmatprep.subr.bf16.mxu0 %v4162_v0 }
  0x7f   : > { %3762 = vmatpush3.bf16.msra.mxu0 %v4259_v25 }
  0x80   : > { %3763 = vmatprep.subr.bf16.mxu0 %v4162_v0 }
  0x83   : > { %3764 = vmatpush3.bf16.msra.mxu0 %v4265_v28  ;;  %v4074_v28 = vld [vmem:[%s4920_s4 + $0x90] sm:$0xff]  }
  0x84   : > { %3812 = vmatprep.subr.bf16.mxu0 %v4162_v0 }
  0x86   : > { %3766 = vmatmul.mubr.msk.bf16.vlgmr.msra.gmra.mrb[24].mxu0 %vm408_vm9, %v4055_v40  ;;  %v4080_v40 = vld [vmem:[%s4920_s4 + $0xc0] sm:$0xff]  }
  0x87   : > { %3820 = vmatprep.mubr.msk.bf16.mxu0 %vm4163_vm0, %v4162_v0 }
  0xf8   : > { %v446_v42 = vpop.f32.mrb[0].mxu1  ;;  %v705_v43 = vpop.f32.mrb[0].mxu0 }
  0xf9   : > { %v3575_v44 = vpop.f32.mrb[1].mxu1  ;;  %v3623_v45 = vpop.f32.mrb[1].mxu0 }
  0xfa   : > { %v449_v46 = vpop.f32.mrb[2].mxu1  ;;  %v708_v47 = vpop.f32.mrb[2].mxu0  ;;  %v4081_v45 = vld [vmem:[%s4920_s4 + $0xc8] sm:$0xff]  }
  0xfb   : > { %v453_v48 = vpack.c.bf16 %v449_v46, %v446_v42  ;;  %v3576_v49 = vpop.f32.mrb[3].mxu1  ;;  %v712_v50 = vpack.c.bf16 %v708_v47, %v705_v43  ;;  %v3624_v51 = vpop.f32.mrb[3].mxu0  ;;  %v4082_v46 = vld [vmem:[%s4920_s4 + $0xd0] sm:$0xff]   ;;  %v4083_v47 = vld [vmem:[%s4920_s4 + $0xd8] sm:$0xff]  }
  0xfc   : > { %v4085_v49 = vld [vmem:[%s4920_s4 + $0xe8] sm:$0xff]   ;;  %v4087_v51 = vld [vmem:[%s4920_s4 + $0xf8] sm:$0xff]  }
 0x108   : > { %v507_v52 = vpop.f32.mrb[4].mxu1 }
 0x109   : > { %v3587_v53 = vpop.f32.mrb[5].mxu1  ;;  %v4400_v54 = vpop.f32.mrb[4].mxu0 }
 0x10a   : > { %v510_v55 = vpop.f32.mrb[6].mxu1  ;;  %v3647_v57 = vpop.f32.mrb[5].mxu0  ;;  %v4089_v53 = vld [vmem:[%s4920_s4 + $0x108] sm:$0xff]  }
 0x10b   : > { %v514_v58 = vpack.c.bf16 %v510_v55, %v507_v52  ;;  %v3588_v59 = vpop.f32.mrb[7].mxu1  ;;  %v840_v60 = vpop.f32.mrb[6].mxu0  ;;  %v4088_v52 = vld [vmem:[%s4920_s4 + $0x100] sm:$0xff]   ;;  %v4091_v55 = vld [vmem:[%s4920_s4 + $0x118] sm:$0xff]  }
 0x10c   : > { %v844_v61 = vpack.c.bf16 %v840_v60, %v4400_v54  ;;  %v3648_v62 = vpop.f32.mrb[7].mxu0  ;;  %v4090_v54 = vld [vmem:[%s4920_s4 + $0x110] sm:$0xff]   ;;  %v1604_v60 = vld [vmem:[%s4922_s6] sm:$0xff] }
 0x10d   : > { %3598 = vmatmul.mubr.msk.bf16.vlgmr.msra.gmra.mrb[8].mxu1 %vm408_vm9, %v514_v58 }
 0x10e   : > { %3602 = vmatpush3.bf16.msra.mxu1 %v4060_v56  ;;  %3609 = vmatprep.mubr.msk.bf16.mxu1 %vm4163_vm0, %v4162_v0 }
 0x10f   : > { %3603 = vmatprep.subr.bf16.mxu1 %v4162_v0 }
 0x112   : > { %3604 = vmatpush3.bf16.msra.mxu1 %v4061_v63  ;;  %v4164_v63 = vmov 0.0|0.0  }
 0x113   : > { %3605 = vmatprep.subr.bf16.mxu1 %v4162_v0 }
 0x116   : > { %3606 = vmatpush3.bf16.msra.mxu1 %v4062_v1  ;;  %v1606_v1 = vld [vmem:[%s4922_s6 + $0x10] sm:$0xff] }
 0x117   : > { %3607 = vmatprep.subr.bf16.mxu1 %v4162_v0 }
 0x119   : > { %v4421_v3 = vpop.f32.mrb[8].mxu0 }
 0x11a   : > { %3608 = vmatpush3.bf16.msra.mxu1 %v4063_v2  ;;  %v3671_v5 = vpop.f32.mrb[9].mxu0  ;;  %v1607_v2 = vld [vmem:[%s4922_s6 + $0x18] sm:$0xff] }
 0x11b   : > { %3625 = vmatprep.subr.bf16.mxu1 %v4162_v0  ;;  %v972_v6 = vpop.f32.mrb[10].mxu0  ;;  %v1609_v5 = vld [vmem:[%s4922_s6 + $0x28] sm:$0xff] }
 0x11c   : > { %v976_v7 = vpack.c.bf16 %v972_v6, %v4421_v3  ;;  %v3672_v8 = vpop.f32.mrb[11].mxu0  ;;  %v3990_v3 = vpack.c.bf16 %v1607_v2, %v1606_v1 }
 0x11d   : > { %3610 = vmatmul.mubr.msk.bf16.vlgmr.msra.gmra.mrb[12].mxu1 %vm408_vm9, %v453_v48  ;;  %v4084_v48 = vld [vmem:[%s4920_s4 + $0xe0] sm:$0xff]  }
 0x11e   : > { %3626 = vmatpush3.bf16.msra.mxu1 %v4064_v4  ;;  %3633 = vmatprep.mubr.msk.bf16.mxu1 %vm4163_vm0, %v4162_v0  ;;  %v1608_v4 = vld [vmem:[%s4922_s6 + $0x20] sm:$0xff] }
 0x11f   : > { %3627 = vmatprep.subr.bf16.mxu1 %v4162_v0  ;;  %v3993_v6 = vpack.c.bf16 %v1609_v5, %v1608_v4 }
 0x122   : > { %3628 = vmatpush3.bf16.msra.mxu1 %v4065_v9 }
 0x123   : > { %3629 = vmatprep.subr.bf16.mxu1 %v4162_v0 }
 0x126   : > { %3630 = vmatpush3.bf16.msra.mxu1 %v4066_v10 }
 0x127   : > { %3631 = vmatprep.subr.bf16.mxu1 %v4162_v0 }
 0x129   : > { %v4443_v12 = vpop.f32.mrb[12].mxu0 }
 0x12a   : > { %3632 = vmatpush3.bf16.msra.mxu1 %v4067_v11  ;;  %v3695_v14 = vpop.f32.mrb[13].mxu0  ;;  %v1610_v11 = vld [vmem:[%s4922_s6 + $0x30] sm:$0xff] }
 0x12b   : > { %3649 = vmatprep.subr.bf16.mxu1 %v4162_v0  ;;  %v1104_v15 = vpop.f32.mrb[14].mxu0 }
 0x12c   : > { %v1108_v16 = vpack.c.bf16 %v1104_v15, %v4443_v12  ;;  %v3696_v17 = vpop.f32.mrb[15].mxu0  ;;  %v1611_v12 = vld [vmem:[%s4922_s6 + $0x38] sm:$0xff] }
 0x12d   : > { %3634 = vmatmul.mubr.msk.bf16.vlgmr.msra.gmra.mrb[16].mxu1 %vm408_vm9, %v712_v50  ;;  %v4086_v50 = vld [vmem:[%s4920_s4 + $0xf0] sm:$0xff]   ;;  %v3996_v15 = vpack.c.bf16 %v1611_v12, %v1610_v11 }
 0x12e   : > { %3650 = vmatpush3.bf16.msra.mxu1 %v4068_v13  ;;  %3657 = vmatprep.mubr.msk.bf16.mxu1 %vm4163_vm0, %v4162_v0 }
 0x12f   : > { %3651 = vmatprep.subr.bf16.mxu1 %v4162_v0 }
 0x132   : > { %3652 = vmatpush3.bf16.msra.mxu1 %v4069_v18 }
 0x133   : > { %3653 = vmatprep.subr.bf16.mxu1 %v4162_v0 }
 0x136   : > { %3654 = vmatpush3.bf16.msra.mxu1 %v4070_v19 }
 0x137   : > { %3655 = vmatprep.subr.bf16.mxu1 %v4162_v0 }
 0x139   : > { %v1233_v21 = vpop.f32.mrb[16].mxu0 }
 0x13a   : > { %3656 = vmatpush3.bf16.msra.mxu1 %v4071_v20  ;;  %v3719_v23 = vpop.f32.mrb[17].mxu0 }
 0x13b   : > { %3673 = vmatprep.subr.bf16.mxu1 %v4162_v0  ;;  %v1236_v24 = vpop.f32.mrb[18].mxu0 }
 0x13c   : > { %v1240_v25 = vpack.c.bf16 %v1236_v24, %v1233_v21  ;;  %v3720_v26 = vpop.f32.mrb[19].mxu0 }
 0x13d   : > { %3658 = vmatmul.mubr.msk.bf16.vlgmr.msra.gmra.mrb[20].mxu1 %vm408_vm9, %v844_v61  ;;  %v1605_v61 = vld [vmem:[%s4922_s6 + $0x8] sm:$0xff] }
 0x13e   : > { %3674 = vmatpush3.bf16.msra.mxu1 %v4072_v22  ;;  %3681 = vmatprep.mubr.msk.bf16.mxu1 %vm4163_vm0, %v4162_v0  ;;  %v3987_v62 = vpack.c.bf16 %v1605_v61, %v1604_v60 }
 0x13f   : > { %3675 = vmatprep.subr.bf16.mxu1 %v4162_v0 }
 0x142   : > { %3676 = vmatpush3.bf16.msra.mxu1 %v4073_v27 }
 0x143   : > { %3677 = vmatprep.subr.bf16.mxu1 %v4162_v0 }
 0x146   : > { %3678 = vmatpush3.bf16.msra.mxu1 %v4074_v28 }
 0x147   : > { %3679 = vmatprep.subr.bf16.mxu1 %v4162_v0 }
 0x149   : > { %v1365_v30 = vpop.f32.mrb[20].mxu0 }
 0x14a   : > { %3680 = vmatpush3.bf16.msra.mxu1 %v4075_v29  ;;  %v3743_v32 = vpop.f32.mrb[21].mxu0 }
 0x14b   : > { %3697 = vmatprep.subr.bf16.mxu1 %v4162_v0  ;;  %v1368_v33 = vpop.f32.mrb[22].mxu0 }
 0x14c   : > { %v1372_v34 = vpack.c.bf16 %v1368_v33, %v1365_v30  ;;  %v3744_v35 = vpop.f32.mrb[23].mxu0 }
 0x14d   : > { %3682 = vmatmul.mubr.msk.bf16.vlgmr.msra.gmra.mrb[24].mxu1 %vm408_vm9, %v976_v7 }
 0x14e   : > { %3698 = vmatpush3.bf16.msra.mxu1 %v4076_v31  ;;  %3705 = vmatprep.mubr.msk.bf16.mxu1 %vm4163_vm0, %v4162_v0 }
 0x14f   : > { %3699 = vmatprep.subr.bf16.mxu1 %v4162_v0 }
 0x152   : > { %3700 = vmatpush3.bf16.msra.mxu1 %v4077_v36 }
 0x153   : > { %3701 = vmatprep.subr.bf16.mxu1 %v4162_v0 }
 0x156   : > { %3702 = vmatpush3.bf16.msra.mxu1 %v4078_v37 }
 0x157   : > { %3703 = vmatprep.subr.bf16.mxu1 %v4162_v0 }
 0x159   : > { %v1497_v39 = vpop.f32.mrb[24].mxu0 }
 0x15a   : > { %3704 = vmatpush3.bf16.msra.mxu1 %v4079_v38  ;;  %v3767_v41 = vpop.f32.mrb[25].mxu0 }
 0x15b   : > { %3721 = vmatprep.subr.bf16.mxu1 %v4162_v0  ;;  %v1500_v42 = vpop.f32.mrb[26].mxu0 }
 0x15c   : > { %v1504_v43 = vpack.c.bf16 %v1500_v42, %v1497_v39  ;;  %v3768_v44 = vpop.f32.mrb[27].mxu0 }
 0x15d   : > { %3706 = vmatmul.mubr.msk.bf16.vlgmr.msra.gmra.mrb[28].mxu1 %vm408_vm9, %v1108_v16 }
 0x15e   : > { %3722 = vmatpush3.bf16.msra.mxu1 %v4080_v40  ;;  %3729 = vmatprep.mubr.msk.bf16.mxu1 %vm4163_vm0, %v4162_v0 }
 0x15f   : > { %3723 = vmatprep.subr.bf16.mxu1 %v4162_v0 }
 0x162   : > { %3724 = vmatpush3.bf16.msra.mxu1 %v4081_v45 }
 0x163   : > { %3725 = vmatprep.subr.bf16.mxu1 %v4162_v0 }
 0x166   : > { %3726 = vmatpush3.bf16.msra.mxu1 %v4082_v46 }
 0x167   : > { %3727 = vmatprep.subr.bf16.mxu1 %v4162_v0 }
 0x16a   : > { %3728 = vmatpush3.bf16.msra.mxu1 %v4083_v47 }
 0x16b   : > { %3745 = vmatprep.subr.bf16.mxu1 %v4162_v0 }
 0x16d   : > { %3730 = vmatmul.mubr.msk.bf16.vlgmr.msra.gmra.mrb[32].mxu1 %vm408_vm9, %v1240_v25 }
 0x16e   : > { %3746 = vmatpush3.bf16.msra.mxu1 %v4084_v48  ;;  %3753 = vmatprep.mubr.msk.bf16.mxu1 %vm4163_vm0, %v4162_v0 }
 0x16f   : > { %3747 = vmatprep.subr.bf16.mxu1 %v4162_v0 }
 0x172   : > { %3748 = vmatpush3.bf16.msra.mxu1 %v4085_v49 }
 0x173   : > { %3749 = vmatprep.subr.bf16.mxu1 %v4162_v0 }
 0x176   : > { %3750 = vmatpush3.bf16.msra.mxu1 %v4086_v50 }
 0x177   : > { %3751 = vmatprep.subr.bf16.mxu1 %v4162_v0 }
 0x17a   : > { %3752 = vmatpush3.bf16.msra.mxu1 %v4087_v51 }
 0x17b   : > { %3769 = vmatprep.subr.bf16.mxu1 %v4162_v0 }
 0x17d   : > { %3754 = vmatmul.mubr.msk.bf16.vlgmr.msra.gmra.mrb[36].mxu1 %vm408_vm9, %v1372_v34 }
 0x17e   : > { %3770 = vmatpush3.bf16.msra.mxu1 %v4088_v52  ;;  %3777 = vmatprep.mubr.msk.bf16.mxu1 %vm4163_vm0, %v4162_v0 }
 0x17f   : > { %3771 = vmatprep.subr.bf16.mxu1 %v4162_v0 }
 0x182   : > { %3772 = vmatpush3.bf16.msra.mxu1 %v4089_v53  ;;  %v3235_v53 = vld [vmem:[%s4921_s5] ss:$0 sm:$0xff] }
 0x183   : > { %3773 = vmatprep.subr.bf16.mxu1 %v4162_v0 }
 0x186   : > { %3774 = vmatpush3.bf16.msra.mxu1 %v4090_v54 }
 0x187   : > { %3775 = vmatprep.subr.bf16.mxu1 %v4162_v0 }
 0x18a   : > { %3776 = vmatpush3.bf16.msra.mxu1 %v4091_v55 }
 0x18b   : > { %3986 = vmatprep.subr.bf16.mxu1 %v4164_v63 }
 0x18d   : > { %3778 = vmatmul.mubr.msk.bf16.vlgmr.msra.gmra.mrb[40].mxu1 %vm408_vm9, %v1504_v43 }
 0x18e   : > { %3797 = vmatprep.mubr.msk.f32.mxu1 %vm4163_vm0, %v4162_v0  ;;  %3988 = vmatpush3.bf16.msra.mxu1 %v3987_v62 }
 0x18f   : > { %3989 = vmatprep.subr.bf16.mxu1 %v4164_v63 }
 0x192   : > { %3991 = vmatpush3.bf16.msra.mxu1 %v3990_v3 }
 0x193   : > { %3992 = vmatprep.subr.bf16.mxu1 %v4164_v63 }
 0x196   : > { %3994 = vmatpush3.bf16.msra.mxu1 %v3993_v6 }
 0x197   : > { %3995 = vmatprep.subr.bf16.mxu1 %v4164_v63 }
 0x19a   : > { %3997 = vmatpush3.bf16.msra.mxu1 %v3996_v15 }
 0x19b   : > { %3800 = vmatprep.subr.bf16.mxu1 %v4162_v0 }
 0x1e0   : > { %v585_v56 = vpop.f32.mrb[8].mxu1 }
 0x1e1   : > { %v3599_v57 = vpop.f32.mrb[9].mxu1 }
 0x1e2   : > { %v588_v58 = vpop.f32.mrb[10].mxu1 }
 0x1e3   : > { %v3600_v59 = vpop.f32.mrb[11].mxu1 }
 0x1f0   : > { %v653_v7 = vpop.f32.mrb[12].mxu1 }
 0x1f1   : > { %v654_v8 = vadd.f32 %v653_v7, %v585_v56  ;;  %v3611_v9 = vpop.f32.mrb[13].mxu1 }
 0x1f2   : > { %v656_v10 = vpop.f32.mrb[14].mxu1 }
 0x1f3   : > { %v657_v13 = vadd.f32 %v656_v10, %v588_v58  ;;  %v3612_v14 = vpop.f32.mrb[15].mxu1 }
 0x1f4   : > { %v1691_v14 = vlaneseq }
 0x1f6   : > { %v1692_v15 = vshrl.u32 %v1691_v14, 7 }
 0x200   : > { %v783_v16 = vpop.f32.mrb[16].mxu1 }
 0x201   : > { %v790_v17 = vadd.f32 %v783_v16, %v654_v8  ;;  %v3635_v18 = vpop.f32.mrb[17].mxu1  ;;  %v4102_v8 = vld [vmem:[%s4923_s7 + $0x20] sm:$0xff]   ;;  %v1693_v16 = vsub.s32 0, %v1692_v15 }
 0x202   : > { %v786_v19 = vpop.f32.mrb[18].mxu1  ;;  %3813 = vmatpush3.bf16.msra.mxu0 %v4102_v8 }
 0x203   : > { %v791_v20 = vadd.f32 %v786_v19, %v657_v13  ;;  %v3636_v21 = vpop.f32.mrb[19].mxu1  ;;  %3814 = vmatprep.subr.bf16.mxu0 %v4162_v0 }
 0x210   : > { %v915_v22 = vpop.f32.mrb[20].mxu1 }
 0x211   : > { %v922_v23 = vadd.f32 %v915_v22, %v790_v17  ;;  %v3659_v24 = vpop.f32.mrb[21].mxu1 }
 0x212   : > { %v918_v25 = vpop.f32.mrb[22].mxu1 }
 0x213   : > { %v923_v26 = vadd.f32 %v918_v25, %v791_v20  ;;  %v3660_v27 = vpop.f32.mrb[23].mxu1 }
 0x214   : > { %v4093_v27 = vld [vmem:[%s4919_s3 + $0x8] sm:$0xff]  }
 0x220   : > { %v1047_v28 = vpop.f32.mrb[24].mxu1 }
 0x221   : > { %v1054_v29 = vadd.f32 %v1047_v28, %v922_v23  ;;  %v3683_v30 = vpop.f32.mrb[25].mxu1  ;;  %v4094_v28 = vld [vmem:[%s4919_s3 + $0x10] sm:$0xff]  }
 0x222   : > { %v1050_v31 = vpop.f32.mrb[26].mxu1  ;;  %v4096_v30 = vld [vmem:[%s4919_s3 + $0x20] sm:$0xff]  }
 0x223   : > { %v1055_v32 = vadd.f32 %v1050_v31, %v923_v26  ;;  %v3684_v33 = vpop.f32.mrb[27].mxu1  ;;  %v4092_v26 = vld [vmem:[%s4919_s3] sm:$0xff]   ;;  %v4097_v31 = vld [vmem:[%s4919_s3 + $0x28] sm:$0xff]  }
 0x224   : > { %v4099_v33 = vld [vmem:[%s4919_s3 + $0x38] sm:$0xff]  }
 0x230   : > { %v1179_v34 = vpop.f32.mrb[28].mxu1 }
 0x231   : > { %v1186_v35 = vadd.f32 %v1179_v34, %v1054_v29  ;;  %v3707_v36 = vpop.f32.mrb[29].mxu1  ;;  %v4095_v29 = vld [vmem:[%s4919_s3 + $0x18] sm:$0xff]   ;;  %v4100_v34 = vld [vmem:[%s4919_s3 + $0x40] sm:$0xff]  }
 0x232   : > { %v1182_v37 = vpop.f32.mrb[30].mxu1  ;;  %v4147_v36 = vld [vmem:[%s4240_s18 + $0x8] sm:$0xff] }
 0x233   : > { %v1187_v38 = vadd.f32 %v1182_v37, %v1055_v32  ;;  %v3708_v39 = vpop.f32.mrb[31].mxu1  ;;  %v4098_v32 = vld [vmem:[%s4919_s3 + $0x30] sm:$0xff]  }
 0x234   : > { %v4149_v39 = vld [vmem:[%s4240_s18 + $0x18] sm:$0xff] }
 0x240   : > { %v1311_v40 = vpop.f32.mrb[32].mxu1 }
 0x241   : > { %v1318_v41 = vadd.f32 %v1311_v40, %v1186_v35  ;;  %v3731_v42 = vpop.f32.mrb[33].mxu1  ;;  %v4146_v35 = vld [vmem:[%s4240_s18] sm:$0xff] }
 0x242   : > { %v1314_v43 = vpop.f32.mrb[34].mxu1  ;;  %v397_v37 = vpack.c.bf16 %v4147_v36, %v4146_v35  ;;  %v4151_v42 = vld [vmem:[%s4240_s18 + $0x28] sm:$0xff] }
 0x243   : > { %v1319_v44 = vadd.f32 %v1314_v43, %v1187_v38  ;;  %v3732_v45 = vpop.f32.mrb[35].mxu1  ;;  %v4148_v38 = vld [vmem:[%s4240_s18 + $0x10] sm:$0xff] }
 0x244   : > { %v398_v40 = vpack.c.bf16 %v4149_v39, %v4148_v38  ;;  %v4153_v45 = vld [vmem:[%s4240_s18 + $0x38] sm:$0xff] }
 0x250   : > { %v1443_v46 = vpop.f32.mrb[36].mxu1 }
 0x251   : > { %v1450_v47 = vadd.f32 %v1443_v46, %v1318_v41  ;;  %v3755_v48 = vpop.f32.mrb[37].mxu1  ;;  %v4150_v41 = vld [vmem:[%s4240_s18 + $0x20] sm:$0xff] }
 0x252   : > { %v1446_v49 = vpop.f32.mrb[38].mxu1  ;;  %v399_v43 = vpack.c.bf16 %v4151_v42, %v4150_v41  ;;  %v4103_v48 = vld [vmem:[%s4923_s7 + $0x28] sm:$0xff]  }
 0x253   : > { %v1451_v50 = vadd.f32 %v1446_v49, %v1319_v44  ;;  %v3756_v51 = vpop.f32.mrb[39].mxu1  ;;  %v4152_v44 = vld [vmem:[%s4240_s18 + $0x30] sm:$0xff]  ;;  %3815 = vmatpush3.bf16.msra.mxu0 %v4103_v48  ;;  %v4119_v41 = vld [vmem:[%s4923_s7 + $0x88] sm:$0xff]   ;;  %v4121_v48 = vld [vmem:[%s4923_s7 + $0x98] sm:$0xff]  }
 0x254   : > { %v400_v46 = vpack.c.bf16 %v4153_v45, %v4152_v44  ;;  %3816 = vmatprep.subr.bf16.mxu0 %v4162_v0  ;;  %v4104_v49 = vld [vmem:[%s4923_s7 + $0x30] sm:$0xff]  }
 0x255   : > { %v4120_v44 = vld [vmem:[%s4923_s7 + $0x90] sm:$0xff]  }
 0x257   : > { %3817 = vmatpush3.bf16.msra.mxu0 %v4104_v49  ;;  %v4122_v49 = vld [vmem:[%s4923_s7 + $0xa0] sm:$0xff]  }
 0x258   : > { %3818 = vmatprep.subr.bf16.mxu0 %v4162_v0 }
 0x260   : > { %v1575_v52 = vpop.f32.mrb[40].mxu1 }
 0x261   : > { %v1582_v54 = vadd.f32 %v1575_v52, %v1450_v47  ;;  %v3779_v55 = vpop.f32.mrb[41].mxu1  ;;  %v4101_v47 = vld [vmem:[%s4918_s2] sm:$0xff]  }
 0x262   : > { %v1578_v56 = vpop.f32.mrb[42].mxu1 }
 0x263   : > { %v1591_v57 = vadd.f32 %v3235_v53, %v1582_v54  ;;  %v1583_v58 = vadd.f32 %v1578_v56, %v1451_v50  ;;  %v3780_v59 = vpop.f32.mrb[43].mxu1  ;;  %v4105_v50 = vld [vmem:[%s4923_s7 + $0x38] sm:$0xff]  }
 0x264   : > { %3819 = vmatpush3.bf16.msra.mxu0 %v4105_v50  ;;  %v4106_v59 = vld [vmem:[%s4923_s7] sm:$0xff]   ;;  %v4123_v50 = vld [vmem:[%s4923_s7 + $0xa8] sm:$0xff]  }
 0x265   : > { %v1592_v60 = vadd.f32 %v3235_v53, %v1583_v58  ;;  %v1593_v61 = vsel %vm408_vm9, %v1591_v57, 0.0  ;;  %3824 = vmatprep.subr.bf16.mxu0 %v4162_v0 }
 0x267   : > { %v1594_v62 = vsel %vm408_vm9, %v1592_v60, 0.0 }
 0x268   : > { %v1595_v63 = vadd.f32 %v1594_v62, %v1593_v61  ;;  %v4107_v62 = vld [vmem:[%s4923_s7 + $0x8] sm:$0xff]  }
 0x26a   : > { %v1596_v1 = vrot.slane %v1595_v63, 4 }
 0x26c   : > { %v1597_v2 = vadd.f32 %v1596_v1, %v1595_v63 }
 0x26e   : > { %v1598_v3 = vrot.slane %v1597_v2, 2 }
 0x270   : > { %v1599_v4 = vadd.f32 %v1598_v3, %v1597_v2  ;;  %v4108_v2 = vld [vmem:[%s4923_s7 + $0x10] sm:$0xff]  }
 0x272   : > { %v1600_v5 = vrot.slane %v1599_v4, 1 }
 0x274   : > { %v1601_v6 = vadd.f32 %v1600_v5, %v1599_v4 }
 0x276   : > { %v1603_v7 = vmul.f32 0.0625, %v1601_v6  ;;  %v4109_v6 = vld [vmem:[%s4923_s7 + $0x18] sm:$0xff]  }
 0x278   : > { %3798 = vmatmul.mubr.msk.f32.vlgmr.msra.gmra.mrb[44].mxu1 %vm408_vm9, %v1603_v7 }
 0x279   : > { %3802 = vmatprep.mubr.msk.bf16.mxu1 %vm4163_vm0, %v4162_v0 }
 0x34b   : > { %v1681_v9 = vpop.f32.mrb[44].mxu1 }
 0x34c   : > { %v3237_v10 = vmul.f32 -1.442695, %v1681_v9  ;;  %v3799_v11 = vpop.f32.mrb[45].mxu1  ;;  %v4110_v9 = vld [vmem:[%s4923_s7 + $0x40] sm:$0xff]  }
 0x34e   : > { %4142 = vpow2.f32 %v3237_v10 }
 0x358   : > { %v4143_v12 = vpop.eup %4142 }
 0x359   : > { %v1688_v13 = vadd.f32 1.0, %v4143_v12 }
 0x35b   : > { %4144 = vrcp.f32 %v1688_v13  ;;  %v4111_v13 = vld [vmem:[%s4923_s7 + $0x48] sm:$0xff]  }
 0x365   : > { %v4145_v17 = vpop.eup %4144 }
 0x366   : > { %v1694_v18 = vrot.slane %v4145_v17, %v1693_v16  ;;  %v4112_v16 = vld [vmem:[%s4923_s7 + $0x50] sm:$0xff]  }
 0x368   : > { %v1695_v19 = vmul.f32 %v1694_v18, %v1591_v57  ;;  %v1696_v20 = vmul.f32 %v1694_v18, %v1592_v60 }
 0x36a   : > { %vm1697_vm10 = vcmp.ge.f32.partialorder %v1695_v19, 0.0  ;;  %vm1698_vm11 = vcmp.ge.f32.partialorder %v1696_v20, 0.0  ;;  %v1699_v21 = vmul.f32 0.2, %v1695_v19  ;;  %v1700_v22 = vmul.f32 0.2, %v1696_v20 }
 0x36c   : > { %v1701_v23 = vsel %vm1697_vm10, %v1695_v19, %v1699_v21  ;;  %v1702_v24 = vsel %vm1698_vm11, %v1696_v20, %v1700_v22  ;;  %v4113_v20 = vld [vmem:[%s4923_s7 + $0x58] sm:$0xff]  }
 0x36d   : > { %v1703_v25 = vpack.c.bf16 %v1702_v24, %v1701_v23  ;;  %v4114_v23 = vld [vmem:[%s4923_s7 + $0x60] sm:$0xff]  }
 0x36f   : > { %3801 = vmatpush3.bf16.msra.mxu1 %v1703_v25 }
 0x370   : > { %3806 = vmatprep.subr.bf16.mxu1 %v4162_v0 }
 0x372   : > { %3803 = vmatmul.mubr.msk.bf16.vlgmr.msra.gmra.mrb[48].mxu1 %vm1711_vm12, %v4092_v26 }
 0x373   : > { %3807 = vmatpush3.bf16.msra.mxu1 %v1703_v25  ;;  %3808 = vmatprep.mubr.msk.bf16.mxu1 %vm4163_vm0, %v4162_v0 }
 0x374   : > { %3836 = vmatprep.subr.bf16.mxu1 %v4162_v0 }
 0x37a   : > { %3809 = vmatmul.mubr.msk.bf16.vlgmr.msra.gmra.mrb[52].mxu1 %vm1711_vm12, %v4093_v27  ;;  %v4115_v27 = vld [vmem:[%s4923_s7 + $0x68] sm:$0xff]  }
 0x37b   : > { %3837 = vmatpush3.bf16.msra.mxu1 %v1703_v25  ;;  %3838 = vmatprep.mubr.msk.bf16.mxu1 %vm4163_vm0, %v4162_v0 }
 0x37c   : > { %3854 = vmatprep.subr.bf16.mxu1 %v4162_v0 }
 0x382   : > { %3839 = vmatmul.mubr.msk.bf16.vlgmr.msra.gmra.mrb[56].mxu1 %vm1711_vm12, %v4094_v28 }
 0x383   : > { %3855 = vmatpush3.bf16.msra.mxu1 %v1703_v25  ;;  %3856 = vmatprep.mubr.msk.bf16.mxu1 %vm4163_vm0, %v4162_v0 }
 0x384   : > { %3872 = vmatprep.subr.bf16.mxu1 %v4162_v0 }
 0x38a   : > { %3857 = vmatmul.mubr.msk.bf16.vlgmr.msra.gmra.mrb[60].mxu1 %vm1711_vm12, %v4095_v29 }
 0x38b   : > { %3873 = vmatpush3.bf16.msra.mxu1 %v1703_v25  ;;  %3874 = vmatprep.mubr.msk.bf16.mxu1 %vm4163_vm0, %v4162_v0 }
 0x38c   : > { %3890 = vmatprep.subr.bf16.mxu1 %v4162_v0 }
 0x392   : > { %3875 = vmatmul.mubr.msk.bf16.vlgmr.msra.gmra.mrb[64].mxu1 %vm1711_vm12, %v4096_v30  ;;  %v4116_v30 = vld [vmem:[%s4923_s7 + $0x70] sm:$0xff]  }
 0x393   : > { %3891 = vmatpush3.bf16.msra.mxu1 %v1703_v25  ;;  %3892 = vmatprep.mubr.msk.bf16.mxu1 %vm4163_vm0, %v4162_v0 }
 0x394   : > { %3908 = vmatprep.subr.bf16.mxu1 %v4162_v0 }
 0x39a   : > { %3893 = vmatmul.mubr.msk.bf16.vlgmr.msra.gmra.mrb[68].mxu1 %vm1711_vm12, %v4097_v31 }
 0x39b   : > { %3909 = vmatpush3.bf16.msra.mxu1 %v1703_v25  ;;  %3910 = vmatprep.mubr.msk.bf16.mxu1 %vm4163_vm0, %v4162_v0 }
 0x39c   : > { %3926 = vmatprep.subr.bf16.mxu1 %v4162_v0 }
 0x3a2   : > { %3911 = vmatmul.mubr.msk.bf16.vlgmr.msra.gmra.mrb[72].mxu1 %vm1711_vm12, %v4098_v32 }
 0x3a3   : > { %3927 = vmatpush3.bf16.msra.mxu1 %v1703_v25  ;;  %3928 = vmatprep.mubr.msk.bf16.mxu1 %vm4163_vm0, %v4162_v0 }
 0x3a4   : > { %3944 = vmatprep.subr.bf16.mxu1 %v4162_v0 }
 0x3aa   : > { %3929 = vmatmul.mubr.msk.bf16.vlgmr.msra.gmra.mrb[76].mxu1 %vm1711_vm12, %v4099_v33 }
 0x3ab   : > { %3945 = vmatpush3.bf16.msra.mxu1 %v1703_v25  ;;  %3946 = vmatprep.mubr.msk.bf16.mxu1 %vm4163_vm0, %v4162_v0 }
 0x3ac   : > { %3962 = vmatprep.subr.bf16.mxu1 %v4162_v0 }
 0x3b2   : > { %3947 = vmatmul.mubr.msk.bf16.vlgmr.msra.gmra.mrb[80].mxu1 %vm1711_vm12, %v4100_v34  ;;  %v4117_v34 = vld [vmem:[%s4923_s7 + $0x78] sm:$0xff]  }
 0x3b3   : > { %3963 = vmatpush3.bf16.msra.mxu1 %v397_v37  ;;  %3970 = vmatprep.mubr.msk.bf16.mxu1 %vm4163_vm0, %v4162_v0  ;;  %v4118_v37 = vld [vmem:[%s4923_s7 + $0x80] sm:$0xff]  }
 0x3b4   : > { %3964 = vmatprep.subr.bf16.mxu1 %v4162_v0 }
 0x3b7   : > { %3965 = vmatpush3.bf16.msra.mxu1 %v398_v40 }
 0x3b8   : > { %3966 = vmatprep.subr.bf16.mxu1 %v4162_v0 }
 0x3bb   : > { %3967 = vmatpush3.bf16.msra.mxu1 %v399_v43 }
 0x3bc   : > { %3968 = vmatprep.subr.bf16.mxu1 %v4162_v0 }
 0x3bf   : > { %3969 = vmatpush3.bf16.msra.mxu1 %v400_v46 }
 0x3c2   : > { %3971 = vmatmul.mubr.msk.bf16.vlgmr.msra.gmra.mrb[84].mxu1 %vm408_vm9, %v4101_v47 }
 0x445   : > { %v1749_v51 = vpop.f32.mrb[48].mxu1 }
 0x446   : > { %v3804_v52 = vpop.f32.mrb[49].mxu1 }
 0x447   : > { %v1752_v53 = vpop.f32.mrb[50].mxu1 }
 0x448   : > { %v1756_v54 = vpack.c.bf16 %v1752_v53, %v1749_v51  ;;  %v3805_v55 = vpop.f32.mrb[51].mxu1  ;;  %v4124_v53 = vld [vmem:[%s4923_s7 + $0xb0] sm:$0xff]  }
 0x44d   : > { %v1810_v56 = vpop.f32.mrb[52].mxu1 }
 0x44e   : > { %v3810_v57 = vpop.f32.mrb[53].mxu1 }
 0x44f   : > { %v1813_v58 = vpop.f32.mrb[54].mxu1  ;;  %v4125_v57 = vld [vmem:[%s4923_s7 + $0xb8] sm:$0xff]  }
 0x450   : > { %v1817_v60 = vpack.c.bf16 %v1813_v58, %v1810_v56  ;;  %v3811_v61 = vpop.f32.mrb[55].mxu1  ;;  %v4126_v58 = vld [vmem:[%s4923_s7 + $0xc0] sm:$0xff]  }
 0x451   : > { %v4129_v61 = vld [vmem:[%s4923_s7 + $0xd8] sm:$0xff]  }
 0x452   : > { %3821 = vmatmul.mubr.msk.bf16.vlgmr.msra.gmra.mrb[28].mxu0 %vm408_vm9, %v1817_v60  ;;  %v4128_v60 = vld [vmem:[%s4923_s7 + $0xd0] sm:$0xff]  }
 0x453   : > { %3825 = vmatpush3.bf16.msra.mxu0 %v4106_v59  ;;  %3832 = vmatprep.mubr.msk.bf16.mxu0 %vm4163_vm0, %v4162_v0  ;;  %v4127_v59 = vld [vmem:[%s4923_s7 + $0xc8] sm:$0xff]  }
 0x454   : > { %3826 = vmatprep.subr.bf16.mxu0 %v4162_v0 }
 0x455   : > { %v2008_v63 = vpop.f32.mrb[56].mxu1 }
 0x456   : > { %v3840_v1 = vpop.f32.mrb[57].mxu1 }
 0x457   : > { %3827 = vmatpush3.bf16.msra.mxu0 %v4107_v62  ;;  %v2011_v3 = vpop.f32.mrb[58].mxu1  ;;  %v4130_v62 = vld [vmem:[%s4923_s7 + $0xe0] sm:$0xff]   ;;  %v4132_v1 = vld [vmem:[%s4923_s7 + $0xf0] sm:$0xff]  }
 0x458   : > { %3828 = vmatprep.subr.bf16.mxu0 %v4162_v0  ;;  %v2015_v4 = vpack.c.bf16 %v2011_v3, %v2008_v63  ;;  %v3841_v5 = vpop.f32.mrb[59].mxu1  ;;  %v4131_v63 = vld [vmem:[%s4923_s7 + $0xe8] sm:$0xff]   ;;  %v4134_v3 = vld [vmem:[%s4923_s7 + $0x100] sm:$0xff]  }
 0x459   : > { %v4136_v5 = vld [vmem:[%s4923_s7 + $0x110] sm:$0xff]  }
 0x45b   : > { %3829 = vmatpush3.bf16.msra.mxu0 %v4108_v2  ;;  %v4133_v2 = vld [vmem:[%s4923_s7 + $0xf8] sm:$0xff]  }
 0x45c   : > { %3830 = vmatprep.subr.bf16.mxu0 %v4162_v0 }
 0x45d   : > { %v2140_v7 = vpop.f32.mrb[60].mxu1 }
 0x45e   : > { %v3858_v8 = vpop.f32.mrb[61].mxu1 }
 0x45f   : > { %3831 = vmatpush3.bf16.msra.mxu0 %v4109_v6  ;;  %v2143_v10 = vpop.f32.mrb[62].mxu1  ;;  %v4137_v6 = vld [vmem:[%s4923_s7 + $0x118] sm:$0xff]   ;;  %v4139_v8 = vld [vmem:[%s4925_s9 + $0x8] sm:$0xff]  }
 0x460   : > { %3842 = vmatprep.subr.bf16.mxu0 %v4162_v0  ;;  %v2147_v11 = vpack.c.bf16 %v2143_v10, %v2140_v7  ;;  %v3859_v12 = vpop.f32.mrb[63].mxu1  ;;  %v4138_v7 = vld [vmem:[%s4925_s9] sm:$0xff]   ;;  %v4141_v10 = vld [vmem:[%s4925_s9 + $0x18] sm:$0xff]  }
 0x462   : > { %3833 = vmatmul.mubr.msk.bf16.vlgmr.msra.gmra.mrb[28].mxu0 %vm408_vm9, %v1756_v54 }
 0x463   : > { %3843 = vmatpush3.bf16.msra.mxu0 %v4110_v9  ;;  %3850 = vmatprep.mubr.msk.bf16.mxu0 %vm4163_vm0, %v4162_v0  ;;  %v4140_v9 = vld [vmem:[%s4925_s9 + $0x10] sm:$0xff]  }
 0x464   : > { %3844 = vmatprep.subr.bf16.mxu0 %v4162_v0 }
 0x465   : > { %v4719_v14 = vpop.f32.mrb[64].mxu1 }
 0x466   : > { %v3876_v15 = vpop.f32.mrb[65].mxu1 }
 0x467   : > { %3845 = vmatpush3.bf16.msra.mxu0 %v4111_v13  ;;  %v2275_v17 = vpop.f32.mrb[66].mxu1 }
 0x468   : > { %3846 = vmatprep.subr.bf16.mxu0 %v4162_v0  ;;  %v2279_v18 = vpack.c.bf16 %v2275_v17, %v4719_v14  ;;  %v3877_v19 = vpop.f32.mrb[67].mxu1 }
 0x46b   : > { %3847 = vmatpush3.bf16.msra.mxu0 %v4112_v16 }
 0x46c   : > { %3848 = vmatprep.subr.bf16.mxu0 %v4162_v0 }
 0x46d   : > { %v4730_v21 = vpop.f32.mrb[68].mxu1 }
 0x46e   : > { %v3894_v22 = vpop.f32.mrb[69].mxu1 }
 0x46f   : > { %3849 = vmatpush3.bf16.msra.mxu0 %v4113_v20  ;;  %v4735_v24 = vpop.f32.mrb[70].mxu1 }
 0x470   : > { %3860 = vmatprep.subr.bf16.mxu0 %v4162_v0  ;;  %v2411_v25 = vpack.c.bf16 %v4735_v24, %v4730_v21  ;;  %v3895_v26 = vpop.f32.mrb[71].mxu1 }
 0x472   : > { %3851 = vmatmul.mubr.msk.bf16.vlgmr.msra.gmra.mrb[28].mxu0 %vm408_vm9, %v2015_v4  ;;  %v4135_v4 = vld [vmem:[%s4923_s7 + $0x108] sm:$0xff]  }
 0x473   : > { %3861 = vmatpush3.bf16.msra.mxu0 %v4114_v23  ;;  %3868 = vmatprep.mubr.msk.bf16.mxu0 %vm4163_vm0, %v4162_v0 }
 0x474   : > { %3862 = vmatprep.subr.bf16.mxu0 %v4162_v0 }
 0x475   : > { %v4747_v28 = vpop.f32.mrb[72].mxu1 }
 0x476   : > { %v3912_v29 = vpop.f32.mrb[73].mxu1 }
 0x477   : > { %3863 = vmatpush3.bf16.msra.mxu0 %v4115_v27  ;;  %v4752_v31 = vpop.f32.mrb[74].mxu1 }
 0x478   : > { %3864 = vmatprep.subr.bf16.mxu0 %v4162_v0  ;;  %v2543_v32 = vpack.c.bf16 %v4752_v31, %v4747_v28  ;;  %v3913_v33 = vpop.f32.mrb[75].mxu1 }
 0x47b   : > { %3865 = vmatpush3.bf16.msra.mxu0 %v4116_v30 }
 0x47c   : > { %3866 = vmatprep.subr.bf16.mxu0 %v4162_v0 }
 0x47d   : > { %v4761_v35 = vpop.f32.mrb[76].mxu1 }
 0x47e   : > { %v3930_v36 = vpop.f32.mrb[77].mxu1 }
 0x47f   : > { %3867 = vmatpush3.bf16.msra.mxu0 %v4117_v34  ;;  %v4766_v38 = vpop.f32.mrb[78].mxu1 }
 0x480   : > { %3878 = vmatprep.subr.bf16.mxu0 %v4162_v0  ;;  %v2675_v39 = vpack.c.bf16 %v4766_v38, %v4761_v35  ;;  %v3931_v40 = vpop.f32.mrb[79].mxu1 }
 0x482   : > { %3869 = vmatmul.mubr.msk.bf16.vlgmr.msra.gmra.mrb[28].mxu0 %vm408_vm9, %v2147_v11  ;;  %v3381_v11 = vld [vmem:[%s4924_s8] ss:$0 sm:$0xff] }
 0x483   : > { %3879 = vmatpush3.bf16.msra.mxu0 %v4118_v37  ;;  %3886 = vmatprep.mubr.msk.bf16.mxu0 %vm4163_vm0, %v4162_v0 }
 0x484   : > { %3880 = vmatprep.subr.bf16.mxu0 %v4162_v0 }
 0x485   : > { %v4778_v42 = vpop.f32.mrb[80].mxu1 }
 0x486   : > { %v3948_v43 = vpop.f32.mrb[81].mxu1 }
 0x487   : > { %3881 = vmatpush3.bf16.msra.mxu0 %v4119_v41  ;;  %v4783_v45 = vpop.f32.mrb[82].mxu1 }
 0x488   : > { %3882 = vmatprep.subr.bf16.mxu0 %v4162_v0  ;;  %v2807_v46 = vpack.c.bf16 %v4783_v45, %v4778_v42  ;;  %v3949_v47 = vpop.f32.mrb[83].mxu1 }
 0x48b   : > { %3883 = vmatpush3.bf16.msra.mxu0 %v4120_v44 }
 0x48c   : > { %3884 = vmatprep.subr.bf16.mxu0 %v4162_v0 }
 0x48f   : > { %3885 = vmatpush3.bf16.msra.mxu0 %v4121_v48 }
 0x490   : > { %3896 = vmatprep.subr.bf16.mxu0 %v4162_v0 }
 0x492   : > { %3887 = vmatmul.mubr.msk.bf16.vlgmr.msra.gmra.mrb[28].mxu0 %vm408_vm9, %v2279_v18 }
 0x493   : > { %3897 = vmatpush3.bf16.msra.mxu0 %v4122_v49  ;;  %3904 = vmatprep.mubr.msk.bf16.mxu0 %vm4163_vm0, %v4162_v0 }
 0x494   : > { %3898 = vmatprep.subr.bf16.mxu0 %v4162_v0 }
 0x495   : > { %v4803_v51 = vpop.f32.mrb[84].mxu1 }
 0x496   : > { %v3972_v52 = vpop.f32.mrb[85].mxu1 }
 0x497   : > { %3899 = vmatpush3.bf16.msra.mxu0 %v4123_v50  ;;  %v4808_v54 = vpop.f32.mrb[86].mxu1 }
 0x498   : > { %3900 = vmatprep.subr.bf16.mxu0 %v4162_v0  ;;  %v2947_v55 = vpack.c.bf16 %v4808_v54, %v4803_v51  ;;  %v3973_v56 = vpop.f32.mrb[87].mxu1 }
 0x49b   : > { %3901 = vmatpush3.bf16.msra.mxu0 %v4124_v53 }
 0x49c   : > { %3902 = vmatprep.subr.bf16.mxu0 %v4162_v0 }
 0x49f   : > { %3903 = vmatpush3.bf16.msra.mxu0 %v4125_v57 }
 0x4a0   : > { %3914 = vmatprep.subr.bf16.mxu0 %v4162_v0 }
 0x4a2   : > { %3905 = vmatmul.mubr.msk.bf16.vlgmr.msra.gmra.mrb[28].mxu0 %vm408_vm9, %v2411_v25 }
 0x4a3   : > { %3915 = vmatpush3.bf16.msra.mxu0 %v4126_v58  ;;  %3922 = vmatprep.mubr.msk.bf16.mxu0 %vm4163_vm0, %v4162_v0 }
 0x4a4   : > { %3916 = vmatprep.subr.bf16.mxu0 %v4162_v0 }
 0x4a7   : > { %3917 = vmatpush3.bf16.msra.mxu0 %v4127_v59 }
 0x4a8   : > { %3918 = vmatprep.subr.bf16.mxu0 %v4162_v0 }
 0x4ab   : > { %3919 = vmatpush3.bf16.msra.mxu0 %v4128_v60 }
 0x4ac   : > { %3920 = vmatprep.subr.bf16.mxu0 %v4162_v0 }
 0x4af   : > { %3921 = vmatpush3.bf16.msra.mxu0 %v4129_v61 }
 0x4b0   : > { %3932 = vmatprep.subr.bf16.mxu0 %v4162_v0 }
 0x4b2   : > { %3923 = vmatmul.mubr.msk.bf16.vlgmr.msra.gmra.mrb[28].mxu0 %vm408_vm9, %v2543_v32 }
 0x4b3   : > { %3933 = vmatpush3.bf16.msra.mxu0 %v4130_v62  ;;  %3940 = vmatprep.mubr.msk.bf16.mxu0 %vm4163_vm0, %v4162_v0 }
 0x4b4   : > { %3934 = vmatprep.subr.bf16.mxu0 %v4162_v0 }
 0x4b7   : > { %3935 = vmatpush3.bf16.msra.mxu0 %v4131_v63 }
 0x4b8   : > { %3936 = vmatprep.subr.bf16.mxu0 %v4162_v0 }
 0x4bb   : > { %3937 = vmatpush3.bf16.msra.mxu0 %v4132_v1 }
 0x4bc   : > { %3938 = vmatprep.subr.bf16.mxu0 %v4162_v0 }
 0x4bf   : > { %3939 = vmatpush3.bf16.msra.mxu0 %v4133_v2 }
 0x4c0   : > { %3950 = vmatprep.subr.bf16.mxu0 %v4162_v0 }
 0x4c2   : > { %3941 = vmatmul.mubr.msk.bf16.vlgmr.msra.gmra.mrb[28].mxu0 %vm408_vm9, %v2675_v39 }
 0x4c3   : > { %3951 = vmatpush3.bf16.msra.mxu0 %v4134_v3  ;;  %3958 = vmatprep.mubr.msk.bf16.mxu0 %vm4163_vm0, %v4162_v0 }
 0x4c4   : > { %3952 = vmatprep.subr.bf16.mxu0 %v4162_v0 }
 0x4c7   : > { %3953 = vmatpush3.bf16.msra.mxu0 %v4135_v4 }
 0x4c8   : > { %3954 = vmatprep.subr.bf16.mxu0 %v4162_v0 }
 0x4cb   : > { %3955 = vmatpush3.bf16.msra.mxu0 %v4136_v5 }
 0x4cc   : > { %3956 = vmatprep.subr.bf16.mxu0 %v4162_v0 }
 0x4cf   : > { %3957 = vmatpush3.bf16.msra.mxu0 %v4137_v6 }
 0x4d0   : > { %3974 = vmatprep.subr.bf16.mxu0 %v4162_v0 }
 0x4d2   : > { %3959 = vmatmul.mubr.msk.bf16.vlgmr.msra.gmra.mrb[28].mxu0 %vm408_vm9, %v2807_v46 }
 0x4d3   : > { %3975 = vmatpush3.bf16.msra.mxu0 %v4138_v7  ;;  %3982 = vmatprep.mubr.msk.bf16.mxu0 %vm4163_vm0, %v4162_v0 }
 0x4d4   : > { %3976 = vmatprep.subr.bf16.mxu0 %v4162_v0 }
 0x4d7   : > { %3977 = vmatpush3.bf16.msra.mxu0 %v4139_v8 }
 0x4d8   : > { %3978 = vmatprep.subr.bf16.mxu0 %v4162_v0 }
 0x4db   : > { %3979 = vmatpush3.bf16.msra.mxu0 %v4140_v9 }
 0x4dc   : > { %3980 = vmatprep.subr.bf16.mxu0 %v4162_v0 }
 0x4df   : > { %3981 = vmatpush3.bf16.msra.mxu0 %v4141_v10 }
 0x4e2   : > { %3983 = vmatmul.mubr.msk.bf16.vlgmr.msra.gmra.mrb[28].mxu0 %vm408_vm9, %v2947_v55 }
 0x5b5   : > { %v3017_v12 = vpop.f32.mrb[28].mxu0 }
 0x5b6   : > { %v3998_v13 = vadd.f32 %v3381_v11, %v3017_v12  ;;  %v3984_v14 = vpop.f32.mrb[29].mxu0 }
 0x5b7   : > { %v3020_v15 = vpop.f32.mrb[30].mxu0 }
 0x5b8   : > { %v3024_v16 = vmul.f32 0.70710677, %v3998_v13  ;;  %v3999_v17 = vadd.f32 %v3381_v11, %v3020_v15  ;;  %v3985_v18 = vpop.f32.mrb[31].mxu0 }
 0x5ba   : > { %3026 = vst [vmem:[%s359_s23] sm:$0xff] %v3024_v16  ;;  %v3025_v0 = vmul.f32 0.70710677, %v3999_v17 }
 0x5bc   : > { %3027 = vst [vmem:[%s359_s23 + $0x8] sm:$0xff] %v3025_v0 }
 0x5bd PF: > { %s20_s13 = sadd.s32 1, %s4160_s13  }
 0x5be   : > { %p17_p4 = scmp.ge.s32.totalorder %s20_s13, 4  }
 0x5c0   :  { %19 = sbr.rel (!%p17_p4) target bundleno = 1 (0x1), region = 122 }

// kernel: _lambda_.3
= control target key start
LH: loop header
LB: loop body
LE: loop exit
PB: predicated region body
PF: predicated region fallthrough
CT: control target
= control target key end

     0   :  { %s7077_s21 = smov 0   ;;  %s8485_s0 = inlined_call_operand.vmem [shape: f32[2,256,8], index: 0, kind: input, shape index: {}]   ;;  %s8486_s1 = inlined_call_operand.vmem [shape: bf16[8,32], index: 1, kind: input, shape index: {}]   ;;  %s8487_s2 = inlined_call_operand.vmem [shape: f32[1,32], index: 2, kind: input, shape index: {}, may-alias: {2,7}]   ;;  %s8488_s3 = inlined_call_operand.vmem [shape: bf16[9,64,256], index: 3, kind: input, shape index: {}]   ;;  %s8489_s4 = inlined_call_operand.vmem [shape: bf16[64,256], index: 4, kind: input, shape index: {}]   ;;  %s8490_s5 = inlined_call_operand.vmem [shape: bf16[9,64,64], index: 5, kind: input, shape index: {}]   ;;  %s8491_s6 = inlined_call_operand.vmem [shape: bf16[9,32,32], index: 6, kind: input, shape index: {}]   ;;  %s8492_s7 = inlined_call_operand.vmem [shape: f32[1,32], index: 7, kind: input, shape index: {}, may-alias: {2,7}]   ;;  %s8493_s8 = inlined_call_operand.vmem [shape: f32[32,32], index: 8, kind: input, shape index: {}]   ;;  %s8494_s9 = inlined_call_operand.vmem [shape: bf16[9,32,64], index: 9, kind: input, shape index: {}]   ;;  %s8495_s10 = inlined_call_operand.vmem [shape: f32[1,64], index: 10, kind: input, shape index: {}]   ;;  %s8496_s11 = inlined_call_operand.vmem [shape: bf16[32,64], index: 11, kind: input, shape index: {}]   ;;  %s8497_s12 = inlined_call_operand.vmem [shape: f32[2,64,64], index: 12, kind: output, shape index: {}]  }
   0x1 LB: > { %s5124_s22 = sadd.s32 4294967295, %s7007_s21   ;;  %p5128_p0 = scmp.ge.s32.totalorder %s7007_s21, 1  ;;  %s7007_s21 = sphi %s7077_s21, %s22_s21  }
   0x2   : > { %p362_p1 = scmp.lt.s32.totalorder %s7007_s21, 3 }
   0x4   : > { %p363_p2 = pnand %p5128_p0, %p362_p1 }
   0x6   : > { %366 = sbr.rel (%p363_p2) target bundleno = 2079 (0x81f), region = 68 }
   0xd   : > { %v463_v0 = vld [vmem:[%s8486_s1] sm:$0xf]  ;;  %vm520_vm0 = vcmask 1043456   ;;  %p404_p3 = scmp.lt.s32.totalorder %s5124_s22, 1  ;;  %vm471_vm1 = vcmask 64512  }
   0xe   : > { %6791 = vmatprep.subr.msk.bf16.mxu0 %vm520_vm0, %v463_v0  ;;  %v522_v1 = vsel %vm520_vm0, %v463_v0, 0  ;;  %v6805_v50 = vld [vmem:[%s8488_s3 + $0x4] ss:$8 sps:$4 sm:$0xff]   ;;  %v7150_v51 = vld [vmem:[%s8487_s2] ss:$0 sm:$0xff] }
   0xf   : > { %6225 = vmatpush3.bf16.msra.mxu0 %v522_v1  ;;  %s8586_s22 = smov (!%p404_p3, %s5124_s22), 1  ;;  %893 = vmatprep.mubr.bf16.mxu1 %v6805_v50 }
  0x10   : > { %s5614_s25 = sshll.u32 %s8586_s22, 8  ;;  %s5615_s13 = sshll.u32 %s8586_s22, 6 }
  0x11   : > { %s7094_s28 = scalar_lea.vmem %s8485_s0, %s5614_s25  ;;  %s413_s16 = scalar_lea.vmem %s8497_s12, %s5615_s13 }
  0x12   : > { %v415_v2 = vld [vmem:[%s7094_s28] sm:$0xff]  ;;  %v416_v3 = vld [vmem:[%s7094_s28 + $0x8] sm:$0xff]  ;;  %v417_v4 = vld [vmem:[%s7094_s28 + $0x10] sm:$0xff] }
  0x13   : > { %v447_v5 = vpack.c.bf16 %v416_v3, %v415_v2  ;;  %v418_v6 = vld [vmem:[%s7094_s28 + $0x18] sm:$0xff]  ;;  %v419_v7 = vld [vmem:[%s7094_s28 + $0x20] sm:$0xff]  ;;  %v420_v8 = vld [vmem:[%s7094_s28 + $0x28] sm:$0xff] }
  0x14   : > { %v448_v9 = vpack.c.bf16 %v418_v6, %v417_v4  ;;  %v449_v10 = vpack.c.bf16 %v420_v8, %v419_v7  ;;  %v421_v11 = vld [vmem:[%s7094_s28 + $0x30] sm:$0xff]  ;;  %v422_v12 = vld [vmem:[%s7094_s28 + $0x38] sm:$0xff]  ;;  %v423_v13 = vld [vmem:[%s7094_s28 + $0x40] sm:$0xff] }
  0x15   : > { %6226 = vmatprep.mubr.msk.bf16.mxu0 %vm471_vm1, %v447_v5  ;;  %v424_v14 = vld [vmem:[%s7094_s28 + $0x48] sm:$0xff]  ;;  %v450_v15 = vpack.c.bf16 %v422_v12, %v421_v11  ;;  %v425_v17 = vld [vmem:[%s7094_s28 + $0x50] sm:$0xff]  ;;  %v426_v18 = vld [vmem:[%s7094_s28 + $0x58] sm:$0xff] }
  0x16   : > { %6227 = vmatmul.mubr.msk.bf16.vlgmr.msra.gmra.mrb[0].mxu0 %vm471_vm1, %v448_v9  ;;  %v451_v16 = vpack.c.bf16 %v424_v14, %v423_v13  ;;  %v427_v19 = vld [vmem:[%s7094_s28 + $0x60] sm:$0xff]  ;;  %v428_v20 = vld [vmem:[%s7094_s28 + $0x68] sm:$0xff]  ;;  %v452_v21 = vpack.c.bf16 %v426_v18, %v425_v17  ;;  %v429_v23 = vld [vmem:[%s7094_s28 + $0x70] sm:$0xff] }
  0x17   : > { %6230 = vmatprep.mubr.msk.bf16.mxu0 %vm471_vm1, %v449_v10  ;;  %v453_v22 = vpack.c.bf16 %v428_v20, %v427_v19  ;;  %v430_v24 = vld [vmem:[%s7094_s28 + $0x78] sm:$0xff]  ;;  %v431_v25 = vld [vmem:[%s7094_s28 + $0x80] sm:$0xff]  ;;  %v432_v26 = vld [vmem:[%s7094_s28 + $0x88] sm:$0xff] }
  0x18   : > { %v454_v27 = vpack.c.bf16 %v430_v24, %v429_v23  ;;  %v455_v28 = vpack.c.bf16 %v432_v26, %v431_v25  ;;  %v433_v29 = vld [vmem:[%s7094_s28 + $0x90] sm:$0xff]  ;;  %v434_v30 = vld [vmem:[%s7094_s28 + $0x98] sm:$0xff]  ;;  %v435_v31 = vld [vmem:[%s7094_s28 + $0xa0] sm:$0xff] }
  0x19   : > { %v436_v32 = vld [vmem:[%s7094_s28 + $0xa8] sm:$0xff]  ;;  %v456_v33 = vpack.c.bf16 %v434_v30, %v433_v29  ;;  %v437_v35 = vld [vmem:[%s7094_s28 + $0xb0] sm:$0xff]  ;;  %v438_v36 = vld [vmem:[%s7094_s28 + $0xb8] sm:$0xff] }
  0x1a   : > { %v457_v34 = vpack.c.bf16 %v436_v32, %v435_v31  ;;  %v439_v37 = vld [vmem:[%s7094_s28 + $0xc0] sm:$0xff]  ;;  %v440_v38 = vld [vmem:[%s7094_s28 + $0xc8] sm:$0xff]  ;;  %v458_v39 = vpack.c.bf16 %v438_v36, %v437_v35  ;;  %v441_v41 = vld [vmem:[%s7094_s28 + $0xd0] sm:$0xff] }
  0x1b   : > { %v459_v40 = vpack.c.bf16 %v440_v38, %v439_v37  ;;  %v442_v42 = vld [vmem:[%s7094_s28 + $0xd8] sm:$0xff]  ;;  %v443_v43 = vld [vmem:[%s7094_s28 + $0xe0] sm:$0xff]  ;;  %v444_v44 = vld [vmem:[%s7094_s28 + $0xe8] sm:$0xff] }
  0x1c   : > { %v460_v45 = vpack.c.bf16 %v442_v42, %v441_v41  ;;  %v461_v46 = vpack.c.bf16 %v444_v44, %v443_v43  ;;  %v445_v47 = vld [vmem:[%s7094_s28 + $0xf0] sm:$0xff]  ;;  %v446_v48 = vld [vmem:[%s7094_s28 + $0xf8] sm:$0xff] }
  0x1d   : > { %v462_v49 = vpack.c.bf16 %v446_v48, %v445_v47 }
  0x1e   : > { %6231 = vmatmul.mubr.msk.bf16.gmra.mrb[4].mxu0 %vm471_vm1, %v450_v15 }
  0x1f   : > { %6234 = vmatprep.mubr.msk.bf16.mxu0 %vm471_vm1, %v451_v16 }
  0x26   : > { %6235 = vmatmul.mubr.msk.bf16.gmra.mrb[8].mxu0 %vm471_vm1, %v452_v21 }
  0x27   : > { %6238 = vmatprep.mubr.msk.bf16.mxu0 %vm471_vm1, %v453_v22 }
  0x2e   : > { %6239 = vmatmul.mubr.msk.bf16.gmra.mrb[12].mxu0 %vm471_vm1, %v454_v27 }
  0x2f   : > { %6242 = vmatprep.mubr.msk.bf16.mxu0 %vm471_vm1, %v455_v28 }
  0x36   : > { %6243 = vmatmul.mubr.msk.bf16.gmra.mrb[16].mxu0 %vm471_vm1, %v456_v33 }
  0x37   : > { %6246 = vmatprep.mubr.msk.bf16.mxu0 %vm471_vm1, %v457_v34 }
  0x3e   : > { %6247 = vmatmul.mubr.msk.bf16.gmra.mrb[20].mxu0 %vm471_vm1, %v458_v39 }
  0x3f   : > { %6250 = vmatprep.mubr.msk.bf16.mxu0 %vm471_vm1, %v459_v40 }
  0x46   : > { %6251 = vmatmul.mubr.msk.bf16.gmra.mrb[24].mxu0 %vm471_vm1, %v460_v45 }
  0x47   : > { %6254 = vmatprep.mubr.msk.bf16.mxu0 %vm471_vm1, %v461_v46 }
  0x4e   : > { %6255 = vmatmul.mubr.msk.bf16.gmra.mrb[28].mxu0 %vm471_vm1, %v462_v49 }
  0xe9   : > { %v6228_v52 = vpop.f32.mrb[0].mxu0 }
  0xea   : > { %v7153_v53 = vadd.f32 %v6228_v52, %v7150_v51  ;;  %v558_v54 = vpop.f32.mrb[1].mxu0 }
  0xeb   : > { %v7156_v55 = vadd.f32 %v7150_v51, %v558_v54  ;;  %v6229_v56 = vpop.f32.mrb[2].mxu0 }
  0xec   : > { %v719_v57 = vmul.f32 0.2, %v7153_v53  ;;  %v7160_v58 = vadd.f32 %v6229_v56, %v7150_v51  ;;  %v561_v59 = vpop.f32.mrb[3].mxu0  ;;  %vm687_vm2 = vcmp.ge.f32.partialorder %v7153_v53, 0.0 }
  0xed   : > { %v717_v60 = vmul.f32 0.2, %v7156_v55  ;;  %v7165_v61 = vadd.f32 %v7150_v51, %v561_v59  ;;  %vm685_vm3 = vcmp.ge.f32.partialorder %v7156_v55, 0.0 }
  0xee   : > { %vm688_vm4 = vcmp.ge.f32.partialorder %v7160_v58, 0.0  ;;  %v720_v62 = vmul.f32 0.2, %v7160_v58  ;;  %v751_v2 = vsel %vm687_vm2, %v7153_v53, %v719_v57 }
  0xef   : > { %vm686_vm5 = vcmp.ge.f32.partialorder %v7165_v61, 0.0  ;;  %v718_v0 = vmul.f32 0.2, %v7165_v61  ;;  %v749_v4 = vsel %vm685_vm3, %v7156_v55, %v717_v60 }
  0xf0   : > { %v752_v3 = vsel %vm688_vm4, %v7160_v58, %v720_v62 }
  0xf1   : > { %v7179_v5 = vpack.c.bf16 %v752_v3, %v751_v2  ;;  %v750_v6 = vsel %vm686_vm5, %v7165_v61, %v718_v0  ;;  %v6232_v7 = vpop.f32.mrb[4].mxu0 }
  0xf2   : > { %v7182_v8 = vpack.c.bf16 %v750_v6, %v749_v4  ;;  %v7185_v9 = vadd.f32 %v6232_v7, %v7150_v51  ;;  %v574_v10 = vpop.f32.mrb[5].mxu0 }
  0xf3   : > { %v7188_v11 = vadd.f32 %v7150_v51, %v574_v10  ;;  %v6233_v12 = vpop.f32.mrb[6].mxu0 }
  0xf4   : > { %8515 = vst [vmem:[#allocation2_spill] sm:$0xff] %v7185_v9  ;;  %v723_v13 = vmul.f32 0.2, %v7185_v9  ;;  %v7192_v14 = vadd.f32 %v6233_v12, %v7150_v51  ;;  %v577_v15 = vpop.f32.mrb[7].mxu0  ;;  %vm691_vm6 = vcmp.ge.f32.partialorder %v7185_v9, 0.0 }
  0xf5   : > { %v721_v16 = vmul.f32 0.2, %v7188_v11  ;;  %v7197_v17 = vadd.f32 %v7150_v51, %v577_v15  ;;  %vm689_vm7 = vcmp.ge.f32.partialorder %v7188_v11, 0.0 }
  0xf6   : > { %vm692_vm8 = vcmp.ge.f32.partialorder %v7192_v14, 0.0  ;;  %v724_v18 = vmul.f32 0.2, %v7192_v14  ;;  %v755_v22 = vsel %vm691_vm6, %v7185_v9, %v723_v13 }
  0xf7   : > { %vm690_vm9 = vcmp.ge.f32.partialorder %v7197_v17, 0.0  ;;  %v722_v20 = vmul.f32 0.2, %v7197_v17  ;;  %v753_v24 = vsel %vm689_vm7, %v7188_v11, %v721_v16 }
  0xf8   : > { %v756_v23 = vsel %vm692_vm8, %v7192_v14, %v724_v18 }
  0xf9   : > { %v7211_v25 = vpack.c.bf16 %v756_v23, %v755_v22  ;;  %v754_v26 = vsel %vm690_vm9, %v7197_v17, %v722_v20  ;;  %v6236_v27 = vpop.f32.mrb[8].mxu0 }
  0xfa   : > { %v7214_v28 = vpack.c.bf16 %v754_v26, %v753_v24  ;;  %v7217_v29 = vadd.f32 %v6236_v27, %v7150_v51  ;;  %v590_v30 = vpop.f32.mrb[9].mxu0 }
  0xfb   : > { %v7220_v31 = vadd.f32 %v7150_v51, %v590_v30  ;;  %v6237_v32 = vpop.f32.mrb[10].mxu0 }
  0xfc   : > { %8516 = vst [vmem:[#allocation3_spill] sm:$0xff] %v7217_v29  ;;  %v727_v33 = vmul.f32 0.2, %v7217_v29  ;;  %v7224_v34 = vadd.f32 %v6237_v32, %v7150_v51  ;;  %v593_v35 = vpop.f32.mrb[11].mxu0  ;;  %vm695_vm10 = vcmp.ge.f32.partialorder %v7217_v29, 0.0 }
  0xfd   : > { %8517 = vst [vmem:[#allocation4_spill] sm:$0xff] %v7220_v31  ;;  %v725_v36 = vmul.f32 0.2, %v7220_v31  ;;  %v7229_v37 = vadd.f32 %v7150_v51, %v593_v35  ;;  %vm693_vm11 = vcmp.ge.f32.partialorder %v7220_v31, 0.0 }
  0xfe   : > { %8518 = vst [vmem:[#allocation5_spill] sm:$0xff] %v7224_v34  ;;  %vm696_vm12 = vcmp.ge.f32.partialorder %v7224_v34, 0.0  ;;  %v728_v38 = vmul.f32 0.2, %v7224_v34  ;;  %v759_v42 = vsel %vm695_vm10, %v7217_v29, %v727_v33 }
  0xff   : > { %8519 = vst [vmem:[#allocation6_spill] sm:$0xff] %v7229_v37  ;;  %vm694_vm13 = vcmp.ge.f32.partialorder %v7229_v37, 0.0  ;;  %v726_v40 = vmul.f32 0.2, %v7229_v37  ;;  %v757_v44 = vsel %vm693_vm11, %v7220_v31, %v725_v36 }
 0x100   : > { %v760_v43 = vsel %vm696_vm12, %v7224_v34, %v728_v38 }
 0x101   : > { %v7243_v45 = vpack.c.bf16 %v760_v43, %v759_v42  ;;  %v758_v46 = vsel %vm694_vm13, %v7229_v37, %v726_v40  ;;  %v6240_v47 = vpop.f32.mrb[12].mxu0 }
 0x102   : > { %v7246_v48 = vpack.c.bf16 %v758_v46, %v757_v44  ;;  %v7249_v49 = vadd.f32 %v6240_v47, %v7150_v51  ;;  %v606_v50 = vpop.f32.mrb[13].mxu0 }
 0x103   : > { %v7252_v52 = vadd.f32 %v7150_v51, %v606_v50  ;;  %v6241_v54 = vpop.f32.mrb[14].mxu0 }
 0x104   : > { %8520 = vst [vmem:[#allocation7_spill] sm:$0xff] %v7249_v49  ;;  %v731_v56 = vmul.f32 0.2, %v7249_v49  ;;  %v7256_v57 = vadd.f32 %v6241_v54, %v7150_v51  ;;  %v609_v59 = vpop.f32.mrb[15].mxu0  ;;  %vm699_vm14 = vcmp.ge.f32.partialorder %v7249_v49, 0.0 }
 0x105   : > { %8521 = vst [vmem:[#allocation8_spill] sm:$0xff] %v7252_v52  ;;  %v729_v60 = vmul.f32 0.2, %v7252_v52  ;;  %v7261_v62 = vadd.f32 %v7150_v51, %v609_v59  ;;  %vm697_vm15 = vcmp.ge.f32.partialorder %v7252_v52, 0.0 }
 0x106   : > { %8522 = vst [vmem:[#allocation9_spill] sm:$0xff] %v7256_v57  ;;  %vm700_vm0 = vcmp.ge.f32.partialorder %v7256_v57, 0.0  ;;  %v732_v0 = vmul.f32 0.2, %v7256_v57  ;;  %v763_v6 = vsel %vm699_vm14, %v7249_v49, %v731_v56 }
 0x107   : > { %8523 = vst [vmem:[#allocation10_spill] sm:$0xff] %v7261_v62  ;;  %vm698_vm1 = vcmp.ge.f32.partialorder %v7261_v62, 0.0  ;;  %v730_v3 = vmul.f32 0.2, %v7261_v62  ;;  %v761_v10 = vsel %vm697_vm15, %v7252_v52, %v729_v60 }
 0x108   : > { %v764_v7 = vsel %vm700_vm0, %v7256_v57, %v732_v0 }
 0x109   : > { %v7275_v12 = vpack.c.bf16 %v764_v7, %v763_v6  ;;  %v762_v13 = vsel %vm698_vm1, %v7261_v62, %v730_v3  ;;  %v6244_v15 = vpop.f32.mrb[16].mxu0 }
 0x10a   : > { %v7278_v16 = vpack.c.bf16 %v762_v13, %v761_v10  ;;  %v7281_v18 = vadd.f32 %v6244_v15, %v7150_v51  ;;  %v622_v20 = vpop.f32.mrb[17].mxu0 }
 0x10b   : > { %v7284_v22 = vadd.f32 %v7150_v51, %v622_v20  ;;  %v6245_v23 = vpop.f32.mrb[18].mxu0 }
 0x10c   : > { %v735_v24 = vmul.f32 0.2, %v7281_v18  ;;  %v7288_v26 = vadd.f32 %v6245_v23, %v7150_v51  ;;  %v625_v27 = vpop.f32.mrb[19].mxu0  ;;  %vm703_vm2 = vcmp.ge.f32.partialorder %v7281_v18, 0.0 }
 0x10d   : > { %v733_v30 = vmul.f32 0.2, %v7284_v22  ;;  %v7293_v32 = vadd.f32 %v7150_v51, %v625_v27  ;;  %vm701_vm3 = vcmp.ge.f32.partialorder %v7284_v22, 0.0 }
 0x10e   : > { %vm704_vm4 = vcmp.ge.f32.partialorder %v7288_v26, 0.0  ;;  %v736_v33 = vmul.f32 0.2, %v7288_v26  ;;  %v767_v40 = vsel %vm703_vm2, %v7281_v18, %v735_v24  ;;  %vm1069_vm2 = vcmask 261120  }
 0x10f   : > { %vm702_vm5 = vcmp.ge.f32.partialorder %v7293_v32, 0.0  ;;  %v734_v36 = vmul.f32 0.2, %v7293_v32  ;;  %v765_v43 = vsel %vm701_vm3, %v7284_v22, %v733_v30  ;;  %vm7010_vm3 = vmmov 0  }
 0x110   : > { %v768_v42 = vsel %vm704_vm4, %v7288_v26, %v736_v33  ;;  %vm2965_vm4 = vcmask 523264  }
 0x111   : > { %v7307_v44 = vpack.c.bf16 %v768_v42, %v767_v40  ;;  %v766_v46 = vsel %vm702_vm5, %v7293_v32, %v734_v36  ;;  %v6248_v47 = vpop.f32.mrb[20].mxu0 }
 0x112   : > { %v7310_v50 = vpack.c.bf16 %v766_v46, %v765_v43  ;;  %v7313_v54 = vadd.f32 %v6248_v47, %v7150_v51  ;;  %v638_v56 = vpop.f32.mrb[21].mxu0 }
 0x113   : > { %v7316_v59 = vadd.f32 %v7150_v51, %v638_v56  ;;  %v6249_v60 = vpop.f32.mrb[22].mxu0 }
 0x114   : > { %v739_v0 = vmul.f32 0.2, %v7313_v54  ;;  %v7320_v3 = vadd.f32 %v6249_v60, %v7150_v51  ;;  %v641_v6 = vpop.f32.mrb[23].mxu0  ;;  %5633 = vmatprep.subr.bf16.mxu1 %v7310_v50  ;;  %vm707_vm6 = vcmp.ge.f32.partialorder %v7313_v54, 0.0 }
 0x115   : > { %v737_v7 = vmul.f32 0.2, %v7316_v59  ;;  %v7326_v10 = vadd.f32 %v7150_v51, %v641_v6  ;;  %5634 = vmatpush3.bf16.msra.mxu1 %v7182_v8  ;;  %vm705_vm7 = vcmp.ge.f32.partialorder %v7316_v59, 0.0 }
 0x116   : > { %vm708_vm8 = vcmp.ge.f32.partialorder %v7320_v3, 0.0  ;;  %v740_v13 = vmul.f32 0.2, %v7320_v3  ;;  %5635 = vmatprep.subr.bf16.mxu1 %v7307_v44  ;;  %v771_v24 = vsel %vm707_vm6, %v7313_v54, %v739_v0 }
 0x117   : > { %vm706_vm9 = vcmp.ge.f32.partialorder %v7326_v10, 0.0  ;;  %v738_v20 = vmul.f32 0.2, %v7326_v10  ;;  %v769_v30 = vsel %vm705_vm7, %v7316_v59, %v737_v7 }
 0x118   : > { %v772_v27 = vsel %vm708_vm8, %v7320_v3, %v740_v13 }
 0x119   : > { %v7342_v33 = vpack.c.bf16 %v772_v27, %v771_v24  ;;  %v770_v36 = vsel %vm706_vm9, %v7326_v10, %v738_v20  ;;  %v6252_v40 = vpop.f32.mrb[24].mxu0  ;;  %5636 = vmatpush3.bf16.msra.mxu1 %v7179_v5 }
 0x11a   : > { %v7346_v42 = vpack.c.bf16 %v770_v36, %v769_v30  ;;  %v7349_v43 = vadd.f32 %v6252_v40, %v7150_v51  ;;  %v654_v46 = vpop.f32.mrb[25].mxu0 }
 0x11b   : > { %v7352_v47 = vadd.f32 %v7150_v51, %v654_v46  ;;  %v6253_v56 = vpop.f32.mrb[26].mxu0 }
 0x11c   : > { %8524 = vst [vmem:[#allocation11_spill] sm:$0xff] %v7349_v43  ;;  %v743_v60 = vmul.f32 0.2, %v7349_v43  ;;  %v7356_v0 = vadd.f32 %v6253_v56, %v7150_v51  ;;  %v657_v6 = vpop.f32.mrb[27].mxu0  ;;  %5637 = vmatprep.subr.bf16.mxu1 %v7346_v42  ;;  %vm711_vm10 = vcmp.ge.f32.partialorder %v7349_v43, 0.0 }
 0x11d   : > { %8525 = vst [vmem:[#allocation12_spill] sm:$0xff] %v7352_v47  ;;  %v741_v7 = vmul.f32 0.2, %v7352_v47  ;;  %v7362_v13 = vadd.f32 %v7150_v51, %v657_v6  ;;  %5638 = vmatpush3.bf16.msra.mxu1 %v7214_v28  ;;  %vm709_vm11 = vcmp.ge.f32.partialorder %v7352_v47, 0.0 }
 0x11e   : > { %8526 = vst [vmem:[#allocation13_spill] sm:$0xff] %v7356_v0  ;;  %vm712_vm12 = vcmp.ge.f32.partialorder %v7356_v0, 0.0  ;;  %v744_v20 = vmul.f32 0.2, %v7356_v0  ;;  %5639 = vmatprep.subr.bf16.mxu1 %v7342_v33  ;;  %v775_v36 = vsel %vm711_vm10, %v7349_v43, %v743_v60 }
 0x11f   : > { %8527 = vst [vmem:[#allocation14_spill] sm:$0xff] %v7362_v13  ;;  %vm710_vm13 = vcmp.ge.f32.partialorder %v7362_v13, 0.0  ;;  %v742_v27 = vmul.f32 0.2, %v7362_v13  ;;  %v773_v46 = vsel %vm709_vm11, %v7352_v47, %v741_v7 }
 0x120   : > { %v776_v40 = vsel %vm712_vm12, %v7356_v0, %v744_v20 }
 0x121   : > { %v7378_v56 = vpack.c.bf16 %v776_v40, %v775_v36  ;;  %v774_v6 = vsel %vm710_vm13, %v7362_v13, %v742_v27  ;;  %v6256_v2 = vpop.f32.mrb[28].mxu0  ;;  %5640 = vmatpush3.bf16.msra.mxu1 %v7211_v25 }
 0x122   : > { %v7382_v4 = vpack.c.bf16 %v774_v6, %v773_v46  ;;  %v7385_v39 = vadd.f32 %v6256_v2, %v7150_v51  ;;  %v670_v24 = vpop.f32.mrb[29].mxu0 }
 0x123   : > { %v7388_v41 = vadd.f32 %v7150_v51, %v670_v24  ;;  %v6257_v60 = vpop.f32.mrb[30].mxu0 }
 0x124   : > { %8528 = vst [vmem:[#allocation15_spill] sm:$0xff] %v7385_v39  ;;  %v747_v20 = vmul.f32 0.2, %v7385_v39  ;;  %v7392_v7 = vadd.f32 %v6257_v60, %v7150_v51  ;;  %v673_v36 = vpop.f32.mrb[31].mxu0  ;;  %5641 = vmatprep.subr.bf16.mxu1 %v7382_v4  ;;  %vm715_vm14 = vcmp.ge.f32.partialorder %v7385_v39, 0.0 }
 0x125   : > { %8529 = vst [vmem:[#allocation16_spill] sm:$0xff] %v7388_v41  ;;  %v745_v27 = vmul.f32 0.2, %v7388_v41  ;;  %v7398_v2 = vadd.f32 %v7150_v51, %v673_v36  ;;  %5642 = vmatpush3.bf16.msra.mxu1 %v7246_v48  ;;  %vm713_vm15 = vcmp.ge.f32.partialorder %v7388_v41, 0.0 }
 0x126   : > { %8530 = vst [vmem:[#allocation17_spill] sm:$0xff] %v7392_v7  ;;  %vm716_vm0 = vcmp.ge.f32.partialorder %v7392_v7, 0.0  ;;  %v748_v24 = vmul.f32 0.2, %v7392_v7  ;;  %5643 = vmatprep.subr.bf16.mxu1 %v7378_v56  ;;  %v779_v6 = vsel %vm715_vm14, %v7385_v39, %v747_v20  ;;  %v6803_v20 = vld [vmem:[%s8488_s3] ss:$8 sps:$4 sm:$0xff]  }
 0x127   : > { %8531 = vst [vmem:[#allocation18_spill] sm:$0xff] %v7398_v2  ;;  %vm714_vm1 = vcmp.ge.f32.partialorder %v7398_v2, 0.0  ;;  %v746_v46 = vmul.f32 0.2, %v7398_v2  ;;  %v777_v36 = vsel %vm713_vm15, %v7388_v41, %v745_v27  ;;  %v6806_v27 = vld [vmem:[%s8488_s3 + $0x14] ss:$8 sps:$4 sm:$0xff]  }
 0x128   : > { %v780_v60 = vsel %vm716_vm0, %v7392_v7, %v748_v24  ;;  %v6809_v24 = vld [vmem:[%s8488_s3 + $0x24] ss:$8 sps:$4 sm:$0xff]  }
 0x129   : > { %v7414_v30 = vpack.c.bf16 %v780_v60, %v779_v6  ;;  %v778_v19 = vsel %vm714_vm1, %v7398_v2, %v746_v46  ;;  %5644 = vmatpush3.bf16.msra.mxu1 %v7243_v45  ;;  %v6811_v46 = vld [vmem:[%s8488_s3 + $0x20] ss:$8 sps:$4 sm:$0xff]   ;;  %v6812_v6 = vld [vmem:[%s8488_s3 + $0x34] ss:$8 sps:$4 sm:$0xff]   ;;  %v6814_v60 = vld [vmem:[%s8488_s3 + $0x30] ss:$8 sps:$4 sm:$0xff]  }
 0x12a   : > { %v7418_v40 = vpack.c.bf16 %v778_v19, %v777_v36  ;;  %v6808_v19 = vld [vmem:[%s8488_s3 + $0x10] ss:$8 sps:$4 sm:$0xff]   ;;  %v6817_v36 = vld [vmem:[%s8488_s3 + $0x44] ss:$8 sps:$4 sm:$0xff]  }
 0x12c   : > { %5645 = vmatprep.subr.bf16.mxu1 %v7418_v40 }
 0x12d   : > { %5646 = vmatpush3.bf16.msra.mxu1 %v7278_v16 }
 0x12e   : > { %5647 = vmatprep.subr.bf16.mxu1 %v7414_v30 }
 0x131   : > { %5648 = vmatpush3.bf16.msra.mxu1 %v7275_v12 }
 0x132   : > { %5673 = vmatprep.subr.bf16.mxu1 %v7310_v50 }
 0x134   : > { %894 = vmatmul.mubr.bf16.vlgmr.msra.gmra.mrb[0].mxu1 %v6803_v20  ;;  %v6815_v20 = vld [vmem:[%s8488_s3 + $0x40] ss:$8 sps:$4 sm:$0xff]  }
 0x135   : > { %5674 = vmatpush3.bf16.msra.mxu1 %v7182_v8  ;;  %901 = vmatprep.mubr.bf16.mxu1 %v6806_v27  ;;  %v6818_v27 = vld [vmem:[%s8488_s3 + $0x54] ss:$8 sps:$4 sm:$0xff]  }
 0x136   : > { %5675 = vmatprep.subr.bf16.mxu1 %v7307_v44 }
 0x139   : > { %5676 = vmatpush3.bf16.msra.mxu1 %v7179_v5 }
 0x13a   : > { %5677 = vmatprep.subr.bf16.mxu1 %v7346_v42 }
 0x13c   : > { %902 = vmatmul.mubr.bf16.gmra.mrb[4].mxu1 %v6808_v19  ;;  %v6820_v19 = vld [vmem:[%s8488_s3 + $0x50] ss:$8 sps:$4 sm:$0xff]  }
 0x13d   : > { %5678 = vmatpush3.bf16.msra.mxu1 %v7214_v28  ;;  %909 = vmatprep.mubr.bf16.mxu1 %v6809_v24  ;;  %v6821_v24 = vld [vmem:[%s8488_s3 + $0x64] ss:$8 sps:$4 sm:$0xff]  }
 0x13e   : > { %5679 = vmatprep.subr.bf16.mxu1 %v7342_v33 }
 0x141   : > { %5680 = vmatpush3.bf16.msra.mxu1 %v7211_v25 }
 0x142   : > { %5681 = vmatprep.subr.bf16.mxu1 %v7382_v4 }
 0x144   : > { %910 = vmatmul.mubr.bf16.gmra.mrb[8].mxu1 %v6811_v46  ;;  %v6823_v46 = vld [vmem:[%s8488_s3 + $0x60] ss:$8 sps:$4 sm:$0xff]  }
 0x145   : > { %5682 = vmatpush3.bf16.msra.mxu1 %v7246_v48  ;;  %917 = vmatprep.mubr.bf16.mxu1 %v6812_v6  ;;  %v6824_v6 = vld [vmem:[%s8488_s3 + $0x74] ss:$8 sps:$4 sm:$0xff]  }
 0x146   : > { %5683 = vmatprep.subr.bf16.mxu1 %v7378_v56 }
 0x149   : > { %5684 = vmatpush3.bf16.msra.mxu1 %v7243_v45 }
 0x14a   : > { %5685 = vmatprep.subr.bf16.mxu1 %v7418_v40 }
 0x14c   : > { %918 = vmatmul.mubr.bf16.gmra.mrb[12].mxu1 %v6814_v60  ;;  %v6826_v60 = vld [vmem:[%s8488_s3 + $0x70] ss:$8 sps:$4 sm:$0xff]  }
 0x14d   : > { %5686 = vmatpush3.bf16.msra.mxu1 %v7278_v16  ;;  %1015 = vmatprep.mubr.bf16.mxu1 %v6817_v36  ;;  %v6829_v36 = vld [vmem:[%s8488_s3 + $0x84] ss:$8 sps:$4 sm:$0xff]  }
 0x14e   : > { %5687 = vmatprep.subr.bf16.mxu1 %v7414_v30 }
 0x151   : > { %5688 = vmatpush3.bf16.msra.mxu1 %v7275_v12 }
 0x152   : > { %5725 = vmatprep.subr.bf16.mxu1 %v7310_v50 }
 0x154   : > { %1016 = vmatmul.mubr.bf16.vlgmr.msra.gmra.mrb[16].mxu1 %v6815_v20  ;;  %v6827_v20 = vld [vmem:[%s8488_s3 + $0x80] ss:$8 sps:$4 sm:$0xff]  }
 0x155   : > { %5726 = vmatpush3.bf16.msra.mxu1 %v7182_v8  ;;  %1023 = vmatprep.mubr.bf16.mxu1 %v6818_v27  ;;  %v6830_v27 = vld [vmem:[%s8488_s3 + $0x94] ss:$8 sps:$4 sm:$0xff]  }
 0x156   : > { %5727 = vmatprep.subr.bf16.mxu1 %v7307_v44 }
 0x159   : > { %5728 = vmatpush3.bf16.msra.mxu1 %v7179_v5 }
 0x15a   : > { %5729 = vmatprep.subr.bf16.mxu1 %v7346_v42 }
 0x15c   : > { %1024 = vmatmul.mubr.bf16.gmra.mrb[20].mxu1 %v6820_v19  ;;  %v6832_v19 = vld [vmem:[%s8488_s3 + $0x90] ss:$8 sps:$4 sm:$0xff]  }
 0x15d   : > { %5730 = vmatpush3.bf16.msra.mxu1 %v7214_v28  ;;  %1031 = vmatprep.mubr.bf16.mxu1 %v6821_v24  ;;  %v6833_v24 = vld [vmem:[%s8488_s3 + $0xa4] ss:$8 sps:$4 sm:$0xff]  }
 0x15e   : > { %5731 = vmatprep.subr.bf16.mxu1 %v7342_v33 }
 0x161   : > { %5732 = vmatpush3.bf16.msra.mxu1 %v7211_v25 }
 0x162   : > { %5733 = vmatprep.subr.bf16.mxu1 %v7382_v4 }
 0x164   : > { %1032 = vmatmul.mubr.bf16.gmra.mrb[24].mxu1 %v6823_v46  ;;  %v6835_v46 = vld [vmem:[%s8488_s3 + $0xa0] ss:$8 sps:$4 sm:$0xff]  }
 0x165   : > { %5734 = vmatpush3.bf16.msra.mxu1 %v7246_v48  ;;  %1039 = vmatprep.mubr.bf16.mxu1 %v6824_v6  ;;  %v6836_v6 = vld [vmem:[%s8488_s3 + $0xb4] ss:$8 sps:$4 sm:$0xff]  }
 0x166   : > { %5735 = vmatprep.subr.bf16.mxu1 %v7378_v56 }
 0x169   : > { %5736 = vmatpush3.bf16.msra.mxu1 %v7243_v45 }
 0x16a   : > { %5737 = vmatprep.subr.bf16.mxu1 %v7418_v40 }
 0x16c   : > { %1040 = vmatmul.mubr.bf16.gmra.mrb[28].mxu1 %v6826_v60  ;;  %v6838_v60 = vld [vmem:[%s8488_s3 + $0xb0] ss:$8 sps:$4 sm:$0xff]  }
 0x16d   : > { %5738 = vmatpush3.bf16.msra.mxu1 %v7278_v16  ;;  %1317 = vmatprep.mubr.bf16.mxu1 %v6829_v36  ;;  %v6841_v36 = vld [vmem:[%s8488_s3 + $0xc4] ss:$8 sps:$4 sm:$0xff]  }
 0x16e   : > { %5739 = vmatprep.subr.bf16.mxu1 %v7414_v30 }
 0x171   : > { %5740 = vmatpush3.bf16.msra.mxu1 %v7275_v12 }
 0x172   : > { %5771 = vmatprep.subr.bf16.mxu1 %v7310_v50 }
 0x174   : > { %1318 = vmatmul.mubr.bf16.vlgmr.msra.gmra.mrb[32].mxu1 %v6827_v20  ;;  %v6839_v20 = vld [vmem:[%s8488_s3 + $0xc0] ss:$8 sps:$4 sm:$0xff]  }
 0x175   : > { %5772 = vmatpush3.bf16.msra.mxu1 %v7182_v8  ;;  %1325 = vmatprep.mubr.bf16.mxu1 %v6830_v27  ;;  %v6842_v27 = vld [vmem:[%s8488_s3 + $0xd4] ss:$8 sps:$4 sm:$0xff]  }
 0x176   : > { %5773 = vmatprep.subr.bf16.mxu1 %v7307_v44 }
 0x179   : > { %5774 = vmatpush3.bf16.msra.mxu1 %v7179_v5 }
 0x17a   : > { %5775 = vmatprep.subr.bf16.mxu1 %v7346_v42 }
 0x17c   : > { %1326 = vmatmul.mubr.bf16.gmra.mrb[36].mxu1 %v6832_v19  ;;  %v6878_v19 = vld [vmem:[%s8491_s6 + $0x10] sm:$0xff]  }
 0x17d   : > { %5776 = vmatpush3.bf16.msra.mxu1 %v7214_v28  ;;  %1333 = vmatprep.mubr.bf16.mxu1 %v6833_v24  ;;  %v6844_v24 = vld [vmem:[%s8488_s3 + $0xd0] ss:$8 sps:$4 sm:$0xff]  }
 0x17e   : > { %5777 = vmatprep.subr.bf16.mxu1 %v7342_v33  ;;  %6258 = vmatprep.subr.bf16.mxu0 %v6878_v19 }
 0x17f   : > { %6259 = vmatpush3.bf16.msra.mxu0 %v6878_v19  ;;  %v6854_v19 = vld [vmem:[%s8488_s3 + $0x154] ss:$8 sps:$4 sm:$0xff]  }
 0x181   : > { %5778 = vmatpush3.bf16.msra.mxu1 %v7211_v25 }
 0x182   : > { %5779 = vmatprep.subr.bf16.mxu1 %v7382_v4 }
 0x184   : > { %1334 = vmatmul.mubr.bf16.gmra.mrb[40].mxu1 %v6835_v46  ;;  %v6845_v46 = vld [vmem:[%s8488_s3 + $0xe4] ss:$8 sps:$4 sm:$0xff]  }
 0x185   : > { %5780 = vmatpush3.bf16.msra.mxu1 %v7246_v48  ;;  %1341 = vmatprep.mubr.bf16.mxu1 %v6836_v6  ;;  %v6847_v6 = vld [vmem:[%s8488_s3 + $0xe0] ss:$8 sps:$4 sm:$0xff]  }
 0x186   : > { %5781 = vmatprep.subr.bf16.mxu1 %v7378_v56 }
 0x189   : > { %5782 = vmatpush3.bf16.msra.mxu1 %v7243_v45 }
 0x18a   : > { %5783 = vmatprep.subr.bf16.mxu1 %v7418_v40 }
 0x18c   : > { %1342 = vmatmul.mubr.bf16.gmra.mrb[44].mxu1 %v6838_v60  ;;  %v6848_v60 = vld [vmem:[%s8488_s3 + $0xf4] ss:$8 sps:$4 sm:$0xff]  }
 0x18d   : > { %5784 = vmatpush3.bf16.msra.mxu1 %v7278_v16  ;;  %1537 = vmatprep.mubr.bf16.mxu1 %v6841_v36  ;;  %v6850_v36 = vld [vmem:[%s8488_s3 + $0xf0] ss:$8 sps:$4 sm:$0xff]  }
 0x18e   : > { %5785 = vmatprep.subr.bf16.mxu1 %v7414_v30 }
 0x191   : > { %5786 = vmatpush3.bf16.msra.mxu1 %v7275_v12 }
 0x192   : > { %5863 = vmatprep.subr.bf16.mxu1 %v7310_v50 }
 0x194   : > { %1538 = vmatmul.mubr.bf16.vlgmr.msra.gmra.mrb[48].mxu1 %v6839_v20  ;;  %v6853_v20 = vld [vmem:[%s8488_s3 + $0x144] ss:$8 sps:$4 sm:$0xff]  }
 0x195   : > { %5864 = vmatpush3.bf16.msra.mxu1 %v7182_v8  ;;  %1545 = vmatprep.mubr.bf16.mxu1 %v6842_v27  ;;  %v6851_v27 = vld [vmem:[%s8488_s3 + $0x140] ss:$8 sps:$4 sm:$0xff]  }
 0x196   : > { %5865 = vmatprep.subr.bf16.mxu1 %v7307_v44 }
 0x199   : > { %5866 = vmatpush3.bf16.msra.mxu1 %v7179_v5 }
 0x19a   : > { %5867 = vmatprep.subr.bf16.mxu1 %v7346_v42 }
 0x19c   : > { %1546 = vmatmul.mubr.bf16.gmra.mrb[52].mxu1 %v6844_v24  ;;  %v6879_v24 = vld [vmem:[%s8491_s6 + $0x18] sm:$0xff]  }
 0x19d   : > { %5868 = vmatpush3.bf16.msra.mxu1 %v7214_v28  ;;  %1553 = vmatprep.mubr.bf16.mxu1 %v6845_v46  ;;  %v6856_v46 = vld [vmem:[%s8488_s3 + $0x150] ss:$8 sps:$4 sm:$0xff]  }
 0x19e   : > { %5869 = vmatprep.subr.bf16.mxu1 %v7342_v33  ;;  %6260 = vmatprep.subr.bf16.mxu0 %v6879_v24 }
 0x19f   : > { %6261 = vmatpush3.bf16.msra.mxu0 %v6879_v24  ;;  %v6863_v24 = vld [vmem:[%s8488_s3 + $0x180] ss:$8 sps:$4 sm:$0xff]  }
 0x1a1   : > { %5870 = vmatpush3.bf16.msra.mxu1 %v7211_v25 }
 0x1a2   : > { %5871 = vmatprep.subr.bf16.mxu1 %v7382_v4 }
 0x1a4   : > { %1554 = vmatmul.mubr.bf16.gmra.mrb[56].mxu1 %v6847_v6  ;;  %v6857_v6 = vld [vmem:[%s8488_s3 + $0x164] ss:$8 sps:$4 sm:$0xff]  }
 0x1a5   : > { %5872 = vmatpush3.bf16.msra.mxu1 %v7246_v48  ;;  %1561 = vmatprep.mubr.bf16.mxu1 %v6848_v60  ;;  %v6859_v60 = vld [vmem:[%s8488_s3 + $0x160] ss:$8 sps:$4 sm:$0xff]  }
 0x1a6   : > { %5873 = vmatprep.subr.bf16.mxu1 %v7378_v56 }
 0x1a9   : > { %5874 = vmatpush3.bf16.msra.mxu1 %v7243_v45 }
 0x1aa   : > { %5875 = vmatprep.subr.bf16.mxu1 %v7418_v40 }
 0x1ac   : > { %1562 = vmatmul.mubr.bf16.gmra.mrb[60].mxu1 %v6850_v36  ;;  %v6860_v36 = vld [vmem:[%s8488_s3 + $0x174] ss:$8 sps:$4 sm:$0xff]  }
 0x1ad   : > { %5876 = vmatpush3.bf16.msra.mxu1 %v7278_v16  ;;  %1977 = vmatprep.mubr.bf16.mxu1 %v6853_v20  ;;  %v7621_v20 = vld [vmem:[%s8491_s6] sm:$0xff]  }
 0x1ae   : > { %5877 = vmatprep.subr.bf16.mxu1 %v7414_v30  ;;  %6270 = vmatprep.subr.bf16.mxu0 %v7621_v20 }
 0x1b1   : > { %5878 = vmatpush3.bf16.msra.mxu1 %v7275_v12 }
 0x1b2   : > { %5909 = vmatprep.subr.bf16.mxu1 %v7310_v50 }
 0x1b4   : > { %1978 = vmatmul.mubr.bf16.vlgmr.msra.gmra.mrb[64].mxu1 %v6851_v27  ;;  %v6862_v27 = vld [vmem:[%s8488_s3 + $0x170] ss:$8 sps:$4 sm:$0xff]  }
 0x1b5   : > { %5910 = vmatpush3.bf16.msra.mxu1 %v7182_v8  ;;  %1985 = vmatprep.mubr.bf16.mxu1 %v6854_v19  ;;  %v6865_v19 = vld [vmem:[%s8488_s3 + $0x184] ss:$8 sps:$4 sm:$0xff]  }
 0x1b6   : > { %5911 = vmatprep.subr.bf16.mxu1 %v7307_v44 }
 0x1b9   : > { %5912 = vmatpush3.bf16.msra.mxu1 %v7179_v5 }
 0x1ba   : > { %5913 = vmatprep.subr.bf16.mxu1 %v7346_v42 }
 0x1bc   : > { %1986 = vmatmul.mubr.bf16.gmra.mrb[68].mxu1 %v6856_v46  ;;  %v6866_v46 = vld [vmem:[%s8488_s3 + $0x194] ss:$8 sps:$4 sm:$0xff]  }
 0x1bd   : > { %5914 = vmatpush3.bf16.msra.mxu1 %v7214_v28  ;;  %1993 = vmatprep.mubr.bf16.mxu1 %v6857_v6  ;;  %v6868_v6 = vld [vmem:[%s8488_s3 + $0x190] ss:$8 sps:$4 sm:$0xff]  }
 0x1be   : > { %5915 = vmatprep.subr.bf16.mxu1 %v7342_v33 }
 0x1c1   : > { %5916 = vmatpush3.bf16.msra.mxu1 %v7211_v25 }
 0x1c2   : > { %5917 = vmatprep.subr.bf16.mxu1 %v7382_v4 }
 0x1c4   : > { %1994 = vmatmul.mubr.bf16.gmra.mrb[72].mxu1 %v6859_v60  ;;  %v6869_v60 = vld [vmem:[%s8488_s3 + $0x1a4] ss:$8 sps:$4 sm:$0xff]  }
 0x1c5   : > { %5918 = vmatpush3.bf16.msra.mxu1 %v7246_v48  ;;  %2001 = vmatprep.mubr.bf16.mxu1 %v6860_v36  ;;  %v6871_v36 = vld [vmem:[%s8488_s3 + $0x1a0] ss:$8 sps:$4 sm:$0xff]  }
 0x1c6   : > { %5919 = vmatprep.subr.bf16.mxu1 %v7378_v56 }
 0x1c9   : > { %5920 = vmatpush3.bf16.msra.mxu1 %v7243_v45 }
 0x1ca   : > { %5921 = vmatprep.subr.bf16.mxu1 %v7418_v40 }
 0x1cc   : > { %2002 = vmatmul.mubr.bf16.gmra.mrb[76].mxu1 %v6862_v27  ;;  %v6872_v27 = vld [vmem:[%s8488_s3 + $0x1b4] ss:$8 sps:$4 sm:$0xff]  }
 0x1cd   : > { %5922 = vmatpush3.bf16.msra.mxu1 %v7278_v16  ;;  %2197 = vmatprep.mubr.bf16.mxu1 %v6865_v19  ;;  %v6874_v19 = vld [vmem:[%s8488_s3 + $0x1b0] ss:$8 sps:$4 sm:$0xff]  }
 0x1ce   : > { %5923 = vmatprep.subr.bf16.mxu1 %v7414_v30 }
 0x1d1   : > { %5924 = vmatpush3.bf16.msra.mxu1 %v7275_v12 }
 0x1d2   : > { %5955 = vmatprep.subr.bf16.mxu1 %v7310_v50 }
 0x1d4   : > { %2198 = vmatmul.mubr.bf16.vlgmr.msra.gmra.mrb[80].mxu1 %v6863_v24  ;;  %v6877_v24 = vld [vmem:[%s8488_s3 + $0x1c4] ss:$8 sps:$4 sm:$0xff]  }
 0x1d5   : > { %5956 = vmatpush3.bf16.msra.mxu1 %v7182_v8  ;;  %2205 = vmatprep.mubr.bf16.mxu1 %v6866_v46  ;;  %v6875_v46 = vld [vmem:[%s8488_s3 + $0x1c0] ss:$8 sps:$4 sm:$0xff]  }
 0x1d6   : > { %5957 = vmatprep.subr.bf16.mxu1 %v7307_v44 }
 0x1d9   : > { %5958 = vmatpush3.bf16.msra.mxu1 %v7179_v5 }
 0x1da   : > { %5959 = vmatprep.subr.bf16.mxu1 %v7346_v42 }
 0x1dc   : > { %2206 = vmatmul.mubr.bf16.gmra.mrb[84].mxu1 %v6868_v6 }
 0x1dd   : > { %5960 = vmatpush3.bf16.msra.mxu1 %v7214_v28  ;;  %2213 = vmatprep.mubr.bf16.mxu1 %v6869_v60 }
 0x1de   : > { %5961 = vmatprep.subr.bf16.mxu1 %v7342_v33 }
 0x1e1   : > { %5962 = vmatpush3.bf16.msra.mxu1 %v7211_v25 }
 0x1e2   : > { %5963 = vmatprep.subr.bf16.mxu1 %v7382_v4 }
 0x1e4   : > { %2214 = vmatmul.mubr.bf16.gmra.mrb[88].mxu1 %v6871_v36 }
 0x1e5   : > { %5964 = vmatpush3.bf16.msra.mxu1 %v7246_v48  ;;  %2221 = vmatprep.mubr.bf16.mxu1 %v6872_v27 }
 0x1e6   : > { %5965 = vmatprep.subr.bf16.mxu1 %v7378_v56 }
 0x1e9   : > { %5966 = vmatpush3.bf16.msra.mxu1 %v7243_v45 }
 0x1ea   : > { %5967 = vmatprep.subr.bf16.mxu1 %v7418_v40 }
 0x1ec   : > { %2222 = vmatmul.mubr.bf16.gmra.mrb[92].mxu1 %v6874_v19 }
 0x1ed   : > { %5968 = vmatpush3.bf16.msra.mxu1 %v7278_v16  ;;  %2417 = vmatprep.mubr.bf16.mxu1 %v6877_v24 }
 0x1ee   : > { %5969 = vmatprep.subr.bf16.mxu1 %v7414_v30 }
 0x1f1   : > { %5970 = vmatpush3.bf16.msra.mxu1 %v7275_v12 }
 0x1f2   : > { %6001 = vmatprep.subr.bf16.mxu1 %v7310_v50 }
 0x1f4   : > { %2418 = vmatmul.mubr.bf16.vlgmr.msra.gmra.mrb[96].mxu1 %v6875_v46 }
 0x1f5   : > { %6002 = vmatpush3.bf16.msra.mxu1 %v7182_v8 }
 0x1f6   : > { %6003 = vmatprep.subr.bf16.mxu1 %v7307_v44 }
 0x1f9   : > { %6004 = vmatpush3.bf16.msra.mxu1 %v7179_v5 }
 0x1fa   : > { %6005 = vmatprep.subr.bf16.mxu1 %v7346_v42 }
 0x1fd   : > { %6006 = vmatpush3.bf16.msra.mxu1 %v7214_v28 }
 0x1fe   : > { %6007 = vmatprep.subr.bf16.mxu1 %v7342_v33 }
 0x201   : > { %6008 = vmatpush3.bf16.msra.mxu1 %v7211_v25 }
 0x202   : > { %6009 = vmatprep.subr.bf16.mxu1 %v7382_v4 }
 0x205   : > { %6010 = vmatpush3.bf16.msra.mxu1 %v7246_v48 }
 0x206   : > { %6011 = vmatprep.subr.bf16.mxu1 %v7378_v56 }
 0x207   : > { %v5649_v6 = vpop.f32.mrb[0].mxu1 }
 0x208   : > { %v5650_v60 = vpop.f32.mrb[1].mxu1 }
 0x209   : > { %v7690_v36 = vadd.f32 %v5650_v60, %v5649_v6  ;;  %v5652_v27 = vpop.f32.mrb[2].mxu1  ;;  %6012 = vmatpush3.bf16.msra.mxu1 %v7243_v45 }
 0x20a   : > { %v5653_v19 = vpop.f32.mrb[3].mxu1  ;;  %6013 = vmatprep.subr.bf16.mxu1 %v7418_v40 }
 0x20b   : > { %v7694_v24 = vadd.f32 %v5653_v19, %v5652_v27 }
 0x20d   : > { %6014 = vmatpush3.bf16.msra.mxu1 %v7278_v16 }
 0x20e   : > { %6015 = vmatprep.subr.bf16.mxu1 %v7414_v30 }
 0x20f   : > { %v5655_v51 = vpop.f32.mrb[4].mxu1 }
 0x210   : > { %v5656_v15 = vpop.f32.mrb[5].mxu1 }
 0x211   : > { %v7700_v21 = vadd.f32 %v5656_v15, %v5655_v51  ;;  %v5658_v6 = vpop.f32.mrb[6].mxu1  ;;  %6016 = vmatpush3.bf16.msra.mxu1 %v7275_v12 }
 0x212   : > { %v5659_v60 = vpop.f32.mrb[7].mxu1 }
 0x213   : > { %v7703_v23 = vadd.f32 %v5659_v60, %v5658_v6 }
 0x217   : > { %v5661_v19 = vpop.f32.mrb[8].mxu1 }
 0x218   : > { %v5662_v63 = vpop.f32.mrb[9].mxu1 }
 0x219   : > { %v7707_v35 = vadd.f32 %v5662_v63, %v5661_v19  ;;  %v5664_v1 = vpop.f32.mrb[10].mxu1 }
 0x21a   : > { %v5665_v38 = vpop.f32.mrb[11].mxu1 }
 0x21b   : > { %v7709_v46 = vadd.f32 %v5665_v38, %v5664_v1 }
 0x21f   : > { %v5667_v51 = vpop.f32.mrb[12].mxu1 }
 0x220   : > { %v5668_v49 = vpop.f32.mrb[13].mxu1 }
 0x221   : > { %v7713_v57 = vadd.f32 %v5668_v49, %v5667_v51  ;;  %v5670_v6 = vpop.f32.mrb[14].mxu1  ;;  %v6898_v49 = vld [vmem:[%s8488_s3 + $0x1d4] ss:$8 sps:$4 sm:$0xff]   ;;  %v6900_v51 = vld [vmem:[%s8488_s3 + $0x1d0] ss:$8 sps:$4 sm:$0xff]  }
 0x222   : > { %v5671_v60 = vpop.f32.mrb[15].mxu1  ;;  %2425 = vmatprep.mubr.bf16.mxu1 %v6898_v49 }
 0x223   : > { %v7715_v39 = vadd.f32 %v5671_v60, %v5670_v6  ;;  %v6901_v60 = vld [vmem:[%s8488_s3 + $0x1e4] ss:$8 sps:$4 sm:$0xff]   ;;  %2426 = vmatmul.mubr.bf16.gmra.mrb[100].mxu1 %v6900_v51 }
 0x224   : > { %2433 = vmatprep.mubr.bf16.mxu1 %v6901_v60  ;;  %v6882_v60 = vld [vmem:[%s8491_s6 + $0x20] sm:$0xff]  }
 0x227   : > { %v5689_v63 = vpop.f32.mrb[16].mxu1 }
 0x228   : > { %v5690_v19 = vpop.f32.mrb[17].mxu1 }
 0x229   : > { %v5691_v7 = vadd.f32 %v5690_v19, %v5689_v63  ;;  %v5692_v52 = vpop.f32.mrb[18].mxu1 }
 0x22a   : > { %v5693_v1 = vpop.f32.mrb[19].mxu1 }
 0x22b   : > { %v5694_v38 = vadd.f32 %v5693_v1, %v5692_v52  ;;  %v6881_v1 = vld [vmem:[%s8491_s6 + $0x8] sm:$0xff]  }
 0x22d   : > { %v1048_v62 = vpack.c.bf16 %v5694_v38, %v5691_v7  ;;  %v6903_v38 = vld [vmem:[%s8488_s3 + $0x1e0] ss:$8 sps:$4 sm:$0xff]  }
 0x22e   : > { %2434 = vmatmul.mubr.bf16.gmra.mrb[104].mxu1 %v6903_v38 }
 0x22f   : > { %v5695_v15 = vpop.f32.mrb[20].mxu1  ;;  %6262 = vmatprep.mubr.msk.bf16.mxu0 %vm1069_vm2, %v1048_v62 }
 0x230   : > { %v5696_v6 = vpop.f32.mrb[21].mxu1 }
 0x231   : > { %v5697_v63 = vadd.f32 %v5696_v6, %v5695_v15  ;;  %v5698_v52 = vpop.f32.mrb[22].mxu1  ;;  %v6904_v15 = vld [vmem:[%s8488_s3 + $0x1f4] ss:$8 sps:$4 sm:$0xff]  }
 0x232   : > { %v5699_v7 = vpop.f32.mrb[23].mxu1  ;;  %2441 = vmatprep.mubr.bf16.mxu1 %v6904_v15 }
 0x233   : > { %v5700_v19 = vadd.f32 %v5699_v7, %v5698_v52 }
 0x235   : > { %v1049_v62 = vpack.c.bf16 %v5700_v19, %v5697_v63  ;;  %v6906_v19 = vld [vmem:[%s8488_s3 + $0x1f0] ss:$8 sps:$4 sm:$0xff]  }
 0x236   : > { %2442 = vmatmul.mubr.bf16.gmra.mrb[108].mxu1 %v6906_v19 }
 0x237   : > { %v5701_v27 = vpop.f32.mrb[24].mxu1  ;;  %6263 = vmatmul.mubr.msk.bf16.vlgmr.msra.gmra.mrb[32].mxu0 %vm1069_vm2, %v1049_v62 }
 0x238   : > { %v5702_v49 = vpop.f32.mrb[25].mxu1  ;;  %6271 = vmatpush3.bf16.msra.mxu0 %v7621_v20  ;;  %v6909_v20 = vld [vmem:[%s8488_s3 + $0x204] ss:$8 sps:$4 sm:$0xff]  }
 0x239   : > { %v5703_v51 = vadd.f32 %v5702_v49, %v5701_v27  ;;  %v5704_v6 = vpop.f32.mrb[26].mxu1  ;;  %6272 = vmatprep.subr.bf16.mxu0 %v6881_v1  ;;  %2637 = vmatprep.mubr.bf16.mxu1 %v6909_v20 }
 0x23a   : > { %v5705_v63 = vpop.f32.mrb[27].mxu1 }
 0x23b   : > { %v5706_v52 = vadd.f32 %v5705_v63, %v5704_v6  ;;  %v6910_v63 = vld [vmem:[%s8488_s3 + $0x214] ss:$8 sps:$4 sm:$0xff]  }
 0x23c   : > { %6273 = vmatpush3.bf16.msra.mxu0 %v6881_v1 }
 0x23d   : > { %v1050_v7 = vpack.c.bf16 %v5706_v52, %v5703_v51  ;;  %6282 = vmatprep.subr.bf16.mxu0 %v6882_v60  ;;  %v6907_v51 = vld [vmem:[%s8488_s3 + $0x200] ss:$8 sps:$4 sm:$0xff]   ;;  %v8532_v52 = vpack.c.bf16 %v7694_v24, %v7690_v36  ;;  %v8533_v36 = vpack.c.bf16 %v7703_v23, %v7700_v21  ;;  %v6884_v21 = vld [vmem:[%s8491_s6 + $0x30] sm:$0xff]  }
 0x23e   : > { %2638 = vmatmul.mubr.bf16.vlgmr.msra.gmra.mrb[112].mxu1 %v6907_v51 }
 0x23f   : > { %v5707_v62 = vpop.f32.mrb[28].mxu1  ;;  %6266 = vmatprep.mubr.msk.bf16.mxu0 %vm1069_vm2, %v1050_v7  ;;  %2645 = vmatprep.mubr.bf16.mxu1 %v6910_v63 }
 0x240   : > { %v5708_v27 = vpop.f32.mrb[29].mxu1 }
 0x241   : > { %v5709_v49 = vadd.f32 %v5708_v27, %v5707_v62  ;;  %v5710_v41 = vpop.f32.mrb[30].mxu1 }
 0x242   : > { %v5711_v38 = vpop.f32.mrb[31].mxu1 }
 0x243   : > { %v5712_v15 = vadd.f32 %v5711_v38, %v5710_v41  ;;  %v6912_v38 = vld [vmem:[%s8488_s3 + $0x210] ss:$8 sps:$4 sm:$0xff]  }
 0x245   : > { %v1051_v1 = vpack.c.bf16 %v5712_v15, %v5709_v49  ;;  %v6883_v49 = vld [vmem:[%s8491_s6 + $0x28] sm:$0xff]  }
 0x246   : > { %v6913_v15 = vld [vmem:[%s8488_s3 + $0x224] ss:$8 sps:$4 sm:$0xff]   ;;  %2646 = vmatmul.mubr.bf16.gmra.mrb[116].mxu1 %v6912_v38 }
 0x247   : > { %6267 = vmatmul.mubr.msk.bf16.gmra.mrb[36].mxu0 %vm1069_vm2, %v1051_v1  ;;  %v5741_v6 = vpop.f32.mrb[32].mxu1  ;;  %v8534_v1 = vpack.c.bf16 %v7709_v46, %v7707_v35  ;;  %2653 = vmatprep.mubr.bf16.mxu1 %v6913_v15  ;;  %v6915_v35 = vld [vmem:[%s8488_s3 + $0x220] ss:$8 sps:$4 sm:$0xff]   ;;  %v8535_v46 = vpack.c.bf16 %v7715_v39, %v7713_v57  ;;  %v6885_v39 = vld [vmem:[%s8491_s6 + $0x38] sm:$0xff]  }
 0x248   : > { %6274 = vmatprep.mubr.msk.bf16.mxu0 %vm1069_vm2, %v8532_v52  ;;  %v5742_v7 = vpop.f32.mrb[33].mxu1  ;;  %v6918_v57 = vld [vmem:[%s8488_s3 + $0x230] ss:$8 sps:$4 sm:$0xff]  }
 0x249   : > { %v5743_v41 = vadd.f32 %v5742_v7, %v5741_v6  ;;  %v5744_v19 = vpop.f32.mrb[34].mxu1 }
 0x24a   : > { %v5745_v62 = vpop.f32.mrb[35].mxu1 }
 0x24b   : > { %v5746_v20 = vadd.f32 %v5745_v62, %v5744_v19 }
 0x24d   : > { %v1350_v27 = vpack.c.bf16 %v5746_v20, %v5743_v41  ;;  %v6916_v41 = vld [vmem:[%s8488_s3 + $0x234] ss:$8 sps:$4 sm:$0xff]  }
 0x24e   : > { %2654 = vmatmul.mubr.bf16.gmra.mrb[120].mxu1 %v6915_v35 }
 0x24f   : > { %6275 = vmatmul.mubr.msk.bf16.vlgmr.msra.gmra.mrb[32].mxu0 %vm1069_vm2, %v8533_v36  ;;  %v5747_v24 = vpop.f32.mrb[36].mxu1  ;;  %2661 = vmatprep.mubr.bf16.mxu1 %v6916_v41 }
 0x250   : > { %6278 = vmatprep.mubr.msk.bf16.mxu0 %vm1069_vm2, %v8534_v1  ;;  %v5748_v51 = vpop.f32.mrb[37].mxu1  ;;  %6283 = vmatpush3.bf16.msra.mxu0 %v6882_v60 }
 0x251   : > { %v5749_v6 = vadd.f32 %v5748_v51, %v5747_v24  ;;  %v5750_v63 = vpop.f32.mrb[38].mxu1  ;;  %6284 = vmatprep.subr.bf16.mxu0 %v6883_v49 }
 0x252   : > { %v5751_v23 = vpop.f32.mrb[39].mxu1 }
 0x253   : > { %v5752_v52 = vadd.f32 %v5751_v23, %v5750_v63 }
 0x254   : > { %6285 = vmatpush3.bf16.msra.mxu0 %v6883_v49 }
 0x255   : > { %v1351_v7 = vpack.c.bf16 %v5752_v52, %v5749_v6  ;;  %6294 = vmatprep.subr.bf16.mxu0 %v6884_v21 }
 0x256   : > { %2662 = vmatmul.mubr.bf16.gmra.mrb[124].mxu1 %v6918_v57 }
 0x257   : > { %6279 = vmatmul.mubr.msk.bf16.gmra.mrb[36].mxu0 %vm1069_vm2, %v8535_v46  ;;  %v5753_v60 = vpop.f32.mrb[40].mxu1 }
 0x258   : > { %v5754_v19 = vpop.f32.mrb[41].mxu1  ;;  %6286 = vmatprep.mubr.msk.bf16.mxu0 %vm1069_vm2, %v1350_v27 }
 0x259   : > { %v5755_v62 = vadd.f32 %v5754_v19, %v5753_v60  ;;  %v5756_v20 = vpop.f32.mrb[42].mxu1 }
 0x25a   : > { %v5757_v49 = vpop.f32.mrb[43].mxu1 }
 0x25b   : > { %v5758_v38 = vadd.f32 %v5757_v49, %v5756_v20 }
 0x25d   : > { %v1352_v36 = vpack.c.bf16 %v5758_v38, %v5755_v62 }
 0x25f   : > { %v5759_v24 = vpop.f32.mrb[44].mxu1  ;;  %6287 = vmatmul.mubr.msk.bf16.vlgmr.msra.gmra.mrb[32].mxu0 %vm1069_vm2, %v1351_v7 }
 0x260   : > { %6295 = vmatpush3.bf16.msra.mxu0 %v6884_v21  ;;  %v5760_v27 = vpop.f32.mrb[45].mxu1  ;;  %6290 = vmatprep.mubr.msk.bf16.mxu0 %vm1069_vm2, %v1352_v36 }
 0x261   : > { %v5761_v15 = vadd.f32 %v5760_v27, %v5759_v24  ;;  %v5762_v1 = vpop.f32.mrb[46].mxu1  ;;  %6296 = vmatprep.subr.bf16.mxu0 %v6885_v39 }
 0x262   : > { %v5763_v51 = vpop.f32.mrb[47].mxu1 }
 0x263   : > { %v5764_v6 = vadd.f32 %v5763_v51, %v5762_v1 }
 0x264   : > { %6297 = vmatpush3.bf16.msra.mxu0 %v6885_v39 }
 0x265   : > { %v1353_v63 = vpack.c.bf16 %v5764_v6, %v5761_v15  ;;  %5817 = vmatprep.subr.bf16.mxu0 %v7310_v50 }
 0x267   : > { %6291 = vmatmul.mubr.msk.bf16.gmra.mrb[36].mxu0 %vm1069_vm2, %v1353_v63  ;;  %v5787_v23 = vpop.f32.mrb[48].mxu1 }
 0x268   : > { %v5788_v52 = vpop.f32.mrb[49].mxu1 }
 0x269   : > { %v5789_v35 = vadd.f32 %v5788_v52, %v5787_v23  ;;  %v5790_v7 = vpop.f32.mrb[50].mxu1 }
 0x26a   : > { %v5791_v21 = vpop.f32.mrb[51].mxu1 }
 0x26b   : > { %v5792_v46 = vadd.f32 %v5791_v21, %v5790_v7 }
 0x26d   : > { %v1570_v60 = vpack.c.bf16 %v5792_v46, %v5789_v35 }
 0x26f   : > { %v5793_v41 = vpop.f32.mrb[52].mxu1  ;;  %6298 = vmatprep.mubr.msk.bf16.mxu0 %vm1069_vm2, %v1570_v60 }
 0x270   : > { %v5794_v19 = vpop.f32.mrb[53].mxu1 }
 0x271   : > { %v5795_v62 = vadd.f32 %v5794_v19, %v5793_v41  ;;  %v5796_v20 = vpop.f32.mrb[54].mxu1  ;;  %v6886_v41 = vld [vmem:[%s8488_s3 + $0x100] ss:$8 sps:$4 sm:$0xff]  }
 0x272   : > { %v5797_v49 = vpop.f32.mrb[55].mxu1 }
 0x273   : > { %v5798_v38 = vadd.f32 %v5797_v49, %v5796_v20 }
 0x275   : > { %v1571_v36 = vpack.c.bf16 %v5798_v38, %v5795_v62  ;;  %v6891_v38 = vld [vmem:[%s8488_s3 + $0x110] ss:$8 sps:$4 sm:$0xff]  }
 0x277   : > { %6299 = vmatmul.mubr.msk.bf16.vlgmr.msra.gmra.mrb[32].mxu0 %vm1069_vm2, %v1571_v36  ;;  %v5799_v50 = vpop.f32.mrb[56].mxu1  ;;  %v6892_v36 = vld [vmem:[%s8488_s3 + $0x124] ss:$8 sps:$4 sm:$0xff]  }
 0x278   : > { %5818 = vmatpush3.bf16.msra.mxu0 %v7182_v8  ;;  %v5800_v39 = vpop.f32.mrb[57].mxu1 }
 0x279   : > { %5819 = vmatprep.subr.bf16.mxu0 %v7307_v44  ;;  %v5801_v57 = vadd.f32 %v5800_v39, %v5799_v50  ;;  %v5802_v24 = vpop.f32.mrb[58].mxu1 }
 0x27a   : > { %v5803_v27 = vpop.f32.mrb[59].mxu1 }
 0x27b   : > { %v5804_v15 = vadd.f32 %v5803_v27, %v5802_v24 }
 0x27c   : > { %5820 = vmatpush3.bf16.msra.mxu0 %v7179_v5  ;;  %v6888_v5 = vld [vmem:[%s8488_s3 + $0x104] ss:$8 sps:$4 sm:$0xff]  }
 0x27d   : > { %5821 = vmatprep.subr.bf16.mxu0 %v7346_v42  ;;  %v1572_v1 = vpack.c.bf16 %v5804_v15, %v5801_v57 }
 0x27f   : > { %v5805_v51 = vpop.f32.mrb[60].mxu1  ;;  %6302 = vmatprep.mubr.msk.bf16.mxu0 %vm1069_vm2, %v1572_v1  ;;  %v6894_v1 = vld [vmem:[%s8488_s3 + $0x120] ss:$8 sps:$4 sm:$0xff]  }
 0x280   : > { %5822 = vmatpush3.bf16.msra.mxu0 %v7214_v28  ;;  %v5806_v6 = vpop.f32.mrb[61].mxu1 }
 0x281   : > { %5823 = vmatprep.subr.bf16.mxu0 %v7342_v33  ;;  %v5807_v8 = vadd.f32 %v5806_v6, %v5805_v51  ;;  %v5808_v63 = vpop.f32.mrb[62].mxu1  ;;  %v6895_v6 = vld [vmem:[%s8488_s3 + $0x134] ss:$8 sps:$4 sm:$0xff]  }
 0x282   : > { %v5809_v44 = vpop.f32.mrb[63].mxu1 }
 0x283   : > { %v5810_v23 = vadd.f32 %v5809_v44, %v5808_v63 }
 0x284   : > { %5824 = vmatpush3.bf16.msra.mxu0 %v7211_v25 }
 0x285   : > { %5825 = vmatprep.subr.bf16.mxu0 %v7382_v4  ;;  %v1573_v42 = vpack.c.bf16 %v5810_v23, %v5807_v8 }
 0x287   : > { %6303 = vmatmul.mubr.msk.bf16.gmra.mrb[36].mxu0 %vm1069_vm2, %v1573_v42  ;;  %v5879_v52 = vpop.f32.mrb[64].mxu1  ;;  %v6897_v42 = vld [vmem:[%s8488_s3 + $0x130] ss:$8 sps:$4 sm:$0xff]  }
 0x288   : > { %5826 = vmatpush3.bf16.msra.mxu0 %v7246_v48  ;;  %1757 = vmatprep.mubr.bf16.mxu0 %v6888_v5  ;;  %v5880_v28 = vpop.f32.mrb[65].mxu1 }
 0x289   : > { %5827 = vmatprep.subr.bf16.mxu0 %v7378_v56  ;;  %v7819_v33 = vadd.f32 %v5880_v28, %v5879_v52  ;;  %v5882_v35 = vpop.f32.mrb[66].mxu1 }
 0x28a   : > { %v5883_v25 = vpop.f32.mrb[67].mxu1 }
 0x28b   : > { %v7821_v7 = vadd.f32 %v5883_v25, %v5882_v35 }
 0x28c   : > { %5828 = vmatpush3.bf16.msra.mxu0 %v7243_v45 }
 0x28d   : > { %5829 = vmatprep.subr.bf16.mxu0 %v7418_v40  ;;  %v6889_v40 = vld [vmem:[%s8488_s3 + $0x114] ss:$8 sps:$4 sm:$0xff]  }
 0x28f   : > { %v5885_v21 = vpop.f32.mrb[68].mxu1 }
 0x290   : > { %5830 = vmatpush3.bf16.msra.mxu0 %v7278_v16  ;;  %v5886_v48 = vpop.f32.mrb[69].mxu1 }
 0x291   : > { %5831 = vmatprep.subr.bf16.mxu0 %v7414_v30  ;;  %v7829_v56 = vadd.f32 %v5886_v48, %v5885_v21  ;;  %v5888_v46 = vpop.f32.mrb[70].mxu1  ;;  %v6919_v48 = vld [vmem:[%s8491_s6 + $0x40] sm:$0xff]  }
 0x292   : > { %v5889_v60 = vpop.f32.mrb[71].mxu1 }
 0x293   : > { %v7834_v45 = vadd.f32 %v5889_v60, %v5888_v46 }
 0x294   : > { %5832 = vmatpush3.bf16.msra.mxu0 %v7275_v12 }
 0x295   : > { %6306 = vmatprep.subr.bf16.mxu0 %v6919_v48 }
 0x297   : > { %1758 = vmatmul.mubr.bf16.vlgmr.msra.gmra.mrb[40].mxu0 %v6886_v41  ;;  %v5891_v30 = vpop.f32.mrb[72].mxu1 }
 0x298   : > { %1765 = vmatprep.mubr.bf16.mxu0 %v6889_v40  ;;  %v5892_v19 = vpop.f32.mrb[73].mxu1  ;;  %6307 = vmatpush3.bf16.msra.mxu0 %v6919_v48 }
 0x299   : > { %v7842_v62 = vadd.f32 %v5892_v19, %v5891_v30  ;;  %v5894_v20 = vpop.f32.mrb[74].mxu1  ;;  %v6920_v30 = vld [vmem:[%s8491_s6 + $0x48] sm:$0xff]  }
 0x29a   : > { %v5895_v49 = vpop.f32.mrb[75].mxu1  ;;  %6308 = vmatprep.subr.bf16.mxu0 %v6920_v30 }
 0x29b   : > { %v7847_v12 = vadd.f32 %v5895_v49, %v5894_v20 }
 0x29c   : > { %6309 = vmatpush3.bf16.msra.mxu0 %v6920_v30 }
 0x29f   : > { %1766 = vmatmul.mubr.bf16.gmra.mrb[44].mxu0 %v6891_v38  ;;  %v5897_v39 = vpop.f32.mrb[76].mxu1 }
 0x2a0   : > { %1773 = vmatprep.mubr.bf16.mxu0 %v6892_v36  ;;  %v5898_v57 = vpop.f32.mrb[77].mxu1 }
 0x2a1   : > { %v7854_v24 = vadd.f32 %v5898_v57, %v5897_v39  ;;  %v5900_v27 = vpop.f32.mrb[78].mxu1 }
 0x2a2   : > { %v5901_v15 = vpop.f32.mrb[79].mxu1 }
 0x2a3   : > { %v7859_v51 = vadd.f32 %v5901_v15, %v5900_v27 }
 0x2a7   : > { %1774 = vmatmul.mubr.bf16.gmra.mrb[48].mxu0 %v6894_v1  ;;  %v5925_v63 = vpop.f32.mrb[80].mxu1 }
 0x2a8   : > { %1781 = vmatprep.mubr.bf16.mxu0 %v6895_v6  ;;  %v5926_v44 = vpop.f32.mrb[81].mxu1 }
 0x2a9   : > { %v7866_v23 = vadd.f32 %v5926_v44, %v5925_v63  ;;  %v5928_v5 = vpop.f32.mrb[82].mxu1 }
 0x2aa   : > { %v5929_v52 = vpop.f32.mrb[83].mxu1 }
 0x2ab   : > { %v7871_v28 = vadd.f32 %v5929_v52, %v5928_v5 }
 0x2af   : > { %1782 = vmatmul.mubr.bf16.gmra.mrb[52].mxu0 %v6897_v42  ;;  %v5931_v25 = vpop.f32.mrb[84].mxu1 }
 0x2b0   : > { %v5932_v21 = vpop.f32.mrb[85].mxu1 }
 0x2b1   : > { %v7878_v46 = vadd.f32 %v5932_v21, %v5931_v25  ;;  %v5934_v60 = vpop.f32.mrb[86].mxu1  ;;  %v7902_v21 = vld [vmem:[%s8491_s6 + $0x50] sm:$0xff]  }
 0x2b2   : > { %v5935_v41 = vpop.f32.mrb[87].mxu1  ;;  %6318 = vmatprep.subr.bf16.mxu0 %v7902_v21 }
 0x2b3   : > { %v7880_v40 = vadd.f32 %v5935_v41, %v5934_v60 }
 0x2b7   : > { %v5937_v20 = vpop.f32.mrb[88].mxu1 }
 0x2b8   : > { %v5938_v49 = vpop.f32.mrb[89].mxu1 }
 0x2b9   : > { %v7887_v38 = vadd.f32 %v5938_v49, %v5937_v20  ;;  %v5940_v36 = vpop.f32.mrb[90].mxu1 }
 0x2ba   : > { %v5941_v39 = vpop.f32.mrb[91].mxu1 }
 0x2bb   : > { %v7889_v57 = vadd.f32 %v5941_v39, %v5940_v36 }
 0x2bf   : > { %v5943_v15 = vpop.f32.mrb[92].mxu1 }
 0x2c0   : > { %v5944_v1 = vpop.f32.mrb[93].mxu1 }
 0x2c1   : > { %v7893_v6 = vadd.f32 %v5944_v1, %v5943_v15  ;;  %v5946_v63 = vpop.f32.mrb[94].mxu1 }
 0x2c2   : > { %v5947_v44 = vpop.f32.mrb[95].mxu1 }
 0x2c3   : > { %v7895_v5 = vadd.f32 %v5947_v44, %v5946_v63 }
 0x2c7   : > { %v5971_v52 = vpop.f32.mrb[96].mxu1 }
 0x2c8   : > { %v5972_v25 = vpop.f32.mrb[97].mxu1 }
 0x2c9   : > { %v7904_v48 = vadd.f32 %v5972_v25, %v5971_v52  ;;  %v5974_v60 = vpop.f32.mrb[98].mxu1 }
 0x2ca   : > { %v5975_v41 = vpop.f32.mrb[99].mxu1 }
 0x2cb   : > { %v7907_v30 = vadd.f32 %v5975_v41, %v5974_v60 }
 0x2f6   : > { %v5977_v20 = vpop.f32.mrb[100].mxu1 }
 0x2f7   : > { %v5978_v49 = vpop.f32.mrb[101].mxu1 }
 0x2f8   : > { %v7911_v39 = vadd.f32 %v5978_v49, %v5977_v20  ;;  %v5980_v15 = vpop.f32.mrb[102].mxu1 }
 0x2f9   : > { %v5981_v1 = vpop.f32.mrb[103].mxu1 }
 0x2fa   : > { %v7913_v63 = vadd.f32 %v5981_v1, %v5980_v15 }
 0x301   : > { %v5983_v44 = vpop.f32.mrb[104].mxu1 }
 0x302   : > { %v5984_v52 = vpop.f32.mrb[105].mxu1 }
 0x303   : > { %v7917_v42 = vadd.f32 %v5984_v52, %v5983_v44  ;;  %v5986_v60 = vpop.f32.mrb[106].mxu1 }
 0x304   : > { %v5987_v41 = vpop.f32.mrb[107].mxu1 }
 0x305   : > { %v7919_v27 = vadd.f32 %v5987_v41, %v5986_v60 }
 0x309   : > { %v5989_v19 = vpop.f32.mrb[108].mxu1 }
 0x30a   : > { %v5990_v35 = vpop.f32.mrb[109].mxu1 }
 0x30b   : > { %v7923_v49 = vadd.f32 %v5990_v35, %v5989_v19  ;;  %v5992_v15 = vpop.f32.mrb[110].mxu1 }
 0x30c   : > { %v5993_v1 = vpop.f32.mrb[111].mxu1 }
 0x30d   : > { %v7925_v36 = vadd.f32 %v5993_v1, %v5992_v15 }
 0x311   : > { %v6017_v8 = vpop.f32.mrb[112].mxu1 }
 0x312   : > { %v6018_v50 = vpop.f32.mrb[113].mxu1 }
 0x313   : > { %v7929_v52 = vadd.f32 %v6018_v50, %v6017_v8  ;;  %v6020_v60 = vpop.f32.mrb[114].mxu1 }
 0x314   : > { %v6021_v41 = vpop.f32.mrb[115].mxu1 }
 0x315   : > { %v7931_v25 = vadd.f32 %v6021_v41, %v6020_v60 }
 0x319   : > { %v6023_v16 = vpop.f32.mrb[116].mxu1 }
 0x31a   : > { %v6024_v4 = vpop.f32.mrb[117].mxu1 }
 0x31b   : > { %v7935_v19 = vadd.f32 %v6024_v4, %v6023_v16  ;;  %v6026_v15 = vpop.f32.mrb[118].mxu1 }
 0x31c   : > { %v6027_v1 = vpop.f32.mrb[119].mxu1 }
 0x31d   : > { %v7937_v20 = vadd.f32 %v6027_v1, %v6026_v15 }
 0x321   : > { %v6029_v2 = vpop.f32.mrb[120].mxu1 }
 0x322   : > { %v6030_v29 = vpop.f32.mrb[121].mxu1 }
 0x323   : > { %v7941_v8 = vadd.f32 %v6030_v29, %v6029_v2  ;;  %v6032_v60 = vpop.f32.mrb[122].mxu1 }
 0x324   : > { %v6033_v41 = vpop.f32.mrb[123].mxu1 }
 0x325   : > { %v7943_v44 = vadd.f32 %v6033_v41, %v6032_v60 }
 0x329   : > { %v6035_v34 = vpop.f32.mrb[124].mxu1 }
 0x32a   : > { %v6036_v43 = vpop.f32.mrb[125].mxu1 }
 0x32b   : > { %v7947_v16 = vadd.f32 %v6036_v43, %v6035_v34  ;;  %v6038_v15 = vpop.f32.mrb[126].mxu1 }
 0x32c   : > { %v6039_v1 = vpop.f32.mrb[127].mxu1 }
 0x32d   : > { %v7949_v35 = vadd.f32 %v6039_v1, %v6038_v15  ;;  %v6922_v1 = vld [vmem:[%s8491_s6 + $0x58] sm:$0xff]  }
 0x36a   : > { %v5833_v29 = vpop.f32.mrb[40].mxu0 }
 0x36b   : > { %v5834_v2 = vpop.f32.mrb[41].mxu0 }
 0x36c   : > { %v5835_v0 = vadd.f32 %v5834_v2, %v5833_v29  ;;  %v5836_v31 = vpop.f32.mrb[42].mxu0 }
 0x36d   : > { %v5837_v60 = vpop.f32.mrb[43].mxu0 }
 0x36e   : > { %v5838_v41 = vadd.f32 %v5837_v60, %v5836_v31 }
 0x370   : > { %v1790_v37 = vpack.c.bf16 %v5838_v41, %v5835_v0 }
 0x372   : > { %v5839_v47 = vpop.f32.mrb[44].mxu0  ;;  %6310 = vmatprep.mubr.msk.bf16.mxu0 %vm1069_vm2, %v1790_v37  ;;  %v6923_v37 = vld [vmem:[%s8491_s6 + $0x60] sm:$0xff]  }
 0x373   : > { %v5840_v4 = vpop.f32.mrb[45].mxu0 }
 0x374   : > { %v5841_v34 = vadd.f32 %v5840_v4, %v5839_v47  ;;  %v5842_v43 = vpop.f32.mrb[46].mxu0 }
 0x375   : > { %v5843_v13 = vpop.f32.mrb[47].mxu0 }
 0x376   : > { %v5844_v9 = vadd.f32 %v5843_v13, %v5842_v43  ;;  %v8536_v43 = vpack.c.bf16 %v7821_v7, %v7819_v33  ;;  %v6925_v33 = vld [vmem:[%s8491_s6 + $0x70] sm:$0xff]   ;;  %v8539_v7 = vpack.c.bf16 %v7859_v51, %v7854_v24  ;;  %v6927_v24 = vld [vmem:[%s8491_s6 + $0x80] sm:$0xff]   ;;  %v8543_v51 = vpack.c.bf16 %v7895_v5, %v7893_v6 }
 0x377   : > { %v8549_v6 = vpack.c.bf16 %v7937_v20, %v7935_v19  ;;  %v8551_v5 = vpack.c.bf16 %v7949_v35, %v7947_v16  ;;  %v7011_v20 = vmov 0.0  }
 0x378   : > { %v1791_v15 = vpack.c.bf16 %v5844_v9, %v5841_v34 }
 0x37a   : > { %v5845_v50 = vpop.f32.mrb[48].mxu0  ;;  %6311 = vmatmul.mubr.msk.bf16.vlgmr.msra.gmra.mrb[32].mxu0 %vm1069_vm2, %v1791_v15  ;;  %v6924_v15 = vld [vmem:[%s8491_s6 + $0x68] sm:$0xff]  }
 0x37b   : > { %v5846_v29 = vpop.f32.mrb[49].mxu0  ;;  %6319 = vmatpush3.bf16.msra.mxu0 %v7902_v21 }
 0x37c   : > { %v5847_v31 = vadd.f32 %v5846_v29, %v5845_v50  ;;  %v5848_v0 = vpop.f32.mrb[50].mxu0  ;;  %6320 = vmatprep.subr.bf16.mxu0 %v6922_v1  ;;  %v8538_v29 = vpack.c.bf16 %v7847_v12, %v7842_v62  ;;  %v8541_v62 = vpack.c.bf16 %v7880_v40, %v7878_v46  ;;  %v8542_v12 = vpack.c.bf16 %v7889_v57, %v7887_v38 }
 0x37d   : > { %v5849_v47 = vpop.f32.mrb[51].mxu0  ;;  %v8545_v46 = vpack.c.bf16 %v7913_v63, %v7911_v39  ;;  %v8546_v40 = vpack.c.bf16 %v7919_v27, %v7917_v42  ;;  %v8547_v38 = vpack.c.bf16 %v7925_v36, %v7923_v49  ;;  %v8548_v57 = vpack.c.bf16 %v7931_v25, %v7929_v52  ;;  %v2814_v42 = vld [vmem:[%s8493_s8] sm:$0xff]  ;;  %v2816_v39 = vld [vmem:[%s8493_s8 + $0x10] sm:$0xff]  ;;  %v2817_v63 = vld [vmem:[%s8493_s8 + $0x18] sm:$0xff] }
 0x37e   : > { %v5850_v13 = vadd.f32 %v5849_v47, %v5848_v0  ;;  %v8550_v27 = vpack.c.bf16 %v7943_v44, %v7941_v8  ;;  %v7009_v36 = vmov 0.0|0.0   ;;  %v6645_v25 = vpack.c.bf16 %v2817_v63, %v2816_v39  ;;  %v5372_v49 = vld [vmem:[%s8492_s7] ss:$0 sm:$0xff] }
 0x37f   : > { %6321 = vmatpush3.bf16.msra.mxu0 %v6922_v1  ;;  %v8537_v1 = vpack.c.bf16 %v7834_v45, %v7829_v56  ;;  %v8540_v56 = vpack.c.bf16 %v7871_v28, %v7866_v23  ;;  %v6926_v45 = vld [vmem:[%s8491_s6 + $0x78] sm:$0xff]   ;;  %v8544_v23 = vpack.c.bf16 %v7907_v30, %v7904_v48  ;;  %v6928_v28 = vld [vmem:[%s8491_s6 + $0x88] sm:$0xff]   ;;  %v2897_v63 = vlaneseq }
 0x380   : > { %v1792_v9 = vpack.c.bf16 %v5850_v13, %v5847_v31  ;;  %6330 = vmatprep.subr.bf16.mxu0 %v6923_v37  ;;  %v2815_v48 = vld [vmem:[%s8493_s8 + $0x8] sm:$0xff] }
 0x381   : > { %v6642_v30 = vpack.c.bf16 %v2815_v48, %v2814_v42 }
 0x382   : > { %v5851_v4 = vpop.f32.mrb[52].mxu0  ;;  %6314 = vmatprep.mubr.msk.bf16.mxu0 %vm1069_vm2, %v1792_v9 }
 0x383   : > { %v5852_v2 = vpop.f32.mrb[53].mxu0 }
 0x384   : > { %v5853_v60 = vadd.f32 %v5852_v2, %v5851_v4  ;;  %v5854_v41 = vpop.f32.mrb[54].mxu0 }
 0x385   : > { %v5855_v34 = vpop.f32.mrb[55].mxu0 }
 0x386   : > { %v5856_v21 = vadd.f32 %v5855_v34, %v5854_v41 }
 0x388   : > { %v1793_v50 = vpack.c.bf16 %v5856_v21, %v5853_v60 }
 0x38a   : > { %6315 = vmatmul.mubr.msk.bf16.gmra.mrb[36].mxu0 %vm1069_vm2, %v1793_v50 }
 0x38b   : > { %6322 = vmatprep.mubr.msk.bf16.mxu0 %vm1069_vm2, %v8536_v43 }
 0x392   : > { %6323 = vmatmul.mubr.msk.bf16.vlgmr.msra.gmra.mrb[32].mxu0 %vm1069_vm2, %v8537_v1 }
 0x393   : > { %6326 = vmatprep.mubr.msk.bf16.mxu0 %vm1069_vm2, %v8538_v29  ;;  %6331 = vmatpush3.bf16.msra.mxu0 %v6923_v37 }
 0x394   : > { %6332 = vmatprep.subr.bf16.mxu0 %v6924_v15 }
 0x397   : > { %6333 = vmatpush3.bf16.msra.mxu0 %v6924_v15 }
 0x398   : > { %6342 = vmatprep.subr.bf16.mxu0 %v6925_v33 }
 0x39a   : > { %6327 = vmatmul.mubr.msk.bf16.gmra.mrb[36].mxu0 %vm1069_vm2, %v8539_v7 }
 0x39b   : > { %6334 = vmatprep.mubr.msk.bf16.mxu0 %vm1069_vm2, %v8540_v56 }
 0x3a2   : > { %6335 = vmatmul.mubr.msk.bf16.vlgmr.msra.gmra.mrb[32].mxu0 %vm1069_vm2, %v8541_v62 }
 0x3a3   : > { %6338 = vmatprep.mubr.msk.bf16.mxu0 %vm1069_vm2, %v8542_v12  ;;  %6343 = vmatpush3.bf16.msra.mxu0 %v6925_v33 }
 0x3a4   : > { %6344 = vmatprep.subr.bf16.mxu0 %v6926_v45 }
 0x3a7   : > { %6345 = vmatpush3.bf16.msra.mxu0 %v6926_v45 }
 0x3a8   : > { %6354 = vmatprep.subr.bf16.mxu0 %v6927_v24 }
 0x3aa   : > { %6339 = vmatmul.mubr.msk.bf16.gmra.mrb[36].mxu0 %vm1069_vm2, %v8543_v51 }
 0x3ab   : > { %6346 = vmatprep.mubr.msk.bf16.mxu0 %vm1069_vm2, %v8544_v23 }
 0x3b2   : > { %6347 = vmatmul.mubr.msk.bf16.vlgmr.msra.gmra.mrb[32].mxu0 %vm1069_vm2, %v8545_v46 }
 0x3b3   : > { %6350 = vmatprep.mubr.msk.bf16.mxu0 %vm1069_vm2, %v8546_v40  ;;  %6355 = vmatpush3.bf16.msra.mxu0 %v6927_v24 }
 0x3b4   : > { %6356 = vmatprep.subr.bf16.mxu0 %v6928_v28 }
 0x3b7   : > { %6357 = vmatpush3.bf16.msra.mxu0 %v6928_v28 }
 0x3b8   : > { %6641 = vmatprep.subr.bf16.mxu0 %v7009_v36 }
 0x3ba   : > { %6351 = vmatmul.mubr.msk.bf16.gmra.mrb[36].mxu0 %vm1069_vm2, %v8547_v38 }
 0x3bb   : > { %6358 = vmatprep.mubr.msk.bf16.mxu0 %vm1069_vm2, %v8548_v57 }
 0x3c2   : > { %6359 = vmatmul.mubr.msk.bf16.vlgmr.msra.gmra.mrb[32].mxu0 %vm1069_vm2, %v8549_v6 }
 0x3c3   : > { %6362 = vmatprep.mubr.msk.bf16.mxu0 %vm1069_vm2, %v8550_v27  ;;  %6643 = vmatpush3.bf16.msra.mxu0 %v6642_v30  ;;  %v6929_v27 = vld [vmem:[%s8490_s5 + $0x20] sm:$0xff]  }
 0x3c4   : > { %6644 = vmatprep.subr.bf16.mxu0 %v7009_v36  ;;  %6401 = vmatprep.mubr.msk.bf16.mxu1 %vm2965_vm4, %v6929_v27  ;;  %v6940_v27 = vld [vmem:[%s8490_s5 + $0x58] sm:$0xff]  }
 0x3c7   : > { %6646 = vmatpush3.bf16.msra.mxu0 %v6645_v25  ;;  %v2898_v25 = vshrl.u32 %v2897_v63, 7  ;;  %v6946_v63 = vld [vmem:[%s8490_s5 + $0x88] sm:$0xff]  }
 0x3ca   : > { %6363 = vmatmul.mubr.msk.bf16.gmra.mrb[36].mxu0 %vm1069_vm2, %v8551_v5  ;;  %v6933_v5 = vld [vmem:[%s8490_s5] sm:$0xff]  }
 0x3cb   : > { %6374 = vmatprep.mubr.msk.f32.mxu0 %vm7010_vm3, %v7011_v20  ;;  %v2899_v20 = vsub.s32 0, %v2898_v25  ;;  %v6947_v25 = vld [vmem:[%s8490_s5 + $0x90] sm:$0xff]  }
 0x495   : > { %v6360_v44 = vpop.f32.mrb[32].mxu0 }
 0x496   : > { %v2737_v52 = vpop.f32.mrb[33].mxu0  ;;  %v2785_v16 = vadd.f32 %v6360_v44, %v5372_v49 }
 0x497   : > { %v2783_v35 = vadd.f32 %v5372_v49, %v2737_v52  ;;  %v6361_v19 = vpop.f32.mrb[34].mxu0 }
 0x498   : > { %v2740_v8 = vpop.f32.mrb[35].mxu0  ;;  %v2786_v37 = vadd.f32 %v6361_v19, %v5372_v49  ;;  %v2794_v9 = vsel %vm1069_vm2, %v2785_v16, 0.0 }
 0x499   : > { %v2784_v31 = vadd.f32 %v5372_v49, %v2740_v8  ;;  %v2791_v0 = vsel %vm1069_vm2, %v2783_v35, 0.0 }
 0x49a   : > { %v2796_v41 = vsel %vm1069_vm2, %v2786_v37, 0.0 }
 0x49b   : > { %v2792_v47 = vsel %vm1069_vm2, %v2784_v31, 0.0 }
 0x49c   : > { %v2793_v13 = vadd.f32 %v2792_v47, %v2791_v0 }
 0x49d   : > { %v6364_v4 = vpop.f32.mrb[36].mxu0 }
 0x49e   : > { %v2795_v2 = vadd.f32 %v2794_v9, %v2793_v13  ;;  %v2753_v60 = vpop.f32.mrb[37].mxu0  ;;  %v2789_v15 = vadd.f32 %v6364_v4, %v5372_v49 }
 0x49f   : > { %v2787_v34 = vadd.f32 %v5372_v49, %v2753_v60  ;;  %v6365_v21 = vpop.f32.mrb[38].mxu0 }
 0x4a0   : > { %v2797_v50 = vadd.f32 %v2796_v41, %v2795_v2  ;;  %v2756_v43 = vpop.f32.mrb[39].mxu0  ;;  %v2790_v7 = vadd.f32 %v6365_v21, %v5372_v49  ;;  %v2802_v62 = vsel %vm1069_vm2, %v2789_v15, 0.0 }
 0x4a1   : > { %v2798_v1 = vsel %vm1069_vm2, %v2787_v34, 0.0  ;;  %v2788_v29 = vadd.f32 %v5372_v49, %v2756_v43 }
 0x4a2   : > { %v2799_v33 = vadd.f32 %v2798_v1, %v2797_v50  ;;  %v2804_v24 = vsel %vm1069_vm2, %v2790_v7, 0.0 }
 0x4a3   : > { %v2800_v56 = vsel %vm1069_vm2, %v2788_v29, 0.0 }
 0x4a4   : > { %v2801_v45 = vadd.f32 %v2800_v56, %v2799_v33 }
 0x4a6   : > { %v2803_v12 = vadd.f32 %v2802_v62, %v2801_v45 }
 0x4a8   : > { %v2805_v51 = vadd.f32 %v2804_v24, %v2803_v12  ;;  %v6930_v24 = vld [vmem:[%s8490_s5 + $0x28] sm:$0xff]  }
 0x4aa   : > { %v2806_v23 = vrot.slane %v2805_v51, 4 }
 0x4ac   : > { %v2807_v28 = vadd.f32 %v2806_v23, %v2805_v51  ;;  %v6934_v51 = vld [vmem:[%s8490_s5 + $0x8] sm:$0xff]   ;;  %v6931_v23 = vld [vmem:[%s8490_s5 + $0x30] sm:$0xff]  }
 0x4ae   : > { %v2808_v46 = vrot.slane %v2807_v28, 2 }
 0x4b0   : > { %v2809_v40 = vadd.f32 %v2808_v46, %v2807_v28  ;;  %v6937_v28 = vld [vmem:[%s8490_s5 + $0x10] sm:$0xff]   ;;  %v6932_v46 = vld [vmem:[%s8490_s5 + $0x38] sm:$0xff]  }
 0x4b2   : > { %v2810_v38 = vrot.slane %v2809_v40, 1 }
 0x4b4   : > { %v2811_v57 = vadd.f32 %v2810_v38, %v2809_v40  ;;  %v6938_v40 = vld [vmem:[%s8490_s5 + $0x18] sm:$0xff]   ;;  %v6935_v38 = vld [vmem:[%s8490_s5 + $0x40] sm:$0xff]  }
 0x4b6   : > { %v2813_v6 = vmul.f32 0.015625, %v2811_v57  ;;  %v6936_v57 = vld [vmem:[%s8490_s5 + $0x48] sm:$0xff]  }
 0x4b8   : > { %6375 = vmatmul.mubr.msk.f32.vlgmr.msra.gmra.mrb[56].mxu0 %vm1069_vm2, %v2813_v6  ;;  %v6939_v6 = vld [vmem:[%s8490_s5 + $0x50] sm:$0xff]  }
 0x4b9   : > { %6385 = vmatprep.mubr.msk.bf16.mxu0 %vm2965_vm4, %v6933_v5  ;;  %v6941_v5 = vld [vmem:[%s8490_s5 + $0x60] sm:$0xff]  }
 0x58b   : > { %v2887_v42 = vpop.f32.mrb[56].mxu0 }
 0x58c   : > { %v5374_v48 = vmul.f32 -1.442695, %v2887_v42  ;;  %v6376_v30 = vpop.f32.mrb[57].mxu0  ;;  %v6942_v42 = vld [vmem:[%s8490_s5 + $0x68] sm:$0xff]  }
 0x58d   : > { %v6944_v30 = vld [vmem:[%s8490_s5 + $0x78] sm:$0xff]  }
 0x58e   : > { %6997 = vpow2.f32 %v5374_v48  ;;  %v6943_v48 = vld [vmem:[%s8490_s5 + $0x70] sm:$0xff]  }
 0x598   : > { %v6998_v36 = vpop.eup %6997 }
 0x599   : > { %v2894_v39 = vadd.f32 1.0, %v6998_v36  ;;  %v6945_v36 = vld [vmem:[%s8490_s5 + $0x80] sm:$0xff]  }
 0x59b   : > { %6999 = vrcp.f32 %v2894_v39  ;;  %v6977_v39 = vld [vmem:[%s8494_s9 + $0x10] sm:$0xff]  }
 0x5a5   : > { %v7000_v49 = vpop.eup %6999 }
 0x5a6   : > { %v2900_v44 = vrot.slane %v7000_v49, %v2899_v20  ;;  %v6948_v20 = vld [vmem:[%s8490_s5 + $0x98] sm:$0xff]   ;;  %v6949_v49 = vld [vmem:[%s8490_s5 + $0xa0] sm:$0xff]  }
 0x5a8   : > { %v2901_v52 = vmul.f32 %v2900_v44, %v2783_v35  ;;  %v2902_v19 = vmul.f32 %v2900_v44, %v2784_v31  ;;  %v2903_v8 = vmul.f32 %v2900_v44, %v2785_v16  ;;  %v2904_v0 = vmul.f32 %v2900_v44, %v2786_v37 }
 0x5a9   : > { %v2905_v47 = vmul.f32 %v2900_v44, %v2787_v34  ;;  %v2906_v13 = vmul.f32 %v2900_v44, %v2788_v29  ;;  %v2907_v41 = vmul.f32 %v2900_v44, %v2789_v15  ;;  %v2908_v21 = vmul.f32 %v2900_v44, %v2790_v7  ;;  %v6950_v44 = vld [vmem:[%s8490_s5 + $0xa8] sm:$0xff]  }
 0x5aa   : > { %vm2909_vm5 = vcmp.ge.f32.partialorder %v2901_v52, 0.0  ;;  %vm2910_vm6 = vcmp.ge.f32.partialorder %v2902_v19, 0.0  ;;  %vm2911_vm7 = vcmp.ge.f32.partialorder %v2903_v8, 0.0  ;;  %vm2912_vm8 = vcmp.ge.f32.partialorder %v2904_v0, 0.0 }
 0x5ab   : > { %v2917_v9 = vmul.f32 0.2, %v2901_v52  ;;  %v2918_v4 = vmul.f32 0.2, %v2902_v19  ;;  %v2919_v2 = vmul.f32 0.2, %v2903_v8 }
 0x5ac   : > { %v2920_v60 = vmul.f32 0.2, %v2904_v0  ;;  %v2921_v1 = vmul.f32 0.2, %v2905_v47  ;;  %v2922_v33 = vmul.f32 0.2, %v2906_v13 }
 0x5ad   : > { %v2925_v50 = vsel %vm2909_vm5, %v2901_v52, %v2917_v9  ;;  %v2926_v43 = vsel %vm2910_vm6, %v2902_v19, %v2918_v4  ;;  %v2927_v35 = vsel %vm2911_vm7, %v2903_v8, %v2919_v2  ;;  %vm2913_vm9 = vcmp.ge.f32.partialorder %v2905_v47, 0.0  ;;  %v6951_v52 = vld [vmem:[%s8490_s5 + $0xb0] sm:$0xff]   ;;  %v6952_v19 = vld [vmem:[%s8490_s5 + $0xb8] sm:$0xff]   ;;  %v6953_v8 = vld [vmem:[%s8490_s5 + $0xc0] sm:$0xff]  }
 0x5ae   : > { %v2928_v31 = vsel %vm2912_vm8, %v2904_v0, %v2920_v60  ;;  %vm2914_vm10 = vcmp.ge.f32.partialorder %v2906_v13, 0.0  ;;  %v8075_v16 = vpack.c.bf16 %v2926_v43, %v2925_v50  ;;  %v2923_v34 = vmul.f32 0.2, %v2907_v41  ;;  %v6954_v0 = vld [vmem:[%s8490_s5 + $0xc8] sm:$0xff]   ;;  %v6957_v9 = vld [vmem:[%s8490_s5 + $0xe0] sm:$0xff]   ;;  %v6978_v4 = vld [vmem:[%s8494_s9 + $0x18] sm:$0xff]  }
 0x5af   : > { %v8077_v37 = vpack.c.bf16 %v2928_v31, %v2927_v35  ;;  %v2924_v29 = vmul.f32 0.2, %v2908_v21  ;;  %v2929_v15 = vsel %vm2913_vm9, %v2905_v47, %v2921_v1  ;;  %v2930_v7 = vsel %vm2914_vm10, %v2906_v13, %v2922_v33  ;;  %v6955_v47 = vld [vmem:[%s8490_s5 + $0xd0] sm:$0xff]   ;;  %v6956_v13 = vld [vmem:[%s8490_s5 + $0xd8] sm:$0xff]   ;;  %v6958_v2 = vld [vmem:[%s8490_s5 + $0xe8] sm:$0xff]  }
 0x5b0   : > { %6377 = vmatprep.subr.bf16.mxu0 %v8075_v16  ;;  %6393 = vmatprep.subr.bf16.mxu1 %v8075_v16  ;;  %vm2915_vm11 = vcmp.ge.f32.partialorder %v2907_v41, 0.0  ;;  %vm2916_vm12 = vcmp.ge.f32.partialorder %v2908_v21, 0.0  ;;  %v8085_v56 = vpack.c.bf16 %v2930_v7, %v2929_v15  ;;  %v6959_v60 = vld [vmem:[%s8490_s5 + $0xf0] sm:$0xff]   ;;  %v6961_v50 = vld [vmem:[%s8490_s5 + $0x100] sm:$0xff]   ;;  %v6962_v43 = vld [vmem:[%s8490_s5 + $0x108] sm:$0xff]   ;;  %v8552_v33 = vpack.c.bf16 %v7293_v32, %v7284_v22 }
 0x5b1   : > { %6378 = vmatpush3.bf16.msra.mxu0 %v8075_v16  ;;  %6394 = vmatpush3.bf16.msra.mxu1 %v8075_v16  ;;  %v2931_v45 = vsel %vm2915_vm11, %v2907_v41, %v2923_v34  ;;  %v2932_v62 = vsel %vm2916_vm12, %v2908_v21, %v2924_v29  ;;  %v8274_v41 = vld [vmem:[%s8494_s9] sm:$0xff]   ;;  %v6960_v21 = vld [vmem:[%s8490_s5 + $0xf8] sm:$0xff]   ;;  %v6963_v1 = vld [vmem:[%s8490_s5 + $0x110] sm:$0xff]   ;;  %v8553_v35 = vpack.c.bf16 %v7165_v61, %v7156_v55 }
 0x5b2   : > { %6379 = vmatprep.subr.bf16.mxu0 %v8077_v37  ;;  %6395 = vmatprep.subr.bf16.mxu1 %v8077_v37  ;;  %v8091_v12 = vpack.c.bf16 %v2932_v62, %v2931_v45  ;;  %v8554_v31 = vpack.c.bf16 %v7288_v26, %v7281_v18  ;;  %v8555_v22 = vpack.c.bf16 %v7160_v58, %v7153_v53  ;;  %v6967_v32 = vld [vmem:[%s8489_s4 + $0x4] ss:$8 sps:$4 sm:$0xff]   ;;  %v8567_v15 = vld [vmem:[#allocation13_spill] sm:$0xff]  ;;  %v8574_v45 = vld [vmem:[#allocation16_spill] sm:$0xff] }
 0x5b3   : > { %v8556_v55 = vpack.c.bf16 %v7326_v10, %v7316_v59  ;;  %v8557_v61 = vpack.c.bf16 %v7197_v17, %v7188_v11  ;;  %v8558_v18 = vpack.c.bf16 %v7320_v3, %v7313_v54  ;;  %v8559_v53 = vld [vmem:[#allocation2_spill] sm:$0xff]  ;;  %v8565_v10 = vld [vmem:[#allocation4_spill] sm:$0xff]  ;;  %v8568_v11 = vld [vmem:[#allocation11_spill] sm:$0xff] }
 0x5b4   : > { %v8560_v58 = vpack.c.bf16 %v7192_v14, %v8559_v53  ;;  %v8561_v26 = vld [vmem:[#allocation14_spill] sm:$0xff]  ;;  %v8569_v17 = vpack.c.bf16 %v8567_v15, %v8568_v11  ;;  %v8570_v7 = vld [vmem:[#allocation5_spill] sm:$0xff] }
 0x5b5   : > { %6380 = vmatpush3.bf16.msra.mxu0 %v8077_v37  ;;  %6396 = vmatpush3.bf16.msra.mxu1 %v8077_v37  ;;  %v8564_v59 = vld [vmem:[#allocation6_spill] sm:$0xff] }
 0x5b6   : > { %6381 = vmatprep.subr.bf16.mxu0 %v8085_v56  ;;  %6397 = vmatprep.subr.bf16.mxu1 %v8085_v56  ;;  %v8566_v29 = vpack.c.bf16 %v8564_v59, %v8565_v10  ;;  %v8573_v3 = vld [vmem:[#allocation18_spill] sm:$0xff] }
 0x5b7   : > { %v8575_v14 = vpack.c.bf16 %v8573_v3, %v8574_v45  ;;  %v8576_v62 = vld [vmem:[#allocation10_spill] sm:$0xff]  ;;  %v6984_v45 = vld [vmem:[%s8494_s9 + $0x38] sm:$0xff]  }
 0x5b9   : > { %6382 = vmatpush3.bf16.msra.mxu0 %v8085_v56  ;;  %6398 = vmatpush3.bf16.msra.mxu1 %v8085_v56 }
 0x5ba   : > { %6383 = vmatprep.subr.bf16.mxu0 %v8091_v12  ;;  %6399 = vmatprep.subr.bf16.mxu1 %v8091_v12 }
 0x5bd   : > { %6384 = vmatpush3.bf16.msra.mxu0 %v8091_v12  ;;  %6400 = vmatpush3.bf16.msra.mxu1 %v8091_v12 }
 0x5be   : > { %6433 = vmatprep.subr.bf16.mxu1 %v8075_v16  ;;  %6409 = vmatprep.subr.bf16.mxu0 %v6977_v39 }
 0x5c0   : > { %6402 = vmatmul.mubr.msk.bf16.vlgmr.msra.gmra.mrb[128].mxu1 %vm2965_vm4, %v6930_v24  ;;  %6386 = vmatmul.mubr.msk.bf16.vlgmr.msra.gmra.mrb[60].mxu0 %vm2965_vm4, %v6934_v51  ;;  %v8579_v51 = vld [vmem:[#allocation17_spill] sm:$0xff] }
 0x5c1   : > { %6434 = vmatpush3.bf16.msra.mxu1 %v8075_v16  ;;  %6405 = vmatprep.mubr.msk.bf16.mxu1 %vm2965_vm4, %v6931_v23  ;;  %v8580_v23 = vld [vmem:[#allocation15_spill] sm:$0xff] }
 0x5c2   : > { %6435 = vmatprep.subr.bf16.mxu1 %v8077_v37  ;;  %6389 = vmatprep.mubr.msk.bf16.mxu0 %vm2965_vm4, %v6937_v28  ;;  %v8581_v28 = vpack.c.bf16 %v8579_v51, %v8580_v23 }
 0x5c3   : > { %6410 = vmatpush3.bf16.msra.mxu0 %v6977_v39 }
 0x5c4   : > { %6411 = vmatprep.subr.bf16.mxu0 %v6978_v4 }
 0x5c5   : > { %6436 = vmatpush3.bf16.msra.mxu1 %v8077_v37 }
 0x5c6   : > { %6437 = vmatprep.subr.bf16.mxu1 %v8085_v56 }
 0x5c7   : > { %6412 = vmatpush3.bf16.msra.mxu0 %v6978_v4 }
 0x5c8   : > { %6406 = vmatmul.mubr.msk.bf16.gmra.mrb[132].mxu1 %vm2965_vm4, %v6932_v46  ;;  %6390 = vmatmul.mubr.msk.bf16.gmra.mrb[64].mxu0 %vm2965_vm4, %v6938_v40  ;;  %v6965_v46 = vld [vmem:[%s8489_s4] ss:$8 sps:$4 sm:$0xff]   ;;  %v8582_v40 = vld [vmem:[#allocation9_spill] sm:$0xff] }
 0x5c9   : > { %6438 = vmatpush3.bf16.msra.mxu1 %v8085_v56  ;;  %6441 = vmatprep.mubr.msk.bf16.mxu1 %vm2965_vm4, %v6935_v38  ;;  %v8583_v38 = vld [vmem:[#allocation7_spill] sm:$0xff] }
 0x5ca   : > { %6439 = vmatprep.subr.bf16.mxu1 %v8091_v12  ;;  %6421 = vmatprep.subr.bf16.mxu0 %v8274_v41 }
 0x5cd   : > { %6440 = vmatpush3.bf16.msra.mxu1 %v8091_v12 }
 0x5ce   : > { %6461 = vmatprep.subr.bf16.mxu1 %v8075_v16 }
 0x5d0   : > { %6442 = vmatmul.mubr.msk.bf16.vlgmr.msra.gmra.mrb[136].mxu1 %vm2965_vm4, %v6936_v57  ;;  %v8584_v57 = vpack.c.bf16 %v8582_v40, %v8583_v38 }
 0x5d1   : > { %6462 = vmatpush3.bf16.msra.mxu1 %v8075_v16  ;;  %6445 = vmatprep.mubr.msk.bf16.mxu1 %vm2965_vm4, %v6939_v6  ;;  %v6968_v6 = vld [vmem:[%s8489_s4 + $0x14] ss:$8 sps:$4 sm:$0xff]  }
 0x5d2   : > { %6463 = vmatprep.subr.bf16.mxu1 %v8077_v37 }
 0x5d5   : > { %6464 = vmatpush3.bf16.msra.mxu1 %v8077_v37 }
 0x5d6   : > { %6465 = vmatprep.subr.bf16.mxu1 %v8085_v56 }
 0x5d8   : > { %6446 = vmatmul.mubr.msk.bf16.gmra.mrb[140].mxu1 %vm2965_vm4, %v6940_v27  ;;  %v6970_v27 = vld [vmem:[%s8489_s4 + $0x10] ss:$8 sps:$4 sm:$0xff]  }
 0x5d9   : > { %6466 = vmatpush3.bf16.msra.mxu1 %v8085_v56  ;;  %6469 = vmatprep.mubr.msk.bf16.mxu1 %vm2965_vm4, %v6941_v5  ;;  %v6971_v5 = vld [vmem:[%s8489_s4 + $0x24] ss:$8 sps:$4 sm:$0xff]  }
 0x5da   : > { %6467 = vmatprep.subr.bf16.mxu1 %v8091_v12 }
 0x5dd   : > { %6468 = vmatpush3.bf16.msra.mxu1 %v8091_v12 }
 0x5de   : > { %6489 = vmatprep.subr.bf16.mxu1 %v8075_v16 }
 0x5e0   : > { %6470 = vmatmul.mubr.msk.bf16.vlgmr.msra.gmra.mrb[144].mxu1 %vm2965_vm4, %v6942_v42  ;;  %v6973_v42 = vld [vmem:[%s8489_s4 + $0x20] ss:$8 sps:$4 sm:$0xff]  }
 0x5e1   : > { %6490 = vmatpush3.bf16.msra.mxu1 %v8075_v16  ;;  %6473 = vmatprep.mubr.msk.bf16.mxu1 %vm2965_vm4, %v6943_v48  ;;  %v6974_v48 = vld [vmem:[%s8489_s4 + $0x34] ss:$8 sps:$4 sm:$0xff]  }
 0x5e2   : > { %6491 = vmatprep.subr.bf16.mxu1 %v8077_v37 }
 0x5e5   : > { %6492 = vmatpush3.bf16.msra.mxu1 %v8077_v37 }
 0x5e6   : > { %6493 = vmatprep.subr.bf16.mxu1 %v8085_v56 }
 0x5e8   : > { %6474 = vmatmul.mubr.msk.bf16.gmra.mrb[148].mxu1 %vm2965_vm4, %v6944_v30  ;;  %v6976_v30 = vld [vmem:[%s8489_s4 + $0x30] ss:$8 sps:$4 sm:$0xff]  }
 0x5e9   : > { %6494 = vmatpush3.bf16.msra.mxu1 %v8085_v56  ;;  %6497 = vmatprep.mubr.msk.bf16.mxu1 %vm2965_vm4, %v6945_v36 }
 0x5ea   : > { %6495 = vmatprep.subr.bf16.mxu1 %v8091_v12 }
 0x5ed   : > { %6496 = vmatpush3.bf16.msra.mxu1 %v8091_v12 }
 0x5ee   : > { %6517 = vmatprep.subr.bf16.mxu1 %v8075_v16 }
 0x5f0   : > { %6498 = vmatmul.mubr.msk.bf16.vlgmr.msra.gmra.mrb[152].mxu1 %vm2965_vm4, %v6946_v63 }
 0x5f1   : > { %6518 = vmatpush3.bf16.msra.mxu1 %v8075_v16  ;;  %6501 = vmatprep.mubr.msk.bf16.mxu1 %vm2965_vm4, %v6947_v25 }
 0x5f2   : > { %6519 = vmatprep.subr.bf16.mxu1 %v8077_v37 }
 0x5f5   : > { %6520 = vmatpush3.bf16.msra.mxu1 %v8077_v37 }
 0x5f6   : > { %6521 = vmatprep.subr.bf16.mxu1 %v8085_v56 }
 0x5f8   : > { %6502 = vmatmul.mubr.msk.bf16.gmra.mrb[156].mxu1 %vm2965_vm4, %v6948_v20 }
 0x5f9   : > { %6522 = vmatpush3.bf16.msra.mxu1 %v8085_v56  ;;  %6525 = vmatprep.mubr.msk.bf16.mxu1 %vm2965_vm4, %v6949_v49 }
 0x5fa   : > { %6523 = vmatprep.subr.bf16.mxu1 %v8091_v12 }
 0x5fd   : > { %6524 = vmatpush3.bf16.msra.mxu1 %v8091_v12 }
 0x5fe   : > { %6545 = vmatprep.subr.bf16.mxu1 %v8075_v16 }
 0x600   : > { %6526 = vmatmul.mubr.msk.bf16.vlgmr.msra.gmra.mrb[160].mxu1 %vm2965_vm4, %v6950_v44 }
 0x601   : > { %6546 = vmatpush3.bf16.msra.mxu1 %v8075_v16  ;;  %6529 = vmatprep.mubr.msk.bf16.mxu1 %vm2965_vm4, %v6951_v52 }
 0x602   : > { %6547 = vmatprep.subr.bf16.mxu1 %v8077_v37 }
 0x605   : > { %6548 = vmatpush3.bf16.msra.mxu1 %v8077_v37 }
 0x606   : > { %6549 = vmatprep.subr.bf16.mxu1 %v8085_v56 }
 0x608   : > { %6530 = vmatmul.mubr.msk.bf16.gmra.mrb[164].mxu1 %vm2965_vm4, %v6952_v19 }
 0x609   : > { %6550 = vmatpush3.bf16.msra.mxu1 %v8085_v56  ;;  %6553 = vmatprep.mubr.msk.bf16.mxu1 %vm2965_vm4, %v6953_v8 }
 0x60a   : > { %6551 = vmatprep.subr.bf16.mxu1 %v8091_v12 }
 0x60d   : > { %6552 = vmatpush3.bf16.msra.mxu1 %v8091_v12 }
 0x60e   : > { %6573 = vmatprep.subr.bf16.mxu1 %v8075_v16 }
 0x610   : > { %6554 = vmatmul.mubr.msk.bf16.vlgmr.msra.gmra.mrb[168].mxu1 %vm2965_vm4, %v6954_v0 }
 0x611   : > { %6574 = vmatpush3.bf16.msra.mxu1 %v8075_v16  ;;  %6557 = vmatprep.mubr.msk.bf16.mxu1 %vm2965_vm4, %v6955_v47 }
 0x612   : > { %6575 = vmatprep.subr.bf16.mxu1 %v8077_v37 }
 0x615   : > { %6576 = vmatpush3.bf16.msra.mxu1 %v8077_v37 }
 0x616   : > { %6577 = vmatprep.subr.bf16.mxu1 %v8085_v56 }
 0x618   : > { %6558 = vmatmul.mubr.msk.bf16.gmra.mrb[172].mxu1 %vm2965_vm4, %v6956_v13  ;;  %v6980_v13 = vld [vmem:[%s8494_s9 + $0x8] sm:$0xff]  }
 0x619   : > { %6578 = vmatpush3.bf16.msra.mxu1 %v8085_v56  ;;  %6581 = vmatprep.mubr.msk.bf16.mxu1 %vm2965_vm4, %v6957_v9 }
 0x61a   : > { %6579 = vmatprep.subr.bf16.mxu1 %v8091_v12 }
 0x61d   : > { %6580 = vmatpush3.bf16.msra.mxu1 %v8091_v12 }
 0x61e   : > { %6601 = vmatprep.subr.bf16.mxu1 %v8075_v16 }
 0x620   : > { %6582 = vmatmul.mubr.msk.bf16.vlgmr.msra.gmra.mrb[176].mxu1 %vm2965_vm4, %v6958_v2 }
 0x621   : > { %6602 = vmatpush3.bf16.msra.mxu1 %v8075_v16  ;;  %6585 = vmatprep.mubr.msk.bf16.mxu1 %vm2965_vm4, %v6959_v60  ;;  %v6964_v16 = vld [vmem:[%s8490_s5 + $0x118] sm:$0xff]  }
 0x622   : > { %6603 = vmatprep.subr.bf16.mxu1 %v8077_v37 }
 0x625   : > { %6604 = vmatpush3.bf16.msra.mxu1 %v8077_v37  ;;  %v8562_v37 = vld [vmem:[#allocation12_spill] sm:$0xff] }
 0x626   : > { %6605 = vmatprep.subr.bf16.mxu1 %v8085_v56  ;;  %v8563_v34 = vpack.c.bf16 %v8561_v26, %v8562_v37 }
 0x628   : > { %6586 = vmatmul.mubr.msk.bf16.gmra.mrb[180].mxu1 %vm2965_vm4, %v6960_v21  ;;  %v6981_v21 = vld [vmem:[%s8494_s9 + $0x20] sm:$0xff]  }
 0x629   : > { %6606 = vmatpush3.bf16.msra.mxu1 %v8085_v56  ;;  %6609 = vmatprep.mubr.msk.bf16.mxu1 %vm2965_vm4, %v6961_v50  ;;  %v8571_v56 = vld [vmem:[#allocation3_spill] sm:$0xff] }
 0x62a   : > { %6607 = vmatprep.subr.bf16.mxu1 %v8091_v12  ;;  %v8572_v54 = vpack.c.bf16 %v8570_v7, %v8571_v56 }
 0x62d   : > { %6608 = vmatpush3.bf16.msra.mxu1 %v8091_v12  ;;  %v8577_v12 = vld [vmem:[#allocation8_spill] sm:$0xff] }
 0x62e   : > { %6178 = vmatprep.subr.bf16.mxu1 %v8552_v33  ;;  %v8578_v24 = vpack.c.bf16 %v8576_v62, %v8577_v12  ;;  %v6985_v12 = vld [vmem:[%s8494_s9 + $0x40] sm:$0xff]  }
 0x630   : > { %6610 = vmatmul.mubr.msk.bf16.vlgmr.msra.gmra.mrb[184].mxu1 %vm2965_vm4, %v6962_v43 }
 0x631   : > { %6179 = vmatpush3.bf16.msra.mxu1 %v8553_v35  ;;  %6613 = vmatprep.mubr.msk.bf16.mxu1 %vm2965_vm4, %v6963_v1 }
 0x632   : > { %6180 = vmatprep.subr.bf16.mxu1 %v8554_v31 }
 0x635   : > { %6181 = vmatpush3.bf16.msra.mxu1 %v8555_v22 }
 0x636   : > { %6182 = vmatprep.subr.bf16.mxu1 %v8556_v55 }
 0x638   : > { %6614 = vmatmul.mubr.msk.bf16.gmra.mrb[188].mxu1 %vm2965_vm4, %v6964_v16 }
 0x639   : > { %6183 = vmatpush3.bf16.msra.mxu1 %v8557_v61  ;;  %4923 = vmatprep.mubr.bf16.mxu1 %v6967_v32 }
 0x63a   : > { %6184 = vmatprep.subr.bf16.mxu1 %v8558_v18 }
 0x63d   : > { %6185 = vmatpush3.bf16.msra.mxu1 %v8560_v58  ;;  %v6982_v58 = vld [vmem:[%s8494_s9 + $0x28] sm:$0xff]  }
 0x63e   : > { %6186 = vmatprep.subr.bf16.mxu1 %v8563_v34  ;;  %v6983_v34 = vld [vmem:[%s8494_s9 + $0x30] sm:$0xff]  }
 0x641   : > { %6187 = vmatpush3.bf16.msra.mxu1 %v8566_v29 }
 0x642   : > { %6188 = vmatprep.subr.bf16.mxu1 %v8569_v17 }
 0x645   : > { %6189 = vmatpush3.bf16.msra.mxu1 %v8572_v54 }
 0x646   : > { %6190 = vmatprep.subr.bf16.mxu1 %v8575_v14 }
 0x649   : > { %6191 = vmatpush3.bf16.msra.mxu1 %v8578_v24 }
 0x64a   : > { %6192 = vmatprep.subr.bf16.mxu1 %v8581_v28 }
 0x64d   : > { %6193 = vmatpush3.bf16.msra.mxu1 %v8584_v57 }
 0x650   : > { %4924 = vmatmul.mubr.bf16.vlgmr.msra.gmra.mrb[192].mxu1 %v6965_v46 }
 0x651   : > { %4931 = vmatprep.mubr.bf16.mxu1 %v6968_v6 }
 0x658   : > { %4932 = vmatmul.mubr.bf16.gmra.mrb[196].mxu1 %v6970_v27 }
 0x659   : > { %4939 = vmatprep.mubr.bf16.mxu1 %v6971_v5  ;;  %v6986_v5 = vld [vmem:[%s8494_s9 + $0x48] sm:$0xff]  }
 0x660   : > { %4940 = vmatmul.mubr.bf16.gmra.mrb[200].mxu1 %v6973_v42 }
 0x661   : > { %4947 = vmatprep.mubr.bf16.mxu1 %v6974_v48 }
 0x668   : > { %4948 = vmatmul.mubr.bf16.gmra.mrb[204].mxu1 %v6976_v30  ;;  %v6987_v30 = vld [vmem:[%s8494_s9 + $0x50] sm:$0xff]  }
 0x693   : > { %v6403_v36 = vpop.f32.mrb[128].mxu1  ;;  %v6387_v39 = vpop.f32.mrb[60].mxu0 }
 0x694   : > { %v3126_v63 = vpop.f32.mrb[129].mxu1  ;;  %v3012_v25 = vpop.f32.mrb[61].mxu0 }
 0x695   : > { %v6404_v20 = vpop.f32.mrb[130].mxu1  ;;  %v6388_v49 = vpop.f32.mrb[62].mxu0 }
 0x696   : > { %v3158_v44 = vpack.c.bf16 %v6404_v20, %v6403_v36  ;;  %v3129_v52 = vpop.f32.mrb[131].mxu1  ;;  %v3044_v19 = vpack.c.bf16 %v6388_v49, %v6387_v39  ;;  %v3015_v8 = vpop.f32.mrb[63].mxu0 }
 0x697   : > { %v3157_v0 = vpack.c.bf16 %v3129_v52, %v3126_v63  ;;  %v3043_v47 = vpack.c.bf16 %v3015_v8, %v3012_v25 }
 0x699   : > { %6413 = vmatprep.mubr.msk.bf16.mxu0 %vm1069_vm2, %v3157_v0  ;;  %v6988_v0 = vld [vmem:[%s8494_s9 + $0x58] sm:$0xff]  }
 0x69a   : > { %6414 = vmatmul.mubr.msk.bf16.vlgmr.msra.gmra.mrb[68].mxu0 %vm1069_vm2, %v3158_v44 }
 0x69b   : > { %v6407_v9 = vpop.f32.mrb[132].mxu1  ;;  %6422 = vmatpush3.bf16.msra.mxu0 %v8274_v41  ;;  %v6391_v4 = vpop.f32.mrb[64].mxu0 }
 0x69c   : > { %v3142_v2 = vpop.f32.mrb[133].mxu1  ;;  %6423 = vmatprep.subr.bf16.mxu0 %v6980_v13  ;;  %v3028_v60 = vpop.f32.mrb[65].mxu0 }
 0x69d   : > { %v6408_v50 = vpop.f32.mrb[134].mxu1  ;;  %v6392_v43 = vpop.f32.mrb[66].mxu0 }
 0x69e   : > { %v3160_v1 = vpack.c.bf16 %v6408_v50, %v6407_v9  ;;  %v3145_v33 = vpop.f32.mrb[135].mxu1  ;;  %v3046_v35 = vpack.c.bf16 %v6392_v43, %v6391_v4  ;;  %v3031_v31 = vpop.f32.mrb[67].mxu0  ;;  %v6989_v9 = vld [vmem:[%s8494_s9 + $0x60] sm:$0xff]  }
 0x69f   : > { %v3159_v16 = vpack.c.bf16 %v3145_v33, %v3142_v2  ;;  %6424 = vmatpush3.bf16.msra.mxu0 %v6980_v13  ;;  %v3045_v22 = vpack.c.bf16 %v3031_v31, %v3028_v60 }
 0x6a0   : > { %6449 = vmatprep.subr.bf16.mxu0 %v6981_v21 }
 0x6a1   : > { %6417 = vmatprep.mubr.msk.bf16.mxu0 %vm1069_vm2, %v3159_v16  ;;  %v6990_v16 = vld [vmem:[%s8494_s9 + $0x68] sm:$0xff]  }
 0x6a2   : > { %6418 = vmatmul.mubr.msk.bf16.gmra.mrb[72].mxu0 %vm1069_vm2, %v3160_v1 }
 0x6a3   : > { %6425 = vmatprep.mubr.msk.bf16.mxu0 %vm1069_vm2, %v3043_v47  ;;  %v6443_v41 = vpop.f32.mrb[136].mxu1 }
 0x6a4   : > { %v3419_v32 = vpop.f32.mrb[137].mxu1 }
 0x6a5   : > { %v6444_v55 = vpop.f32.mrb[138].mxu1 }
 0x6a6   : > { %v3451_v61 = vpack.c.bf16 %v6444_v55, %v6443_v41  ;;  %v3422_v18 = vpop.f32.mrb[139].mxu1 }
 0x6a7   : > { %v3450_v53 = vpack.c.bf16 %v3422_v18, %v3419_v32  ;;  %v6991_v32 = vld [vmem:[%s8494_s9 + $0x70] sm:$0xff]  }
 0x6aa   : > { %6426 = vmatmul.mubr.msk.bf16.vlgmr.msra.gmra.mrb[68].mxu0 %vm1069_vm2, %v3044_v19 }
 0x6ab   : > { %6429 = vmatprep.mubr.msk.bf16.mxu0 %vm1069_vm2, %v3045_v22  ;;  %6450 = vmatpush3.bf16.msra.mxu0 %v6981_v21  ;;  %v6447_v26 = vpop.f32.mrb[140].mxu1 }
 0x6ac   : > { %6451 = vmatprep.subr.bf16.mxu0 %v6982_v58  ;;  %v3435_v37 = vpop.f32.mrb[141].mxu1 }
 0x6ad   : > { %v6448_v59 = vpop.f32.mrb[142].mxu1 }
 0x6ae   : > { %v3453_v10 = vpack.c.bf16 %v6448_v59, %v6447_v26  ;;  %v3438_v29 = vpop.f32.mrb[143].mxu1 }
 0x6af   : > { %6452 = vmatpush3.bf16.msra.mxu0 %v6982_v58  ;;  %v3452_v15 = vpack.c.bf16 %v3438_v29, %v3435_v37  ;;  %v6992_v29 = vld [vmem:[%s8494_s9 + $0x78] sm:$0xff]  }
 0x6b0   : > { %6477 = vmatprep.subr.bf16.mxu0 %v6983_v34 }
 0x6b2   : > { %6430 = vmatmul.mubr.msk.bf16.gmra.mrb[72].mxu0 %vm1069_vm2, %v3046_v35 }
 0x6b3   : > { %6453 = vmatprep.mubr.msk.bf16.mxu0 %vm1069_vm2, %v3450_v53  ;;  %v6471_v11 = vpop.f32.mrb[144].mxu1 }
 0x6b4   : > { %v3631_v17 = vpop.f32.mrb[145].mxu1 }
 0x6b5   : > { %v6472_v7 = vpop.f32.mrb[146].mxu1 }
 0x6b6   : > { %v3663_v56 = vpack.c.bf16 %v6472_v7, %v6471_v11  ;;  %v3634_v54 = vpop.f32.mrb[147].mxu1 }
 0x6b7   : > { %v3662_v3 = vpack.c.bf16 %v3634_v54, %v3631_v17  ;;  %v6993_v17 = vld [vmem:[%s8494_s9 + $0x80] sm:$0xff]  }
 0x6ba   : > { %6454 = vmatmul.mubr.msk.bf16.vlgmr.msra.gmra.mrb[68].mxu0 %vm1069_vm2, %v3451_v61 }
 0x6bb   : > { %6457 = vmatprep.mubr.msk.bf16.mxu0 %vm1069_vm2, %v3452_v15  ;;  %6478 = vmatpush3.bf16.msra.mxu0 %v6983_v34  ;;  %v6475_v14 = vpop.f32.mrb[148].mxu1 }
 0x6bc   : > { %6479 = vmatprep.subr.bf16.mxu0 %v6984_v45  ;;  %v3647_v62 = vpop.f32.mrb[149].mxu1 }
 0x6bd   : > { %v6476_v24 = vpop.f32.mrb[150].mxu1 }
 0x6be   : > { %v3665_v51 = vpack.c.bf16 %v6476_v24, %v6475_v14  ;;  %v3650_v23 = vpop.f32.mrb[151].mxu1 }
 0x6bf   : > { %6480 = vmatpush3.bf16.msra.mxu0 %v6984_v45  ;;  %v3664_v28 = vpack.c.bf16 %v3650_v23, %v3647_v62  ;;  %v6994_v23 = vld [vmem:[%s8494_s9 + $0x88] sm:$0xff]  }
 0x6c0   : > { %6505 = vmatprep.subr.bf16.mxu0 %v6985_v12 }
 0x6c2   : > { %6458 = vmatmul.mubr.msk.bf16.gmra.mrb[72].mxu0 %vm1069_vm2, %v3453_v10 }
 0x6c3   : > { %6481 = vmatprep.mubr.msk.bf16.mxu0 %vm1069_vm2, %v3662_v3  ;;  %v6499_v46 = vpop.f32.mrb[152].mxu1 }
 0x6c4   : > { %v3843_v40 = vpop.f32.mrb[153].mxu1 }
 0x6c5   : > { %v6500_v38 = vpop.f32.mrb[154].mxu1 }
 0x6c6   : > { %v3875_v57 = vpack.c.bf16 %v6500_v38, %v6499_v46  ;;  %v3846_v6 = vpop.f32.mrb[155].mxu1 }
 0x6c7   : > { %v3874_v27 = vpack.c.bf16 %v3846_v6, %v3843_v40  ;;  %v6995_v40 = vld [vmem:[%s8496_s11] sm:$0xff]  }
 0x6ca   : > { %6482 = vmatmul.mubr.msk.bf16.vlgmr.msra.gmra.mrb[68].mxu0 %vm1069_vm2, %v3663_v56 }
 0x6cb   : > { %6485 = vmatprep.mubr.msk.bf16.mxu0 %vm1069_vm2, %v3664_v28  ;;  %6506 = vmatpush3.bf16.msra.mxu0 %v6985_v12  ;;  %v6503_v42 = vpop.f32.mrb[156].mxu1 }
 0x6cc   : > { %6507 = vmatprep.subr.bf16.mxu0 %v6986_v5  ;;  %v3859_v48 = vpop.f32.mrb[157].mxu1 }
 0x6cd   : > { %v6504_v36 = vpop.f32.mrb[158].mxu1 }
 0x6ce   : > { %v3877_v39 = vpack.c.bf16 %v6504_v36, %v6503_v42  ;;  %v3862_v63 = vpop.f32.mrb[159].mxu1 }
 0x6cf   : > { %6508 = vmatpush3.bf16.msra.mxu0 %v6986_v5  ;;  %v3876_v25 = vpack.c.bf16 %v3862_v63, %v3859_v48  ;;  %v6996_v5 = vld [vmem:[%s8496_s11 + $0x8] sm:$0xff]  }
 0x6d0   : > { %6533 = vmatprep.subr.bf16.mxu0 %v6987_v30 }
 0x6d2   : > { %6486 = vmatmul.mubr.msk.bf16.gmra.mrb[72].mxu0 %vm1069_vm2, %v3665_v51 }
 0x6d3   : > { %6509 = vmatprep.mubr.msk.bf16.mxu0 %vm1069_vm2, %v3874_v27  ;;  %v6527_v20 = vpop.f32.mrb[160].mxu1 }
 0x6d4   : > { %v4055_v49 = vpop.f32.mrb[161].mxu1 }
 0x6d5   : > { %v6528_v44 = vpop.f32.mrb[162].mxu1 }
 0x6d6   : > { %v4087_v52 = vpack.c.bf16 %v6528_v44, %v6527_v20  ;;  %v4058_v19 = vpop.f32.mrb[163].mxu1 }
 0x6d7   : > { %v4086_v8 = vpack.c.bf16 %v4058_v19, %v4055_v49 }
 0x6da   : > { %6510 = vmatmul.mubr.msk.bf16.vlgmr.msra.gmra.mrb[68].mxu0 %vm1069_vm2, %v3875_v57 }
 0x6db   : > { %6513 = vmatprep.mubr.msk.bf16.mxu0 %vm1069_vm2, %v3876_v25  ;;  %6534 = vmatpush3.bf16.msra.mxu0 %v6987_v30  ;;  %v6531_v47 = vpop.f32.mrb[164].mxu1 }
 0x6dc   : > { %6535 = vmatprep.subr.bf16.mxu0 %v6988_v0  ;;  %v4071_v13 = vpop.f32.mrb[165].mxu1 }
 0x6dd   : > { %v6532_v4 = vpop.f32.mrb[166].mxu1 }
 0x6de   : > { %v4089_v2 = vpack.c.bf16 %v6532_v4, %v6531_v47  ;;  %v4074_v60 = vpop.f32.mrb[167].mxu1 }
 0x6df   : > { %6536 = vmatpush3.bf16.msra.mxu0 %v6988_v0  ;;  %v4088_v21 = vpack.c.bf16 %v4074_v60, %v4071_v13 }
 0x6e0   : > { %6561 = vmatprep.subr.bf16.mxu0 %v6989_v9 }
 0x6e2   : > { %6514 = vmatmul.mubr.msk.bf16.gmra.mrb[72].mxu0 %vm1069_vm2, %v3877_v39 }
 0x6e3   : > { %6537 = vmatprep.mubr.msk.bf16.mxu0 %vm1069_vm2, %v4086_v8  ;;  %v6555_v50 = vpop.f32.mrb[168].mxu1 }
 0x6e4   : > { %v4267_v43 = vpop.f32.mrb[169].mxu1 }
 0x6e5   : > { %v6556_v1 = vpop.f32.mrb[170].mxu1 }
 0x6e6   : > { %v4299_v33 = vpack.c.bf16 %v6556_v1, %v6555_v50  ;;  %v4270_v35 = vpop.f32.mrb[171].mxu1 }
 0x6e7   : > { %v4298_v31 = vpack.c.bf16 %v4270_v35, %v4267_v43 }
 0x6ea   : > { %6538 = vmatmul.mubr.msk.bf16.vlgmr.msra.gmra.mrb[68].mxu0 %vm1069_vm2, %v4087_v52 }
 0x6eb   : > { %6541 = vmatprep.mubr.msk.bf16.mxu0 %vm1069_vm2, %v4088_v21  ;;  %6562 = vmatpush3.bf16.msra.mxu0 %v6989_v9  ;;  %v6559_v22 = vpop.f32.mrb[172].mxu1 }
 0x6ec   : > { %6563 = vmatprep.subr.bf16.mxu0 %v6990_v16  ;;  %v4283_v41 = vpop.f32.mrb[173].mxu1 }
 0x6ed   : > { %v6560_v55 = vpop.f32.mrb[174].mxu1 }
 0x6ee   : > { %v4301_v61 = vpack.c.bf16 %v6560_v55, %v6559_v22  ;;  %v4286_v18 = vpop.f32.mrb[175].mxu1  ;;  %v5597_v22 = vld [vmem:[%s8495_s10] ss:$0 sm:$0xff] }
 0x6ef   : > { %6564 = vmatpush3.bf16.msra.mxu0 %v6990_v16  ;;  %v4300_v53 = vpack.c.bf16 %v4286_v18, %v4283_v41 }
 0x6f0   : > { %6589 = vmatprep.subr.bf16.mxu0 %v6991_v32 }
 0x6f2   : > { %6542 = vmatmul.mubr.msk.bf16.gmra.mrb[72].mxu0 %vm1069_vm2, %v4089_v2 }
 0x6f3   : > { %6565 = vmatprep.mubr.msk.bf16.mxu0 %vm1069_vm2, %v4298_v31  ;;  %v6583_v58 = vpop.f32.mrb[176].mxu1 }
 0x6f4   : > { %v4479_v26 = vpop.f32.mrb[177].mxu1 }
 0x6f5   : > { %v6584_v37 = vpop.f32.mrb[178].mxu1 }
 0x6f6   : > { %v4511_v34 = vpack.c.bf16 %v6584_v37, %v6583_v58  ;;  %v4482_v59 = vpop.f32.mrb[179].mxu1 }
 0x6f7   : > { %v4510_v10 = vpack.c.bf16 %v4482_v59, %v4479_v26 }
 0x6fa   : > { %6566 = vmatmul.mubr.msk.bf16.vlgmr.msra.gmra.mrb[68].mxu0 %vm1069_vm2, %v4299_v33 }
 0x6fb   : > { %6569 = vmatprep.mubr.msk.bf16.mxu0 %vm1069_vm2, %v4300_v53  ;;  %6590 = vmatpush3.bf16.msra.mxu0 %v6991_v32  ;;  %v6587_v15 = vpop.f32.mrb[180].mxu1 }
 0x6fc   : > { %6591 = vmatprep.subr.bf16.mxu0 %v6992_v29  ;;  %v4495_v11 = vpop.f32.mrb[181].mxu1 }
 0x6fd   : > { %v6588_v7 = vpop.f32.mrb[182].mxu1 }
 0x6fe   : > { %v4513_v56 = vpack.c.bf16 %v6588_v7, %v6587_v15  ;;  %v4498_v54 = vpop.f32.mrb[183].mxu1 }
 0x6ff   : > { %6592 = vmatpush3.bf16.msra.mxu0 %v6992_v29  ;;  %v4512_v3 = vpack.c.bf16 %v4498_v54, %v4495_v11 }
 0x700   : > { %6617 = vmatprep.subr.bf16.mxu0 %v6993_v17 }
 0x702   : > { %6570 = vmatmul.mubr.msk.bf16.gmra.mrb[72].mxu0 %vm1069_vm2, %v4301_v61 }
 0x703   : > { %6593 = vmatprep.mubr.msk.bf16.mxu0 %vm1069_vm2, %v4510_v10  ;;  %v6611_v45 = vpop.f32.mrb[184].mxu1 }
 0x704   : > { %v4691_v14 = vpop.f32.mrb[185].mxu1 }
 0x705   : > { %v6612_v62 = vpop.f32.mrb[186].mxu1 }
 0x706   : > { %v4723_v12 = vpack.c.bf16 %v6612_v62, %v6611_v45  ;;  %v4694_v24 = vpop.f32.mrb[187].mxu1 }
 0x707   : > { %v4722_v51 = vpack.c.bf16 %v4694_v24, %v4691_v14 }
 0x70a   : > { %6594 = vmatmul.mubr.msk.bf16.vlgmr.msra.gmra.mrb[68].mxu0 %vm1069_vm2, %v4511_v34 }
 0x70b   : > { %6597 = vmatprep.mubr.msk.bf16.mxu0 %vm1069_vm2, %v4512_v3  ;;  %6618 = vmatpush3.bf16.msra.mxu0 %v6993_v17  ;;  %v6615_v28 = vpop.f32.mrb[188].mxu1 }
 0x70c   : > { %6619 = vmatprep.subr.bf16.mxu0 %v6994_v23  ;;  %v4707_v46 = vpop.f32.mrb[189].mxu1 }
 0x70d   : > { %v6616_v38 = vpop.f32.mrb[190].mxu1 }
 0x70e   : > { %v4725_v57 = vpack.c.bf16 %v6616_v38, %v6615_v28  ;;  %v4710_v6 = vpop.f32.mrb[191].mxu1 }
 0x70f   : > { %6620 = vmatpush3.bf16.msra.mxu0 %v6994_v23  ;;  %v4724_v27 = vpack.c.bf16 %v4710_v6, %v4707_v46 }
 0x710   : > { %6629 = vmatprep.subr.bf16.mxu0 %v6995_v40 }
 0x712   : > { %6598 = vmatmul.mubr.msk.bf16.gmra.mrb[72].mxu0 %vm1069_vm2, %v4513_v56 }
 0x713   : > { %6621 = vmatprep.mubr.msk.bf16.mxu0 %vm1069_vm2, %v4722_v51 }
 0x71a   : > { %6622 = vmatmul.mubr.msk.bf16.vlgmr.msra.gmra.mrb[68].mxu0 %vm1069_vm2, %v4723_v12 }
 0x71b   : > { %6625 = vmatprep.mubr.msk.bf16.mxu0 %vm1069_vm2, %v4724_v27  ;;  %6630 = vmatpush3.bf16.msra.mxu0 %v6995_v40 }
 0x71c   : > { %6631 = vmatprep.subr.bf16.mxu0 %v6996_v5 }
 0x71f   : > { %6632 = vmatpush3.bf16.msra.mxu0 %v6996_v5 }
 0x722   : > { %6626 = vmatmul.mubr.msk.bf16.gmra.mrb[72].mxu0 %vm1069_vm2, %v4725_v57 }
 0x723   : > { %v6194_v42 = vpop.f32.mrb[192].mxu1 }
 0x724   : > { %v6195_v48 = vpop.f32.mrb[193].mxu1 }
 0x725   : > { %v6196_v30 = vadd.f32 %v6195_v48, %v6194_v42  ;;  %v6197_v36 = vpop.f32.mrb[194].mxu1 }
 0x726   : > { %v6198_v39 = vpop.f32.mrb[195].mxu1 }
 0x727   : > { %v6199_v63 = vadd.f32 %v6198_v39, %v6197_v36 }
 0x729   : > { %v4956_v25 = vpack.c.bf16 %v6199_v63, %v6196_v30 }
 0x72b   : > { %v6200_v20 = vpop.f32.mrb[196].mxu1  ;;  %6633 = vmatprep.mubr.msk.bf16.mxu0 %vm1069_vm2, %v4956_v25 }
 0x72c   : > { %v6201_v49 = vpop.f32.mrb[197].mxu1 }
 0x72d   : > { %v6202_v44 = vadd.f32 %v6201_v49, %v6200_v20  ;;  %v6203_v52 = vpop.f32.mrb[198].mxu1 }
 0x72e   : > { %v6204_v19 = vpop.f32.mrb[199].mxu1 }
 0x72f   : > { %v6205_v8 = vadd.f32 %v6204_v19, %v6203_v52 }
 0x731   : > { %v4957_v0 = vpack.c.bf16 %v6205_v8, %v6202_v44 }
 0x733   : > { %6634 = vmatmul.mubr.msk.bf16.vlgmr.msra.gmra.mrb[68].mxu0 %vm1069_vm2, %v4957_v0  ;;  %v6206_v47 = vpop.f32.mrb[200].mxu1 }
 0x734   : > { %v6207_v13 = vpop.f32.mrb[201].mxu1 }
 0x735   : > { %v6208_v9 = vadd.f32 %v6207_v13, %v6206_v47  ;;  %v6209_v4 = vpop.f32.mrb[202].mxu1 }
 0x736   : > { %v6210_v2 = vpop.f32.mrb[203].mxu1 }
 0x737   : > { %v6211_v60 = vadd.f32 %v6210_v2, %v6209_v4 }
 0x739   : > { %v4958_v21 = vpack.c.bf16 %v6211_v60, %v6208_v9 }
 0x73b   : > { %v6212_v50 = vpop.f32.mrb[204].mxu1  ;;  %6637 = vmatprep.mubr.msk.bf16.mxu0 %vm1069_vm2, %v4958_v21 }
 0x73c   : > { %v6213_v43 = vpop.f32.mrb[205].mxu1 }
 0x73d   : > { %v6214_v1 = vadd.f32 %v6213_v43, %v6212_v50  ;;  %v6215_v33 = vpop.f32.mrb[206].mxu1 }
 0x73e   : > { %v6216_v35 = vpop.f32.mrb[207].mxu1 }
 0x73f   : > { %v6217_v31 = vadd.f32 %v6216_v35, %v6215_v33 }
 0x741   : > { %v4959_v16 = vpack.c.bf16 %v6217_v31, %v6214_v1 }
 0x743   : > { %6638 = vmatmul.mubr.msk.bf16.gmra.mrb[72].mxu0 %vm1069_vm2, %v4959_v16 }
 0x806   : > { %v6635_v41 = vpop.f32.mrb[68].mxu0 }
 0x807   : > { %v6647_v32 = vadd.f32 %v6635_v41, %v5597_v22  ;;  %v5022_v55 = vpop.f32.mrb[69].mxu0 }
 0x808   : > { %v6648_v61 = vadd.f32 %v5597_v22, %v5022_v55  ;;  %v6636_v18 = vpop.f32.mrb[70].mxu0 }
 0x809   : > { %v5055_v53 = vmul.f32 0.70710677, %v6647_v32  ;;  %v6649_v58 = vadd.f32 %v6636_v18, %v5597_v22  ;;  %v5025_v26 = vpop.f32.mrb[71].mxu0 }
 0x80a   : > { %v5053_v37 = vmul.f32 0.70710677, %v6648_v61  ;;  %v6650_v34 = vadd.f32 %v5597_v22, %v5025_v26 }
 0x80b   : > { %5063 = vst.msk [vmem:[%s413_s16 + $0x10] sm:$0xff] %vm2965_vm4, %v5055_v53  ;;  %v5056_v59 = vmul.f32 0.70710677, %v6649_v58 }
 0x80c   : > { %5061 = vst.msk [vmem:[%s413_s16] sm:$0xff] %vm2965_vm4, %v5053_v37  ;;  %v5054_v10 = vmul.f32 0.70710677, %v6650_v34 }
 0x80d   : > { %5064 = vst.msk [vmem:[%s413_s16 + $0x18] sm:$0xff] %vm2965_vm4, %v5056_v59 }
 0x80e   : > { %5062 = vst.msk [vmem:[%s413_s16 + $0x8] sm:$0xff] %vm2965_vm4, %v5054_v10 }
 0x816   : > { %v6639_v29 = vpop.f32.mrb[72].mxu0 }
 0x817   : > { %v6651_v15 = vadd.f32 %v6639_v29, %v5597_v22  ;;  %v5038_v11 = vpop.f32.mrb[73].mxu0 }
 0x818   : > { %v6652_v17 = vadd.f32 %v5597_v22, %v5038_v11  ;;  %v6640_v7 = vpop.f32.mrb[74].mxu0 }
 0x819   : > { %v5059_v56 = vmul.f32 0.70710677, %v6651_v15  ;;  %v6653_v54 = vadd.f32 %v6640_v7, %v5597_v22  ;;  %v5041_v3 = vpop.f32.mrb[75].mxu0 }
 0x81a   : > { %v5057_v45 = vmul.f32 0.70710677, %v6652_v17  ;;  %v6654_v14 = vadd.f32 %v5597_v22, %v5041_v3 }
 0x81b   : > { %5067 = vst.msk [vmem:[%s413_s16 + $0x30] sm:$0xff] %vm2965_vm4, %v5059_v56  ;;  %v5060_v62 = vmul.f32 0.70710677, %v6653_v54 }
 0x81c   : > { %5065 = vst.msk [vmem:[%s413_s16 + $0x20] sm:$0xff] %vm2965_vm4, %v5057_v45  ;;  %v5058_v12 = vmul.f32 0.70710677, %v6654_v14 }
 0x81d   : > { %5068 = vst.msk [vmem:[%s413_s16 + $0x38] sm:$0xff] %vm2965_vm4, %v5060_v62 }
 0x81e   : > { %5066 = vst.msk [vmem:[%s413_s16 + $0x28] sm:$0xff] %vm2965_vm4, %v5058_v12 }
 0x81f PF: > { %s22_s21 = sadd.s32 1, %s7007_s21  }
 0x820   : > { %p19_p4 = scmp.ge.s32.totalorder %s22_s21, 4  }
 0x822   :  { %21 = sbr.rel (!%p19_p4) target bundleno = 1 (0x1), region = 130 }

</bundles_post_ra>
